<compile_context>
chip_gen: v5e
topology: v5e:2x2
jax: 0.10.0
libtpu: 0.0.40
codegen_flags: <defaults>
</compile_context>

<pallas_src>
import functools

import jax
import jax.numpy as jnp
from jax.experimental import pallas as pl
from jax.experimental.pallas import tpu as pltpu

# bf16 MXU inputs for the wide conv matmuls (f32 accumulation, f32 BN affine):
# native MXU rate on v6e/v7x and half the weight/activation traffic on v5e.
CONV_MATMUL_DTYPE = jnp.bfloat16


# ------------------- fused conv stack + max-over-points ---------------------

def _conv_stack_max_kernel(x_ref, w1_ref, s1_ref, t1_ref,
                           w2_ref, s2_ref, t2_ref,
                           w3_ref, s3_ref, t3_ref,
                           o_ref, *, last_relu, matmul_dtype):
    """One (batch b, point-tile n) grid step of conv1x1+BN(+ReLU) x3, fused with
    a running max over points accumulated in the per-batch output block."""

    @pl.when(pl.program_id(1) == 0)
    def _init():
        o_ref[...] = jnp.full(o_ref.shape, -jnp.inf, dtype=o_ref.dtype)

    x = x_ref[0]                                        # (TN, Cin) f32
    # layer 1: per-batch weight (input transform folded in); K == 3, keep f32
    h = jnp.dot(x, w1_ref[0], preferred_element_type=jnp.float32)
    h = jnp.maximum(h * s1_ref[...] + t1_ref[...], 0.0)
    # layer 2
    h = jnp.dot(h.astype(matmul_dtype), w2_ref[...],
                preferred_element_type=jnp.float32)
    h = jnp.maximum(h * s2_ref[...] + t2_ref[...], 0.0)
    # layer 3 (BN, optional ReLU)
    h = jnp.dot(h.astype(matmul_dtype), w3_ref[...],
                preferred_element_type=jnp.float32)
    h = h * s3_ref[...] + t3_ref[...]
    if last_relu:
        h = jnp.maximum(h, 0.0)
    # running max over this tile of points
    o_ref[0] = jnp.maximum(o_ref[0], jnp.max(h, axis=0, keepdims=True))


def conv_stack_max(x, w1b, l1, l2, l3, *, last_relu,
                   matmul_dtype=CONV_MATMUL_DTYPE, max_point_tile=512):
    """x:(B,N,Cin) channels-last, w1b:(B,Cin,C1) per-batch first-layer weight.
    Returns max-over-points of the fused 3-layer stack: (B, C3) f32."""
    B, N, Cin = x.shape
    C1 = w1b.shape[2]
    C2 = l2["w"].shape[1]
    C3 = l3["w"].shape[1]

    # Point tile: multiple of 8, capped; pad N by replicating the last point
    # (duplicate points leave the max over points unchanged).
    tn = min(max_point_tile, ((N + 7) // 8) * 8)
    pad = (-N) % tn
    if pad:
        x = jnp.concatenate(
            [x, jnp.broadcast_to(x[:, -1:, :], (B, pad, Cin))], axis=1)
    n_pts = N + pad

    def const(shape):
        return pl.BlockSpec(shape, lambda b, n: (0,) * len(shape))

    out = pl.pallas_call(
        functools.partial(_conv_stack_max_kernel, last_relu=last_relu,
                          matmul_dtype=matmul_dtype),
        out_shape=jax.ShapeDtypeStruct((B, 1, C3), jnp.float32),
        grid=(B, n_pts // tn),
        in_specs=[
            pl.BlockSpec((1, tn, Cin), lambda b, n: (b, n, 0)),
            pl.BlockSpec((1, Cin, C1), lambda b, n: (b, 0, 0)),
            const((1, C1)), const((1, C1)),
            const((C1, C2)), const((1, C2)), const((1, C2)),
            const((C2, C3)), const((1, C3)), const((1, C3)),
        ],
        out_specs=pl.BlockSpec((1, 1, C3), lambda b, n: (b, 0, 0)),
        compiler_params=pltpu.CompilerParams(
            dimension_semantics=("parallel", "arbitrary")),
    )(x, w1b,
      l1["scale"].reshape(1, C1), l1["shift"].reshape(1, C1),
      l2["w"].astype(matmul_dtype),
      l2["scale"].reshape(1, C2), l2["shift"].reshape(1, C2),
      l3["w"].astype(matmul_dtype),
      l3["scale"].reshape(1, C3), l3["shift"].reshape(1, C3))
    return out.reshape(B, C3)


# ----------------------- fused 3-layer FC tails ------------------------------

def _mlp3_kernel(x_ref, w1_ref, s1_ref, t1_ref, w2_ref, s2_ref, t2_ref,
                 w3_ref, s3_ref, t3_ref, o_ref, *, tail):
    def layer(h, w_ref, s_ref, t_ref, relu):
        y = jnp.dot(h, w_ref[...], preferred_element_type=jnp.float32)
        y = y * s_ref[...] + t_ref[...]
        return jnp.maximum(y, 0.0) if relu else y

    h = layer(x_ref[...], w1_ref, s1_ref, t1_ref, True)
    # Dropout(p=0.3) between fc layers is the eval-mode identity.
    h = layer(h, w2_ref, s2_ref, t2_ref, True)
    y = layer(h, w3_ref, s3_ref, t3_ref, False)
    o_ref[...] = tail(y).astype(o_ref.dtype)


def _tail_identity(y):
    return y


def _tail_log_softmax(y):
    m = jnp.max(y, axis=-1, keepdims=True)
    s = y - m
    return s - jnp.log(jnp.sum(jnp.exp(s), axis=-1, keepdims=True))


def fused_mlp3(x, l1, l2, l3, *, tail):
    """Three fused (linear + folded-BN affine [+ReLU]) layers on (B, K) rows
    plus a row-wise tail, as one pallas_call (M is tiny, so a single grid step
    with all weights resident in VMEM)."""
    B = x.shape[0]
    d3 = l3["w"].shape[1]

    def const(shape):
        return pl.BlockSpec(shape, lambda i: (0,) * len(shape))

    args, specs = [x], [const(x.shape)]
    for l in (l1, l2, l3):
        n = l["w"].shape[1]
        args += [l["w"], l["scale"].reshape(1, n), l["shift"].reshape(1, n)]
        specs += [const(l["w"].shape), const((1, n)), const((1, n))]

    return pl.pallas_call(
        functools.partial(_mlp3_kernel, tail=tail),
        out_shape=jax.ShapeDtypeStruct((B, d3), jnp.float32),
        grid=(1,),
        in_specs=specs,
        out_specs=const((B, d3)),
    )(*args)


# --------------------------- parameter construction ------------------------

def _bn_affine(key, c, eps=1e-5):
    k1, k2, k3, k4 = jax.random.split(key, 4)
    gamma = 1.0 + 0.1 * jax.random.normal(k1, (c,), jnp.float32)
    beta = 0.1 * jax.random.normal(k2, (c,), jnp.float32)
    mean = 0.1 * jax.random.normal(k3, (c,), jnp.float32)
    var = 1.0 + 0.1 * jax.random.uniform(k4, (c,), jnp.float32)
    s = gamma / jnp.sqrt(var + eps)
    t = beta - mean * s
    return s, t


def _linear(key, cin, cout):
    k1, k2 = jax.random.split(key)
    w = jax.random.normal(k1, (cin, cout), jnp.float32) / jnp.sqrt(cin)
    b = 0.1 * jax.random.normal(k2, (cout,), jnp.float32)
    return w, b


def make_params(key, k_classes=2):
    keys = iter(jax.random.split(key, 64))

    def fused(cin, cout, bn=True):
        # conv1d(k=1)/linear bias and BatchNorm folded into (scale, shift)
        w, b = _linear(next(keys), cin, cout)
        if bn:
            s, t = _bn_affine(next(keys), cout)
        else:
            s = jnp.ones((cout,), jnp.float32)
            t = jnp.zeros((cout,), jnp.float32)
        return dict(w=w, scale=s, shift=b * s + t)

    p = {}
    # STN3d: convs (3->64->128->1024) + fcs (1024->512->256->9)
    p["stn_convs"] = [fused(3, 64), fused(64, 128), fused(128, 1024)]
    p["stn_fcs"] = [fused(1024, 512), fused(512, 256), fused(256, 9, bn=False)]
    # PointNetfeat conv stack (3->64->128->1024); last layer has BN but no ReLU
    p["feat_convs"] = [fused(3, 64), fused(64, 128), fused(128, 1024)]
    # classifier head
    p["fc1"] = fused(1024, 512)
    p["fc2"] = fused(512, 256)
    p["fc3"] = fused(256, k_classes, bn=False)
    return p


# -------------------------------- forward ----------------------------------

def pointnet_cls_forward(params, x_ncw):
    B, C, _ = x_ncw.shape                       # PyTorch NCW input, C == 3
    x = jnp.transpose(x_ncw, (0, 2, 1))         # (B, N, 3) channels-last

    # ---- STN3d: fused conv stack + max, then fused FC tail ----
    sc1, sc2, sc3 = params["stn_convs"]
    w1_stn = jnp.broadcast_to(sc1["w"][None], (B,) + sc1["w"].shape)
    g = conv_stack_max(x, w1_stn, sc1, sc2, sc3, last_relu=True)    # (B, 1024)

    f1, f2, f3 = params["stn_fcs"]
    # eye(3) add is a per-channel constant -> fold it into the fc3 bias/shift
    f3_eye = dict(f3, shift=f3["shift"]
                  + jnp.eye(C, dtype=jnp.float32).reshape(-1))
    trans = fused_mlp3(g, f1, f2, f3_eye, tail=_tail_identity).reshape(B, C, C)

    # ---- fold the 3x3 input transform into the first feat-conv weight ----
    # bmm(trans^T, x_ncw) followed by conv1:  (x_cl @ trans) @ W == x_cl @ (trans @ W)
    fc1c, fc2c, fc3c = params["feat_convs"]
    w1_feat = jnp.einsum("bij,jk->bik", trans, fc1c["w"])           # (B, 3, 64)
    gf = conv_stack_max(x, w1_feat, fc1c, fc2c, fc3c, last_relu=False)  # (B,1024)

    # ---- classifier head: fc1/fc2/fc3 + log_softmax, one kernel ----
    log_probs = fused_mlp3(gf, params["fc1"], params["fc2"], params["fc3"],
                           tail=_tail_log_softmax)
    return log_probs, trans, None


# ---------------------------------- main ------------------------------------

if __name__ == "__main__":
    key = jax.random.PRNGKey(0)
    pkey, xkey = jax.random.split(key)

    K_CLASSES = 2
    params = make_params(pkey, k_classes=K_CLASSES)

    B, N = 2, 64
    x = jax.random.normal(xkey, (B, 3, N), jnp.float32)  # PyTorch NCW layout

    fwd = jax.jit(lambda xx: pointnet_cls_forward(params, xx))
    log_probs, trans, trans_feat = fwd(x)
    jax.block_until_ready((log_probs, trans))

    assert log_probs.shape == (B, K_CLASSES)
    assert trans.shape == (B, 3, 3)
    assert trans_feat is None
    assert bool(jnp.all(jnp.isfinite(log_probs)))
    print("KERNEL_OK")
</pallas_src>

<mosaic_0001>
module attributes {stable_mosaic.version = 11 : i64} {
  func.func @_conv_stack_max_kernel(%arg0: i32, %arg1: i32, %arg2: memref<1x64x3xf32, #tpu.memory_space<vmem>>, %arg3: memref<1x3x64xf32, #tpu.memory_space<vmem>>, %arg4: memref<1x64xf32, #tpu.memory_space<vmem>>, %arg5: memref<1x64xf32, #tpu.memory_space<vmem>>, %arg6: memref<64x128xbf16, #tpu.memory_space<vmem>>, %arg7: memref<1x128xf32, #tpu.memory_space<vmem>>, %arg8: memref<1x128xf32, #tpu.memory_space<vmem>>, %arg9: memref<128x1024xbf16, #tpu.memory_space<vmem>>, %arg10: memref<1x1024xf32, #tpu.memory_space<vmem>>, %arg11: memref<1x1024xf32, #tpu.memory_space<vmem>>, %arg12: memref<1x1x1024xf32, #tpu.memory_space<vmem>>) attributes {dimension_semantics = [#tpu.dimension_semantics<parallel>, #tpu.dimension_semantics<arbitrary>], iteration_bounds = array<i64: 2, 1>, scalar_prefetch = 0 : i64, scratch_operands = 0 : i64, tpu.core_type = #tpu.core_type<tc>, window_params = [{transform_indices = @transform_0, window_bounds = array<i64: 1, 64, 3>}, {transform_indices = @transform_1, window_bounds = array<i64: 1, 3, 64>}, {pipeline_mode = #tpu.pipeline_mode<synchronous>, transform_indices = @transform_2, window_bounds = array<i64: 1, 64>}, {pipeline_mode = #tpu.pipeline_mode<synchronous>, transform_indices = @transform_3, window_bounds = array<i64: 1, 64>}, {pipeline_mode = #tpu.pipeline_mode<synchronous>, transform_indices = @transform_4, window_bounds = array<i64: 64, 128>}, {pipeline_mode = #tpu.pipeline_mode<synchronous>, transform_indices = @transform_5, window_bounds = array<i64: 1, 128>}, {pipeline_mode = #tpu.pipeline_mode<synchronous>, transform_indices = @transform_6, window_bounds = array<i64: 1, 128>}, {pipeline_mode = #tpu.pipeline_mode<synchronous>, transform_indices = @transform_7, window_bounds = array<i64: 128, 1024>}, {pipeline_mode = #tpu.pipeline_mode<synchronous>, transform_indices = @transform_8, window_bounds = array<i64: 1, 1024>}, {pipeline_mode = #tpu.pipeline_mode<synchronous>, transform_indices = @transform_9, window_bounds = array<i64: 1, 1024>}, {transform_indices = @transform_10, window_bounds = array<i64: 1, 1, 1024>}]} {
    %c0_i32 = arith.constant 0 : i32
    %0 = arith.cmpi eq, %arg1, %c0_i32 : i32
    %1 = arith.extui %0 : i1 to i32
    %c0_i32_0 = arith.constant 0 : i32
    %2 = arith.cmpi ne, %1, %c0_i32_0 : i32
    scf.if %2 {
      %cst_34 = arith.constant 0xFF800000 : f32
      %46 = vector.broadcast %cst_34 : f32 to vector<1x1x1024xf32>
      %c0_35 = arith.constant 0 : index
      %c0_36 = arith.constant 0 : index
      %c0_37 = arith.constant 0 : index
      %47 = vector.load %arg12[%c0_35, %c0_36, %c0_37] : memref<1x1x1024xf32, #tpu.memory_space<vmem>>, vector<1x1x1024xf32>
      tpu.vector_store %arg12[%c0_35, %c0_36, %c0_37], %46 {strides = array<i32>} : memref<1x1x1024xf32, #tpu.memory_space<vmem>>, vector<1x1x1024xf32>,
    } else {
    }
    %c0 = arith.constant 0 : index
    %c0_1 = arith.constant 0 : index
    %c0_2 = arith.constant 0 : index
    %3 = vector.load %arg2[%c0, %c0_1, %c0_2] : memref<1x64x3xf32, #tpu.memory_space<vmem>>, vector<1x64x3xf32>
    %4 = vector.shape_cast %3 : vector<1x64x3xf32> to vector<64x3xf32>
    %c0_3 = arith.constant 0 : index
    %c0_4 = arith.constant 0 : index
    %c0_5 = arith.constant 0 : index
    %5 = vector.load %arg3[%c0_3, %c0_4, %c0_5] : memref<1x3x64xf32, #tpu.memory_space<vmem>>, vector<1x3x64xf32>
    %6 = vector.shape_cast %5 : vector<1x3x64xf32> to vector<3x64xf32>
    %cst = arith.constant dense<0.000000e+00> : vector<64x64xf32>
    %7 = tpu.matmul %4, %6, %cst {dimension_numbers = #tpu.dot_dimension_numbers<[1], [0], [0], [1], [0, 0, 1, 1], [], []>} : vector<64x3xf32>, vector<3x64xf32>, vector<64x64xf32> -> vector<64x64xf32>
    %c0_6 = arith.constant 0 : index
    %c0_7 = arith.constant 0 : index
    %8 = vector.load %arg4[%c0_6, %c0_7] : memref<1x64xf32, #tpu.memory_space<vmem>>, vector<1x64xf32>
    %9 = vector.broadcast %8 : vector<1x64xf32> to vector<64x64xf32>
    %10 = arith.mulf %7, %9 : vector<64x64xf32>
    %c0_8 = arith.constant 0 : index
    %c0_9 = arith.constant 0 : index
    %11 = vector.load %arg5[%c0_8, %c0_9] : memref<1x64xf32, #tpu.memory_space<vmem>>, vector<1x64xf32>
    %12 = vector.broadcast %11 : vector<1x64xf32> to vector<64x64xf32>
    %13 = arith.addf %10, %12 : vector<64x64xf32>
    %cst_10 = arith.constant 0.000000e+00 : f32
    %14 = vector.broadcast %cst_10 : f32 to vector<64x64xf32>
    %15 = arith.maximumf %13, %14 : vector<64x64xf32>
    %16 = arith.truncf %15 : vector<64x64xf32> to vector<64x64xbf16>
    %c0_11 = arith.constant 0 : index
    %c0_12 = arith.constant 0 : index
    %17 = vector.load %arg6[%c0_11, %c0_12] : memref<64x128xbf16, #tpu.memory_space<vmem>>, vector<64x128xbf16>
    %cst_13 = arith.constant dense<0.000000e+00> : vector<64x128xf32>
    %18 = tpu.matmul %16, %17, %cst_13 {dimension_numbers = #tpu.dot_dimension_numbers<[1], [0], [0], [1], [0, 0, 1, 1], [], []>} : vector<64x64xbf16>, vector<64x128xbf16>, vector<64x128xf32> -> vector<64x128xf32>
    %c0_14 = arith.constant 0 : index
    %c0_15 = arith.constant 0 : index
    %19 = vector.load %arg7[%c0_14, %c0_15] : memref<1x128xf32, #tpu.memory_space<vmem>>, vector<1x128xf32>
    %20 = vector.broadcast %19 : vector<1x128xf32> to vector<64x128xf32>
    %21 = arith.mulf %18, %20 : vector<64x128xf32>
    %c0_16 = arith.constant 0 : index
    %c0_17 = arith.constant 0 : index
    %22 = vector.load %arg8[%c0_16, %c0_17] : memref<1x128xf32, #tpu.memory_space<vmem>>, vector<1x128xf32>
    %23 = vector.broadcast %22 : vector<1x128xf32> to vector<64x128xf32>
    %24 = arith.addf %21, %23 : vector<64x128xf32>
    %cst_18 = arith.constant 0.000000e+00 : f32
    %25 = vector.broadcast %cst_18 : f32 to vector<64x128xf32>
    %26 = arith.maximumf %24, %25 : vector<64x128xf32>
    %27 = arith.truncf %26 : vector<64x128xf32> to vector<64x128xbf16>
    %c0_19 = arith.constant 0 : index
    %c0_20 = arith.constant 0 : index
    %28 = vector.load %arg9[%c0_19, %c0_20] : memref<128x1024xbf16, #tpu.memory_space<vmem>>, vector<128x1024xbf16>
    %cst_21 = arith.constant dense<0.000000e+00> : vector<64x1024xf32>
    %29 = tpu.matmul %27, %28, %cst_21 {dimension_numbers = #tpu.dot_dimension_numbers<[1], [0], [0], [1], [0, 0, 1, 1], [], []>} : vector<64x128xbf16>, vector<128x1024xbf16>, vector<64x1024xf32> -> vector<64x1024xf32>
    %c0_22 = arith.constant 0 : index
    %c0_23 = arith.constant 0 : index
    %30 = vector.load %arg10[%c0_22, %c0_23] : memref<1x1024xf32, #tpu.memory_space<vmem>>, vector<1x1024xf32>
    %31 = vector.broadcast %30 : vector<1x1024xf32> to vector<64x1024xf32>
    %32 = arith.mulf %29, %31 : vector<64x1024xf32>
    %c0_24 = arith.constant 0 : index
    %c0_25 = arith.constant 0 : index
    %33 = vector.load %arg11[%c0_24, %c0_25] : memref<1x1024xf32, #tpu.memory_space<vmem>>, vector<1x1024xf32>
    %34 = vector.broadcast %33 : vector<1x1024xf32> to vector<64x1024xf32>
    %35 = arith.addf %32, %34 : vector<64x1024xf32>
    %cst_26 = arith.constant 0.000000e+00 : f32
    %36 = vector.broadcast %cst_26 : f32 to vector<64x1024xf32>
    %37 = arith.maximumf %35, %36 : vector<64x1024xf32>
    %c0_27 = arith.constant 0 : index
    %c0_28 = arith.constant 0 : index
    %c0_29 = arith.constant 0 : index
    %38 = vector.load %arg12[%c0_27, %c0_28, %c0_29] : memref<1x1x1024xf32, #tpu.memory_space<vmem>>, vector<1x1x1024xf32>
    %39 = vector.shape_cast %38 : vector<1x1x1024xf32> to vector<1x1024xf32>
    %cst_30 = arith.constant dense<0xFF800000> : vector<1024xf32>
    %40 = vector.multi_reduction <maximumf>, %37, %cst_30 [0] : vector<64x1024xf32> to vector<1024xf32>
    %41 = vector.shape_cast %40 : vector<1024xf32> to vector<1x1024xf32>
    %42 = arith.maximumf %39, %41 : vector<1x1024xf32>
    %c0_31 = arith.constant 0 : index
    %c0_32 = arith.constant 0 : index
    %c0_33 = arith.constant 0 : index
    %43 = vector.load %arg12[%c0_31, %c0_32, %c0_33] : memref<1x1x1024xf32, #tpu.memory_space<vmem>>, vector<1x1x1024xf32>
    %44 = vector.shape_cast %43 : vector<1x1x1024xf32> to vector<1x1024xf32>
    %45 = vector.shape_cast %42 : vector<1x1024xf32> to vector<1x1x1024xf32>
    tpu.vector_store %arg12[%c0_31, %c0_32, %c0_33], %45 {strides = array<i32>} : memref<1x1x1024xf32, #tpu.memory_space<vmem>>, vector<1x1x1024xf32>,
    return
  }
  func.func @transform_0(%arg0: i32, %arg1: i32) -> (i32, i32, i32) {
    %c0_i32 = arith.constant 0 : i32
    %c0_i32_0 = arith.constant 0 : i32
    return %arg0, %arg1, %c0_i32 : i32, i32, i32
  }
  func.func @transform_1(%arg0: i32, %arg1: i32) -> (i32, i32, i32) {
    %c0_i32 = arith.constant 0 : i32
    %c0_i32_0 = arith.constant 0 : i32
    %c0_i32_1 = arith.constant 0 : i32
    return %arg0, %c0_i32, %c0_i32_0 : i32, i32, i32
  }
  func.func @transform_2(%arg0: i32, %arg1: i32) -> (i32, i32) {
    %c0_i32 = arith.constant 0 : i32
    %c0_i32_0 = arith.constant 0 : i32
    %c0_i32_1 = arith.constant 0 : i32
    return %c0_i32, %c0_i32_0 : i32, i32
  }
  func.func @transform_3(%arg0: i32, %arg1: i32) -> (i32, i32) {
    %c0_i32 = arith.constant 0 : i32
    %c0_i32_0 = arith.constant 0 : i32
    %c0_i32_1 = arith.constant 0 : i32
    return %c0_i32, %c0_i32_0 : i32, i32
  }
  func.func @transform_4(%arg0: i32, %arg1: i32) -> (i32, i32) {
    %c0_i32 = arith.constant 0 : i32
    %c0_i32_0 = arith.constant 0 : i32
    %c0_i32_1 = arith.constant 0 : i32
    return %c0_i32, %c0_i32_0 : i32, i32
  }
  func.func @transform_5(%arg0: i32, %arg1: i32) -> (i32, i32) {
    %c0_i32 = arith.constant 0 : i32
    %c0_i32_0 = arith.constant 0 : i32
    %c0_i32_1 = arith.constant 0 : i32
    return %c0_i32, %c0_i32_0 : i32, i32
  }
  func.func @transform_6(%arg0: i32, %arg1: i32) -> (i32, i32) {
    %c0_i32 = arith.constant 0 : i32
    %c0_i32_0 = arith.constant 0 : i32
    %c0_i32_1 = arith.constant 0 : i32
    return %c0_i32, %c0_i32_0 : i32, i32
  }
  func.func @transform_7(%arg0: i32, %arg1: i32) -> (i32, i32) {
    %c0_i32 = arith.constant 0 : i32
    %c0_i32_0 = arith.constant 0 : i32
    %c0_i32_1 = arith.constant 0 : i32
    return %c0_i32, %c0_i32_0 : i32, i32
  }
  func.func @transform_8(%arg0: i32, %arg1: i32) -> (i32, i32) {
    %c0_i32 = arith.constant 0 : i32
    %c0_i32_0 = arith.constant 0 : i32
    %c0_i32_1 = arith.constant 0 : i32
    return %c0_i32, %c0_i32_0 : i32, i32
  }
  func.func @transform_9(%arg0: i32, %arg1: i32) -> (i32, i32) {
    %c0_i32 = arith.constant 0 : i32
    %c0_i32_0 = arith.constant 0 : i32
    %c0_i32_1 = arith.constant 0 : i32
    return %c0_i32, %c0_i32_0 : i32, i32
  }
  func.func @transform_10(%arg0: i32, %arg1: i32) -> (i32, i32, i32) {
    %c0_i32 = arith.constant 0 : i32
    %c0_i32_0 = arith.constant 0 : i32
    %c0_i32_1 = arith.constant 0 : i32
    return %arg0, %c0_i32, %c0_i32_0 : i32, i32, i32
  }
}

module attributes {stable_mosaic.version = 11 : i64} {
  func.func @_mlp3_kernel(%arg0: i32, %arg1: memref<2x1024xf32, #tpu.memory_space<vmem>>, %arg2: memref<1024x512xf32, #tpu.memory_space<vmem>>, %arg3: memref<1x512xf32, #tpu.memory_space<vmem>>, %arg4: memref<1x512xf32, #tpu.memory_space<vmem>>, %arg5: memref<512x256xf32, #tpu.memory_space<vmem>>, %arg6: memref<1x256xf32, #tpu.memory_space<vmem>>, %arg7: memref<1x256xf32, #tpu.memory_space<vmem>>, %arg8: memref<256x9xf32, #tpu.memory_space<vmem>>, %arg9: memref<1x9xf32, #tpu.memory_space<vmem>>, %arg10: memref<1x9xf32, #tpu.memory_space<vmem>>, %arg11: memref<2x9xf32, #tpu.memory_space<vmem>>) attributes {dimension_semantics = [#tpu.dimension_semantics<arbitrary>], iteration_bounds = array<i64: 1>, scalar_prefetch = 0 : i64, scratch_operands = 0 : i64, tpu.core_type = #tpu.core_type<tc>, window_params = [{pipeline_mode = #tpu.pipeline_mode<synchronous>, transform_indices = @transform_0, window_bounds = array<i64: 2, 1024>}, {pipeline_mode = #tpu.pipeline_mode<synchronous>, transform_indices = @transform_1, window_bounds = array<i64: 1024, 512>}, {pipeline_mode = #tpu.pipeline_mode<synchronous>, transform_indices = @transform_2, window_bounds = array<i64: 1, 512>}, {pipeline_mode = #tpu.pipeline_mode<synchronous>, transform_indices = @transform_3, window_bounds = array<i64: 1, 512>}, {pipeline_mode = #tpu.pipeline_mode<synchronous>, transform_indices = @transform_4, window_bounds = array<i64: 512, 256>}, {pipeline_mode = #tpu.pipeline_mode<synchronous>, transform_indices = @transform_5, window_bounds = array<i64: 1, 256>}, {pipeline_mode = #tpu.pipeline_mode<synchronous>, transform_indices = @transform_6, window_bounds = array<i64: 1, 256>}, {pipeline_mode = #tpu.pipeline_mode<synchronous>, transform_indices = @transform_7, window_bounds = array<i64: 256, 9>}, {pipeline_mode = #tpu.pipeline_mode<synchronous>, transform_indices = @transform_8, window_bounds = array<i64: 1, 9>}, {pipeline_mode = #tpu.pipeline_mode<synchronous>, transform_indices = @transform_9, window_bounds = array<i64: 1, 9>}, {pipeline_mode = #tpu.pipeline_mode<synchronous>, transform_indices = @transform_10, window_bounds = array<i64: 2, 9>}]} {
    %c0 = arith.constant 0 : index
    %c0_0 = arith.constant 0 : index
    %0 = vector.load %arg1[%c0, %c0_0] : memref<2x1024xf32, #tpu.memory_space<vmem>>, vector<2x1024xf32>
    %c0_1 = arith.constant 0 : index
    %c0_2 = arith.constant 0 : index
    %1 = vector.load %arg2[%c0_1, %c0_2] : memref<1024x512xf32, #tpu.memory_space<vmem>>, vector<1024x512xf32>
    %cst = arith.constant dense<0.000000e+00> : vector<2x512xf32>
    %2 = tpu.matmul %0, %1, %cst {dimension_numbers = #tpu.dot_dimension_numbers<[1], [0], [0], [1], [0, 0, 1, 1], [], []>} : vector<2x1024xf32>, vector<1024x512xf32>, vector<2x512xf32> -> vector<2x512xf32>
    %c0_3 = arith.constant 0 : index
    %c0_4 = arith.constant 0 : index
    %3 = vector.load %arg3[%c0_3, %c0_4] : memref<1x512xf32, #tpu.memory_space<vmem>>, vector<1x512xf32>
    %4 = vector.broadcast %3 : vector<1x512xf32> to vector<2x512xf32>
    %5 = arith.mulf %2, %4 : vector<2x512xf32>
    %c0_5 = arith.constant 0 : index
    %c0_6 = arith.constant 0 : index
    %6 = vector.load %arg4[%c0_5, %c0_6] : memref<1x512xf32, #tpu.memory_space<vmem>>, vector<1x512xf32>
    %7 = vector.broadcast %6 : vector<1x512xf32> to vector<2x512xf32>
    %8 = arith.addf %5, %7 : vector<2x512xf32>
    %cst_7 = arith.constant 0.000000e+00 : f32
    %9 = vector.broadcast %cst_7 : f32 to vector<2x512xf32>
    %10 = arith.maximumf %8, %9 : vector<2x512xf32>
    %c0_8 = arith.constant 0 : index
    %c0_9 = arith.constant 0 : index
    %11 = vector.load %arg5[%c0_8, %c0_9] : memref<512x256xf32, #tpu.memory_space<vmem>>, vector<512x256xf32>
    %cst_10 = arith.constant dense<0.000000e+00> : vector<2x256xf32>
    %12 = tpu.matmul %10, %11, %cst_10 {dimension_numbers = #tpu.dot_dimension_numbers<[1], [0], [0], [1], [0, 0, 1, 1], [], []>} : vector<2x512xf32>, vector<512x256xf32>, vector<2x256xf32> -> vector<2x256xf32>
    %c0_11 = arith.constant 0 : index
    %c0_12 = arith.constant 0 : index
    %13 = vector.load %arg6[%c0_11, %c0_12] : memref<1x256xf32, #tpu.memory_space<vmem>>, vector<1x256xf32>
    %14 = vector.broadcast %13 : vector<1x256xf32> to vector<2x256xf32>
    %15 = arith.mulf %12, %14 : vector<2x256xf32>
    %c0_13 = arith.constant 0 : index
    %c0_14 = arith.constant 0 : index
    %16 = vector.load %arg7[%c0_13, %c0_14] : memref<1x256xf32, #tpu.memory_space<vmem>>, vector<1x256xf32>
    %17 = vector.broadcast %16 : vector<1x256xf32> to vector<2x256xf32>
    %18 = arith.addf %15, %17 : vector<2x256xf32>
    %cst_15 = arith.constant 0.000000e+00 : f32
    %19 = vector.broadcast %cst_15 : f32 to vector<2x256xf32>
    %20 = arith.maximumf %18, %19 : vector<2x256xf32>
    %c0_16 = arith.constant 0 : index
    %c0_17 = arith.constant 0 : index
    %21 = vector.load %arg8[%c0_16, %c0_17] : memref<256x9xf32, #tpu.memory_space<vmem>>, vector<256x9xf32>
    %cst_18 = arith.constant dense<0.000000e+00> : vector<2x9xf32>
    %22 = tpu.matmul %20, %21, %cst_18 {dimension_numbers = #tpu.dot_dimension_numbers<[1], [0], [0], [1], [0, 0, 1, 1], [], []>} : vector<2x256xf32>, vector<256x9xf32>, vector<2x9xf32> -> vector<2x9xf32>
    %c0_19 = arith.constant 0 : index
    %c0_20 = arith.constant 0 : index
    %23 = vector.load %arg9[%c0_19, %c0_20] : memref<1x9xf32, #tpu.memory_space<vmem>>, vector<1x9xf32>
    %24 = vector.broadcast %23 : vector<1x9xf32> to vector<2x9xf32>
    %25 = arith.mulf %22, %24 : vector<2x9xf32>
    %c0_21 = arith.constant 0 : index
    %c0_22 = arith.constant 0 : index
    %26 = vector.load %arg10[%c0_21, %c0_22] : memref<1x9xf32, #tpu.memory_space<vmem>>, vector<1x9xf32>
    %27 = vector.broadcast %26 : vector<1x9xf32> to vector<2x9xf32>
    %28 = arith.addf %25, %27 : vector<2x9xf32>
    %c0_23 = arith.constant 0 : index
    %c0_24 = arith.constant 0 : index
    %29 = vector.load %arg11[%c0_23, %c0_24] : memref<2x9xf32, #tpu.memory_space<vmem>>, vector<2x9xf32>
    tpu.vector_store %arg11[%c0_23, %c0_24], %28 {strides = array<i32>} : memref<2x9xf32, #tpu.memory_space<vmem>>, vector<2x9xf32>,
    return
  }
  func.func @transform_0(%arg0: i32) -> (i32, i32) {
    %c0_i32 = arith.constant 0 : i32
    %c0_i32_0 = arith.constant 0 : i32
    %c0_i32_1 = arith.constant 0 : i32
    return %c0_i32, %c0_i32_0 : i32, i32
  }
  func.func @transform_1(%arg0: i32) -> (i32, i32) {
    %c0_i32 = arith.constant 0 : i32
    %c0_i32_0 = arith.constant 0 : i32
    %c0_i32_1 = arith.constant 0 : i32
    return %c0_i32, %c0_i32_0 : i32, i32
  }
  func.func @transform_2(%arg0: i32) -> (i32, i32) {
    %c0_i32 = arith.constant 0 : i32
    %c0_i32_0 = arith.constant 0 : i32
    %c0_i32_1 = arith.constant 0 : i32
    return %c0_i32, %c0_i32_0 : i32, i32
  }
  func.func @transform_3(%arg0: i32) -> (i32, i32) {
    %c0_i32 = arith.constant 0 : i32
    %c0_i32_0 = arith.constant 0 : i32
    %c0_i32_1 = arith.constant 0 : i32
    return %c0_i32, %c0_i32_0 : i32, i32
  }
  func.func @transform_4(%arg0: i32) -> (i32, i32) {
    %c0_i32 = arith.constant 0 : i32
    %c0_i32_0 = arith.constant 0 : i32
    %c0_i32_1 = arith.constant 0 : i32
    return %c0_i32, %c0_i32_0 : i32, i32
  }
  func.func @transform_5(%arg0: i32) -> (i32, i32) {
    %c0_i32 = arith.constant 0 : i32
    %c0_i32_0 = arith.constant 0 : i32
    %c0_i32_1 = arith.constant 0 : i32
    return %c0_i32, %c0_i32_0 : i32, i32
  }
  func.func @transform_6(%arg0: i32) -> (i32, i32) {
    %c0_i32 = arith.constant 0 : i32
    %c0_i32_0 = arith.constant 0 : i32
    %c0_i32_1 = arith.constant 0 : i32
    return %c0_i32, %c0_i32_0 : i32, i32
  }
  func.func @transform_7(%arg0: i32) -> (i32, i32) {
    %c0_i32 = arith.constant 0 : i32
    %c0_i32_0 = arith.constant 0 : i32
    %c0_i32_1 = arith.constant 0 : i32
    return %c0_i32, %c0_i32_0 : i32, i32
  }
  func.func @transform_8(%arg0: i32) -> (i32, i32) {
    %c0_i32 = arith.constant 0 : i32
    %c0_i32_0 = arith.constant 0 : i32
    %c0_i32_1 = arith.constant 0 : i32
    return %c0_i32, %c0_i32_0 : i32, i32
  }
  func.func @transform_9(%arg0: i32) -> (i32, i32) {
    %c0_i32 = arith.constant 0 : i32
    %c0_i32_0 = arith.constant 0 : i32
    %c0_i32_1 = arith.constant 0 : i32
    return %c0_i32, %c0_i32_0 : i32, i32
  }
  func.func @transform_10(%arg0: i32) -> (i32, i32) {
    %c0_i32 = arith.constant 0 : i32
    %c0_i32_0 = arith.constant 0 : i32
    %c0_i32_1 = arith.constant 0 : i32
    return %c0_i32, %c0_i32_0 : i32, i32
  }
}

module attributes {stable_mosaic.version = 11 : i64} {
  func.func @_conv_stack_max_kernel(%arg0: i32, %arg1: i32, %arg2: memref<1x64x3xf32, #tpu.memory_space<vmem>>, %arg3: memref<1x3x64xf32, #tpu.memory_space<vmem>>, %arg4: memref<1x64xf32, #tpu.memory_space<vmem>>, %arg5: memref<1x64xf32, #tpu.memory_space<vmem>>, %arg6: memref<64x128xbf16, #tpu.memory_space<vmem>>, %arg7: memref<1x128xf32, #tpu.memory_space<vmem>>, %arg8: memref<1x128xf32, #tpu.memory_space<vmem>>, %arg9: memref<128x1024xbf16, #tpu.memory_space<vmem>>, %arg10: memref<1x1024xf32, #tpu.memory_space<vmem>>, %arg11: memref<1x1024xf32, #tpu.memory_space<vmem>>, %arg12: memref<1x1x1024xf32, #tpu.memory_space<vmem>>) attributes {dimension_semantics = [#tpu.dimension_semantics<parallel>, #tpu.dimension_semantics<arbitrary>], iteration_bounds = array<i64: 2, 1>, scalar_prefetch = 0 : i64, scratch_operands = 0 : i64, tpu.core_type = #tpu.core_type<tc>, window_params = [{transform_indices = @transform_0, window_bounds = array<i64: 1, 64, 3>}, {transform_indices = @transform_1, window_bounds = array<i64: 1, 3, 64>}, {pipeline_mode = #tpu.pipeline_mode<synchronous>, transform_indices = @transform_2, window_bounds = array<i64: 1, 64>}, {pipeline_mode = #tpu.pipeline_mode<synchronous>, transform_indices = @transform_3, window_bounds = array<i64: 1, 64>}, {pipeline_mode = #tpu.pipeline_mode<synchronous>, transform_indices = @transform_4, window_bounds = array<i64: 64, 128>}, {pipeline_mode = #tpu.pipeline_mode<synchronous>, transform_indices = @transform_5, window_bounds = array<i64: 1, 128>}, {pipeline_mode = #tpu.pipeline_mode<synchronous>, transform_indices = @transform_6, window_bounds = array<i64: 1, 128>}, {pipeline_mode = #tpu.pipeline_mode<synchronous>, transform_indices = @transform_7, window_bounds = array<i64: 128, 1024>}, {pipeline_mode = #tpu.pipeline_mode<synchronous>, transform_indices = @transform_8, window_bounds = array<i64: 1, 1024>}, {pipeline_mode = #tpu.pipeline_mode<synchronous>, transform_indices = @transform_9, window_bounds = array<i64: 1, 1024>}, {transform_indices = @transform_10, window_bounds = array<i64: 1, 1, 1024>}]} {
    %c0_i32 = arith.constant 0 : i32
    %0 = arith.cmpi eq, %arg1, %c0_i32 : i32
    %1 = arith.extui %0 : i1 to i32
    %c0_i32_0 = arith.constant 0 : i32
    %2 = arith.cmpi ne, %1, %c0_i32_0 : i32
    scf.if %2 {
      %cst_33 = arith.constant 0xFF800000 : f32
      %44 = vector.broadcast %cst_33 : f32 to vector<1x1x1024xf32>
      %c0_34 = arith.constant 0 : index
      %c0_35 = arith.constant 0 : index
      %c0_36 = arith.constant 0 : index
      %45 = vector.load %arg12[%c0_34, %c0_35, %c0_36] : memref<1x1x1024xf32, #tpu.memory_space<vmem>>, vector<1x1x1024xf32>
      tpu.vector_store %arg12[%c0_34, %c0_35, %c0_36], %44 {strides = array<i32>} : memref<1x1x1024xf32, #tpu.memory_space<vmem>>, vector<1x1x1024xf32>,
    } else {
    }
    %c0 = arith.constant 0 : index
    %c0_1 = arith.constant 0 : index
    %c0_2 = arith.constant 0 : index
    %3 = vector.load %arg2[%c0, %c0_1, %c0_2] : memref<1x64x3xf32, #tpu.memory_space<vmem>>, vector<1x64x3xf32>
    %4 = vector.shape_cast %3 : vector<1x64x3xf32> to vector<64x3xf32>
    %c0_3 = arith.constant 0 : index
    %c0_4 = arith.constant 0 : index
    %c0_5 = arith.constant 0 : index
    %5 = vector.load %arg3[%c0_3, %c0_4, %c0_5] : memref<1x3x64xf32, #tpu.memory_space<vmem>>, vector<1x3x64xf32>
    %6 = vector.shape_cast %5 : vector<1x3x64xf32> to vector<3x64xf32>
    %cst = arith.constant dense<0.000000e+00> : vector<64x64xf32>
    %7 = tpu.matmul %4, %6, %cst {dimension_numbers = #tpu.dot_dimension_numbers<[1], [0], [0], [1], [0, 0, 1, 1], [], []>} : vector<64x3xf32>, vector<3x64xf32>, vector<64x64xf32> -> vector<64x64xf32>
    %c0_6 = arith.constant 0 : index
    %c0_7 = arith.constant 0 : index
    %8 = vector.load %arg4[%c0_6, %c0_7] : memref<1x64xf32, #tpu.memory_space<vmem>>, vector<1x64xf32>
    %9 = vector.broadcast %8 : vector<1x64xf32> to vector<64x64xf32>
    %10 = arith.mulf %7, %9 : vector<64x64xf32>
    %c0_8 = arith.constant 0 : index
    %c0_9 = arith.constant 0 : index
    %11 = vector.load %arg5[%c0_8, %c0_9] : memref<1x64xf32, #tpu.memory_space<vmem>>, vector<1x64xf32>
    %12 = vector.broadcast %11 : vector<1x64xf32> to vector<64x64xf32>
    %13 = arith.addf %10, %12 : vector<64x64xf32>
    %cst_10 = arith.constant 0.000000e+00 : f32
    %14 = vector.broadcast %cst_10 : f32 to vector<64x64xf32>
    %15 = arith.maximumf %13, %14 : vector<64x64xf32>
    %16 = arith.truncf %15 : vector<64x64xf32> to vector<64x64xbf16>
    %c0_11 = arith.constant 0 : index
    %c0_12 = arith.constant 0 : index
    %17 = vector.load %arg6[%c0_11, %c0_12] : memref<64x128xbf16, #tpu.memory_space<vmem>>, vector<64x128xbf16>
    %cst_13 = arith.constant dense<0.000000e+00> : vector<64x128xf32>
    %18 = tpu.matmul %16, %17, %cst_13 {dimension_numbers = #tpu.dot_dimension_numbers<[1], [0], [0], [1], [0, 0, 1, 1], [], []>} : vector<64x64xbf16>, vector<64x128xbf16>, vector<64x128xf32> -> vector<64x128xf32>
    %c0_14 = arith.constant 0 : index
    %c0_15 = arith.constant 0 : index
    %19 = vector.load %arg7[%c0_14, %c0_15] : memref<1x128xf32, #tpu.memory_space<vmem>>, vector<1x128xf32>
    %20 = vector.broadcast %19 : vector<1x128xf32> to vector<64x128xf32>
    %21 = arith.mulf %18, %20 : vector<64x128xf32>
    %c0_16 = arith.constant 0 : index
    %c0_17 = arith.constant 0 : index
    %22 = vector.load %arg8[%c0_16, %c0_17] : memref<1x128xf32, #tpu.memory_space<vmem>>, vector<1x128xf32>
    %23 = vector.broadcast %22 : vector<1x128xf32> to vector<64x128xf32>
    %24 = arith.addf %21, %23 : vector<64x128xf32>
    %cst_18 = arith.constant 0.000000e+00 : f32
    %25 = vector.broadcast %cst_18 : f32 to vector<64x128xf32>
    %26 = arith.maximumf %24, %25 : vector<64x128xf32>
    %27 = arith.truncf %26 : vector<64x128xf32> to vector<64x128xbf16>
    %c0_19 = arith.constant 0 : index
    %c0_20 = arith.constant 0 : index
    %28 = vector.load %arg9[%c0_19, %c0_20] : memref<128x1024xbf16, #tpu.memory_space<vmem>>, vector<128x1024xbf16>
    %cst_21 = arith.constant dense<0.000000e+00> : vector<64x1024xf32>
    %29 = tpu.matmul %27, %28, %cst_21 {dimension_numbers = #tpu.dot_dimension_numbers<[1], [0], [0], [1], [0, 0, 1, 1], [], []>} : vector<64x128xbf16>, vector<128x1024xbf16>, vector<64x1024xf32> -> vector<64x1024xf32>
    %c0_22 = arith.constant 0 : index
    %c0_23 = arith.constant 0 : index
    %30 = vector.load %arg10[%c0_22, %c0_23] : memref<1x1024xf32, #tpu.memory_space<vmem>>, vector<1x1024xf32>
    %31 = vector.broadcast %30 : vector<1x1024xf32> to vector<64x1024xf32>
    %32 = arith.mulf %29, %31 : vector<64x1024xf32>
    %c0_24 = arith.constant 0 : index
    %c0_25 = arith.constant 0 : index
    %33 = vector.load %arg11[%c0_24, %c0_25] : memref<1x1024xf32, #tpu.memory_space<vmem>>, vector<1x1024xf32>
    %34 = vector.broadcast %33 : vector<1x1024xf32> to vector<64x1024xf32>
    %35 = arith.addf %32, %34 : vector<64x1024xf32>
    %c0_26 = arith.constant 0 : index
    %c0_27 = arith.constant 0 : index
    %c0_28 = arith.constant 0 : index
    %36 = vector.load %arg12[%c0_26, %c0_27, %c0_28] : memref<1x1x1024xf32, #tpu.memory_space<vmem>>, vector<1x1x1024xf32>
    %37 = vector.shape_cast %36 : vector<1x1x1024xf32> to vector<1x1024xf32>
    %cst_29 = arith.constant dense<0xFF800000> : vector<1024xf32>
    %38 = vector.multi_reduction <maximumf>, %35, %cst_29 [0] : vector<64x1024xf32> to vector<1024xf32>
    %39 = vector.shape_cast %38 : vector<1024xf32> to vector<1x1024xf32>
    %40 = arith.maximumf %37, %39 : vector<1x1024xf32>
    %c0_30 = arith.constant 0 : index
    %c0_31 = arith.constant 0 : index
    %c0_32 = arith.constant 0 : index
    %41 = vector.load %arg12[%c0_30, %c0_31, %c0_32] : memref<1x1x1024xf32, #tpu.memory_space<vmem>>, vector<1x1x1024xf32>
    %42 = vector.shape_cast %41 : vector<1x1x1024xf32> to vector<1x1024xf32>
    %43 = vector.shape_cast %40 : vector<1x1024xf32> to vector<1x1x1024xf32>
    tpu.vector_store %arg12[%c0_30, %c0_31, %c0_32], %43 {strides = array<i32>} : memref<1x1x1024xf32, #tpu.memory_space<vmem>>, vector<1x1x1024xf32>,
    return
  }
  func.func @transform_0(%arg0: i32, %arg1: i32) -> (i32, i32, i32) {
    %c0_i32 = arith.constant 0 : i32
    %c0_i32_0 = arith.constant 0 : i32
    return %arg0, %arg1, %c0_i32 : i32, i32, i32
  }
  func.func @transform_1(%arg0: i32, %arg1: i32) -> (i32, i32, i32) {
    %c0_i32 = arith.constant 0 : i32
    %c0_i32_0 = arith.constant 0 : i32
    %c0_i32_1 = arith.constant 0 : i32
    return %arg0, %c0_i32, %c0_i32_0 : i32, i32, i32
  }
  func.func @transform_2(%arg0: i32, %arg1: i32) -> (i32, i32) {
    %c0_i32 = arith.constant 0 : i32
    %c0_i32_0 = arith.constant 0 : i32
    %c0_i32_1 = arith.constant 0 : i32
    return %c0_i32, %c0_i32_0 : i32, i32
  }
  func.func @transform_3(%arg0: i32, %arg1: i32) -> (i32, i32) {
    %c0_i32 = arith.constant 0 : i32
    %c0_i32_0 = arith.constant 0 : i32
    %c0_i32_1 = arith.constant 0 : i32
    return %c0_i32, %c0_i32_0 : i32, i32
  }
  func.func @transform_4(%arg0: i32, %arg1: i32) -> (i32, i32) {
    %c0_i32 = arith.constant 0 : i32
    %c0_i32_0 = arith.constant 0 : i32
    %c0_i32_1 = arith.constant 0 : i32
    return %c0_i32, %c0_i32_0 : i32, i32
  }
  func.func @transform_5(%arg0: i32, %arg1: i32) -> (i32, i32) {
    %c0_i32 = arith.constant 0 : i32
    %c0_i32_0 = arith.constant 0 : i32
    %c0_i32_1 = arith.constant 0 : i32
    return %c0_i32, %c0_i32_0 : i32, i32
  }
  func.func @transform_6(%arg0: i32, %arg1: i32) -> (i32, i32) {
    %c0_i32 = arith.constant 0 : i32
    %c0_i32_0 = arith.constant 0 : i32
    %c0_i32_1 = arith.constant 0 : i32
    return %c0_i32, %c0_i32_0 : i32, i32
  }
  func.func @transform_7(%arg0: i32, %arg1: i32) -> (i32, i32) {
    %c0_i32 = arith.constant 0 : i32
    %c0_i32_0 = arith.constant 0 : i32
    %c0_i32_1 = arith.constant 0 : i32
    return %c0_i32, %c0_i32_0 : i32, i32
  }
  func.func @transform_8(%arg0: i32, %arg1: i32) -> (i32, i32) {
    %c0_i32 = arith.constant 0 : i32
    %c0_i32_0 = arith.constant 0 : i32
    %c0_i32_1 = arith.constant 0 : i32
    return %c0_i32, %c0_i32_0 : i32, i32
  }
  func.func @transform_9(%arg0: i32, %arg1: i32) -> (i32, i32) {
    %c0_i32 = arith.constant 0 : i32
    %c0_i32_0 = arith.constant 0 : i32
    %c0_i32_1 = arith.constant 0 : i32
    return %c0_i32, %c0_i32_0 : i32, i32
  }
  func.func @transform_10(%arg0: i32, %arg1: i32) -> (i32, i32, i32) {
    %c0_i32 = arith.constant 0 : i32
    %c0_i32_0 = arith.constant 0 : i32
    %c0_i32_1 = arith.constant 0 : i32
    return %arg0, %c0_i32, %c0_i32_0 : i32, i32, i32
  }
}

module attributes {stable_mosaic.version = 11 : i64} {
  func.func @_mlp3_kernel(%arg0: i32, %arg1: memref<2x1024xf32, #tpu.memory_space<vmem>>, %arg2: memref<1024x512xf32, #tpu.memory_space<vmem>>, %arg3: memref<1x512xf32, #tpu.memory_space<vmem>>, %arg4: memref<1x512xf32, #tpu.memory_space<vmem>>, %arg5: memref<512x256xf32, #tpu.memory_space<vmem>>, %arg6: memref<1x256xf32, #tpu.memory_space<vmem>>, %arg7: memref<1x256xf32, #tpu.memory_space<vmem>>, %arg8: memref<256x2xf32, #tpu.memory_space<vmem>>, %arg9: memref<1x2xf32, #tpu.memory_space<vmem>>, %arg10: memref<1x2xf32, #tpu.memory_space<vmem>>, %arg11: memref<2x2xf32, #tpu.memory_space<vmem>>) attributes {dimension_semantics = [#tpu.dimension_semantics<arbitrary>], iteration_bounds = array<i64: 1>, scalar_prefetch = 0 : i64, scratch_operands = 0 : i64, tpu.core_type = #tpu.core_type<tc>, window_params = [{pipeline_mode = #tpu.pipeline_mode<synchronous>, transform_indices = @transform_0, window_bounds = array<i64: 2, 1024>}, {pipeline_mode = #tpu.pipeline_mode<synchronous>, transform_indices = @transform_1, window_bounds = array<i64: 1024, 512>}, {pipeline_mode = #tpu.pipeline_mode<synchronous>, transform_indices = @transform_2, window_bounds = array<i64: 1, 512>}, {pipeline_mode = #tpu.pipeline_mode<synchronous>, transform_indices = @transform_3, window_bounds = array<i64: 1, 512>}, {pipeline_mode = #tpu.pipeline_mode<synchronous>, transform_indices = @transform_4, window_bounds = array<i64: 512, 256>}, {pipeline_mode = #tpu.pipeline_mode<synchronous>, transform_indices = @transform_5, window_bounds = array<i64: 1, 256>}, {pipeline_mode = #tpu.pipeline_mode<synchronous>, transform_indices = @transform_6, window_bounds = array<i64: 1, 256>}, {pipeline_mode = #tpu.pipeline_mode<synchronous>, transform_indices = @transform_7, window_bounds = array<i64: 256, 2>}, {pipeline_mode = #tpu.pipeline_mode<synchronous>, transform_indices = @transform_8, window_bounds = array<i64: 1, 2>}, {pipeline_mode = #tpu.pipeline_mode<synchronous>, transform_indices = @transform_9, window_bounds = array<i64: 1, 2>}, {pipeline_mode = #tpu.pipeline_mode<synchronous>, transform_indices = @transform_10, window_bounds = array<i64: 2, 2>}]} {
    %c0 = arith.constant 0 : index
    %c0_0 = arith.constant 0 : index
    %0 = vector.load %arg1[%c0, %c0_0] : memref<2x1024xf32, #tpu.memory_space<vmem>>, vector<2x1024xf32>
    %c0_1 = arith.constant 0 : index
    %c0_2 = arith.constant 0 : index
    %1 = vector.load %arg2[%c0_1, %c0_2] : memref<1024x512xf32, #tpu.memory_space<vmem>>, vector<1024x512xf32>
    %cst = arith.constant dense<0.000000e+00> : vector<2x512xf32>
    %2 = tpu.matmul %0, %1, %cst {dimension_numbers = #tpu.dot_dimension_numbers<[1], [0], [0], [1], [0, 0, 1, 1], [], []>} : vector<2x1024xf32>, vector<1024x512xf32>, vector<2x512xf32> -> vector<2x512xf32>
    %c0_3 = arith.constant 0 : index
    %c0_4 = arith.constant 0 : index
    %3 = vector.load %arg3[%c0_3, %c0_4] : memref<1x512xf32, #tpu.memory_space<vmem>>, vector<1x512xf32>
    %4 = vector.broadcast %3 : vector<1x512xf32> to vector<2x512xf32>
    %5 = arith.mulf %2, %4 : vector<2x512xf32>
    %c0_5 = arith.constant 0 : index
    %c0_6 = arith.constant 0 : index
    %6 = vector.load %arg4[%c0_5, %c0_6] : memref<1x512xf32, #tpu.memory_space<vmem>>, vector<1x512xf32>
    %7 = vector.broadcast %6 : vector<1x512xf32> to vector<2x512xf32>
    %8 = arith.addf %5, %7 : vector<2x512xf32>
    %cst_7 = arith.constant 0.000000e+00 : f32
    %9 = vector.broadcast %cst_7 : f32 to vector<2x512xf32>
    %10 = arith.maximumf %8, %9 : vector<2x512xf32>
    %c0_8 = arith.constant 0 : index
    %c0_9 = arith.constant 0 : index
    %11 = vector.load %arg5[%c0_8, %c0_9] : memref<512x256xf32, #tpu.memory_space<vmem>>, vector<512x256xf32>
    %cst_10 = arith.constant dense<0.000000e+00> : vector<2x256xf32>
    %12 = tpu.matmul %10, %11, %cst_10 {dimension_numbers = #tpu.dot_dimension_numbers<[1], [0], [0], [1], [0, 0, 1, 1], [], []>} : vector<2x512xf32>, vector<512x256xf32>, vector<2x256xf32> -> vector<2x256xf32>
    %c0_11 = arith.constant 0 : index
    %c0_12 = arith.constant 0 : index
    %13 = vector.load %arg6[%c0_11, %c0_12] : memref<1x256xf32, #tpu.memory_space<vmem>>, vector<1x256xf32>
    %14 = vector.broadcast %13 : vector<1x256xf32> to vector<2x256xf32>
    %15 = arith.mulf %12, %14 : vector<2x256xf32>
    %c0_13 = arith.constant 0 : index
    %c0_14 = arith.constant 0 : index
    %16 = vector.load %arg7[%c0_13, %c0_14] : memref<1x256xf32, #tpu.memory_space<vmem>>, vector<1x256xf32>
    %17 = vector.broadcast %16 : vector<1x256xf32> to vector<2x256xf32>
    %18 = arith.addf %15, %17 : vector<2x256xf32>
    %cst_15 = arith.constant 0.000000e+00 : f32
    %19 = vector.broadcast %cst_15 : f32 to vector<2x256xf32>
    %20 = arith.maximumf %18, %19 : vector<2x256xf32>
    %c0_16 = arith.constant 0 : index
    %c0_17 = arith.constant 0 : index
    %21 = vector.load %arg8[%c0_16, %c0_17] : memref<256x2xf32, #tpu.memory_space<vmem>>, vector<256x2xf32>
    %cst_18 = arith.constant dense<0.000000e+00> : vector<2x2xf32>
    %22 = tpu.matmul %20, %21, %cst_18 {dimension_numbers = #tpu.dot_dimension_numbers<[1], [0], [0], [1], [0, 0, 1, 1], [], []>} : vector<2x256xf32>, vector<256x2xf32>, vector<2x2xf32> -> vector<2x2xf32>
    %c0_19 = arith.constant 0 : index
    %c0_20 = arith.constant 0 : index
    %23 = vector.load %arg9[%c0_19, %c0_20] : memref<1x2xf32, #tpu.memory_space<vmem>>, vector<1x2xf32>
    %24 = vector.broadcast %23 : vector<1x2xf32> to vector<2x2xf32>
    %25 = arith.mulf %22, %24 : vector<2x2xf32>
    %c0_21 = arith.constant 0 : index
    %c0_22 = arith.constant 0 : index
    %26 = vector.load %arg10[%c0_21, %c0_22] : memref<1x2xf32, #tpu.memory_space<vmem>>, vector<1x2xf32>
    %27 = vector.broadcast %26 : vector<1x2xf32> to vector<2x2xf32>
    %28 = arith.addf %25, %27 : vector<2x2xf32>
    %cst_23 = arith.constant dense<0xFF800000> : vector<2xf32>
    %29 = vector.multi_reduction <maximumf>, %28, %cst_23 [1] : vector<2x2xf32> to vector<2xf32>
    %30 = vector.shape_cast %29 : vector<2xf32> to vector<2x1xf32>
    %31 = vector.broadcast %30 : vector<2x1xf32> to vector<2x2xf32>
    %32 = arith.subf %28, %31 : vector<2x2xf32>
    %33 = math.exp %32 : vector<2x2xf32>
    %cst_24 = arith.constant dense<0.000000e+00> : vector<2xf32>
    %34 = vector.multi_reduction <add>, %33, %cst_24 [1] : vector<2x2xf32> to vector<2xf32>
    %35 = vector.shape_cast %34 : vector<2xf32> to vector<2x1xf32>
    %36 = math.log %35 : vector<2x1xf32>
    %37 = vector.broadcast %36 : vector<2x1xf32> to vector<2x2xf32>
    %38 = arith.subf %32, %37 : vector<2x2xf32>
    %c0_25 = arith.constant 0 : index
    %c0_26 = arith.constant 0 : index
    %39 = vector.load %arg11[%c0_25, %c0_26] : memref<2x2xf32, #tpu.memory_space<vmem>>, vector<2x2xf32>
    tpu.vector_store %arg11[%c0_25, %c0_26], %38 {strides = array<i32>} : memref<2x2xf32, #tpu.memory_space<vmem>>, vector<2x2xf32>,
    return
  }
  func.func @transform_0(%arg0: i32) -> (i32, i32) {
    %c0_i32 = arith.constant 0 : i32
    %c0_i32_0 = arith.constant 0 : i32
    %c0_i32_1 = arith.constant 0 : i32
    return %c0_i32, %c0_i32_0 : i32, i32
  }
  func.func @transform_1(%arg0: i32) -> (i32, i32) {
    %c0_i32 = arith.constant 0 : i32
    %c0_i32_0 = arith.constant 0 : i32
    %c0_i32_1 = arith.constant 0 : i32
    return %c0_i32, %c0_i32_0 : i32, i32
  }
  func.func @transform_2(%arg0: i32) -> (i32, i32) {
    %c0_i32 = arith.constant 0 : i32
    %c0_i32_0 = arith.constant 0 : i32
    %c0_i32_1 = arith.constant 0 : i32
    return %c0_i32, %c0_i32_0 : i32, i32
  }
  func.func @transform_3(%arg0: i32) -> (i32, i32) {
    %c0_i32 = arith.constant 0 : i32
    %c0_i32_0 = arith.constant 0 : i32
    %c0_i32_1 = arith.constant 0 : i32
    return %c0_i32, %c0_i32_0 : i32, i32
  }
  func.func @transform_4(%arg0: i32) -> (i32, i32) {
    %c0_i32 = arith.constant 0 : i32
    %c0_i32_0 = arith.constant 0 : i32
    %c0_i32_1 = arith.constant 0 : i32
    return %c0_i32, %c0_i32_0 : i32, i32
  }
  func.func @transform_5(%arg0: i32) -> (i32, i32) {
    %c0_i32 = arith.constant 0 : i32
    %c0_i32_0 = arith.constant 0 : i32
    %c0_i32_1 = arith.constant 0 : i32
    return %c0_i32, %c0_i32_0 : i32, i32
  }
  func.func @transform_6(%arg0: i32) -> (i32, i32) {
    %c0_i32 = arith.constant 0 : i32
    %c0_i32_0 = arith.constant 0 : i32
    %c0_i32_1 = arith.constant 0 : i32
    return %c0_i32, %c0_i32_0 : i32, i32
  }
  func.func @transform_7(%arg0: i32) -> (i32, i32) {
    %c0_i32 = arith.constant 0 : i32
    %c0_i32_0 = arith.constant 0 : i32
    %c0_i32_1 = arith.constant 0 : i32
    return %c0_i32, %c0_i32_0 : i32, i32
  }
  func.func @transform_8(%arg0: i32) -> (i32, i32) {
    %c0_i32 = arith.constant 0 : i32
    %c0_i32_0 = arith.constant 0 : i32
    %c0_i32_1 = arith.constant 0 : i32
    return %c0_i32, %c0_i32_0 : i32, i32
  }
  func.func @transform_9(%arg0: i32) -> (i32, i32) {
    %c0_i32 = arith.constant 0 : i32
    %c0_i32_0 = arith.constant 0 : i32
    %c0_i32_1 = arith.constant 0 : i32
    return %c0_i32, %c0_i32_0 : i32, i32
  }
  func.func @transform_10(%arg0: i32) -> (i32, i32) {
    %c0_i32 = arith.constant 0 : i32
    %c0_i32_0 = arith.constant 0 : i32
    %c0_i32_1 = arith.constant 0 : i32
    return %c0_i32, %c0_i32_0 : i32, i32
  }
}

</mosaic_0001>

<bundles_post_ra>
// kernel: _lambda_.4
= control target key start
LH: loop header
LB: loop body
LE: loop exit
PB: predicated region body
PF: predicated region fallthrough
CT: control target
= control target key end

     0   :  { %s3140_s0 = inlined_call_operand.vmem [shape: f32[2,64,3], index: 0, kind: input, shape index: {}]   ;;  %s3141_s1 = inlined_call_operand.vmem [shape: f32[2,3,64], index: 1, kind: input, shape index: {}]   ;;  %s3142_s2 = inlined_call_operand.hbm [shape: f32[1,64], index: 2, kind: input, shape index: {}]   ;;  %s3143_s3 = inlined_call_operand.hbm [shape: f32[1,64], index: 3, kind: input, shape index: {}]   ;;  %s3144_s4 = inlined_call_operand.hbm [shape: bf16[64,128], index: 4, kind: input, shape index: {}]   ;;  %s3145_s5 = inlined_call_operand.hbm [shape: f32[1,128], index: 5, kind: input, shape index: {}]   ;;  %s3146_s6 = inlined_call_operand.hbm [shape: f32[1,128], index: 6, kind: input, shape index: {}]   ;;  %s3147_s7 = inlined_call_operand.hbm [shape: bf16[128,1024], index: 7, kind: input, shape index: {}]   ;;  %s3148_s8 = inlined_call_operand.hbm [shape: f32[1,1024], index: 8, kind: input, shape index: {}]   ;;  %s3149_s9 = inlined_call_operand.hbm [shape: f32[1,1024], index: 9, kind: input, shape index: {}]   ;;  %s3150_s10 = inlined_call_operand.vmem [shape: f32[2,1,1024], index: 10, kind: output, shape index: {}]  }
   0x1   :  { %3151 = sst [smem:[#allocation20_spill]] %s3142_s2 }
   0x2   :  { %3152 = sst [smem:[#allocation21_spill]] %s3143_s3 }
   0x3   :  { %15 = vsyncpa [#allocation3], 0 }
   0x4   :  { %16 = vsyncpa [#allocation5], 0 }
   0x5   :  { %17 = vsyncpa [#allocation8], 0 }
   0x6   :  { %18 = vsyncpa [#allocation11], 0 }
   0x7   :  { %19 = vsyncpa [#allocation14], 0  ;;  %s2746_s13 = smov 0   ;;  %s2748_s14 = smov 0  }
   0x8   :  { %s2750_s15 = smov 0  }
   0x9 LB: > { %s3153_s3 = sld [smem:[#allocation21_spill]]  ;;  %s1895_s19 = sadd.s32 4294967295, %s2677_s15   ;;  %s2677_s15 = sphi %s2750_s15, %s25_s15   ;;  %s2673_s14 = sphi %s2748_s14, %s3159_s14   ;;  %s2669_s13 = sphi %s2746_s13, %s3158_s13  }
   0xa   : > { %p1897_p0 = scmp.ge.s32.totalorder %s2677_s15, 1  ;;  %p290_p1 = scmp.lt.s32.totalorder %s2677_s15, 3 }
   0xb   : > { %p2767_p2 = scmp.eq.s32.totalorder %s1895_s19, 0  ;;  %s2679_s22 = smov [#allocation4]  }
   0xc   : > { %p2771_p3 = pnand %p1897_p0, %p290_p1  ;;  %s316_s23 = sshll.u32 %s2679_s22, 4  ;;  %s317_s23 = int_to_ptr.vmem [resolvable:$true] %s316_s23 }
   0xd   : > { %s340_s26 = sshll.u32 %s3145_s5, 4  ;;  %s363_s29 = sshll.u32 %s3147_s7, 4  ;;  %s341_s26 = int_to_ptr.hbm [resolvable:$true] %s340_s26  ;;  %s364_s29 = int_to_ptr.hbm [resolvable:$true] %s363_s29 }
   0xe   : > { %p2313_p4 = pneg %p2771_p3  ;;  %s2680_s11 = smov [#allocation7]  }
   0xf   : > { %s314_s18 = sshll.u32 %s3153_s3, 4  ;;  %s342_s12 = sshll.u32 %s2680_s11, 4  ;;  %s315_s18 = int_to_ptr.hbm [resolvable:$true] %s314_s18  ;;  %s343_s12 = int_to_ptr.vmem [resolvable:$true] %s342_s12 }
  0x10   : > { %p2785_p5 = pnand %p2767_p2, %p2313_p4  ;;  %s2681_s16 = smov [#allocation10]  }
  0x11   : > { %s365_s17 = sshll.u32 %s2681_s16, 4  ;;  %s2682_s19 = smov 512   ;;  %s366_s17 = int_to_ptr.vmem [resolvable:$true] %s365_s17 }
  0x12   : > { %2319 = dma.hbm_to_vmem [thread:$0]  (!%p2785_p5), %s315_s18, 16, %s317_s23, [#allocation5]  }
  0x13   : > { %2325 = dma.hbm_to_vmem [thread:$0]  (!%p2785_p5), %s341_s26, 16, %s343_s12, [#allocation8]  }
  0x14   : > { %s2683_s22 = smov 32   ;;  %s37_s24 = sadd.s32 1, %s2673_s14 }
  0x15   : > { %2331 = dma.hbm_to_vmem [thread:$0]  (!%p2785_p5), %s364_s29, 8192, %s366_s17, [#allocation11], %s2682_s19, %s2682_s19, %s2683_s22  }
  0x16   : > { %s3157_s2 = sld [smem:[#allocation20_spill]]  ;;  %p39_p6 = scmp.ge.s32.totalorder %s37_s24, 2 }
  0x17   : > { %s325_s23 = sshll.u32 %s3144_s4, 4  ;;  %s2684_s26 = smov [#allocation2]   ;;  %s326_s23 = int_to_ptr.hbm [resolvable:$true] %s325_s23 }
  0x18   : > { %s3161_s24 = smov (%p39_p6, %s37_s24), 0  ;;  %s304_s12 = sshll.u32 %s2684_s26, 4  ;;  %s305_s12 = int_to_ptr.vmem [resolvable:$true] %s304_s12 }
  0x19   : > { %s2685_s29 = smov [#allocation6]   ;;  %s2686_s17 = smov 64  }
  0x1a   : > { %s327_s16 = sshll.u32 %s2685_s29, 4  ;;  %s2687_s19 = smov 4   ;;  %s328_s16 = int_to_ptr.vmem [resolvable:$true] %s327_s16 }
  0x1b   : > { %2322 = dma.hbm_to_vmem [thread:$0]  (!%p2785_p5), %s326_s23, 512, %s328_s16, [#allocation5], %s2686_s17, %s2686_s17, %s2687_s19  }
  0x1c   : > { %s302_s28 = sshll.u32 %s3157_s2, 4  ;;  %s352_s27 = sshll.u32 %s3146_s6, 4  ;;  %s303_s28 = int_to_ptr.hbm [resolvable:$true] %s302_s28  ;;  %s353_s27 = int_to_ptr.hbm [resolvable:$true] %s352_s27 }
  0x1d   : > { %2316 = dma.hbm_to_vmem [thread:$0]  (!%p2785_p5), %s303_s28, 16, %s305_s12, [#allocation3]  }
  0x1e   : > { %s2688_s11 = smov [#allocation9]   ;;  %s378_s28 = sshll.u32 %s3148_s8, 4  ;;  %s379_s28 = int_to_ptr.hbm [resolvable:$true] %s378_s28 }
  0x1f   : > { %s354_s18 = sshll.u32 %s2688_s11, 4  ;;  %s2689_s12 = smov [#allocation12]   ;;  %s355_s18 = int_to_ptr.vmem [resolvable:$true] %s354_s18 }
  0x20   : > { %2328 = dma.hbm_to_vmem [thread:$0]  (!%p2785_p5), %s353_s27, 16, %s355_s18, [#allocation8]  }
  0x21   : > { %s380_s29 = sshll.u32 %s2689_s12, 4  ;;  %s390_s16 = sshll.u32 %s3149_s9, 4  ;;  %s381_s29 = int_to_ptr.vmem [resolvable:$true] %s380_s29  ;;  %s391_s16 = int_to_ptr.hbm [resolvable:$true] %s390_s16 }
  0x22   : > { %2334 = dma.hbm_to_vmem [thread:$0]  (!%p2785_p5), %s379_s28, 128, %s381_s29, [#allocation11]  }
  0x23   : > { %s2690_s17 = smov [#allocation13]   ;;  %425 = sbr.rel (%p2771_p3) target bundleno = 618 (0x26a), region = 60 }
  0x24   : > { %s392_s19 = sshll.u32 %s2690_s17, 4  ;;  %s393_s19 = int_to_ptr.vmem [resolvable:$true] %s392_s19 }
  0x25   : > { %2337 = dma.hbm_to_vmem [thread:$0]  (!%p2785_p5), %s391_s16, 128, %s393_s19, [#allocation14]  }
  0x28   : > { %2648 = dma.done.wait (%p2767_p2), [#allocation3], 16  }
  0x29   : > { %2650 = vsyncadd (%p2767_p2), [#allocation3], 4294967280 }
  0x2a   : > { %2652 = dma.done.wait (%p2767_p2), [#allocation5], 528  }
  0x2b   : > { %2654 = vsyncadd (%p2767_p2), [#allocation5], 4294966768 }
  0x2c   : > { %2656 = dma.done.wait (%p2767_p2), [#allocation8], 32  }
  0x2d   : > { %2658 = vsyncadd (%p2767_p2), [#allocation8], 4294967264 }
  0x2e   : > { %2660 = dma.done.wait (%p2767_p2), [#allocation11], 8320  }
  0x2f   : > { %2662 = vsyncadd (%p2767_p2), [#allocation11], 4294958976 }
  0x30   : > { %2664 = dma.done.wait (%p2767_p2), [#allocation14], 128  }
  0x31   : > { %2666 = vsyncadd (%p2767_p2), [#allocation14], 4294967168  ;;  %p507_p7 = scmp.lt.s32.totalorder %s2669_s13, 1  ;;  %vm564_vm0 = vcmask 1042432   ;;  %vm539_vm1 = vcmask 23552   ;;  %v2211_v9 = vld [vmem:[#allocation6 + $0x18] sm:$0xff] }
  0x32   : > { %694 = vmatpush.bf16.msra.mxu1 %v2211_v9  ;;  %2277 = vmatpush.bf16.msra.mxu2 %v2211_v9  ;;  %v2210_v10 = vld [vmem:[#allocation6 + $0x10] sm:$0xff]  ;;  %v2209_v11 = vld [vmem:[#allocation6 + $0x8] sm:$0xff]  ;;  %v2208_v12 = vld [vmem:[#allocation6] sm:$0xff]  ;;  %vm677_vm2 = vcmask 523264   ;;  %vm1721_vm3 = vcmask 1042434   ;;  %vm1719_vm4 = vcmask 1040384  }
  0x33   : > { %s3163_s13 = smov (!%p507_p7, %s2669_s13), 1  ;;  %v2865_v13 = vld [vmem:[#allocation2] ss:$0 sm:$0xff]  ;;  %v2868_v16 = vld [vmem:[#allocation4] ss:$0 sm:$0xff]  ;;  %vm1723_vm5 = vcmask 1041408  }
  0x34   : > { %s2207_s2 = sshll.u32 %s3163_s13, 6  ;;  %s1918_s3 = sshll.u32 %s3163_s13, 2  ;;  %v2175_v20 = vld [vmem:[#allocation10 + $0x1c0] sm:$0xf]  ;;  %v2268_v22 = vld [vmem:[#allocation10 + $0x1c4] sm:$0xf] }
  0x35   : > { %s514_s22 = scalar_lea.vmem %s3140_s0, %s2207_s2  ;;  %s519_s11 = scalar_lea.vmem %s3141_s1, %s1918_s3  ;;  %v2272_v21 = vld [vmem:[#allocation10 + $0x1dc] sm:$0xf0]  ;;  %v2177_v25 = vld [vmem:[#allocation10 + $0x1e0] sm:$0xf0]  ;;  %v2183_v26 = vld [vmem:[#allocation10 + $0x1c8] sm:$0xf] }
  0x36   : > { %v538_v0 = vld [vmem:[%s519_s11] sm:$0x7]  ;;  %v531_v3 = vld [vmem:[%s514_s22 + $0x8] sm:$0xff]  ;;  %v532_v5 = vld [vmem:[%s514_s22 + $0x10] sm:$0xff]  ;;  %695 = vmatpush.bf16.msra.mxu1 %v2210_v10  ;;  %2278 = vmatpush.bf16.msra.mxu2 %v2210_v10  ;;  %v2176_v24 = vor.u32 %v2272_v21, %v2175_v20  ;;  %v2180_v30 = vor.u32 %v2268_v22, %v2177_v25  ;;  %vm1727_vm6 = vcmask 1046534   ;;  %vm1725_vm7 = vcmask 1044484  }
  0x37   : > { %v530_v1 = vld [vmem:[%s514_s22] sm:$0xff]  ;;  %1920 = vmatpush.msk.msra.mxu0 %vm564_vm0, %v538_v0  ;;  %2276 = vmatpush.msk.msra.mxu3 %vm564_vm0, %v538_v0  ;;  %v535_v4 = vld [vmem:[%s514_s22 + $0x28] sm:$0xff]  ;;  %v536_v6 = vld [vmem:[%s514_s22 + $0x30] sm:$0xff]  ;;  %vm1729_vm8 = vcmask 1045508   ;;  %s1919_s20 = sshll.u32 %s3163_s13, 3  ;;  %vm1731_vm9 = vcmask 1043456  }
  0x38   : > { %v534_v2 = vld [vmem:[%s514_s22 + $0x20] sm:$0xff]  ;;  %1921 = vmatmul.msk.f32.vlgmr.msra.gmra.mxu0 %vm539_vm1, %v530_v1  ;;  %v533_v7 = vld [vmem:[%s514_s22 + $0x18] sm:$0xff]  ;;  %v2273_v27 = vld [vmem:[#allocation10 + $0x1e4] sm:$0xf0]  ;;  %s523_s28 = scalar_lea.vmem %s3150_s10, %s1919_s20 }
  0x39   : > { %1925 = vmatmul.msk.f32.vlgmr.msra.gmra.mxu3 %vm539_vm1, %v534_v2  ;;  %v537_v8 = vld [vmem:[%s514_s22 + $0x38] sm:$0xff]  ;;  %v2184_v31 = vor.u32 %v2273_v27, %v2183_v26  ;;  %v2269_v32 = vld [vmem:[#allocation10 + $0x1cc] sm:$0xf]  ;;  %v2143_v34 = vld [vmem:[#allocation10 + $0x180] sm:$0xf] }
  0x3a   : > { %696 = vmatpush.bf16.msra.mxu1 %v2209_v11  ;;  %2279 = vmatpush.bf16.msra.mxu2 %v2209_v11  ;;  %v2185_v33 = vld [vmem:[#allocation10 + $0x1e8] sm:$0xf0]  ;;  %v2264_v36 = vld [vmem:[#allocation10 + $0x19c] sm:$0xf0]  ;;  %v2260_v37 = vld [vmem:[#allocation10 + $0x184] sm:$0xf] }
  0x3b   : > { %v2188_v35 = vor.u32 %v2269_v32, %v2185_v33  ;;  %v2145_v38 = vld [vmem:[#allocation10 + $0x1a0] sm:$0xf0]  ;;  %1168 = vmatpush.bf16.msrb.mxu3 %v2180_v30  ;;  %1197 = vmatpush.bf16.msrb.mxu0 %v2184_v31  ;;  %v2144_v41 = vor.u32 %v2264_v36, %v2143_v34  ;;  %v2151_v43 = vld [vmem:[#allocation10 + $0x188] sm:$0xf]  ;;  %v2261_v46 = vld [vmem:[#allocation10 + $0x18c] sm:$0xf] }
  0x3c   : > { %v2148_v42 = vor.u32 %v2260_v37, %v2145_v38  ;;  %v2265_v44 = vld [vmem:[#allocation10 + $0x1a4] sm:$0xf0]  ;;  %v2153_v47 = vld [vmem:[#allocation10 + $0x1a8] sm:$0xf0]  ;;  %v2111_v48 = vld [vmem:[#allocation10 + $0x140] sm:$0xf] }
  0x3d   : > { %v2152_v45 = vor.u32 %v2265_v44, %v2151_v43  ;;  %v2156_v51 = vor.u32 %v2261_v46, %v2153_v47  ;;  %v2256_v52 = vld [vmem:[#allocation10 + $0x15c] sm:$0xf0]  ;;  %v2252_v53 = vld [vmem:[#allocation10 + $0x144] sm:$0xf]  ;;  %v2119_v57 = vld [vmem:[#allocation10 + $0x148] sm:$0xf] }
  0x3e   : > { %697 = vmatpush.bf16.msra.mxu1 %v2208_v12  ;;  %2280 = vmatpush.bf16.msra.mxu2 %v2208_v12  ;;  %v2112_v55 = vor.u32 %v2256_v52, %v2111_v48  ;;  %v2113_v56 = vld [vmem:[#allocation10 + $0x160] sm:$0xf0]  ;;  %v2257_v58 = vld [vmem:[#allocation10 + $0x164] sm:$0xf0]  ;;  %v2253_v62 = vld [vmem:[#allocation10 + $0x14c] sm:$0xf] }
  0x3f   : > { %1169 = vmatpush.bf16.msrb.mxu3 %v2148_v42  ;;  %1198 = vmatpush.bf16.msrb.mxu0 %v2152_v45  ;;  %v2116_v61 = vor.u32 %v2252_v53, %v2113_v56  ;;  %v2121_v63 = vld [vmem:[#allocation10 + $0x168] sm:$0xf0]  ;;  %v2079_v0 = vld [vmem:[#allocation10 + $0x100] sm:$0xf]  ;;  %v2120_v2 = vor.u32 %v2257_v58, %v2119_v57  ;;  %v2249_v9 = vld [vmem:[#allocation10 + $0x124] sm:$0xf0] }
  0x40   : > { %1922 = vmatmul.msk.f32.gmra.mxu0 %vm539_vm1, %v531_v3  ;;  %v2124_v3 = vor.u32 %v2253_v62, %v2121_v63  ;;  %v2245_v10 = vld [vmem:[#allocation10 + $0x10c] sm:$0xf]  ;;  %v2047_v37 = vld [vmem:[#allocation10 + $0xc0] sm:$0xf]  ;;  %v2055_v42 = vld [vmem:[#allocation10 + $0xc8] sm:$0xf] }
  0x41   : > { %1926 = vmatmul.msk.f32.gmra.mxu3 %vm539_vm1, %v535_v4  ;;  %v2248_v4 = vld [vmem:[#allocation10 + $0x11c] sm:$0xf0]  ;;  %v2089_v12 = vld [vmem:[#allocation10 + $0x128] sm:$0xf0]  ;;  %v2241_v44 = vld [vmem:[#allocation10 + $0xe4] sm:$0xf0] }
  0x42   : > { %1139 = vmatpush.bf16.msrb.mxu2 %v2176_v24  ;;  %1226 = vmatpush.bf16.msrb.mxu1 %v2188_v35  ;;  %v2080_v11 = vor.u32 %v2248_v4, %v2079_v0  ;;  %v2240_v38 = vld [vmem:[#allocation10 + $0xdc] sm:$0xf0]  ;;  %v2237_v45 = vld [vmem:[#allocation10 + $0xcc] sm:$0xf]  ;;  %v2023_v52 = vld [vmem:[#allocation10 + $0x88] sm:$0xf] }
  0x43   : > { %1170 = vmatpush.bf16.msrb.mxu3 %v2116_v61  ;;  %1199 = vmatpush.bf16.msrb.mxu0 %v2120_v2  ;;  %v2057_v46 = vld [vmem:[#allocation10 + $0xe8] sm:$0xf0]  ;;  %v2015_v48 = vld [vmem:[#allocation10 + $0x80] sm:$0xf]  ;;  %v2233_v53 = vld [vmem:[#allocation10 + $0xa4] sm:$0xf0] }
  0x44   : > { %v2060_v47 = vor.u32 %v2237_v45, %v2057_v46  ;;  %v2229_v56 = vld [vmem:[#allocation10 + $0x8c] sm:$0xf]  ;;  %v2220_v61 = vld [vmem:[#allocation10 + $0x44] sm:$0xf]  ;;  %v1991_v0 = vld [vmem:[#allocation10 + $0x48] sm:$0xf] }
  0x45   : > { %v2025_v57 = vld [vmem:[#allocation10 + $0xa8] sm:$0xf0]  ;;  %v1985_v63 = vld [vmem:[#allocation10 + $0x60] sm:$0xf0]  ;;  %v2169_v45 = vld [vmem:[#allocation10 + $0x1b8] sm:$0xf0] }
  0x46   : > { %1140 = vmatpush.bf16.msrb.mxu2 %v2144_v41  ;;  %1227 = vmatpush.bf16.msrb.mxu1 %v2156_v51  ;;  %v2049_v41 = vld [vmem:[#allocation10 + $0xe0] sm:$0xf0]  ;;  %v2028_v58 = vor.u32 %v2229_v56, %v2025_v57  ;;  %v1988_v2 = vor.u32 %v2220_v61, %v1985_v63  ;;  %v2221_v4 = vld [vmem:[#allocation10 + $0x4c] sm:$0xf]  ;;  %v2127_v46 = vld [vmem:[#allocation10 + $0x150] sm:$0xf] }
  0x47   : > { %v2017_v51 = vld [vmem:[#allocation10 + $0xa0] sm:$0xf0]  ;;  %v2895_v57 = vld [vmem:[#allocation9] ss:$0 sm:$0xff]  ;;  %v2095_v63 = vld [vmem:[#allocation10 + $0x110] sm:$0xf] }
  0x48   : > { %1923 = vmatmul.msk.f32.gmra.mxu0 %vm539_vm1, %v532_v5  ;;  %v2244_v5 = vld [vmem:[#allocation10 + $0x104] sm:$0xf] }
  0x49   : > { %1927 = vmatmul.msk.f32.gmra.mxu3 %vm539_vm1, %v536_v6  ;;  %v2081_v6 = vld [vmem:[#allocation10 + $0x120] sm:$0xf0] }
  0x4a   : > { %1141 = vmatpush.bf16.msrb.mxu2 %v2112_v55  ;;  %1228 = vmatpush.bf16.msrb.mxu1 %v2124_v3  ;;  %v2024_v55 = vor.u32 %v2233_v53, %v2023_v52 }
  0x4e   : > { %1142 = vmatpush.bf16.msrb.mxu2 %v2080_v11  ;;  %v1953_v11 = vld [vmem:[#allocation10 + $0x20] sm:$0xf0] }
  0x50   : > { %1924 = vmatmul.msk.f32.gmra.mxu0 %vm539_vm1, %v533_v7 }
  0x51   : > { %1928 = vmatmul.msk.f32.gmra.mxu3 %vm539_vm1, %v537_v8  ;;  %v2087_v8 = vld [vmem:[#allocation10 + $0x108] sm:$0xf] }
  0xb5   : > { %v585_v14 = vpop.f32.mrf.mxu0 }
  0xb6   : > { %v613_v15 = vmul.f32 %v2865_v13, %v585_v14 }
  0xb8   : > { %v625_v18 = vadd.f32 %v2868_v16, %v613_v15  ;;  %v2084_v15 = vor.u32 %v2244_v5, %v2081_v6  ;;  %v1993_v5 = vld [vmem:[#allocation10 + $0x68] sm:$0xf0] }
  0xb9   : > { %v1996_v6 = vor.u32 %v2221_v4, %v1993_v5  ;;  %v2103_v4 = vld [vmem:[#allocation10 + $0x118] sm:$0xf] }
  0xba   : > { %v633_v39 = vmax.f32 %v625_v18, 0.0  ;;  %v2092_v18 = vor.u32 %v2245_v10, %v2089_v12  ;;  %1171 = vmatpush.bf16.msrb.mxu3 %v2084_v15  ;;  %v1959_v12 = vld [vmem:[#allocation10 + $0x8] sm:$0xf]  ;;  %v2251_v5 = vld [vmem:[#allocation10 + $0x134] sm:$0xf0] }
  0xbc   : > { %v597_v17 = vpop.f32.mrf.mxu3  ;;  %1229 = vmatpush.bf16.msrb.mxu1 %v2092_v18  ;;  %v2213_v18 = vld [vmem:[#allocation10 + $0xc] sm:$0xf] }
  0xbd   : > { %v617_v19 = vmul.f32 %v2865_v13, %v597_v17  ;;  %v588_v23 = vpop.f32.mrf.mxu0  ;;  %v2088_v17 = vor.u32 %v2249_v9, %v2087_v8  ;;  %v2216_v8 = vld [vmem:[#allocation10 + $0x1c] sm:$0xf0]  ;;  %v2212_v9 = vld [vmem:[#allocation10 + $0x4] sm:$0xf] }
  0xbe   : > { %v614_v28 = vmul.f32 %v2865_v13, %v588_v23  ;;  %v1956_v15 = vor.u32 %v2212_v9, %v1953_v11  ;;  %v2104_v9 = vor.u32 %v2251_v5, %v2103_v4  ;;  %v2105_v11 = vld [vmem:[#allocation10 + $0x138] sm:$0xf0]  ;;  %v1969_v4 = vld [vmem:[#allocation10 + $0x30] sm:$0xf0] }
  0xbf   : > { %v2874_v29 = vadd.f32 %v2868_v16, %v617_v19  ;;  %1200 = vmatpush.bf16.msrb.mxu0 %v2088_v17 }
  0xc0   : > { %v626_v40 = vadd.f32 %v2868_v16, %v614_v28  ;;  %1230 = vmatpush.bf16.msrb.mxu1 %v2060_v47  ;;  %v2258_v47 = vld [vmem:[#allocation10 + $0x16c] sm:$0xf0] }
  0xc1   : > { %v637_v50 = vmax.f32 %v2874_v29, 0.0 }
  0xc2   : > { %v634_v49 = vmax.f32 %v626_v40, 0.0  ;;  %v2236_v40 = vld [vmem:[#allocation10 + $0xc4] sm:$0xf] }
  0xc3   : > { %v2052_v43 = vor.u32 %v2236_v40, %v2049_v41  ;;  %v2267_v40 = vld [vmem:[#allocation10 + $0x1b4] sm:$0xf0]  ;;  %v2892_v41 = vld [vmem:[#allocation7] ss:$0 sm:$0xff] }
  0xc4   : > { %v600_v54 = vpop.f32.mrf.mxu3  ;;  %v641_v59 = vpack.c.bf16 %v634_v49, %v633_v39  ;;  %v2048_v39 = vor.u32 %v2240_v38, %v2047_v37  ;;  %v2228_v49 = vld [vmem:[#allocation10 + $0x84] sm:$0xf]  ;;  %1231 = vmatpush.bf16.msrb.mxu1 %v2028_v58  ;;  %v2161_v38 = vld [vmem:[#allocation10 + $0x1b0] sm:$0xf0] }
  0xc5   : > { %v618_v60 = vmul.f32 %v2865_v13, %v600_v54  ;;  %v591_v1 = vpop.f32.mrf.mxu0  ;;  %1172 = vmatpush.bf16.msrb.mxu3 %v2052_v43  ;;  %v2020_v54 = vor.u32 %v2228_v49, %v2017_v51  ;;  %v2129_v49 = vld [vmem:[#allocation10 + $0x170] sm:$0xf0]  ;;  %v2259_v51 = vld [vmem:[#allocation10 + $0x174] sm:$0xf0] }
  0xc6   : > { %1945 = vmatmul.msk.bf16.vlgmr.msra.gmra.mxu1 %vm677_vm2, %v641_v59  ;;  %v615_v19 = vmul.f32 %v2865_v13, %v591_v1  ;;  %1143 = vmatpush.bf16.msrb.mxu2 %v2048_v39  ;;  %v1983_v59 = vld [vmem:[#allocation10 + $0x40] sm:$0xf]  ;;  %v2225_v1 = vld [vmem:[#allocation10 + $0x64] sm:$0xf0]  ;;  %v2167_v39 = vld [vmem:[#allocation10 + $0x198] sm:$0xf] }
  0xc7   : > { %v630_v7 = vadd.f32 %v2868_v16, %v618_v60  ;;  %v2224_v60 = vld [vmem:[#allocation10 + $0x5c] sm:$0xf0]  ;;  %v1992_v3 = vor.u32 %v2225_v1, %v1991_v0  ;;  %v2168_v43 = vor.u32 %v2267_v40, %v2167_v39  ;;  %v2250_v0 = vld [vmem:[#allocation10 + $0x12c] sm:$0xf0]  ;;  %v2246_v1 = vld [vmem:[#allocation10 + $0x114] sm:$0xf] }
  0xc8   : > { %v627_v23 = vadd.f32 %v2868_v16, %v615_v19  ;;  %v1984_v62 = vor.u32 %v2224_v60, %v1983_v59  ;;  %1232 = vmatpush.bf16.msrb.mxu1 %v1996_v6  ;;  %v1961_v19 = vld [vmem:[#allocation10 + $0x28] sm:$0xf0]  ;;  %v2231_v40 = vld [vmem:[#allocation10 + $0x9c] sm:$0xf] }
  0xc9   : > { %v638_v14 = vmax.f32 %v630_v7, 0.0  ;;  %1173 = vmatpush.bf16.msrb.mxu3 %v2020_v54  ;;  %v1951_v7 = vld [vmem:[#allocation10] sm:$0xf]  ;;  %v2255_v54 = vld [vmem:[#allocation10 + $0x15c] sm:$0xf] }
  0xca   : > { %v635_v27 = vmax.f32 %v627_v23, 0.0  ;;  %v1952_v10 = vor.u32 %v2216_v8, %v1951_v7  ;;  %v2270_v23 = vld [vmem:[#allocation10 + $0x1d4] sm:$0xf] }
  0xcb   : > { %v643_v20 = vpack.c.bf16 %v638_v14, %v637_v50  ;;  %v2217_v14 = vld [vmem:[#allocation10 + $0x24] sm:$0xf0] }
  0xcc   : > { %v603_v21 = vpop.f32.mrf.mxu3  ;;  %v1960_v17 = vor.u32 %v2217_v14, %v1959_v12 }
  0xcd   : > { %1947 = vmatmul.msk.bf16.vlgmr.msra.gmra.mxu2 %vm677_vm2, %v643_v20  ;;  %v594_v22 = vpop.f32.mrf.mxu0  ;;  %v619_v25 = vmul.f32 %v2865_v13, %v603_v21  ;;  %1174 = vmatpush.bf16.msrb.mxu3 %v1988_v2  ;;  %v1964_v20 = vor.u32 %v2213_v18, %v1961_v19  ;;  %v2191_v21 = vld [vmem:[#allocation10 + $0x1d0] sm:$0xf]  ;;  %v2096_v2 = vor.u32 %v2250_v0, %v2095_v63  ;;  %v2009_v63 = vld [vmem:[#allocation10 + $0x78] sm:$0xf0] }
  0xce   : > { %v616_v24 = vmul.f32 %v2865_v13, %v594_v22  ;;  %v2274_v22 = vld [vmem:[#allocation10 + $0x1ec] sm:$0xf0] }
  0xcf   : > { %v631_v29 = vadd.f32 %v2868_v16, %v619_v25  ;;  %1233 = vmatpush.bf16.msrb.mxu1 %v1964_v20  ;;  %v2193_v25 = vld [vmem:[#allocation10 + $0x1f0] sm:$0xf0]  ;;  %v2063_v18 = vld [vmem:[#allocation10 + $0xd0] sm:$0xf] }
  0xd0   : > { %v628_v26 = vadd.f32 %v2868_v16, %v616_v24  ;;  %v2192_v24 = vor.u32 %v2274_v22, %v2191_v21  ;;  %v2242_v19 = vld [vmem:[#allocation10 + $0xec] sm:$0xf0]  ;;  %v2238_v20 = vld [vmem:[#allocation10 + $0xd4] sm:$0xf] }
  0xd1   : > { %v639_v33 = vmax.f32 %v631_v29, 0.0  ;;  %1175 = vmatpush.bf16.msrb.mxu3 %v1956_v15  ;;  %v2064_v21 = vor.u32 %v2242_v19, %v2063_v18  ;;  %v2065_v22 = vld [vmem:[#allocation10 + $0xf0] sm:$0xf0]  ;;  %v1967_v0 = vld [vmem:[#allocation10 + $0x10] sm:$0xf] }
  0xd2   : > { %v636_v28 = vmax.f32 %v628_v26, 0.0  ;;  %v2199_v26 = vld [vmem:[#allocation10 + $0x1d8] sm:$0xf] }
  0xd4   : > { %v606_v30 = vpop.f32.mrf.mxu3  ;;  %v642_v31 = vpack.c.bf16 %v636_v28, %v635_v27  ;;  %v2275_v27 = vld [vmem:[#allocation10 + $0x1f4] sm:$0xf0]  ;;  %v2196_v28 = vor.u32 %v2270_v23, %v2193_v25  ;;  %v2068_v25 = vor.u32 %v2238_v20, %v2065_v22 }
  0xd5   : > { %v620_v32 = vmul.f32 %v2865_v13, %v606_v30  ;;  %v2056_v13 = vor.u32 %v2241_v44, %v2055_v42  ;;  %v2200_v29 = vor.u32 %v2275_v27, %v2199_v26  ;;  %v2271_v30 = vld [vmem:[#allocation10 + $0x1dc] sm:$0xf]  ;;  %v2071_v23 = vld [vmem:[#allocation10 + $0xd8] sm:$0xf] }
  0xd6   : > { %1946 = vmatmul.msk.bf16.gmra.mxu1 %vm677_vm2, %v642_v31  ;;  %v2201_v31 = vld [vmem:[#allocation10 + $0x1f8] sm:$0xf0]  ;;  %1284 = vmatpush.bf16.msra.mxu3 %v2196_v28 }
  0xd7   : > { %v632_v34 = vadd.f32 %v2868_v16, %v620_v32  ;;  %v2232_v16 = vld [vmem:[#allocation10 + $0x9c] sm:$0xf0]  ;;  %1201 = vmatpush.bf16.msrb.mxu0 %v2056_v13  ;;  %v2204_v32 = vor.u32 %v2271_v30, %v2201_v31  ;;  %v2263_v44 = vld [vmem:[#allocation10 + $0x19c] sm:$0xf] }
  0xd8   : > { %v2016_v50 = vor.u32 %v2232_v16, %v2015_v48  ;;  %v2172_v13 = vor.u32 %v2263_v44, %v2169_v45  ;;  %v2254_v48 = vld [vmem:[#allocation10 + $0x154] sm:$0xf]  ;;  %v2128_v16 = vor.u32 %v2258_v47, %v2127_v46  ;;  %v2239_v27 = vld [vmem:[#allocation10 + $0xdc] sm:$0xf] }
  0xd9   : > { %v640_v35 = vmax.f32 %v632_v34, 0.0  ;;  %1342 = vmatpush.bf16.msra.mxu1 %v2204_v32  ;;  %v2266_v34 = vld [vmem:[#allocation10 + $0x1ac] sm:$0xf0]  ;;  %v2132_v52 = vor.u32 %v2254_v48, %v2129_v49  ;;  %v2073_v28 = vld [vmem:[#allocation10 + $0xf8] sm:$0xf0] }
  0xda   : > { %1144 = vmatpush.bf16.msrb.mxu2 %v2016_v50  ;;  %v2135_v50 = vld [vmem:[#allocation10 + $0x158] sm:$0xf]  ;;  %v2076_v31 = vor.u32 %v2239_v27, %v2073_v28  ;;  %v2234_v32 = vld [vmem:[#allocation10 + $0xac] sm:$0xf0] }
  0xdb   : > { %v644_v36 = vpack.c.bf16 %v640_v35, %v639_v33  ;;  %1202 = vmatpush.bf16.msrb.mxu0 %v2024_v55  ;;  %v2159_v33 = vld [vmem:[#allocation10 + $0x190] sm:$0xf]  ;;  %v2262_v35 = vld [vmem:[#allocation10 + $0x194] sm:$0xf]  ;;  %v2136_v53 = vor.u32 %v2259_v51, %v2135_v50  ;;  %v2137_v55 = vld [vmem:[#allocation10 + $0x178] sm:$0xf0] }
  0xdc   : > { %v2160_v37 = vor.u32 %v2266_v34, %v2159_v33  ;;  %v2164_v42 = vor.u32 %v2262_v35, %v2161_v38  ;;  %v2140_v58 = vor.u32 %v2255_v54, %v2137_v55  ;;  %v2230_v33 = vld [vmem:[#allocation10 + $0x94] sm:$0xf]  ;;  %v1999_v50 = vld [vmem:[#allocation10 + $0x50] sm:$0xf] }
  0xdd   : > { %1948 = vmatmul.msk.bf16.gmra.mxu2 %vm677_vm2, %v644_v36  ;;  %1343 = vmatpush.bf16.msra.mxu1 %v2172_v13  ;;  %v2033_v35 = vld [vmem:[#allocation10 + $0xb0] sm:$0xf0]  ;;  %v2226_v51 = vld [vmem:[#allocation10 + $0x6c] sm:$0xf0] }
  0xde   : > { %1145 = vmatpush.bf16.msrb.mxu2 %v1984_v62  ;;  %1285 = vmatpush.bf16.msra.mxu3 %v2164_v42  ;;  %v2036_v38 = vor.u32 %v2230_v33, %v2033_v35  ;;  %v2041_v42 = vld [vmem:[#allocation10 + $0xb8] sm:$0xf0]  ;;  %v2000_v55 = vor.u32 %v2226_v51, %v1999_v50 }
  0xdf   : > { %1203 = vmatpush.bf16.msrb.mxu0 %v1992_v3  ;;  %v2097_v3 = vld [vmem:[#allocation10 + $0x130] sm:$0xf0]  ;;  %v2044_v44 = vor.u32 %v2231_v40, %v2041_v42 }
  0xe0   : > { %v2100_v8 = vor.u32 %v2246_v1, %v2097_v3  ;;  %v2214_v3 = vld [vmem:[#allocation10 + $0x14] sm:$0xf] }
  0xe1   : > { %1344 = vmatpush.bf16.msra.mxu1 %v2140_v58  ;;  %v2007_v58 = vld [vmem:[#allocation10 + $0x58] sm:$0xf] }
  0xe2   : > { %1146 = vmatpush.bf16.msrb.mxu2 %v1952_v10  ;;  %1286 = vmatpush.bf16.msra.mxu3 %v2132_v52  ;;  %v2247_v10 = vld [vmem:[#allocation10 + $0x11c] sm:$0xf]  ;;  %v2222_v52 = vld [vmem:[#allocation10 + $0x54] sm:$0xf] }
  0xe3   : > { %1204 = vmatpush.bf16.msrb.mxu0 %v1960_v17  ;;  %v2108_v12 = vor.u32 %v2247_v10, %v2105_v11  ;;  %v2215_v10 = vld [vmem:[#allocation10 + $0x1c] sm:$0xf] }
  0xe5   : > { %1345 = vmatpush.bf16.msra.mxu1 %v2108_v12 }
  0xe6   : > { %1255 = vmatpush.bf16.msra.mxu2 %v2192_v24  ;;  %1287 = vmatpush.bf16.msra.mxu3 %v2100_v8  ;;  %v2243_v24 = vld [vmem:[#allocation10 + $0xf4] sm:$0xf0] }
  0xe7   : > { %1313 = vmatpush.bf16.msra.mxu0 %v2200_v29  ;;  %v2072_v26 = vor.u32 %v2243_v24, %v2071_v23  ;;  %v2031_v29 = vld [vmem:[#allocation10 + $0x90] sm:$0xf]  ;;  %v1975_v8 = vld [vmem:[#allocation10 + $0x18] sm:$0xf] }
  0xe8   : > { %v2032_v34 = vor.u32 %v2234_v32, %v2031_v29  ;;  %v2940_v32 = vld [vmem:[#allocation13] sm:$0xff] }
  0xe9   : > { %1346 = vmatpush.bf16.msra.mxu1 %v2076_v31 }
  0xea   : > { %1256 = vmatpush.bf16.msra.mxu2 %v2160_v37  ;;  %1288 = vmatpush.bf16.msra.mxu3 %v2068_v25  ;;  %v2235_v37 = vld [vmem:[#allocation10 + $0xb4] sm:$0xf0] }
  0xeb   : > { %1314 = vmatpush.bf16.msra.mxu0 %v2168_v43 }
  0xed   : > { %1347 = vmatpush.bf16.msra.mxu1 %v2044_v44 }
  0xee   : > { %1257 = vmatpush.bf16.msra.mxu2 %v2128_v16  ;;  %1289 = vmatpush.bf16.msra.mxu3 %v2036_v38 }
  0xef   : > { %1315 = vmatpush.bf16.msra.mxu0 %v2136_v53 }
  0xf2   : > { %1258 = vmatpush.bf16.msra.mxu2 %v2096_v2  ;;  %v2218_v2 = vld [vmem:[#allocation10 + $0x2c] sm:$0xf0] }
  0xf3   : > { %1316 = vmatpush.bf16.msra.mxu0 %v2104_v9  ;;  %v2219_v9 = vld [vmem:[#allocation10 + $0x34] sm:$0xf0] }
  0xf6   : > { %1259 = vmatpush.bf16.msra.mxu2 %v2064_v21 }
  0xf7   : > { %1317 = vmatpush.bf16.msra.mxu0 %v2072_v26 }
  0xfa   : > { %1260 = vmatpush.bf16.msra.mxu2 %v2032_v34  ;;  %v2944_v34 = vperm.slane %v2940_v32, 2 }
  0xfe   : > { %1261 = vmatpush.bf16.msra.mxu2 %v2000_v55 }
 0x143   : > { %v699_v36 = vpop.f32.mrf.mxu1 }
 0x144   : > { %v723_v56 = vmul.f32 %v2892_v41, %v699_v36  ;;  %v2039_v36 = vld [vmem:[#allocation10 + $0x98] sm:$0xf] }
 0x145   : > { %v2040_v39 = vor.u32 %v2235_v37, %v2039_v36  ;;  %v2948_v36 = vperm.slane %v2940_v32, 3 }
 0x146   : > { %v735_v60 = vadd.f32 %v2895_v57, %v723_v56  ;;  %v2001_v56 = vld [vmem:[#allocation10 + $0x70] sm:$0xf0] }
 0x147   : > { %1318 = vmatpush.bf16.msra.mxu0 %v2040_v39 }
 0x148   : > { %v743_v6 = vmax.f32 %v735_v60, 0.0  ;;  %v2004_v60 = vor.u32 %v2222_v52, %v2001_v56 }
 0x14a   : > { %1290 = vmatpush.bf16.msra.mxu3 %v2004_v60 }
 0x14b   : > { %v701_v59 = vpop.f32.mrf.mxu1 }
 0x14c   : > { %v724_v61 = vmul.f32 %v2892_v41, %v701_v59  ;;  %v2227_v59 = vld [vmem:[#allocation10 + $0x74] sm:$0xf0] }
 0x14e   : > { %v736_v62 = vadd.f32 %v2895_v57, %v724_v61  ;;  %v2008_v61 = vor.u32 %v2227_v59, %v2007_v58 }
 0x150   : > { %v744_v7 = vmax.f32 %v736_v62, 0.0  ;;  %v709_v17 = vpop.f32.mrf.mxu2  ;;  %v2223_v62 = vld [vmem:[#allocation10 + $0x5c] sm:$0xf]  ;;  %1319 = vmatpush.bf16.msra.mxu0 %v2008_v61 }
 0x151   : > { %v727_v53 = vmul.f32 %v2892_v41, %v709_v17  ;;  %v2012_v1 = vor.u32 %v2223_v62, %v2009_v63  ;;  %v1977_v17 = vld [vmem:[#allocation10 + $0x38] sm:$0xf0] }
 0x152   : > { %v2900_v14 = vpack.c.bf16 %v744_v7, %v743_v6  ;;  %v1968_v6 = vor.u32 %v2218_v2, %v1967_v0  ;;  %v1972_v7 = vor.u32 %v2214_v3, %v1969_v4  ;;  %v1980_v18 = vor.u32 %v2215_v10, %v1977_v17 }
 0x153   : > { %v704_v15 = vpop.f32.mrf.mxu1  ;;  %v739_v11 = vadd.f32 %v2895_v57, %v727_v53  ;;  %1348 = vmatpush.bf16.msra.mxu1 %v2012_v1 }
 0x154   : > { %1147 = vmatmul.bf16.vlgmr.msrb.gmra.mxu2 %v2900_v14  ;;  %1176 = vmatmul.bf16.vlgmr.msrb.gmra.mxu3 %v2900_v14  ;;  %v725_v30 = vmul.f32 %v2892_v41, %v704_v15  ;;  %v1976_v15 = vor.u32 %v2219_v9, %v1975_v8 }
 0x155   : > { %1205 = vmatmul.bf16.vlgmr.msrb.gmra.mxu0 %v2900_v14  ;;  %1234 = vmatmul.bf16.vlgmr.msrb.gmra.mxu1 %v2900_v14  ;;  %v747_v19 = vmax.f32 %v739_v11, 0.0 }
 0x156   : > { %v737_v45 = vadd.f32 %v2895_v57, %v725_v30  ;;  %1262 = vmatpush.bf16.msra.mxu2 %v1968_v6  ;;  %1291 = vmatpush.bf16.msra.mxu3 %v1972_v7 }
 0x157   : > { %1320 = vmatpush.bf16.msra.mxu0 %v1976_v15  ;;  %1349 = vmatpush.bf16.msra.mxu1 %v1980_v18 }
 0x158   : > { %v711_v47 = vpop.f32.mrf.mxu2  ;;  %v745_v48 = vmax.f32 %v737_v45, 0.0 }
 0x159   : > { %v728_v54 = vmul.f32 %v2892_v41, %v711_v47 }
 0x15b   : > { %v706_v43 = vpop.f32.mrf.mxu1  ;;  %v740_v12 = vadd.f32 %v2895_v57, %v728_v54 }
 0x15c   : > { %v726_v13 = vmul.f32 %v2892_v41, %v706_v43 }
 0x15d   : > { %v748_v20 = vmax.f32 %v740_v12, 0.0 }
 0x15e   : > { %v738_v46 = vadd.f32 %v2895_v57, %v726_v13 }
 0x15f   : > { %v753_v21 = vpack.c.bf16 %v748_v20, %v747_v19 }
 0x160   : > { %v746_v16 = vmax.f32 %v738_v46, 0.0  ;;  %v714_v5 = vpop.f32.mrf.mxu2 }
 0x161   : > { %v729_v23 = vmul.f32 %v2892_v41, %v714_v5 }
 0x162   : > { %v2910_v49 = vpack.c.bf16 %v746_v16, %v745_v48  ;;  %v2962_v48 = vperm.slane %v2940_v32, 0 }
 0x163   : > { %v741_v25 = vadd.f32 %v2895_v57, %v729_v23 }
 0x164   : > { %1152 = vmatmul.bf16.gmra.mxu2 %v2910_v49  ;;  %1181 = vmatmul.bf16.gmra.mxu3 %v2910_v49 }
 0x165   : > { %1210 = vmatmul.bf16.gmra.mxu0 %v2910_v49  ;;  %1239 = vmatmul.bf16.gmra.mxu1 %v2910_v49  ;;  %v749_v27 = vmax.f32 %v741_v25, 0.0 }
 0x168   : > { %v716_v22 = vpop.f32.mrf.mxu2 }
 0x169   : > { %v730_v24 = vmul.f32 %v2892_v41, %v716_v22  ;;  %v2932_v41 = vld [vmem:[#allocation12] sm:$0xff] }
 0x16a   : > { %v2935_v30 = vperm.slane %v2932_v41, 2  ;;  %v2938_v31 = vperm.slane %v2932_v41, 3  ;;  %v2951_v39 = vperm.slane %v2932_v41, 0  ;;  %v2954_v40 = vperm.slane %v2932_v41, 1 }
 0x16b   : > { %v742_v26 = vadd.f32 %v2895_v57, %v730_v24 }
 0x16d   : > { %v750_v28 = vmax.f32 %v742_v26, 0.0 }
 0x16f   : > { %v754_v29 = vpack.c.bf16 %v750_v28, %v749_v27 }
 0x174   : > { %1157 = vmatmul.bf16.gmra.mxu2 %v753_v21  ;;  %1186 = vmatmul.bf16.gmra.mxu3 %v753_v21 }
 0x175   : > { %1215 = vmatmul.bf16.gmra.mxu0 %v753_v21  ;;  %1244 = vmatmul.bf16.gmra.mxu1 %v753_v21 }
 0x184   : > { %1162 = vmatmul.bf16.gmra.mxu2 %v754_v29  ;;  %1191 = vmatmul.bf16.gmra.mxu3 %v754_v29 }
 0x185   : > { %1220 = vmatmul.bf16.gmra.mxu0 %v754_v29  ;;  %1249 = vmatmul.bf16.gmra.mxu1 %v754_v29 }
 0x194   : > { %1263 = vmatmul.bf16.vlgmr.msra.gmra.mxu2 %v2900_v14  ;;  %1292 = vmatmul.bf16.vlgmr.msra.gmra.mxu3 %v2900_v14 }
 0x195   : > { %1321 = vmatmul.bf16.vlgmr.msra.gmra.mxu0 %v2900_v14  ;;  %1350 = vmatmul.bf16.vlgmr.msra.gmra.mxu1 %v2900_v14 }
 0x1a4   : > { %1268 = vmatmul.bf16.gmra.mxu2 %v2910_v49  ;;  %1297 = vmatmul.bf16.gmra.mxu3 %v2910_v49 }
 0x1a5   : > { %1326 = vmatmul.bf16.gmra.mxu0 %v2910_v49  ;;  %1355 = vmatmul.bf16.gmra.mxu1 %v2910_v49  ;;  %v2966_v49 = vperm.slane %v2940_v32, 1 }
 0x1b4   : > { %1273 = vmatmul.bf16.gmra.mxu2 %v753_v21  ;;  %1302 = vmatmul.bf16.gmra.mxu3 %v753_v21 }
 0x1b5   : > { %1331 = vmatmul.bf16.gmra.mxu0 %v753_v21  ;;  %1360 = vmatmul.bf16.gmra.mxu1 %v753_v21 }
 0x1c4   : > { %1278 = vmatmul.bf16.gmra.mxu2 %v754_v29  ;;  %1307 = vmatmul.bf16.gmra.mxu3 %v754_v29 }
 0x1c5   : > { %1336 = vmatmul.bf16.gmra.mxu0 %v754_v29  ;;  %1365 = vmatmul.bf16.gmra.mxu1 %v754_v29 }
 0x1d2   : > { %v1206_v57 = vpop.f32.mrf.mxu0  ;;  %v1235_v14 = vpop.f32.mrf.mxu1 }
 0x1d3   : > { %v1391_v33 = vmul.f32 %v2935_v30, %v1206_v57  ;;  %v1392_v35 = vmul.f32 %v2938_v31, %v1235_v14 }
 0x1d5   : > { %v1473_v44 = vadd.f32 %v2944_v34, %v1391_v33  ;;  %v1474_v45 = vadd.f32 %v2948_v36, %v1392_v35 }
 0x1d7   : > { %v1148_v37 = vpop.f32.mrf.mxu2  ;;  %v1177_v38 = vpop.f32.mrf.mxu3  ;;  %v1537_v52 = vmax.f32 %v1473_v44, 0.0  ;;  %v1538_v53 = vmax.f32 %v1474_v45, 0.0 }
 0x1d8   : > { %v1389_v47 = vmul.f32 %v2951_v39, %v1148_v37  ;;  %v1390_v16 = vmul.f32 %v2954_v40, %v1177_v38 }
 0x1da   : > { %v1208_v42 = vpop.f32.mrf.mxu0  ;;  %v1237_v43 = vpop.f32.mrf.mxu1  ;;  %v1471_v59 = vadd.f32 %v2962_v48, %v1389_v47  ;;  %v1472_v60 = vadd.f32 %v2966_v49, %v1390_v16 }
 0x1db   : > { %v1399_v13 = vmul.f32 %v2935_v30, %v1208_v42  ;;  %v1400_v46 = vmul.f32 %v2938_v31, %v1237_v43 }
 0x1dc   : > { %v1535_v7 = vmax.f32 %v1471_v59, 0.0  ;;  %v1536_v8 = vmax.f32 %v1472_v60, 0.0 }
 0x1dd   : > { %v1481_v50 = vadd.f32 %v2944_v34, %v1399_v13  ;;  %v1482_v51 = vadd.f32 %v2948_v36, %v1400_v46 }
 0x1df   : > { %v1545_v54 = vmax.f32 %v1481_v50, 0.0  ;;  %v1546_v55 = vmax.f32 %v1482_v51, 0.0  ;;  %v1150_v56 = vpop.f32.mrf.mxu2  ;;  %v1179_v58 = vpop.f32.mrf.mxu3 }
 0x1e0   : > { %v1397_v61 = vmul.f32 %v2951_v39, %v1150_v56  ;;  %v1398_v62 = vmul.f32 %v2954_v40, %v1179_v58 }
 0x1e1   : > { %v1626_v63 = vmax.f32 %v1537_v52, %v1545_v54  ;;  %v1639_v0 = vmax.f32 %v1538_v53, %v1546_v55 }
 0x1e2   : > { %v1479_v1 = vadd.f32 %v2962_v48, %v1397_v61  ;;  %v1480_v2 = vadd.f32 %v2966_v49, %v1398_v62  ;;  %v1211_v3 = vpop.f32.mrf.mxu0  ;;  %v1240_v4 = vpop.f32.mrf.mxu1 }
 0x1e3   : > { %v1407_v5 = vmul.f32 %v2935_v30, %v1211_v3  ;;  %v1408_v6 = vmul.f32 %v2938_v31, %v1240_v4 }
 0x1e4   : > { %v1543_v9 = vmax.f32 %v1479_v1, 0.0  ;;  %v1544_v10 = vmax.f32 %v1480_v2, 0.0 }
 0x1e5   : > { %v1489_v11 = vadd.f32 %v2944_v34, %v1407_v5  ;;  %v1490_v12 = vadd.f32 %v2948_v36, %v1408_v6 }
 0x1e6   : > { %v1600_v15 = vmax.f32 %v1535_v7, %v1543_v9  ;;  %v1613_v17 = vmax.f32 %v1536_v8, %v1544_v10 }
 0x1e7   : > { %v1553_v18 = vmax.f32 %v1489_v11, 0.0  ;;  %v1554_v19 = vmax.f32 %v1490_v12, 0.0  ;;  %v1153_v20 = vpop.f32.mrf.mxu2  ;;  %v1182_v21 = vpop.f32.mrf.mxu3 }
 0x1e8   : > { %v1405_v22 = vmul.f32 %v2951_v39, %v1153_v20  ;;  %v1406_v23 = vmul.f32 %v2954_v40, %v1182_v21 }
 0x1e9   : > { %v1627_v24 = vmax.f32 %v1626_v63, %v1553_v18  ;;  %v1640_v25 = vmax.f32 %v1639_v0, %v1554_v19 }
 0x1ea   : > { %v1487_v26 = vadd.f32 %v2962_v48, %v1405_v22  ;;  %v1488_v27 = vadd.f32 %v2966_v49, %v1406_v23  ;;  %v1213_v28 = vpop.f32.mrf.mxu0  ;;  %v1242_v29 = vpop.f32.mrf.mxu1 }
 0x1eb   : > { %v1415_v57 = vmul.f32 %v2935_v30, %v1213_v28  ;;  %v1416_v14 = vmul.f32 %v2938_v31, %v1242_v29 }
 0x1ec   : > { %v1551_v33 = vmax.f32 %v1487_v26, 0.0  ;;  %v1552_v35 = vmax.f32 %v1488_v27, 0.0 }
 0x1ed   : > { %v1497_v37 = vadd.f32 %v2944_v34, %v1415_v57  ;;  %v1498_v38 = vadd.f32 %v2948_v36, %v1416_v14 }
 0x1ee   : > { %v1601_v42 = vmax.f32 %v1600_v15, %v1551_v33  ;;  %v1614_v43 = vmax.f32 %v1613_v17, %v1552_v35 }
 0x1ef   : > { %v1561_v44 = vmax.f32 %v1497_v37, 0.0  ;;  %v1562_v45 = vmax.f32 %v1498_v38, 0.0  ;;  %v1155_v13 = vpop.f32.mrf.mxu2  ;;  %v1184_v46 = vpop.f32.mrf.mxu3 }
 0x1f0   : > { %v1413_v47 = vmul.f32 %v2951_v39, %v1155_v13  ;;  %v1414_v16 = vmul.f32 %v2954_v40, %v1184_v46 }
 0x1f1   : > { %v1628_v50 = vmax.f32 %v1627_v24, %v1561_v44  ;;  %v1641_v51 = vmax.f32 %v1640_v25, %v1562_v45 }
 0x1f2   : > { %v1495_v52 = vadd.f32 %v2962_v48, %v1413_v47  ;;  %v1496_v53 = vadd.f32 %v2966_v49, %v1414_v16  ;;  %v1216_v54 = vpop.f32.mrf.mxu0  ;;  %v1245_v55 = vpop.f32.mrf.mxu1 }
 0x1f3   : > { %v1423_v56 = vmul.f32 %v2935_v30, %v1216_v54  ;;  %v1424_v58 = vmul.f32 %v2938_v31, %v1245_v55 }
 0x1f4   : > { %v1559_v59 = vmax.f32 %v1495_v52, 0.0  ;;  %v1560_v60 = vmax.f32 %v1496_v53, 0.0 }
 0x1f5   : > { %v1505_v61 = vadd.f32 %v2944_v34, %v1423_v56  ;;  %v1506_v62 = vadd.f32 %v2948_v36, %v1424_v58 }
 0x1f6   : > { %v1602_v63 = vmax.f32 %v1601_v42, %v1559_v59  ;;  %v1615_v0 = vmax.f32 %v1614_v43, %v1560_v60 }
 0x1f7   : > { %v1569_v1 = vmax.f32 %v1505_v61, 0.0  ;;  %v1570_v2 = vmax.f32 %v1506_v62, 0.0  ;;  %v1158_v3 = vpop.f32.mrf.mxu2  ;;  %v1187_v4 = vpop.f32.mrf.mxu3 }
 0x1f8   : > { %v1421_v5 = vmul.f32 %v2951_v39, %v1158_v3  ;;  %v1422_v6 = vmul.f32 %v2954_v40, %v1187_v4 }
 0x1f9   : > { %v1629_v7 = vmax.f32 %v1628_v50, %v1569_v1  ;;  %v1642_v8 = vmax.f32 %v1641_v51, %v1570_v2 }
 0x1fa   : > { %v1503_v9 = vadd.f32 %v2962_v48, %v1421_v5  ;;  %v1504_v10 = vadd.f32 %v2966_v49, %v1422_v6  ;;  %v1218_v11 = vpop.f32.mrf.mxu0  ;;  %v1247_v12 = vpop.f32.mrf.mxu1 }
 0x1fb   : > { %v1431_v15 = vmul.f32 %v2935_v30, %v1218_v11  ;;  %v1432_v17 = vmul.f32 %v2938_v31, %v1247_v12 }
 0x1fc   : > { %v1567_v18 = vmax.f32 %v1503_v9, 0.0  ;;  %v1568_v19 = vmax.f32 %v1504_v10, 0.0 }
 0x1fd   : > { %v1513_v20 = vadd.f32 %v2944_v34, %v1431_v15  ;;  %v1514_v21 = vadd.f32 %v2948_v36, %v1432_v17 }
 0x1fe   : > { %v1603_v22 = vmax.f32 %v1602_v63, %v1567_v18  ;;  %v1616_v23 = vmax.f32 %v1615_v0, %v1568_v19 }
 0x1ff   : > { %v1577_v24 = vmax.f32 %v1513_v20, 0.0  ;;  %v1578_v25 = vmax.f32 %v1514_v21, 0.0  ;;  %v1160_v26 = vpop.f32.mrf.mxu2  ;;  %v1189_v27 = vpop.f32.mrf.mxu3 }
 0x200   : > { %v1429_v28 = vmul.f32 %v2951_v39, %v1160_v26  ;;  %v1430_v29 = vmul.f32 %v2954_v40, %v1189_v27 }
 0x201   : > { %v1630_v57 = vmax.f32 %v1629_v7, %v1577_v24  ;;  %v1643_v14 = vmax.f32 %v1642_v8, %v1578_v25 }
 0x202   : > { %v1511_v33 = vadd.f32 %v2962_v48, %v1429_v28  ;;  %v1512_v35 = vadd.f32 %v2966_v49, %v1430_v29  ;;  %v1221_v37 = vpop.f32.mrf.mxu0  ;;  %v1250_v38 = vpop.f32.mrf.mxu1 }
 0x203   : > { %v1439_v42 = vmul.f32 %v2935_v30, %v1221_v37  ;;  %v1440_v43 = vmul.f32 %v2938_v31, %v1250_v38 }
 0x204   : > { %v1575_v44 = vmax.f32 %v1511_v33, 0.0  ;;  %v1576_v45 = vmax.f32 %v1512_v35, 0.0 }
 0x205   : > { %v1521_v13 = vadd.f32 %v2944_v34, %v1439_v42  ;;  %v1522_v46 = vadd.f32 %v2948_v36, %v1440_v43 }
 0x206   : > { %v1604_v47 = vmax.f32 %v1603_v22, %v1575_v44  ;;  %v1617_v16 = vmax.f32 %v1616_v23, %v1576_v45 }
 0x207   : > { %v1585_v50 = vmax.f32 %v1521_v13, 0.0  ;;  %v1586_v51 = vmax.f32 %v1522_v46, 0.0  ;;  %v1163_v52 = vpop.f32.mrf.mxu2  ;;  %v1192_v53 = vpop.f32.mrf.mxu3 }
 0x208   : > { %v1437_v54 = vmul.f32 %v2951_v39, %v1163_v52  ;;  %v1438_v55 = vmul.f32 %v2954_v40, %v1192_v53 }
 0x209   : > { %v1631_v56 = vmax.f32 %v1630_v57, %v1585_v50  ;;  %v1644_v58 = vmax.f32 %v1643_v14, %v1586_v51 }
 0x20a   : > { %v1519_v59 = vadd.f32 %v2962_v48, %v1437_v54  ;;  %v1520_v60 = vadd.f32 %v2966_v49, %v1438_v55  ;;  %v1223_v61 = vpop.f32.mrf.mxu0  ;;  %v1252_v62 = vpop.f32.mrf.mxu1 }
 0x20b   : > { %v1447_v63 = vmul.f32 %v2935_v30, %v1223_v61  ;;  %v1448_v0 = vmul.f32 %v2938_v31, %v1252_v62 }
 0x20c   : > { %v1583_v1 = vmax.f32 %v1519_v59, 0.0  ;;  %v1584_v2 = vmax.f32 %v1520_v60, 0.0 }
 0x20d   : > { %v1529_v3 = vadd.f32 %v2944_v34, %v1447_v63  ;;  %v1530_v4 = vadd.f32 %v2948_v36, %v1448_v0 }
 0x20e   : > { %v1605_v5 = vmax.f32 %v1604_v47, %v1583_v1  ;;  %v1618_v6 = vmax.f32 %v1617_v16, %v1584_v2 }
 0x20f   : > { %v1593_v7 = vmax.f32 %v1529_v3, 0.0  ;;  %v1594_v8 = vmax.f32 %v1530_v4, 0.0  ;;  %v1165_v9 = vpop.f32.mrf.mxu2  ;;  %v1194_v10 = vpop.f32.mrf.mxu3 }
 0x210   : > { %v1445_v11 = vmul.f32 %v2951_v39, %v1165_v9  ;;  %v1446_v12 = vmul.f32 %v2954_v40, %v1194_v10 }
 0x211   : > { %v1632_v15 = vmax.f32 %v1631_v56, %v1593_v7  ;;  %v1645_v30 = vmax.f32 %v1644_v58, %v1594_v8  ;;  %v3041_v7 = vperm.slane %v2932_v41, 4  ;;  %v3044_v8 = vperm.slane %v2932_v41, 5 }
 0x212   : > { %v1527_v31 = vadd.f32 %v2962_v48, %v1445_v11  ;;  %v1528_v17 = vadd.f32 %v2966_v49, %v1446_v12  ;;  %v3024_v18 = vpop.f32.mrf.mxu0  ;;  %v3026_v34 = vpop.f32.mrf.mxu1 }
 0x213   : > { %v1633_v36 = vrot.slane %v1632_v15, 4  ;;  %v1646_v19 = vrot.slane %v1645_v30, 4 }
 0x214   : > { %v1591_v20 = vmax.f32 %v1527_v31, 0.0  ;;  %v1592_v21 = vmax.f32 %v1528_v17, 0.0  ;;  %v3053_v17 = vperm.slane %v2940_v32, 6 }
 0x215   : > { %v1634_v22 = vmax.f32 %v1632_v15, %v1633_v36  ;;  %v1647_v23 = vmax.f32 %v1645_v30, %v1646_v19  ;;  %v3058_v36 = vperm.slane %v2940_v32, 7 }
 0x216   : > { %v1606_v24 = vmax.f32 %v1605_v5, %v1591_v20  ;;  %v1619_v39 = vmax.f32 %v1618_v6, %v1592_v21  ;;  %v3035_v5 = vperm.slane %v2932_v41, 6  ;;  %v3038_v6 = vperm.slane %v2932_v41, 7 }
 0x217   : > { %v1635_v25 = vrot.slane %v1634_v22, 2  ;;  %v1648_v40 = vrot.slane %v1647_v23, 2  ;;  %v1264_v26 = vpop.f32.mrf.mxu2  ;;  %v1293_v27 = vpop.f32.mrf.mxu3  ;;  %v3062_v20 = vperm.slane %v2940_v32, 4 }
 0x218   : > { %v1607_v28 = vrot.slane %v1606_v24, 4  ;;  %v1620_v48 = vrot.slane %v1619_v39, 4  ;;  %v1395_v31 = vmul.f32 %v3035_v5, %v3024_v18  ;;  %v1396_v41 = vmul.f32 %v3038_v6, %v3026_v34 }
 0x219   : > { %v1636_v29 = vmax.f32 %v1634_v22, %v1635_v25  ;;  %v1649_v49 = vmax.f32 %v1647_v23, %v1648_v40  ;;  %v1393_v19 = vmul.f32 %v3041_v7, %v1264_v26  ;;  %v1394_v21 = vmul.f32 %v3044_v8, %v1293_v27 }
 0x21a   : > { %v1608_v57 = vmax.f32 %v1606_v24, %v1607_v28  ;;  %v1621_v14 = vmax.f32 %v1619_v39, %v1620_v48  ;;  %v1324_v33 = vpop.f32.mrf.mxu0  ;;  %v1353_v35 = vpop.f32.mrf.mxu1  ;;  %v3066_v22 = vperm.slane %v2940_v32, 5  ;;  %v1477_v28 = vadd.f32 %v3053_v17, %v1395_v31 }
 0x21b   : > { %v1637_v37 = vrot.slane %v1636_v29, 1  ;;  %v1650_v38 = vrot.slane %v1649_v49, 1  ;;  %v1403_v9 = vmul.f32 %v3035_v5, %v1324_v33  ;;  %v1404_v10 = vmul.f32 %v3038_v6, %v1353_v35 }
 0x21c   : > { %v1609_v42 = vrot.slane %v1608_v57, 2  ;;  %v1622_v43 = vrot.slane %v1621_v14, 2  ;;  %v1478_v27 = vadd.f32 %v3058_v36, %v1396_v41 }
 0x21d   : > { %v1638_v44 = vmax.f32 %v1636_v29, %v1637_v37  ;;  %v1651_v45 = vmax.f32 %v1649_v49, %v1650_v38  ;;  %v1485_v18 = vadd.f32 %v3053_v17, %v1403_v9  ;;  %v1486_v23 = vadd.f32 %v3058_v36, %v1404_v10 }
 0x21e   : > { %v1610_v13 = vmax.f32 %v1608_v57, %v1609_v42  ;;  %v1623_v46 = vmax.f32 %v1621_v14, %v1622_v43  ;;  %v1475_v29 = vadd.f32 %v3062_v20, %v1393_v19  ;;  %v1476_v49 = vadd.f32 %v3066_v22, %v1394_v21 }
 0x21f   : > { %v1713_v47 = vrot.slane %v1638_v44, 6  ;;  %v1714_v16 = vrot.slane %v1651_v45, 5  ;;  %v1266_v50 = vpop.f32.mrf.mxu2  ;;  %v1295_v51 = vpop.f32.mrf.mxu3  ;;  %v1549_v57 = vmax.f32 %v1485_v18, 0.0  ;;  %v1550_v14 = vmax.f32 %v1486_v23, 0.0 }
 0x220   : > { %v1611_v52 = vrot.slane %v1610_v13, 1  ;;  %v1624_v53 = vrot.slane %v1623_v46, 1  ;;  %v1401_v15 = vmul.f32 %v3041_v7, %v1266_v50  ;;  %v1402_v30 = vmul.f32 %v3044_v8, %v1295_v51 }
 0x221   : > { %v1722_v54 = vsel %vm1721_vm3, %v1713_v47, %v1714_v16  ;;  %v1539_v50 = vmax.f32 %v1475_v29, 0.0  ;;  %v1540_v51 = vmax.f32 %v1476_v49, 0.0 }
 0x222   : > { %v1625_v55 = vmax.f32 %v1623_v46, %v1624_v53  ;;  %v1327_v56 = vpop.f32.mrf.mxu0  ;;  %v1356_v58 = vpop.f32.mrf.mxu1  ;;  %v1612_v59 = vmax.f32 %v1610_v13, %v1611_v52  ;;  %v1483_v39 = vadd.f32 %v3062_v20, %v1401_v15  ;;  %v1484_v25 = vadd.f32 %v3066_v22, %v1402_v30 }
 0x223   : > { %v1411_v24 = vmul.f32 %v3035_v5, %v1327_v56  ;;  %v1412_v34 = vmul.f32 %v3038_v6, %v1356_v58  ;;  %v1541_v13 = vmax.f32 %v1477_v28, 0.0  ;;  %v1542_v46 = vmax.f32 %v1478_v27, 0.0 }
 0x224   : > { %v1712_v60 = vrot.slane %v1625_v55, 7  ;;  %v1547_v42 = vmax.f32 %v1483_v39, 0.0  ;;  %v1548_v43 = vmax.f32 %v1484_v25, 0.0 }
 0x225   : > { %v1493_v33 = vadd.f32 %v3053_v17, %v1411_v24  ;;  %v1494_v35 = vadd.f32 %v3058_v36, %v1412_v34  ;;  %v1691_v55 = vmax.f32 %v1542_v46, %v1550_v14 }
 0x226   : > { %v1720_v61 = vsel %vm1719_vm4, %v1612_v59, %v1712_v60  ;;  %v1652_v59 = vmax.f32 %v1539_v50, %v1547_v42  ;;  %v1665_v60 = vmax.f32 %v1540_v51, %v1548_v43 }
 0x227   : > { %v3028_v62 = vsel %vm1723_vm5, %v1720_v61, %v1722_v54  ;;  %v1269_v63 = vpop.f32.mrf.mxu2  ;;  %v1298_v0 = vpop.f32.mrf.mxu3  ;;  %v1678_v54 = vmax.f32 %v1541_v13, %v1549_v57  ;;  %v1557_v56 = vmax.f32 %v1493_v33, 0.0  ;;  %v1558_v58 = vmax.f32 %v1494_v35, 0.0 }
 0x228   : > { %v1409_v32 = vmul.f32 %v3041_v7, %v1269_v63  ;;  %v1410_v48 = vmul.f32 %v3044_v8, %v1298_v0 }
 0x229   : > { %v1679_v41 = vmax.f32 %v1678_v54, %v1557_v56  ;;  %v1692_v19 = vmax.f32 %v1691_v55, %v1558_v58 }
 0x22a   : > { %v1329_v1 = vpop.f32.mrf.mxu0  ;;  %v1358_v2 = vpop.f32.mrf.mxu1  ;;  %v1491_v47 = vadd.f32 %v3062_v20, %v1409_v32  ;;  %v1492_v16 = vadd.f32 %v3066_v22, %v1410_v48 }
 0x22b   : > { %v1419_v44 = vmul.f32 %v3035_v5, %v1329_v1  ;;  %v1420_v45 = vmul.f32 %v3038_v6, %v1358_v2 }
 0x22c   : > { %v1555_v2 = vmax.f32 %v1491_v47, 0.0  ;;  %v1556_v9 = vmax.f32 %v1492_v16, 0.0 }
 0x22d   : > { %v1501_v61 = vadd.f32 %v3053_v17, %v1419_v44  ;;  %v1502_v63 = vadd.f32 %v3058_v36, %v1420_v45 }
 0x22e   : > { %v1653_v25 = vmax.f32 %v1652_v59, %v1555_v2  ;;  %v1666_v28 = vmax.f32 %v1665_v60, %v1556_v9 }
 0x22f   : > { %v3030_v3 = vpop.f32.mrf.mxu2  ;;  %v3032_v4 = vpop.f32.mrf.mxu3  ;;  %v1566_v34 = vmax.f32 %v1502_v63, 0.0 }
 0x230   : > { %v1417_v10 = vmul.f32 %v3041_v7, %v3030_v3  ;;  %v1565_v3 = vmax.f32 %v1501_v61, 0.0 }
 0x232   : > { %v1332_v11 = vpop.f32.mrf.mxu0  ;;  %v1361_v12 = vpop.f32.mrf.mxu1  ;;  %v1499_v27 = vadd.f32 %v3062_v20, %v1417_v10  ;;  %v1680_v35 = vmax.f32 %v1679_v41, %v1565_v3 }
 0x233   : > { %v1427_v52 = vmul.f32 %v3035_v5, %v1332_v11  ;;  %v1428_v53 = vmul.f32 %v3038_v6, %v1361_v12  ;;  %v1418_v11 = vmul.f32 %v3044_v8, %v3032_v4 }
 0x234   : > { %v1563_v45 = vmax.f32 %v1499_v27, 0.0 }
 0x235   : > { %v1509_v12 = vadd.f32 %v3053_v17, %v1427_v52  ;;  %v1510_v15 = vadd.f32 %v3058_v36, %v1428_v53  ;;  %v1500_v32 = vadd.f32 %v3066_v22, %v1418_v11 }
 0x237   : > { %v1274_v40 = vpop.f32.mrf.mxu2  ;;  %v1303_v26 = vpop.f32.mrf.mxu3  ;;  %v1573_v48 = vmax.f32 %v1509_v12, 0.0  ;;  %v1574_v29 = vmax.f32 %v1510_v15, 0.0  ;;  %v1564_v13 = vmax.f32 %v1500_v32, 0.0 }
 0x238   : > { %v1425_v21 = vmul.f32 %v3041_v7, %v1274_v40  ;;  %v1426_v18 = vmul.f32 %v3044_v8, %v1303_v26 }
 0x239   : > { %v1681_v16 = vmax.f32 %v1680_v35, %v1573_v48  ;;  %v1667_v2 = vmax.f32 %v1666_v28, %v1564_v13 }
 0x23a   : > { %v1334_v37 = vpop.f32.mrf.mxu0  ;;  %v1363_v38 = vpop.f32.mrf.mxu1  ;;  %v1507_v49 = vadd.f32 %v3062_v20, %v1425_v21  ;;  %v1508_v57 = vadd.f32 %v3066_v22, %v1426_v18 }
 0x23b   : > { %v1435_v30 = vmul.f32 %v3035_v5, %v1334_v37  ;;  %v1436_v31 = vmul.f32 %v3038_v6, %v1363_v38  ;;  %v1693_v37 = vmax.f32 %v1692_v19, %v1566_v34 }
 0x23c   : > { %v1571_v53 = vmax.f32 %v1507_v49, 0.0  ;;  %v1572_v54 = vmax.f32 %v1508_v57, 0.0 }
 0x23d   : > { %v1517_v40 = vadd.f32 %v3053_v17, %v1435_v30  ;;  %v1518_v26 = vadd.f32 %v3058_v36, %v1436_v31  ;;  %v1694_v50 = vmax.f32 %v1693_v37, %v1574_v29 }
 0x23e   : > { %v1668_v41 = vmax.f32 %v1667_v2, %v1572_v54 }
 0x23f   : > { %v1276_v0 = vpop.f32.mrf.mxu2  ;;  %v1305_v1 = vpop.f32.mrf.mxu3  ;;  %v1581_v51 = vmax.f32 %v1517_v40, 0.0  ;;  %v1582_v52 = vmax.f32 %v1518_v26, 0.0 }
 0x240   : > { %v1433_v14 = vmul.f32 %v3041_v7, %v1276_v0  ;;  %v1434_v33 = vmul.f32 %v3044_v8, %v1305_v1  ;;  %v1654_v1 = vmax.f32 %v1653_v25, %v1563_v45 }
 0x241   : > { %v1682_v11 = vmax.f32 %v1681_v16, %v1581_v51  ;;  %v1695_v12 = vmax.f32 %v1694_v50, %v1582_v52 }
 0x242   : > { %v1337_v23 = vpop.f32.mrf.mxu0  ;;  %v1366_v24 = vpop.f32.mrf.mxu1  ;;  %v1515_v55 = vadd.f32 %v3062_v20, %v1433_v14  ;;  %v1516_v56 = vadd.f32 %v3066_v22, %v1434_v33  ;;  %v1655_v31 = vmax.f32 %v1654_v1, %v1571_v53 }
 0x243   : > { %v1443_v4 = vmul.f32 %v3035_v5, %v1337_v23  ;;  %v1444_v39 = vmul.f32 %v3038_v6, %v1366_v24 }
 0x244   : > { %v1579_v19 = vmax.f32 %v1515_v55, 0.0  ;;  %v1580_v21 = vmax.f32 %v1516_v56, 0.0 }
 0x245   : > { %v1525_v38 = vadd.f32 %v3053_v17, %v1443_v4  ;;  %v1526_v42 = vadd.f32 %v3058_v36, %v1444_v39 }
 0x246   : > { %v1656_v27 = vmax.f32 %v1655_v31, %v1579_v19 }
 0x247   : > { %v1279_v43 = vpop.f32.mrf.mxu2  ;;  %v1308_v44 = vpop.f32.mrf.mxu3  ;;  %v1589_v60 = vmax.f32 %v1525_v38, 0.0  ;;  %v1590_v61 = vmax.f32 %v1526_v42, 0.0 }
 0x248   : > { %v1441_v46 = vmul.f32 %v3041_v7, %v1279_v43  ;;  %v1442_v47 = vmul.f32 %v3044_v8, %v1308_v44 }
 0x249   : > { %v1683_v18 = vmax.f32 %v1682_v11, %v1589_v60 }
 0x24a   : > { %v1339_v58 = vpop.f32.mrf.mxu0  ;;  %v1368_v59 = vpop.f32.mrf.mxu1  ;;  %v1523_v9 = vadd.f32 %v3062_v20, %v1441_v46  ;;  %v1524_v10 = vadd.f32 %v3066_v22, %v1442_v47 }
 0x24b   : > { %v1451_v63 = vmul.f32 %v3035_v5, %v1339_v58  ;;  %v1452_v0 = vmul.f32 %v3038_v6, %v1368_v59  ;;  %v1696_v5 = vmax.f32 %v1695_v12, %v1590_v61 }
 0x24c   : > { %v1587_v34 = vmax.f32 %v1523_v9, 0.0  ;;  %v1588_v4 = vmax.f32 %v1524_v10, 0.0 }
 0x24d   : > { %v1533_v15 = vadd.f32 %v3053_v17, %v1451_v63  ;;  %v1534_v30 = vadd.f32 %v3058_v36, %v1452_v0  ;;  %v1669_v36 = vmax.f32 %v1668_v41, %v1580_v21 }
 0x24e   : > { %v1657_v26 = vmax.f32 %v1656_v27, %v1587_v34 }
 0x24f   : > { %v1597_v23 = vmax.f32 %v1533_v15, 0.0  ;;  %v1598_v6 = vmax.f32 %v1534_v30, 0.0  ;;  %v1281_v24 = vpop.f32.mrf.mxu2  ;;  %v1310_v3 = vpop.f32.mrf.mxu3  ;;  %v1670_v49 = vmax.f32 %v1669_v36, %v1588_v4 }
 0x250   : > { %v1449_v39 = vmul.f32 %v3041_v7, %v1281_v24  ;;  %v1450_v25 = vmul.f32 %v3044_v8, %v1310_v3 }
 0x251   : > { %v1684_v28 = vmax.f32 %v1683_v18, %v1597_v23  ;;  %v1697_v17 = vmax.f32 %v1696_v5, %v1598_v6 }
 0x252   : > { %v1531_v32 = vadd.f32 %v3062_v20, %v1449_v39  ;;  %v1532_v48 = vadd.f32 %v3066_v22, %v1450_v25 }
 0x253   : > { %v1685_v29 = vrot.slane %v1684_v28, 4  ;;  %v1698_v40 = vrot.slane %v1697_v17, 4 }
 0x254   : > { %v1595_v57 = vmax.f32 %v1531_v32, 0.0  ;;  %v1596_v14 = vmax.f32 %v1532_v48, 0.0 }
 0x255   : > { %v1686_v33 = vmax.f32 %v1684_v28, %v1685_v29  ;;  %v1699_v35 = vmax.f32 %v1697_v17, %v1698_v40 }
 0x256   : > { %v1658_v37 = vmax.f32 %v1657_v26, %v1595_v57  ;;  %v1671_v7 = vmax.f32 %v1670_v49, %v1596_v14 }
 0x257   : > { %v1687_v38 = vrot.slane %v1686_v33, 2  ;;  %v1700_v8 = vrot.slane %v1699_v35, 2 }
 0x258   : > { %v1659_v42 = vrot.slane %v1658_v37, 4  ;;  %v1672_v43 = vrot.slane %v1671_v7, 4 }
 0x259   : > { %v1688_v44 = vmax.f32 %v1686_v33, %v1687_v38  ;;  %v1701_v45 = vmax.f32 %v1699_v35, %v1700_v8 }
 0x25a   : > { %v1660_v13 = vmax.f32 %v1658_v37, %v1659_v42  ;;  %v1673_v20 = vmax.f32 %v1671_v7, %v1672_v43 }
 0x25b   : > { %v1689_v46 = vrot.slane %v1688_v44, 1  ;;  %v1702_v22 = vrot.slane %v1701_v45, 1 }
 0x25c   : > { %v1661_v47 = vrot.slane %v1660_v13, 2  ;;  %v1674_v16 = vrot.slane %v1673_v20, 2 }
 0x25d   : > { %v1690_v50 = vmax.f32 %v1688_v44, %v1689_v46  ;;  %v1703_v51 = vmax.f32 %v1701_v45, %v1702_v22 }
 0x25e   : > { %v1662_v52 = vmax.f32 %v1660_v13, %v1661_v47  ;;  %v1675_v53 = vmax.f32 %v1673_v20, %v1674_v16 }
 0x25f   : > { %v1717_v56 = vrot.slane %v1690_v50, 2  ;;  %v1718_v58 = vrot.slane %v1703_v51, 1 }
 0x260   : > { %v1663_v54 = vrot.slane %v1662_v52, 1  ;;  %v1676_v55 = vrot.slane %v1675_v53, 1 }
 0x261   : > { %v1728_v0 = vsel %vm1727_vm6, %v1717_v56, %v1718_v58 }
 0x262   : > { %v1664_v59 = vmax.f32 %v1662_v52, %v1663_v54  ;;  %v1677_v60 = vmax.f32 %v1675_v53, %v1676_v55 }
 0x264   : > { %v1715_v61 = vrot.slane %v1664_v59, 4  ;;  %v1716_v63 = vrot.slane %v1677_v60, 3 }
 0x266   : > { %v1726_v1 = vsel %vm1725_vm7, %v1715_v61, %v1716_v63 }
 0x267   : > { %v1730_v2 = vsel %vm1729_vm8, %v1726_v1, %v1728_v0 }
 0x268   : > { %v1732_v9 = vsel %vm1731_vm9, %v3028_v62, %v1730_v2 }
 0x269   : > { %1735 = vst [vmem:[%s523_s28] sm:$0xff] %v1732_v9 }
 0x26a PF: > { %s25_s15 = sadd.s32 1, %s2677_s15   ;;  %s3158_s13 = smov %s2673_s14 }
 0x26b   : > { %p22_p8 = scmp.ge.s32.totalorder %s25_s15, 4   ;;  %s3159_s14 = smov %s3161_s24 }
 0x26d   :  { %24 = sbr.rel (!%p22_p8) target bundleno = 9 (0x9), region = 130 }
 0x272   :  { %1755 = vsyncpa [#allocation3], 1 }
 0x273   :  { %1757 = vsyncpa [#allocation3 + $0x1], 1 }
 0x274   :  { %1758 = vsyncpa [#allocation5], 1 }
 0x275   :  { %1759 = vsyncpa [#allocation8], 1 }
 0x276   :  { %1760 = vsyncpa [#allocation11], 1 }
 0x277   :  { %1761 = vsyncpa [#allocation14], 1 }

// kernel: _lambda_.6
= control target key start
LH: loop header
LB: loop body
LE: loop exit
PB: predicated region body
PF: predicated region fallthrough
CT: control target
= control target key end

     0   :  { %s3070_s0 = inlined_call_operand.vmem [shape: f32[2,64,3], index: 0, kind: input, shape index: {}]   ;;  %s3071_s1 = inlined_call_operand.vmem [shape: f32[2,3,64], index: 1, kind: input, shape index: {}]   ;;  %s3072_s2 = inlined_call_operand.hbm [shape: f32[1,64], index: 2, kind: input, shape index: {}]   ;;  %s3073_s3 = inlined_call_operand.hbm [shape: f32[1,64], index: 3, kind: input, shape index: {}]   ;;  %s3074_s4 = inlined_call_operand.hbm [shape: bf16[64,128], index: 4, kind: input, shape index: {}]   ;;  %s3075_s5 = inlined_call_operand.hbm [shape: f32[1,128], index: 5, kind: input, shape index: {}]   ;;  %s3076_s6 = inlined_call_operand.hbm [shape: f32[1,128], index: 6, kind: input, shape index: {}]   ;;  %s3077_s7 = inlined_call_operand.hbm [shape: bf16[128,1024], index: 7, kind: input, shape index: {}]   ;;  %s3078_s8 = inlined_call_operand.hbm [shape: f32[1,1024], index: 8, kind: input, shape index: {}]   ;;  %s3079_s9 = inlined_call_operand.hbm [shape: f32[1,1024], index: 9, kind: input, shape index: {}]   ;;  %s3080_s10 = inlined_call_operand.vmem [shape: f32[2,1,1024], index: 10, kind: output, shape index: {}]  }
   0x1   :  { %3081 = sst [smem:[#allocation20_spill]] %s3072_s2 }
   0x2   :  { %3082 = sst [smem:[#allocation21_spill]] %s3073_s3 }
   0x3   :  { %15 = vsyncpa [#allocation3], 0 }
   0x4   :  { %16 = vsyncpa [#allocation5], 0 }
   0x5   :  { %17 = vsyncpa [#allocation8], 0 }
   0x6   :  { %18 = vsyncpa [#allocation11], 0 }
   0x7   :  { %19 = vsyncpa [#allocation14], 0  ;;  %s2682_s13 = smov 0   ;;  %s2684_s14 = smov 0  }
   0x8   :  { %s2686_s15 = smov 0  }
   0x9 LB: > { %s3083_s3 = sld [smem:[#allocation21_spill]]  ;;  %s1831_s19 = sadd.s32 4294967295, %s2613_s15   ;;  %s2613_s15 = sphi %s2686_s15, %s25_s15   ;;  %s2609_s14 = sphi %s2684_s14, %s3089_s14   ;;  %s2605_s13 = sphi %s2682_s13, %s3088_s13  }
   0xa   : > { %p1833_p0 = scmp.ge.s32.totalorder %s2613_s15, 1  ;;  %p290_p1 = scmp.lt.s32.totalorder %s2613_s15, 3 }
   0xb   : > { %p2703_p2 = scmp.eq.s32.totalorder %s1831_s19, 0  ;;  %s2615_s22 = smov [#allocation4]  }
   0xc   : > { %p2707_p3 = pnand %p1833_p0, %p290_p1  ;;  %s316_s23 = sshll.u32 %s2615_s22, 4  ;;  %s317_s23 = int_to_ptr.vmem [resolvable:$true] %s316_s23 }
   0xd   : > { %s340_s26 = sshll.u32 %s3075_s5, 4  ;;  %s363_s29 = sshll.u32 %s3077_s7, 4  ;;  %s341_s26 = int_to_ptr.hbm [resolvable:$true] %s340_s26  ;;  %s364_s29 = int_to_ptr.hbm [resolvable:$true] %s363_s29 }
   0xe   : > { %p2249_p4 = pneg %p2707_p3  ;;  %s2616_s11 = smov [#allocation7]  }
   0xf   : > { %s314_s18 = sshll.u32 %s3083_s3, 4  ;;  %s342_s12 = sshll.u32 %s2616_s11, 4  ;;  %s315_s18 = int_to_ptr.hbm [resolvable:$true] %s314_s18  ;;  %s343_s12 = int_to_ptr.vmem [resolvable:$true] %s342_s12 }
  0x10   : > { %p2721_p5 = pnand %p2703_p2, %p2249_p4  ;;  %s2617_s16 = smov [#allocation10]  }
  0x11   : > { %s365_s17 = sshll.u32 %s2617_s16, 4  ;;  %s2618_s19 = smov 512   ;;  %s366_s17 = int_to_ptr.vmem [resolvable:$true] %s365_s17 }
  0x12   : > { %2255 = dma.hbm_to_vmem [thread:$0]  (!%p2721_p5), %s315_s18, 16, %s317_s23, [#allocation5]  }
  0x13   : > { %2261 = dma.hbm_to_vmem [thread:$0]  (!%p2721_p5), %s341_s26, 16, %s343_s12, [#allocation8]  }
  0x14   : > { %s2619_s22 = smov 32   ;;  %s37_s24 = sadd.s32 1, %s2609_s14 }
  0x15   : > { %2267 = dma.hbm_to_vmem [thread:$0]  (!%p2721_p5), %s364_s29, 8192, %s366_s17, [#allocation11], %s2618_s19, %s2618_s19, %s2619_s22  }
  0x16   : > { %s3087_s2 = sld [smem:[#allocation20_spill]]  ;;  %p39_p6 = scmp.ge.s32.totalorder %s37_s24, 2 }
  0x17   : > { %s325_s23 = sshll.u32 %s3074_s4, 4  ;;  %s2620_s26 = smov [#allocation2]   ;;  %s326_s23 = int_to_ptr.hbm [resolvable:$true] %s325_s23 }
  0x18   : > { %s3091_s24 = smov (%p39_p6, %s37_s24), 0  ;;  %s304_s12 = sshll.u32 %s2620_s26, 4  ;;  %s305_s12 = int_to_ptr.vmem [resolvable:$true] %s304_s12 }
  0x19   : > { %s2621_s29 = smov [#allocation6]   ;;  %s2622_s17 = smov 64  }
  0x1a   : > { %s327_s16 = sshll.u32 %s2621_s29, 4  ;;  %s2623_s19 = smov 4   ;;  %s328_s16 = int_to_ptr.vmem [resolvable:$true] %s327_s16 }
  0x1b   : > { %2258 = dma.hbm_to_vmem [thread:$0]  (!%p2721_p5), %s326_s23, 512, %s328_s16, [#allocation5], %s2622_s17, %s2622_s17, %s2623_s19  }
  0x1c   : > { %s302_s28 = sshll.u32 %s3087_s2, 4  ;;  %s352_s27 = sshll.u32 %s3076_s6, 4  ;;  %s303_s28 = int_to_ptr.hbm [resolvable:$true] %s302_s28  ;;  %s353_s27 = int_to_ptr.hbm [resolvable:$true] %s352_s27 }
  0x1d   : > { %2252 = dma.hbm_to_vmem [thread:$0]  (!%p2721_p5), %s303_s28, 16, %s305_s12, [#allocation3]  }
  0x1e   : > { %s2624_s11 = smov [#allocation9]   ;;  %s378_s28 = sshll.u32 %s3078_s8, 4  ;;  %s379_s28 = int_to_ptr.hbm [resolvable:$true] %s378_s28 }
  0x1f   : > { %s354_s18 = sshll.u32 %s2624_s11, 4  ;;  %s2625_s12 = smov [#allocation12]   ;;  %s355_s18 = int_to_ptr.vmem [resolvable:$true] %s354_s18 }
  0x20   : > { %2264 = dma.hbm_to_vmem [thread:$0]  (!%p2721_p5), %s353_s27, 16, %s355_s18, [#allocation8]  }
  0x21   : > { %s380_s29 = sshll.u32 %s2625_s12, 4  ;;  %s390_s16 = sshll.u32 %s3079_s9, 4  ;;  %s381_s29 = int_to_ptr.vmem [resolvable:$true] %s380_s29  ;;  %s391_s16 = int_to_ptr.hbm [resolvable:$true] %s390_s16 }
  0x22   : > { %2270 = dma.hbm_to_vmem [thread:$0]  (!%p2721_p5), %s379_s28, 128, %s381_s29, [#allocation11]  }
  0x23   : > { %s2626_s17 = smov [#allocation13]   ;;  %425 = sbr.rel (%p2707_p3) target bundleno = 616 (0x268), region = 60 }
  0x24   : > { %s392_s19 = sshll.u32 %s2626_s17, 4  ;;  %s393_s19 = int_to_ptr.vmem [resolvable:$true] %s392_s19 }
  0x25   : > { %2273 = dma.hbm_to_vmem [thread:$0]  (!%p2721_p5), %s391_s16, 128, %s393_s19, [#allocation14]  }
  0x28   : > { %2584 = dma.done.wait (%p2703_p2), [#allocation3], 16  }
  0x29   : > { %2586 = vsyncadd (%p2703_p2), [#allocation3], 4294967280 }
  0x2a   : > { %2588 = dma.done.wait (%p2703_p2), [#allocation5], 528  }
  0x2b   : > { %2590 = vsyncadd (%p2703_p2), [#allocation5], 4294966768 }
  0x2c   : > { %2592 = dma.done.wait (%p2703_p2), [#allocation8], 32  }
  0x2d   : > { %2594 = vsyncadd (%p2703_p2), [#allocation8], 4294967264 }
  0x2e   : > { %2596 = dma.done.wait (%p2703_p2), [#allocation11], 8320  }
  0x2f   : > { %2598 = vsyncadd (%p2703_p2), [#allocation11], 4294958976 }
  0x30   : > { %2600 = dma.done.wait (%p2703_p2), [#allocation14], 128  }
  0x31   : > { %2602 = vsyncadd (%p2703_p2), [#allocation14], 4294967168  ;;  %p507_p7 = scmp.lt.s32.totalorder %s2605_s13, 1  ;;  %vm564_vm0 = vcmask 1042432   ;;  %vm539_vm1 = vcmask 23552   ;;  %v2147_v9 = vld [vmem:[#allocation6 + $0x18] sm:$0xff] }
  0x32   : > { %694 = vmatpush.bf16.msra.mxu1 %v2147_v9  ;;  %2213 = vmatpush.bf16.msra.mxu2 %v2147_v9  ;;  %v2146_v10 = vld [vmem:[#allocation6 + $0x10] sm:$0xff]  ;;  %v2145_v11 = vld [vmem:[#allocation6 + $0x8] sm:$0xff]  ;;  %v2144_v12 = vld [vmem:[#allocation6] sm:$0xff]  ;;  %vm677_vm2 = vcmask 523264   ;;  %vm1657_vm3 = vcmask 1042434   ;;  %vm1655_vm4 = vcmask 1040384  }
  0x33   : > { %s3093_s13 = smov (!%p507_p7, %s2605_s13), 1  ;;  %v2801_v13 = vld [vmem:[#allocation2] ss:$0 sm:$0xff]  ;;  %v2804_v16 = vld [vmem:[#allocation4] ss:$0 sm:$0xff]  ;;  %vm1659_vm5 = vcmask 1041408  }
  0x34   : > { %s2143_s2 = sshll.u32 %s3093_s13, 6  ;;  %s1854_s3 = sshll.u32 %s3093_s13, 2  ;;  %v2111_v20 = vld [vmem:[#allocation10 + $0x1c0] sm:$0xf]  ;;  %v2204_v22 = vld [vmem:[#allocation10 + $0x1c4] sm:$0xf] }
  0x35   : > { %s514_s22 = scalar_lea.vmem %s3070_s0, %s2143_s2  ;;  %s519_s11 = scalar_lea.vmem %s3071_s1, %s1854_s3  ;;  %v2208_v21 = vld [vmem:[#allocation10 + $0x1dc] sm:$0xf0]  ;;  %v2113_v25 = vld [vmem:[#allocation10 + $0x1e0] sm:$0xf0]  ;;  %v2119_v26 = vld [vmem:[#allocation10 + $0x1c8] sm:$0xf] }
  0x36   : > { %v538_v0 = vld [vmem:[%s519_s11] sm:$0x7]  ;;  %v531_v3 = vld [vmem:[%s514_s22 + $0x8] sm:$0xff]  ;;  %v532_v5 = vld [vmem:[%s514_s22 + $0x10] sm:$0xff]  ;;  %695 = vmatpush.bf16.msra.mxu1 %v2146_v10  ;;  %2214 = vmatpush.bf16.msra.mxu2 %v2146_v10  ;;  %v2112_v24 = vor.u32 %v2208_v21, %v2111_v20  ;;  %v2116_v30 = vor.u32 %v2204_v22, %v2113_v25  ;;  %vm1663_vm6 = vcmask 1046534   ;;  %vm1661_vm7 = vcmask 1044484  }
  0x37   : > { %v530_v1 = vld [vmem:[%s514_s22] sm:$0xff]  ;;  %1856 = vmatpush.msk.msra.mxu0 %vm564_vm0, %v538_v0  ;;  %2212 = vmatpush.msk.msra.mxu3 %vm564_vm0, %v538_v0  ;;  %v535_v4 = vld [vmem:[%s514_s22 + $0x28] sm:$0xff]  ;;  %v536_v6 = vld [vmem:[%s514_s22 + $0x30] sm:$0xff]  ;;  %vm1665_vm8 = vcmask 1045508   ;;  %s1855_s20 = sshll.u32 %s3093_s13, 3  ;;  %vm1667_vm9 = vcmask 1043456  }
  0x38   : > { %v534_v2 = vld [vmem:[%s514_s22 + $0x20] sm:$0xff]  ;;  %1857 = vmatmul.msk.f32.vlgmr.msra.gmra.mxu0 %vm539_vm1, %v530_v1  ;;  %v533_v7 = vld [vmem:[%s514_s22 + $0x18] sm:$0xff]  ;;  %v2209_v27 = vld [vmem:[#allocation10 + $0x1e4] sm:$0xf0]  ;;  %s523_s28 = scalar_lea.vmem %s3080_s10, %s1855_s20 }
  0x39   : > { %1861 = vmatmul.msk.f32.vlgmr.msra.gmra.mxu3 %vm539_vm1, %v534_v2  ;;  %v537_v8 = vld [vmem:[%s514_s22 + $0x38] sm:$0xff]  ;;  %v2120_v31 = vor.u32 %v2209_v27, %v2119_v26  ;;  %v2205_v32 = vld [vmem:[#allocation10 + $0x1cc] sm:$0xf]  ;;  %v2079_v34 = vld [vmem:[#allocation10 + $0x180] sm:$0xf] }
  0x3a   : > { %696 = vmatpush.bf16.msra.mxu1 %v2145_v11  ;;  %2215 = vmatpush.bf16.msra.mxu2 %v2145_v11  ;;  %v2121_v33 = vld [vmem:[#allocation10 + $0x1e8] sm:$0xf0]  ;;  %v2200_v36 = vld [vmem:[#allocation10 + $0x19c] sm:$0xf0]  ;;  %v2196_v37 = vld [vmem:[#allocation10 + $0x184] sm:$0xf] }
  0x3b   : > { %v2124_v35 = vor.u32 %v2205_v32, %v2121_v33  ;;  %v2081_v38 = vld [vmem:[#allocation10 + $0x1a0] sm:$0xf0]  ;;  %1168 = vmatpush.bf16.msrb.mxu3 %v2116_v30  ;;  %1197 = vmatpush.bf16.msrb.mxu0 %v2120_v31  ;;  %v2080_v41 = vor.u32 %v2200_v36, %v2079_v34  ;;  %v2087_v43 = vld [vmem:[#allocation10 + $0x188] sm:$0xf]  ;;  %v2197_v46 = vld [vmem:[#allocation10 + $0x18c] sm:$0xf] }
  0x3c   : > { %v2084_v42 = vor.u32 %v2196_v37, %v2081_v38  ;;  %v2201_v44 = vld [vmem:[#allocation10 + $0x1a4] sm:$0xf0]  ;;  %v2089_v47 = vld [vmem:[#allocation10 + $0x1a8] sm:$0xf0]  ;;  %v2047_v48 = vld [vmem:[#allocation10 + $0x140] sm:$0xf] }
  0x3d   : > { %v2088_v45 = vor.u32 %v2201_v44, %v2087_v43  ;;  %v2092_v51 = vor.u32 %v2197_v46, %v2089_v47  ;;  %v2192_v52 = vld [vmem:[#allocation10 + $0x15c] sm:$0xf0]  ;;  %v2188_v53 = vld [vmem:[#allocation10 + $0x144] sm:$0xf]  ;;  %v2055_v57 = vld [vmem:[#allocation10 + $0x148] sm:$0xf] }
  0x3e   : > { %697 = vmatpush.bf16.msra.mxu1 %v2144_v12  ;;  %2216 = vmatpush.bf16.msra.mxu2 %v2144_v12  ;;  %v2048_v55 = vor.u32 %v2192_v52, %v2047_v48  ;;  %v2049_v56 = vld [vmem:[#allocation10 + $0x160] sm:$0xf0]  ;;  %v2193_v58 = vld [vmem:[#allocation10 + $0x164] sm:$0xf0]  ;;  %v2189_v62 = vld [vmem:[#allocation10 + $0x14c] sm:$0xf] }
  0x3f   : > { %1169 = vmatpush.bf16.msrb.mxu3 %v2084_v42  ;;  %1198 = vmatpush.bf16.msrb.mxu0 %v2088_v45  ;;  %v2052_v61 = vor.u32 %v2188_v53, %v2049_v56  ;;  %v2057_v63 = vld [vmem:[#allocation10 + $0x168] sm:$0xf0]  ;;  %v2015_v0 = vld [vmem:[#allocation10 + $0x100] sm:$0xf]  ;;  %v2056_v2 = vor.u32 %v2193_v58, %v2055_v57  ;;  %v2185_v9 = vld [vmem:[#allocation10 + $0x124] sm:$0xf0] }
  0x40   : > { %1858 = vmatmul.msk.f32.gmra.mxu0 %vm539_vm1, %v531_v3  ;;  %v2060_v3 = vor.u32 %v2189_v62, %v2057_v63  ;;  %v2181_v10 = vld [vmem:[#allocation10 + $0x10c] sm:$0xf]  ;;  %v1983_v37 = vld [vmem:[#allocation10 + $0xc0] sm:$0xf]  ;;  %v1991_v42 = vld [vmem:[#allocation10 + $0xc8] sm:$0xf] }
  0x41   : > { %1862 = vmatmul.msk.f32.gmra.mxu3 %vm539_vm1, %v535_v4  ;;  %v2184_v4 = vld [vmem:[#allocation10 + $0x11c] sm:$0xf0]  ;;  %v2025_v12 = vld [vmem:[#allocation10 + $0x128] sm:$0xf0]  ;;  %v2177_v44 = vld [vmem:[#allocation10 + $0xe4] sm:$0xf0] }
  0x42   : > { %1139 = vmatpush.bf16.msrb.mxu2 %v2112_v24  ;;  %1226 = vmatpush.bf16.msrb.mxu1 %v2124_v35  ;;  %v2016_v11 = vor.u32 %v2184_v4, %v2015_v0  ;;  %v2176_v38 = vld [vmem:[#allocation10 + $0xdc] sm:$0xf0]  ;;  %v2173_v45 = vld [vmem:[#allocation10 + $0xcc] sm:$0xf]  ;;  %v1959_v52 = vld [vmem:[#allocation10 + $0x88] sm:$0xf] }
  0x43   : > { %1170 = vmatpush.bf16.msrb.mxu3 %v2052_v61  ;;  %1199 = vmatpush.bf16.msrb.mxu0 %v2056_v2  ;;  %v1993_v46 = vld [vmem:[#allocation10 + $0xe8] sm:$0xf0]  ;;  %v1951_v48 = vld [vmem:[#allocation10 + $0x80] sm:$0xf]  ;;  %v2169_v53 = vld [vmem:[#allocation10 + $0xa4] sm:$0xf0] }
  0x44   : > { %v1996_v47 = vor.u32 %v2173_v45, %v1993_v46  ;;  %v2165_v56 = vld [vmem:[#allocation10 + $0x8c] sm:$0xf]  ;;  %v2156_v61 = vld [vmem:[#allocation10 + $0x44] sm:$0xf]  ;;  %v1927_v0 = vld [vmem:[#allocation10 + $0x48] sm:$0xf] }
  0x45   : > { %v1961_v57 = vld [vmem:[#allocation10 + $0xa8] sm:$0xf0]  ;;  %v1921_v63 = vld [vmem:[#allocation10 + $0x60] sm:$0xf0]  ;;  %v2105_v45 = vld [vmem:[#allocation10 + $0x1b8] sm:$0xf0] }
  0x46   : > { %1140 = vmatpush.bf16.msrb.mxu2 %v2080_v41  ;;  %1227 = vmatpush.bf16.msrb.mxu1 %v2092_v51  ;;  %v1985_v41 = vld [vmem:[#allocation10 + $0xe0] sm:$0xf0]  ;;  %v1964_v58 = vor.u32 %v2165_v56, %v1961_v57  ;;  %v1924_v2 = vor.u32 %v2156_v61, %v1921_v63  ;;  %v2157_v4 = vld [vmem:[#allocation10 + $0x4c] sm:$0xf]  ;;  %v2063_v46 = vld [vmem:[#allocation10 + $0x150] sm:$0xf] }
  0x47   : > { %v1953_v51 = vld [vmem:[#allocation10 + $0xa0] sm:$0xf0]  ;;  %v2831_v57 = vld [vmem:[#allocation9] ss:$0 sm:$0xff]  ;;  %v2031_v63 = vld [vmem:[#allocation10 + $0x110] sm:$0xf] }
  0x48   : > { %1859 = vmatmul.msk.f32.gmra.mxu0 %vm539_vm1, %v532_v5  ;;  %v2180_v5 = vld [vmem:[#allocation10 + $0x104] sm:$0xf] }
  0x49   : > { %1863 = vmatmul.msk.f32.gmra.mxu3 %vm539_vm1, %v536_v6  ;;  %v2017_v6 = vld [vmem:[#allocation10 + $0x120] sm:$0xf0] }
  0x4a   : > { %1141 = vmatpush.bf16.msrb.mxu2 %v2048_v55  ;;  %1228 = vmatpush.bf16.msrb.mxu1 %v2060_v3  ;;  %v1960_v55 = vor.u32 %v2169_v53, %v1959_v52 }
  0x4e   : > { %1142 = vmatpush.bf16.msrb.mxu2 %v2016_v11  ;;  %v1889_v11 = vld [vmem:[#allocation10 + $0x20] sm:$0xf0] }
  0x50   : > { %1860 = vmatmul.msk.f32.gmra.mxu0 %vm539_vm1, %v533_v7 }
  0x51   : > { %1864 = vmatmul.msk.f32.gmra.mxu3 %vm539_vm1, %v537_v8  ;;  %v2023_v8 = vld [vmem:[#allocation10 + $0x108] sm:$0xf] }
  0xb5   : > { %v585_v14 = vpop.f32.mrf.mxu0 }
  0xb6   : > { %v613_v15 = vmul.f32 %v2801_v13, %v585_v14 }
  0xb8   : > { %v625_v18 = vadd.f32 %v2804_v16, %v613_v15  ;;  %v2020_v15 = vor.u32 %v2180_v5, %v2017_v6  ;;  %v1929_v5 = vld [vmem:[#allocation10 + $0x68] sm:$0xf0] }
  0xb9   : > { %v1932_v6 = vor.u32 %v2157_v4, %v1929_v5  ;;  %v2039_v4 = vld [vmem:[#allocation10 + $0x118] sm:$0xf] }
  0xba   : > { %v633_v39 = vmax.f32 %v625_v18, 0.0  ;;  %v2028_v18 = vor.u32 %v2181_v10, %v2025_v12  ;;  %1171 = vmatpush.bf16.msrb.mxu3 %v2020_v15  ;;  %v1895_v12 = vld [vmem:[#allocation10 + $0x8] sm:$0xf]  ;;  %v2187_v5 = vld [vmem:[#allocation10 + $0x134] sm:$0xf0] }
  0xbc   : > { %v597_v17 = vpop.f32.mrf.mxu3  ;;  %1229 = vmatpush.bf16.msrb.mxu1 %v2028_v18  ;;  %v2149_v18 = vld [vmem:[#allocation10 + $0xc] sm:$0xf] }
  0xbd   : > { %v617_v19 = vmul.f32 %v2801_v13, %v597_v17  ;;  %v588_v23 = vpop.f32.mrf.mxu0  ;;  %v2024_v17 = vor.u32 %v2185_v9, %v2023_v8  ;;  %v2152_v8 = vld [vmem:[#allocation10 + $0x1c] sm:$0xf0]  ;;  %v2148_v9 = vld [vmem:[#allocation10 + $0x4] sm:$0xf] }
  0xbe   : > { %v614_v28 = vmul.f32 %v2801_v13, %v588_v23  ;;  %v1892_v15 = vor.u32 %v2148_v9, %v1889_v11  ;;  %v2040_v9 = vor.u32 %v2187_v5, %v2039_v4  ;;  %v2041_v11 = vld [vmem:[#allocation10 + $0x138] sm:$0xf0]  ;;  %v1905_v4 = vld [vmem:[#allocation10 + $0x30] sm:$0xf0] }
  0xbf   : > { %v2810_v29 = vadd.f32 %v2804_v16, %v617_v19  ;;  %1200 = vmatpush.bf16.msrb.mxu0 %v2024_v17 }
  0xc0   : > { %v626_v40 = vadd.f32 %v2804_v16, %v614_v28  ;;  %1230 = vmatpush.bf16.msrb.mxu1 %v1996_v47  ;;  %v2194_v47 = vld [vmem:[#allocation10 + $0x16c] sm:$0xf0] }
  0xc1   : > { %v637_v50 = vmax.f32 %v2810_v29, 0.0 }
  0xc2   : > { %v634_v49 = vmax.f32 %v626_v40, 0.0  ;;  %v2172_v40 = vld [vmem:[#allocation10 + $0xc4] sm:$0xf] }
  0xc3   : > { %v1988_v43 = vor.u32 %v2172_v40, %v1985_v41  ;;  %v2203_v40 = vld [vmem:[#allocation10 + $0x1b4] sm:$0xf0]  ;;  %v2828_v41 = vld [vmem:[#allocation7] ss:$0 sm:$0xff] }
  0xc4   : > { %v600_v54 = vpop.f32.mrf.mxu3  ;;  %v641_v59 = vpack.c.bf16 %v634_v49, %v633_v39  ;;  %v1984_v39 = vor.u32 %v2176_v38, %v1983_v37  ;;  %v2164_v49 = vld [vmem:[#allocation10 + $0x84] sm:$0xf]  ;;  %1231 = vmatpush.bf16.msrb.mxu1 %v1964_v58  ;;  %v2097_v38 = vld [vmem:[#allocation10 + $0x1b0] sm:$0xf0] }
  0xc5   : > { %v618_v60 = vmul.f32 %v2801_v13, %v600_v54  ;;  %v591_v1 = vpop.f32.mrf.mxu0  ;;  %1172 = vmatpush.bf16.msrb.mxu3 %v1988_v43  ;;  %v1956_v54 = vor.u32 %v2164_v49, %v1953_v51  ;;  %v2065_v49 = vld [vmem:[#allocation10 + $0x170] sm:$0xf0]  ;;  %v2195_v51 = vld [vmem:[#allocation10 + $0x174] sm:$0xf0] }
  0xc6   : > { %1881 = vmatmul.msk.bf16.vlgmr.msra.gmra.mxu1 %vm677_vm2, %v641_v59  ;;  %v615_v19 = vmul.f32 %v2801_v13, %v591_v1  ;;  %1143 = vmatpush.bf16.msrb.mxu2 %v1984_v39  ;;  %v1919_v59 = vld [vmem:[#allocation10 + $0x40] sm:$0xf]  ;;  %v2161_v1 = vld [vmem:[#allocation10 + $0x64] sm:$0xf0]  ;;  %v2103_v39 = vld [vmem:[#allocation10 + $0x198] sm:$0xf] }
  0xc7   : > { %v630_v7 = vadd.f32 %v2804_v16, %v618_v60  ;;  %v2160_v60 = vld [vmem:[#allocation10 + $0x5c] sm:$0xf0]  ;;  %v1928_v3 = vor.u32 %v2161_v1, %v1927_v0  ;;  %v2104_v43 = vor.u32 %v2203_v40, %v2103_v39  ;;  %v2186_v0 = vld [vmem:[#allocation10 + $0x12c] sm:$0xf0]  ;;  %v2182_v1 = vld [vmem:[#allocation10 + $0x114] sm:$0xf] }
  0xc8   : > { %v627_v23 = vadd.f32 %v2804_v16, %v615_v19  ;;  %v1920_v62 = vor.u32 %v2160_v60, %v1919_v59  ;;  %1232 = vmatpush.bf16.msrb.mxu1 %v1932_v6  ;;  %v1897_v19 = vld [vmem:[#allocation10 + $0x28] sm:$0xf0]  ;;  %v2167_v40 = vld [vmem:[#allocation10 + $0x9c] sm:$0xf] }
  0xc9   : > { %v638_v14 = vmax.f32 %v630_v7, 0.0  ;;  %1173 = vmatpush.bf16.msrb.mxu3 %v1956_v54  ;;  %v1887_v7 = vld [vmem:[#allocation10] sm:$0xf]  ;;  %v2191_v54 = vld [vmem:[#allocation10 + $0x15c] sm:$0xf] }
  0xca   : > { %v635_v27 = vmax.f32 %v627_v23, 0.0  ;;  %v1888_v10 = vor.u32 %v2152_v8, %v1887_v7  ;;  %v2206_v23 = vld [vmem:[#allocation10 + $0x1d4] sm:$0xf] }
  0xcb   : > { %v643_v20 = vpack.c.bf16 %v638_v14, %v637_v50  ;;  %v2153_v14 = vld [vmem:[#allocation10 + $0x24] sm:$0xf0] }
  0xcc   : > { %v603_v21 = vpop.f32.mrf.mxu3  ;;  %v1896_v17 = vor.u32 %v2153_v14, %v1895_v12 }
  0xcd   : > { %1883 = vmatmul.msk.bf16.vlgmr.msra.gmra.mxu2 %vm677_vm2, %v643_v20  ;;  %v594_v22 = vpop.f32.mrf.mxu0  ;;  %v619_v25 = vmul.f32 %v2801_v13, %v603_v21  ;;  %1174 = vmatpush.bf16.msrb.mxu3 %v1924_v2  ;;  %v1900_v20 = vor.u32 %v2149_v18, %v1897_v19  ;;  %v2127_v21 = vld [vmem:[#allocation10 + $0x1d0] sm:$0xf]  ;;  %v2032_v2 = vor.u32 %v2186_v0, %v2031_v63  ;;  %v1945_v63 = vld [vmem:[#allocation10 + $0x78] sm:$0xf0] }
  0xce   : > { %v616_v24 = vmul.f32 %v2801_v13, %v594_v22  ;;  %v2210_v22 = vld [vmem:[#allocation10 + $0x1ec] sm:$0xf0] }
  0xcf   : > { %v631_v29 = vadd.f32 %v2804_v16, %v619_v25  ;;  %1233 = vmatpush.bf16.msrb.mxu1 %v1900_v20  ;;  %v2129_v25 = vld [vmem:[#allocation10 + $0x1f0] sm:$0xf0]  ;;  %v1999_v18 = vld [vmem:[#allocation10 + $0xd0] sm:$0xf] }
  0xd0   : > { %v628_v26 = vadd.f32 %v2804_v16, %v616_v24  ;;  %v2128_v24 = vor.u32 %v2210_v22, %v2127_v21  ;;  %v2178_v19 = vld [vmem:[#allocation10 + $0xec] sm:$0xf0]  ;;  %v2174_v20 = vld [vmem:[#allocation10 + $0xd4] sm:$0xf] }
  0xd1   : > { %v639_v33 = vmax.f32 %v631_v29, 0.0  ;;  %1175 = vmatpush.bf16.msrb.mxu3 %v1892_v15  ;;  %v2000_v21 = vor.u32 %v2178_v19, %v1999_v18  ;;  %v2001_v22 = vld [vmem:[#allocation10 + $0xf0] sm:$0xf0]  ;;  %v1903_v0 = vld [vmem:[#allocation10 + $0x10] sm:$0xf] }
  0xd2   : > { %v636_v28 = vmax.f32 %v628_v26, 0.0  ;;  %v2135_v26 = vld [vmem:[#allocation10 + $0x1d8] sm:$0xf] }
  0xd4   : > { %v606_v30 = vpop.f32.mrf.mxu3  ;;  %v642_v31 = vpack.c.bf16 %v636_v28, %v635_v27  ;;  %v2211_v27 = vld [vmem:[#allocation10 + $0x1f4] sm:$0xf0]  ;;  %v2132_v28 = vor.u32 %v2206_v23, %v2129_v25  ;;  %v2004_v25 = vor.u32 %v2174_v20, %v2001_v22 }
  0xd5   : > { %v620_v32 = vmul.f32 %v2801_v13, %v606_v30  ;;  %v1992_v13 = vor.u32 %v2177_v44, %v1991_v42  ;;  %v2136_v29 = vor.u32 %v2211_v27, %v2135_v26  ;;  %v2207_v30 = vld [vmem:[#allocation10 + $0x1dc] sm:$0xf]  ;;  %v2007_v23 = vld [vmem:[#allocation10 + $0xd8] sm:$0xf] }
  0xd6   : > { %1882 = vmatmul.msk.bf16.gmra.mxu1 %vm677_vm2, %v642_v31  ;;  %v2137_v31 = vld [vmem:[#allocation10 + $0x1f8] sm:$0xf0]  ;;  %1284 = vmatpush.bf16.msra.mxu3 %v2132_v28 }
  0xd7   : > { %v632_v34 = vadd.f32 %v2804_v16, %v620_v32  ;;  %v2168_v16 = vld [vmem:[#allocation10 + $0x9c] sm:$0xf0]  ;;  %1201 = vmatpush.bf16.msrb.mxu0 %v1992_v13  ;;  %v2140_v32 = vor.u32 %v2207_v30, %v2137_v31  ;;  %v2199_v44 = vld [vmem:[#allocation10 + $0x19c] sm:$0xf] }
  0xd8   : > { %v1952_v50 = vor.u32 %v2168_v16, %v1951_v48  ;;  %v2108_v13 = vor.u32 %v2199_v44, %v2105_v45  ;;  %v2190_v48 = vld [vmem:[#allocation10 + $0x154] sm:$0xf]  ;;  %v2064_v16 = vor.u32 %v2194_v47, %v2063_v46  ;;  %v2175_v27 = vld [vmem:[#allocation10 + $0xdc] sm:$0xf] }
  0xd9   : > { %v640_v35 = vmax.f32 %v632_v34, 0.0  ;;  %1342 = vmatpush.bf16.msra.mxu1 %v2140_v32  ;;  %v2202_v34 = vld [vmem:[#allocation10 + $0x1ac] sm:$0xf0]  ;;  %v2068_v52 = vor.u32 %v2190_v48, %v2065_v49  ;;  %v2009_v28 = vld [vmem:[#allocation10 + $0xf8] sm:$0xf0] }
  0xda   : > { %1144 = vmatpush.bf16.msrb.mxu2 %v1952_v50  ;;  %v2071_v50 = vld [vmem:[#allocation10 + $0x158] sm:$0xf]  ;;  %v2012_v31 = vor.u32 %v2175_v27, %v2009_v28  ;;  %v2170_v32 = vld [vmem:[#allocation10 + $0xac] sm:$0xf0] }
  0xdb   : > { %v644_v36 = vpack.c.bf16 %v640_v35, %v639_v33  ;;  %1202 = vmatpush.bf16.msrb.mxu0 %v1960_v55  ;;  %v2095_v33 = vld [vmem:[#allocation10 + $0x190] sm:$0xf]  ;;  %v2198_v35 = vld [vmem:[#allocation10 + $0x194] sm:$0xf]  ;;  %v2072_v53 = vor.u32 %v2195_v51, %v2071_v50  ;;  %v2073_v55 = vld [vmem:[#allocation10 + $0x178] sm:$0xf0] }
  0xdc   : > { %v2096_v37 = vor.u32 %v2202_v34, %v2095_v33  ;;  %v2100_v42 = vor.u32 %v2198_v35, %v2097_v38  ;;  %v2076_v58 = vor.u32 %v2191_v54, %v2073_v55  ;;  %v2166_v33 = vld [vmem:[#allocation10 + $0x94] sm:$0xf]  ;;  %v1935_v50 = vld [vmem:[#allocation10 + $0x50] sm:$0xf] }
  0xdd   : > { %1884 = vmatmul.msk.bf16.gmra.mxu2 %vm677_vm2, %v644_v36  ;;  %1343 = vmatpush.bf16.msra.mxu1 %v2108_v13  ;;  %v1969_v35 = vld [vmem:[#allocation10 + $0xb0] sm:$0xf0]  ;;  %v2162_v51 = vld [vmem:[#allocation10 + $0x6c] sm:$0xf0] }
  0xde   : > { %1145 = vmatpush.bf16.msrb.mxu2 %v1920_v62  ;;  %1285 = vmatpush.bf16.msra.mxu3 %v2100_v42  ;;  %v1972_v38 = vor.u32 %v2166_v33, %v1969_v35  ;;  %v1977_v42 = vld [vmem:[#allocation10 + $0xb8] sm:$0xf0]  ;;  %v1936_v55 = vor.u32 %v2162_v51, %v1935_v50 }
  0xdf   : > { %1203 = vmatpush.bf16.msrb.mxu0 %v1928_v3  ;;  %v2033_v3 = vld [vmem:[#allocation10 + $0x130] sm:$0xf0]  ;;  %v1980_v44 = vor.u32 %v2167_v40, %v1977_v42 }
  0xe0   : > { %v2036_v8 = vor.u32 %v2182_v1, %v2033_v3  ;;  %v2150_v3 = vld [vmem:[#allocation10 + $0x14] sm:$0xf] }
  0xe1   : > { %1344 = vmatpush.bf16.msra.mxu1 %v2076_v58  ;;  %v1943_v58 = vld [vmem:[#allocation10 + $0x58] sm:$0xf] }
  0xe2   : > { %1146 = vmatpush.bf16.msrb.mxu2 %v1888_v10  ;;  %1286 = vmatpush.bf16.msra.mxu3 %v2068_v52  ;;  %v2183_v10 = vld [vmem:[#allocation10 + $0x11c] sm:$0xf]  ;;  %v2158_v52 = vld [vmem:[#allocation10 + $0x54] sm:$0xf] }
  0xe3   : > { %1204 = vmatpush.bf16.msrb.mxu0 %v1896_v17  ;;  %v2044_v12 = vor.u32 %v2183_v10, %v2041_v11  ;;  %v2151_v10 = vld [vmem:[#allocation10 + $0x1c] sm:$0xf] }
  0xe5   : > { %1345 = vmatpush.bf16.msra.mxu1 %v2044_v12 }
  0xe6   : > { %1255 = vmatpush.bf16.msra.mxu2 %v2128_v24  ;;  %1287 = vmatpush.bf16.msra.mxu3 %v2036_v8  ;;  %v2179_v24 = vld [vmem:[#allocation10 + $0xf4] sm:$0xf0] }
  0xe7   : > { %1313 = vmatpush.bf16.msra.mxu0 %v2136_v29  ;;  %v2008_v26 = vor.u32 %v2179_v24, %v2007_v23  ;;  %v1967_v29 = vld [vmem:[#allocation10 + $0x90] sm:$0xf]  ;;  %v1911_v8 = vld [vmem:[#allocation10 + $0x18] sm:$0xf] }
  0xe8   : > { %v1968_v34 = vor.u32 %v2170_v32, %v1967_v29  ;;  %v2876_v32 = vld [vmem:[#allocation13] sm:$0xff] }
  0xe9   : > { %1346 = vmatpush.bf16.msra.mxu1 %v2012_v31  ;;  %v2904_v51 = vperm.slane %v2876_v32, 1 }
  0xea   : > { %1256 = vmatpush.bf16.msra.mxu2 %v2096_v37  ;;  %1288 = vmatpush.bf16.msra.mxu3 %v2004_v25  ;;  %v2171_v37 = vld [vmem:[#allocation10 + $0xb4] sm:$0xf0] }
  0xeb   : > { %1314 = vmatpush.bf16.msra.mxu0 %v2104_v43 }
  0xed   : > { %1347 = vmatpush.bf16.msra.mxu1 %v1980_v44 }
  0xee   : > { %1257 = vmatpush.bf16.msra.mxu2 %v2064_v16  ;;  %1289 = vmatpush.bf16.msra.mxu3 %v1972_v38  ;;  %v2884_v38 = vperm.slane %v2876_v32, 3 }
  0xef   : > { %1315 = vmatpush.bf16.msra.mxu0 %v2072_v53 }
  0xf2   : > { %1258 = vmatpush.bf16.msra.mxu2 %v2032_v2  ;;  %v2154_v2 = vld [vmem:[#allocation10 + $0x2c] sm:$0xf0] }
  0xf3   : > { %1316 = vmatpush.bf16.msra.mxu0 %v2040_v9  ;;  %v2155_v9 = vld [vmem:[#allocation10 + $0x34] sm:$0xf0] }
  0xf6   : > { %1259 = vmatpush.bf16.msra.mxu2 %v2000_v21 }
  0xf7   : > { %1317 = vmatpush.bf16.msra.mxu0 %v2008_v26 }
  0xfa   : > { %1260 = vmatpush.bf16.msra.mxu2 %v1968_v34 }
  0xfe   : > { %1261 = vmatpush.bf16.msra.mxu2 %v1936_v55 }
 0x143   : > { %v699_v36 = vpop.f32.mrf.mxu1 }
 0x144   : > { %v723_v56 = vmul.f32 %v2828_v41, %v699_v36  ;;  %v1975_v36 = vld [vmem:[#allocation10 + $0x98] sm:$0xf] }
 0x145   : > { %v1976_v39 = vor.u32 %v2171_v37, %v1975_v36  ;;  %v2880_v36 = vperm.slane %v2876_v32, 2 }
 0x146   : > { %v735_v60 = vadd.f32 %v2831_v57, %v723_v56  ;;  %v1937_v56 = vld [vmem:[#allocation10 + $0x70] sm:$0xf0] }
 0x147   : > { %1318 = vmatpush.bf16.msra.mxu0 %v1976_v39 }
 0x148   : > { %v743_v6 = vmax.f32 %v735_v60, 0.0  ;;  %v1940_v60 = vor.u32 %v2158_v52, %v1937_v56 }
 0x14a   : > { %1290 = vmatpush.bf16.msra.mxu3 %v1940_v60 }
 0x14b   : > { %v701_v59 = vpop.f32.mrf.mxu1 }
 0x14c   : > { %v724_v61 = vmul.f32 %v2828_v41, %v701_v59  ;;  %v2163_v59 = vld [vmem:[#allocation10 + $0x74] sm:$0xf0] }
 0x14e   : > { %v736_v62 = vadd.f32 %v2831_v57, %v724_v61  ;;  %v1944_v61 = vor.u32 %v2163_v59, %v1943_v58 }
 0x150   : > { %v744_v7 = vmax.f32 %v736_v62, 0.0  ;;  %v709_v17 = vpop.f32.mrf.mxu2  ;;  %v2159_v62 = vld [vmem:[#allocation10 + $0x5c] sm:$0xf]  ;;  %1319 = vmatpush.bf16.msra.mxu0 %v1944_v61 }
 0x151   : > { %v727_v53 = vmul.f32 %v2828_v41, %v709_v17  ;;  %v1948_v1 = vor.u32 %v2159_v62, %v1945_v63  ;;  %v1913_v17 = vld [vmem:[#allocation10 + $0x38] sm:$0xf0] }
 0x152   : > { %v2836_v14 = vpack.c.bf16 %v744_v7, %v743_v6  ;;  %v1904_v6 = vor.u32 %v2154_v2, %v1903_v0  ;;  %v1908_v7 = vor.u32 %v2150_v3, %v1905_v4  ;;  %v1916_v18 = vor.u32 %v2151_v10, %v1913_v17 }
 0x153   : > { %v704_v15 = vpop.f32.mrf.mxu1  ;;  %v739_v11 = vadd.f32 %v2831_v57, %v727_v53  ;;  %1348 = vmatpush.bf16.msra.mxu1 %v1948_v1 }
 0x154   : > { %1147 = vmatmul.bf16.vlgmr.msrb.gmra.mxu2 %v2836_v14  ;;  %1176 = vmatmul.bf16.vlgmr.msrb.gmra.mxu3 %v2836_v14  ;;  %v725_v30 = vmul.f32 %v2828_v41, %v704_v15  ;;  %v1912_v15 = vor.u32 %v2155_v9, %v1911_v8 }
 0x155   : > { %1205 = vmatmul.bf16.vlgmr.msrb.gmra.mxu0 %v2836_v14  ;;  %1234 = vmatmul.bf16.vlgmr.msrb.gmra.mxu1 %v2836_v14  ;;  %v747_v19 = vmax.f32 %v739_v11, 0.0 }
 0x156   : > { %v737_v45 = vadd.f32 %v2831_v57, %v725_v30  ;;  %1262 = vmatpush.bf16.msra.mxu2 %v1904_v6  ;;  %1291 = vmatpush.bf16.msra.mxu3 %v1908_v7 }
 0x157   : > { %1320 = vmatpush.bf16.msra.mxu0 %v1912_v15  ;;  %1349 = vmatpush.bf16.msra.mxu1 %v1916_v18 }
 0x158   : > { %v711_v47 = vpop.f32.mrf.mxu2  ;;  %v745_v48 = vmax.f32 %v737_v45, 0.0 }
 0x159   : > { %v728_v54 = vmul.f32 %v2828_v41, %v711_v47 }
 0x15b   : > { %v706_v43 = vpop.f32.mrf.mxu1  ;;  %v740_v12 = vadd.f32 %v2831_v57, %v728_v54 }
 0x15c   : > { %v726_v13 = vmul.f32 %v2828_v41, %v706_v43 }
 0x15d   : > { %v748_v20 = vmax.f32 %v740_v12, 0.0 }
 0x15e   : > { %v738_v46 = vadd.f32 %v2831_v57, %v726_v13 }
 0x15f   : > { %v753_v21 = vpack.c.bf16 %v748_v20, %v747_v19 }
 0x160   : > { %v746_v16 = vmax.f32 %v738_v46, 0.0  ;;  %v714_v5 = vpop.f32.mrf.mxu2 }
 0x161   : > { %v729_v23 = vmul.f32 %v2828_v41, %v714_v5 }
 0x162   : > { %v2846_v49 = vpack.c.bf16 %v746_v16, %v745_v48 }
 0x163   : > { %v741_v25 = vadd.f32 %v2831_v57, %v729_v23 }
 0x164   : > { %1152 = vmatmul.bf16.gmra.mxu2 %v2846_v49  ;;  %1181 = vmatmul.bf16.gmra.mxu3 %v2846_v49 }
 0x165   : > { %1210 = vmatmul.bf16.gmra.mxu0 %v2846_v49  ;;  %1239 = vmatmul.bf16.gmra.mxu1 %v2846_v49  ;;  %v749_v27 = vmax.f32 %v741_v25, 0.0 }
 0x168   : > { %v716_v22 = vpop.f32.mrf.mxu2 }
 0x169   : > { %v730_v24 = vmul.f32 %v2828_v41, %v716_v22 }
 0x16b   : > { %v742_v26 = vadd.f32 %v2831_v57, %v730_v24  ;;  %v2868_v57 = vld [vmem:[#allocation12] sm:$0xff] }
 0x16c   : > { %v2871_v30 = vperm.slane %v2868_v57, 2  ;;  %v2874_v31 = vperm.slane %v2868_v57, 3  ;;  %v2887_v39 = vperm.slane %v2868_v57, 0  ;;  %v2890_v40 = vperm.slane %v2868_v57, 1 }
 0x16d   : > { %v750_v28 = vmax.f32 %v742_v26, 0.0 }
 0x16f   : > { %v754_v29 = vpack.c.bf16 %v750_v28, %v749_v27 }
 0x174   : > { %1157 = vmatmul.bf16.gmra.mxu2 %v753_v21  ;;  %1186 = vmatmul.bf16.gmra.mxu3 %v753_v21 }
 0x175   : > { %1215 = vmatmul.bf16.gmra.mxu0 %v753_v21  ;;  %1244 = vmatmul.bf16.gmra.mxu1 %v753_v21 }
 0x184   : > { %1162 = vmatmul.bf16.gmra.mxu2 %v754_v29  ;;  %1191 = vmatmul.bf16.gmra.mxu3 %v754_v29 }
 0x185   : > { %1220 = vmatmul.bf16.gmra.mxu0 %v754_v29  ;;  %1249 = vmatmul.bf16.gmra.mxu1 %v754_v29 }
 0x194   : > { %1263 = vmatmul.bf16.vlgmr.msra.gmra.mxu2 %v2836_v14  ;;  %1292 = vmatmul.bf16.vlgmr.msra.gmra.mxu3 %v2836_v14 }
 0x195   : > { %1321 = vmatmul.bf16.vlgmr.msra.gmra.mxu0 %v2836_v14  ;;  %1350 = vmatmul.bf16.vlgmr.msra.gmra.mxu1 %v2836_v14 }
 0x1a4   : > { %1268 = vmatmul.bf16.gmra.mxu2 %v2846_v49  ;;  %1297 = vmatmul.bf16.gmra.mxu3 %v2846_v49 }
 0x1a5   : > { %1326 = vmatmul.bf16.gmra.mxu0 %v2846_v49  ;;  %1355 = vmatmul.bf16.gmra.mxu1 %v2846_v49  ;;  %v2900_v49 = vperm.slane %v2876_v32, 0 }
 0x1b4   : > { %1273 = vmatmul.bf16.gmra.mxu2 %v753_v21  ;;  %1302 = vmatmul.bf16.gmra.mxu3 %v753_v21 }
 0x1b5   : > { %1331 = vmatmul.bf16.gmra.mxu0 %v753_v21  ;;  %1360 = vmatmul.bf16.gmra.mxu1 %v753_v21 }
 0x1c4   : > { %1278 = vmatmul.bf16.gmra.mxu2 %v754_v29  ;;  %1307 = vmatmul.bf16.gmra.mxu3 %v754_v29 }
 0x1c5   : > { %1336 = vmatmul.bf16.gmra.mxu0 %v754_v29  ;;  %1365 = vmatmul.bf16.gmra.mxu1 %v754_v29 }
 0x1d2   : > { %v1206_v41 = vpop.f32.mrf.mxu0  ;;  %v1235_v14 = vpop.f32.mrf.mxu1 }
 0x1d3   : > { %v1391_v35 = vmul.f32 %v2871_v30, %v1206_v41  ;;  %v1392_v37 = vmul.f32 %v2874_v31, %v1235_v14 }
 0x1d5   : > { %v1473_v13 = vadd.f32 %v2880_v36, %v1391_v35  ;;  %v1474_v46 = vadd.f32 %v2884_v38, %v1392_v37 }
 0x1d7   : > { %v1148_v33 = vpop.f32.mrf.mxu2  ;;  %v1177_v34 = vpop.f32.mrf.mxu3 }
 0x1d8   : > { %v1389_v16 = vmul.f32 %v2887_v39, %v1148_v33  ;;  %v1390_v50 = vmul.f32 %v2890_v40, %v1177_v34 }
 0x1da   : > { %v1208_v42 = vpop.f32.mrf.mxu0  ;;  %v1237_v43 = vpop.f32.mrf.mxu1  ;;  %v1471_v59 = vadd.f32 %v2900_v49, %v1389_v16  ;;  %v1472_v60 = vadd.f32 %v2904_v51, %v1390_v50 }
 0x1db   : > { %v1399_v44 = vmul.f32 %v2871_v30, %v1208_v42  ;;  %v1400_v45 = vmul.f32 %v2874_v31, %v1237_v43 }
 0x1dd   : > { %v1481_v47 = vadd.f32 %v2880_v36, %v1399_v44  ;;  %v1482_v48 = vadd.f32 %v2884_v38, %v1400_v45 }
 0x1df   : > { %v1562_v52 = vmax.f32 %v1473_v13, %v1481_v47  ;;  %v1575_v53 = vmax.f32 %v1474_v46, %v1482_v48  ;;  %v1150_v54 = vpop.f32.mrf.mxu2  ;;  %v1179_v55 = vpop.f32.mrf.mxu3 }
 0x1e0   : > { %v1397_v56 = vmul.f32 %v2887_v39, %v1150_v54  ;;  %v1398_v58 = vmul.f32 %v2890_v40, %v1179_v55 }
 0x1e2   : > { %v1479_v61 = vadd.f32 %v2900_v49, %v1397_v56  ;;  %v1480_v62 = vadd.f32 %v2904_v51, %v1398_v58  ;;  %v1211_v63 = vpop.f32.mrf.mxu0  ;;  %v1240_v0 = vpop.f32.mrf.mxu1 }
 0x1e3   : > { %v1407_v1 = vmul.f32 %v2871_v30, %v1211_v63  ;;  %v1408_v2 = vmul.f32 %v2874_v31, %v1240_v0 }
 0x1e4   : > { %v1536_v3 = vmax.f32 %v1471_v59, %v1479_v61  ;;  %v1549_v4 = vmax.f32 %v1472_v60, %v1480_v62 }
 0x1e5   : > { %v1489_v5 = vadd.f32 %v2880_v36, %v1407_v1  ;;  %v1490_v6 = vadd.f32 %v2884_v38, %v1408_v2 }
 0x1e7   : > { %v1563_v7 = vmax.f32 %v1562_v52, %v1489_v5  ;;  %v1576_v8 = vmax.f32 %v1575_v53, %v1490_v6  ;;  %v1153_v9 = vpop.f32.mrf.mxu2  ;;  %v1182_v10 = vpop.f32.mrf.mxu3 }
 0x1e8   : > { %v1405_v11 = vmul.f32 %v2887_v39, %v1153_v9  ;;  %v1406_v12 = vmul.f32 %v2890_v40, %v1182_v10 }
 0x1ea   : > { %v1487_v15 = vadd.f32 %v2900_v49, %v1405_v11  ;;  %v1488_v17 = vadd.f32 %v2904_v51, %v1406_v12  ;;  %v1213_v18 = vpop.f32.mrf.mxu0  ;;  %v1242_v19 = vpop.f32.mrf.mxu1 }
 0x1eb   : > { %v1415_v20 = vmul.f32 %v2871_v30, %v1213_v18  ;;  %v1416_v21 = vmul.f32 %v2874_v31, %v1242_v19 }
 0x1ec   : > { %v1537_v22 = vmax.f32 %v1536_v3, %v1487_v15  ;;  %v1550_v23 = vmax.f32 %v1549_v4, %v1488_v17 }
 0x1ed   : > { %v1497_v24 = vadd.f32 %v2880_v36, %v1415_v20  ;;  %v1498_v25 = vadd.f32 %v2884_v38, %v1416_v21 }
 0x1ef   : > { %v1564_v26 = vmax.f32 %v1563_v7, %v1497_v24  ;;  %v1577_v27 = vmax.f32 %v1576_v8, %v1498_v25  ;;  %v1155_v28 = vpop.f32.mrf.mxu2  ;;  %v1184_v29 = vpop.f32.mrf.mxu3 }
 0x1f0   : > { %v1413_v41 = vmul.f32 %v2887_v39, %v1155_v28  ;;  %v1414_v14 = vmul.f32 %v2890_v40, %v1184_v29 }
 0x1f2   : > { %v1495_v33 = vadd.f32 %v2900_v49, %v1413_v41  ;;  %v1496_v34 = vadd.f32 %v2904_v51, %v1414_v14  ;;  %v1216_v35 = vpop.f32.mrf.mxu0  ;;  %v1245_v37 = vpop.f32.mrf.mxu1 }
 0x1f3   : > { %v1423_v42 = vmul.f32 %v2871_v30, %v1216_v35  ;;  %v1424_v43 = vmul.f32 %v2874_v31, %v1245_v37 }
 0x1f4   : > { %v1538_v44 = vmax.f32 %v1537_v22, %v1495_v33  ;;  %v1551_v45 = vmax.f32 %v1550_v23, %v1496_v34 }
 0x1f5   : > { %v1505_v13 = vadd.f32 %v2880_v36, %v1423_v42  ;;  %v1506_v46 = vadd.f32 %v2884_v38, %v1424_v43 }
 0x1f7   : > { %v1565_v47 = vmax.f32 %v1564_v26, %v1505_v13  ;;  %v1578_v48 = vmax.f32 %v1577_v27, %v1506_v46  ;;  %v1158_v16 = vpop.f32.mrf.mxu2  ;;  %v1187_v50 = vpop.f32.mrf.mxu3 }
 0x1f8   : > { %v1421_v52 = vmul.f32 %v2887_v39, %v1158_v16  ;;  %v1422_v53 = vmul.f32 %v2890_v40, %v1187_v50 }
 0x1fa   : > { %v1503_v54 = vadd.f32 %v2900_v49, %v1421_v52  ;;  %v1504_v55 = vadd.f32 %v2904_v51, %v1422_v53  ;;  %v1218_v56 = vpop.f32.mrf.mxu0  ;;  %v1247_v58 = vpop.f32.mrf.mxu1 }
 0x1fb   : > { %v1431_v59 = vmul.f32 %v2871_v30, %v1218_v56  ;;  %v1432_v60 = vmul.f32 %v2874_v31, %v1247_v58 }
 0x1fc   : > { %v1539_v61 = vmax.f32 %v1538_v44, %v1503_v54  ;;  %v1552_v62 = vmax.f32 %v1551_v45, %v1504_v55 }
 0x1fd   : > { %v1513_v63 = vadd.f32 %v2880_v36, %v1431_v59  ;;  %v1514_v0 = vadd.f32 %v2884_v38, %v1432_v60 }
 0x1ff   : > { %v1566_v1 = vmax.f32 %v1565_v47, %v1513_v63  ;;  %v1579_v2 = vmax.f32 %v1578_v48, %v1514_v0  ;;  %v1160_v3 = vpop.f32.mrf.mxu2  ;;  %v1189_v4 = vpop.f32.mrf.mxu3 }
 0x200   : > { %v1429_v5 = vmul.f32 %v2887_v39, %v1160_v3  ;;  %v1430_v6 = vmul.f32 %v2890_v40, %v1189_v4 }
 0x202   : > { %v1511_v7 = vadd.f32 %v2900_v49, %v1429_v5  ;;  %v1512_v8 = vadd.f32 %v2904_v51, %v1430_v6  ;;  %v1221_v9 = vpop.f32.mrf.mxu0  ;;  %v1250_v10 = vpop.f32.mrf.mxu1 }
 0x203   : > { %v1439_v11 = vmul.f32 %v2871_v30, %v1221_v9  ;;  %v1440_v12 = vmul.f32 %v2874_v31, %v1250_v10 }
 0x204   : > { %v1540_v15 = vmax.f32 %v1539_v61, %v1511_v7  ;;  %v1553_v17 = vmax.f32 %v1552_v62, %v1512_v8 }
 0x205   : > { %v1521_v18 = vadd.f32 %v2880_v36, %v1439_v11  ;;  %v1522_v19 = vadd.f32 %v2884_v38, %v1440_v12 }
 0x207   : > { %v1567_v20 = vmax.f32 %v1566_v1, %v1521_v18  ;;  %v1580_v21 = vmax.f32 %v1579_v2, %v1522_v19  ;;  %v1163_v22 = vpop.f32.mrf.mxu2  ;;  %v1192_v23 = vpop.f32.mrf.mxu3 }
 0x208   : > { %v1437_v24 = vmul.f32 %v2887_v39, %v1163_v22  ;;  %v1438_v25 = vmul.f32 %v2890_v40, %v1192_v23 }
 0x20a   : > { %v1519_v26 = vadd.f32 %v2900_v49, %v1437_v24  ;;  %v1520_v27 = vadd.f32 %v2904_v51, %v1438_v25  ;;  %v1223_v28 = vpop.f32.mrf.mxu0  ;;  %v1252_v29 = vpop.f32.mrf.mxu1 }
 0x20b   : > { %v1447_v41 = vmul.f32 %v2871_v30, %v1223_v28  ;;  %v1448_v14 = vmul.f32 %v2874_v31, %v1252_v29 }
 0x20c   : > { %v1541_v33 = vmax.f32 %v1540_v15, %v1519_v26  ;;  %v1554_v34 = vmax.f32 %v1553_v17, %v1520_v27 }
 0x20d   : > { %v1529_v35 = vadd.f32 %v2880_v36, %v1447_v41  ;;  %v1530_v37 = vadd.f32 %v2884_v38, %v1448_v14 }
 0x20f   : > { %v1568_v42 = vmax.f32 %v1567_v20, %v1529_v35  ;;  %v1581_v43 = vmax.f32 %v1580_v21, %v1530_v37  ;;  %v1165_v44 = vpop.f32.mrf.mxu2  ;;  %v1194_v45 = vpop.f32.mrf.mxu3 }
 0x210   : > { %v1445_v13 = vmul.f32 %v2887_v39, %v1165_v44  ;;  %v1446_v46 = vmul.f32 %v2890_v40, %v1194_v45 }
 0x211   : > { %v1569_v47 = vrot.slane %v1568_v42, 4  ;;  %v1582_v48 = vrot.slane %v1581_v43, 4 }
 0x212   : > { %v1527_v30 = vadd.f32 %v2900_v49, %v1445_v13  ;;  %v1528_v31 = vadd.f32 %v2904_v51, %v1446_v46  ;;  %v2960_v16 = vpop.f32.mrf.mxu0  ;;  %v2962_v50 = vpop.f32.mrf.mxu1  ;;  %v2981_v13 = vperm.slane %v2876_v32, 6  ;;  %v2984_v46 = vperm.slane %v2876_v32, 7 }
 0x213   : > { %v1570_v36 = vmax.f32 %v1568_v42, %v1569_v47  ;;  %v1583_v38 = vmax.f32 %v1581_v43, %v1582_v48  ;;  %v2973_v42 = vperm.slane %v2868_v57, 4  ;;  %v2976_v43 = vperm.slane %v2868_v57, 5 }
 0x214   : > { %v1542_v52 = vmax.f32 %v1541_v33, %v1527_v30  ;;  %v1555_v53 = vmax.f32 %v1554_v34, %v1528_v31  ;;  %v2967_v33 = vperm.slane %v2868_v57, 6  ;;  %v2970_v34 = vperm.slane %v2868_v57, 7 }
 0x215   : > { %v1571_v54 = vrot.slane %v1570_v36, 2  ;;  %v1584_v55 = vrot.slane %v1583_v38, 2 }
 0x216   : > { %v1543_v56 = vrot.slane %v1542_v52, 4  ;;  %v1556_v39 = vrot.slane %v1555_v53, 4  ;;  %v1395_v57 = vmul.f32 %v2967_v33, %v2960_v16 }
 0x217   : > { %v1572_v58 = vmax.f32 %v1570_v36, %v1571_v54  ;;  %v1585_v40 = vmax.f32 %v1583_v38, %v1584_v55  ;;  %v1264_v59 = vpop.f32.mrf.mxu2  ;;  %v1293_v60 = vpop.f32.mrf.mxu3  ;;  %v1396_v36 = vmul.f32 %v2970_v34, %v2962_v50  ;;  %v2993_v38 = vperm.slane %v2876_v32, 4 }
 0x218   : > { %v1544_v61 = vmax.f32 %v1542_v52, %v1543_v56  ;;  %v1557_v49 = vmax.f32 %v1555_v53, %v1556_v39  ;;  %v2996_v52 = vperm.slane %v2876_v32, 5  ;;  %v1393_v53 = vmul.f32 %v2973_v42, %v1264_v59 }
 0x219   : > { %v1573_v62 = vrot.slane %v1572_v58, 1  ;;  %v1586_v51 = vrot.slane %v1585_v40, 1  ;;  %v1394_v54 = vmul.f32 %v2976_v43, %v1293_v60  ;;  %v1477_v59 = vadd.f32 %v2981_v13, %v1395_v57 }
 0x21a   : > { %v1545_v63 = vrot.slane %v1544_v61, 2  ;;  %v1558_v0 = vrot.slane %v1557_v49, 2  ;;  %v1324_v1 = vpop.f32.mrf.mxu0  ;;  %v1353_v2 = vpop.f32.mrf.mxu1  ;;  %v1478_v60 = vadd.f32 %v2984_v46, %v1396_v36 }
 0x21b   : > { %v1574_v3 = vmax.f32 %v1572_v58, %v1573_v62  ;;  %v1587_v4 = vmax.f32 %v1585_v40, %v1586_v51  ;;  %v1403_v44 = vmul.f32 %v2967_v33, %v1324_v1  ;;  %v1404_v45 = vmul.f32 %v2970_v34, %v1353_v2 }
 0x21c   : > { %v1546_v5 = vmax.f32 %v1544_v61, %v1545_v63  ;;  %v1559_v6 = vmax.f32 %v1557_v49, %v1558_v0  ;;  %v1475_v63 = vadd.f32 %v2993_v38, %v1393_v53  ;;  %v1476_v0 = vadd.f32 %v2996_v52, %v1394_v54 }
 0x21d   : > { %v1649_v7 = vrot.slane %v1574_v3, 6  ;;  %v1650_v8 = vrot.slane %v1587_v4, 5  ;;  %v1485_v39 = vadd.f32 %v2981_v13, %v1403_v44  ;;  %v1486_v16 = vadd.f32 %v2984_v46, %v1404_v45 }
 0x21e   : > { %v1547_v9 = vrot.slane %v1546_v5, 1  ;;  %v1560_v10 = vrot.slane %v1559_v6, 1 }
 0x21f   : > { %v1658_v11 = vsel %vm1657_vm3, %v1649_v7, %v1650_v8  ;;  %v1266_v12 = vpop.f32.mrf.mxu2  ;;  %v1295_v15 = vpop.f32.mrf.mxu3  ;;  %v1614_v3 = vmax.f32 %v1477_v59, %v1485_v39  ;;  %v1627_v4 = vmax.f32 %v1478_v60, %v1486_v16 }
 0x220   : > { %v1561_v17 = vmax.f32 %v1559_v6, %v1560_v10  ;;  %v1548_v18 = vmax.f32 %v1546_v5, %v1547_v9  ;;  %v1401_v47 = vmul.f32 %v2973_v42, %v1266_v12  ;;  %v1402_v48 = vmul.f32 %v2976_v43, %v1295_v15 }
 0x222   : > { %v1648_v19 = vrot.slane %v1561_v17, 7  ;;  %v1327_v20 = vpop.f32.mrf.mxu0  ;;  %v1356_v21 = vpop.f32.mrf.mxu1  ;;  %v1483_v50 = vadd.f32 %v2993_v38, %v1401_v47  ;;  %v1484_v58 = vadd.f32 %v2996_v52, %v1402_v48 }
 0x223   : > { %v1411_v55 = vmul.f32 %v2967_v33, %v1327_v20  ;;  %v1412_v56 = vmul.f32 %v2970_v34, %v1356_v21 }
 0x224   : > { %v1656_v22 = vsel %vm1655_vm4, %v1548_v18, %v1648_v19  ;;  %v1588_v7 = vmax.f32 %v1475_v63, %v1483_v50  ;;  %v1601_v8 = vmax.f32 %v1476_v0, %v1484_v58 }
 0x225   : > { %v2964_v23 = vsel %vm1659_vm5, %v1656_v22, %v1658_v11  ;;  %v1493_v1 = vadd.f32 %v2981_v13, %v1411_v55  ;;  %v1494_v2 = vadd.f32 %v2984_v46, %v1412_v56 }
 0x227   : > { %v1269_v24 = vpop.f32.mrf.mxu2  ;;  %v1298_v25 = vpop.f32.mrf.mxu3  ;;  %v1615_v20 = vmax.f32 %v1614_v3, %v1493_v1  ;;  %v1628_v21 = vmax.f32 %v1627_v4, %v1494_v2 }
 0x228   : > { %v1409_v40 = vmul.f32 %v2973_v42, %v1269_v24  ;;  %v1410_v32 = vmul.f32 %v2976_v43, %v1298_v25 }
 0x22a   : > { %v1329_v26 = vpop.f32.mrf.mxu0  ;;  %v1358_v27 = vpop.f32.mrf.mxu1  ;;  %v1491_v9 = vadd.f32 %v2993_v38, %v1409_v40  ;;  %v1492_v10 = vadd.f32 %v2996_v52, %v1410_v32 }
 0x22b   : > { %v1419_v61 = vmul.f32 %v2967_v33, %v1329_v26  ;;  %v1420_v49 = vmul.f32 %v2970_v34, %v1358_v27 }
 0x22c   : > { %v1602_v44 = vmax.f32 %v1601_v8, %v1492_v10 }
 0x22d   : > { %v1501_v15 = vadd.f32 %v2981_v13, %v1419_v61  ;;  %v1502_v17 = vadd.f32 %v2984_v46, %v1420_v49 }
 0x22f   : > { %v1271_v28 = vpop.f32.mrf.mxu2  ;;  %v1300_v29 = vpop.f32.mrf.mxu3  ;;  %v1616_v48 = vmax.f32 %v1615_v20, %v1501_v15 }
 0x230   : > { %v1417_v22 = vmul.f32 %v2973_v42, %v1271_v28  ;;  %v1418_v24 = vmul.f32 %v2976_v43, %v1300_v29 }
 0x232   : > { %v1332_v41 = vpop.f32.mrf.mxu0  ;;  %v1361_v14 = vpop.f32.mrf.mxu1  ;;  %v1499_v36 = vadd.f32 %v2993_v38, %v1417_v22  ;;  %v1500_v53 = vadd.f32 %v2996_v52, %v1418_v24 }
 0x233   : > { %v1427_v5 = vmul.f32 %v2967_v33, %v1332_v41  ;;  %v1428_v6 = vmul.f32 %v2970_v34, %v1361_v14  ;;  %v1589_v14 = vmax.f32 %v1588_v7, %v1491_v9 }
 0x234   : > { %v1603_v63 = vmax.f32 %v1602_v44, %v1500_v53 }
 0x235   : > { %v1509_v25 = vadd.f32 %v2981_v13, %v1427_v5  ;;  %v1510_v26 = vadd.f32 %v2984_v46, %v1428_v6 }
 0x237   : > { %v1274_v35 = vpop.f32.mrf.mxu2  ;;  %v1303_v37 = vpop.f32.mrf.mxu3  ;;  %v1617_v56 = vmax.f32 %v1616_v48, %v1509_v25 }
 0x238   : > { %v1425_v45 = vmul.f32 %v2973_v42, %v1274_v35  ;;  %v1426_v47 = vmul.f32 %v2976_v43, %v1303_v37 }
 0x23a   : > { %v1334_v30 = vpop.f32.mrf.mxu0  ;;  %v1363_v31 = vpop.f32.mrf.mxu1  ;;  %v1507_v16 = vadd.f32 %v2993_v38, %v1425_v45  ;;  %v1508_v50 = vadd.f32 %v2996_v52, %v1426_v47 }
 0x23b   : > { %v1435_v18 = vmul.f32 %v2967_v33, %v1334_v30  ;;  %v1436_v19 = vmul.f32 %v2970_v34, %v1363_v31  ;;  %v1629_v30 = vmax.f32 %v1628_v21, %v1502_v17 }
 0x23c   : > { %v1604_v7 = vmax.f32 %v1603_v63, %v1508_v50 }
 0x23d   : > { %v1517_v28 = vadd.f32 %v2981_v13, %v1435_v18  ;;  %v1518_v29 = vadd.f32 %v2984_v46, %v1436_v19  ;;  %v1630_v35 = vmax.f32 %v1629_v30, %v1510_v26 }
 0x23f   : > { %v1276_v62 = vpop.f32.mrf.mxu2  ;;  %v1305_v51 = vpop.f32.mrf.mxu3  ;;  %v1618_v60 = vmax.f32 %v1617_v56, %v1517_v28  ;;  %v1631_v61 = vmax.f32 %v1630_v35, %v1518_v29 }
 0x240   : > { %v1433_v54 = vmul.f32 %v2973_v42, %v1276_v62  ;;  %v1434_v55 = vmul.f32 %v2976_v43, %v1305_v51  ;;  %v1590_v51 = vmax.f32 %v1589_v14, %v1499_v36 }
 0x242   : > { %v1337_v11 = vpop.f32.mrf.mxu0  ;;  %v1366_v12 = vpop.f32.mrf.mxu1  ;;  %v1515_v0 = vadd.f32 %v2993_v38, %v1433_v54  ;;  %v1516_v1 = vadd.f32 %v2996_v52, %v1434_v55  ;;  %v1591_v6 = vmax.f32 %v1590_v51, %v1507_v16 }
 0x243   : > { %v1443_v27 = vmul.f32 %v2967_v33, %v1337_v11  ;;  %v1444_v41 = vmul.f32 %v2970_v34, %v1366_v12 }
 0x244   : > { %v1592_v12 = vmax.f32 %v1591_v6, %v1515_v0  ;;  %v1605_v15 = vmax.f32 %v1604_v7, %v1516_v1 }
 0x245   : > { %v1525_v37 = vadd.f32 %v2981_v13, %v1443_v27  ;;  %v1526_v39 = vadd.f32 %v2984_v46, %v1444_v41 }
 0x247   : > { %v1279_v31 = vpop.f32.mrf.mxu2  ;;  %v1308_v57 = vpop.f32.mrf.mxu3  ;;  %v1619_v2 = vmax.f32 %v1618_v60, %v1525_v37  ;;  %v1632_v3 = vmax.f32 %v1631_v61, %v1526_v39 }
 0x248   : > { %v1441_v58 = vmul.f32 %v2973_v42, %v1279_v31  ;;  %v1442_v40 = vmul.f32 %v2976_v43, %v1308_v57 }
 0x24a   : > { %v1339_v32 = vpop.f32.mrf.mxu0  ;;  %v1368_v59 = vpop.f32.mrf.mxu1  ;;  %v1523_v8 = vadd.f32 %v2993_v38, %v1441_v58 }
 0x24b   : > { %v1451_v49 = vmul.f32 %v2967_v33, %v1339_v32  ;;  %v1452_v62 = vmul.f32 %v2970_v34, %v1368_v59  ;;  %v1524_v33 = vadd.f32 %v2996_v52, %v1442_v40 }
 0x24c   : > { %v1593_v20 = vmax.f32 %v1592_v12, %v1523_v8 }
 0x24d   : > { %v1533_v4 = vadd.f32 %v2981_v13, %v1451_v49  ;;  %v1534_v5 = vadd.f32 %v2984_v46, %v1452_v62  ;;  %v1606_v46 = vmax.f32 %v1605_v15, %v1524_v33 }
 0x24f   : > { %v1620_v9 = vmax.f32 %v1619_v2, %v1533_v4  ;;  %v1633_v34 = vmax.f32 %v1632_v3, %v1534_v5  ;;  %v1281_v10 = vpop.f32.mrf.mxu2  ;;  %v1310_v11 = vpop.f32.mrf.mxu3 }
 0x250   : > { %v1449_v17 = vmul.f32 %v2973_v42, %v1281_v10  ;;  %v1450_v18 = vmul.f32 %v2976_v43, %v1310_v11 }
 0x251   : > { %v1621_v19 = vrot.slane %v1620_v9, 4  ;;  %v1634_v13 = vrot.slane %v1633_v34, 4 }
 0x252   : > { %v1531_v21 = vadd.f32 %v2993_v38, %v1449_v17  ;;  %v1532_v22 = vadd.f32 %v2996_v52, %v1450_v18 }
 0x253   : > { %v1622_v24 = vmax.f32 %v1620_v9, %v1621_v19  ;;  %v1635_v25 = vmax.f32 %v1633_v34, %v1634_v13 }
 0x254   : > { %v1594_v26 = vmax.f32 %v1593_v20, %v1531_v21  ;;  %v1607_v27 = vmax.f32 %v1606_v46, %v1532_v22 }
 0x255   : > { %v1623_v41 = vrot.slane %v1622_v24, 2  ;;  %v1636_v14 = vrot.slane %v1635_v25, 2 }
 0x256   : > { %v1595_v44 = vrot.slane %v1594_v26, 4  ;;  %v1608_v45 = vrot.slane %v1607_v27, 4 }
 0x257   : > { %v1624_v47 = vmax.f32 %v1622_v24, %v1623_v41  ;;  %v1637_v42 = vmax.f32 %v1635_v25, %v1636_v14 }
 0x258   : > { %v1596_v48 = vmax.f32 %v1594_v26, %v1595_v44  ;;  %v1609_v43 = vmax.f32 %v1607_v27, %v1608_v45 }
 0x259   : > { %v1625_v30 = vrot.slane %v1624_v47, 1  ;;  %v1638_v28 = vrot.slane %v1637_v42, 1 }
 0x25a   : > { %v1597_v29 = vrot.slane %v1596_v48, 2  ;;  %v1610_v31 = vrot.slane %v1609_v43, 2 }
 0x25b   : > { %v1626_v38 = vmax.f32 %v1624_v47, %v1625_v30  ;;  %v1639_v57 = vmax.f32 %v1637_v42, %v1638_v28 }
 0x25c   : > { %v1598_v52 = vmax.f32 %v1596_v48, %v1597_v29  ;;  %v1611_v36 = vmax.f32 %v1609_v43, %v1610_v31 }
 0x25d   : > { %v1653_v55 = vrot.slane %v1626_v38, 2  ;;  %v1654_v56 = vrot.slane %v1639_v57, 1 }
 0x25e   : > { %v1599_v53 = vrot.slane %v1598_v52, 1  ;;  %v1612_v54 = vrot.slane %v1611_v36, 1 }
 0x25f   : > { %v1664_v50 = vsel %vm1663_vm6, %v1653_v55, %v1654_v56 }
 0x260   : > { %v1600_v35 = vmax.f32 %v1598_v52, %v1599_v53  ;;  %v1613_v37 = vmax.f32 %v1611_v36, %v1612_v54 }
 0x262   : > { %v1651_v39 = vrot.slane %v1600_v35, 4  ;;  %v1652_v16 = vrot.slane %v1613_v37, 3 }
 0x264   : > { %v1662_v58 = vsel %vm1661_vm7, %v1651_v39, %v1652_v16 }
 0x265   : > { %v1666_v40 = vsel %vm1665_vm8, %v1662_v58, %v1664_v50 }
 0x266   : > { %v1668_v32 = vsel %vm1667_vm9, %v2964_v23, %v1666_v40 }
 0x267   : > { %1671 = vst [vmem:[%s523_s28] sm:$0xff] %v1668_v32 }
 0x268 PF: > { %s25_s15 = sadd.s32 1, %s2613_s15   ;;  %s3088_s13 = smov %s2609_s14 }
 0x269   : > { %p22_p8 = scmp.ge.s32.totalorder %s25_s15, 4   ;;  %s3089_s14 = smov %s3091_s24 }
 0x26b   :  { %24 = sbr.rel (!%p22_p8) target bundleno = 9 (0x9), region = 130 }
 0x270   :  { %1691 = vsyncpa [#allocation3], 1 }
 0x271   :  { %1693 = vsyncpa [#allocation3 + $0x1], 1 }
 0x272   :  { %1694 = vsyncpa [#allocation5], 1 }
 0x273   :  { %1695 = vsyncpa [#allocation8], 1 }
 0x274   :  { %1696 = vsyncpa [#allocation11], 1 }
 0x275   :  { %1697 = vsyncpa [#allocation14], 1 }

// kernel: _lambda_.5
= control target key start
LH: loop header
LB: loop body
LE: loop exit
PB: predicated region body
PF: predicated region fallthrough
CT: control target
= control target key end

     0   :  { %15 = vsyncpa [#allocation3], 0  ;;  %s2158_s0 = inlined_call_operand.vmem [shape: f32[2,1024], index: 0, kind: input, shape index: {}]   ;;  %s2159_s1 = inlined_call_operand.hbm [shape: f32[1024,512], index: 1, kind: input, shape index: {}]   ;;  %s2160_s2 = inlined_call_operand.hbm [shape: f32[1,512], index: 2, kind: input, shape index: {}]   ;;  %s2161_s3 = inlined_call_operand.hbm [shape: f32[1,512], index: 3, kind: input, shape index: {}]   ;;  %s2162_s4 = inlined_call_operand.hbm [shape: f32[512,256], index: 4, kind: input, shape index: {}]   ;;  %s2163_s5 = inlined_call_operand.hbm [shape: f32[1,256], index: 5, kind: input, shape index: {}]   ;;  %s2164_s6 = inlined_call_operand.hbm [shape: f32[1,256], index: 6, kind: input, shape index: {}]   ;;  %s2165_s7 = inlined_call_operand.hbm [shape: f32[256,9], index: 7, kind: input, shape index: {}]   ;;  %s2166_s8 = inlined_call_operand.vmem [shape: f32[1,9], index: 8, kind: input, shape index: {}]   ;;  %s2167_s9 = inlined_call_operand.vmem [shape: f32[1,9], index: 9, kind: input, shape index: {}]   ;;  %s2168_s10 = inlined_call_operand.vmem [shape: f32[2,9], index: 10, kind: output, shape index: {}]  }
   0x1   :  { %16 = vsyncpa [#allocation5], 0 }
   0x2   :  { %17 = vsyncpa [#allocation8], 0  ;;  %s39_s15 = sshll.u32 %s2160_s2, 4  ;;  %s40_s15 = int_to_ptr.hbm [resolvable:$true] %s39_s15 }
   0x3   :  { %18 = vsyncpa [#allocation11], 0  ;;  %s1940_s16 = smov [#allocation4]   ;;  %s60_s20 = sshll.u32 %s2162_s4, 4  ;;  %s61_s20 = int_to_ptr.hbm [resolvable:$true] %s60_s20 }
   0x4   :  { %s41_s17 = sshll.u32 %s1940_s16, 4  ;;  %s1941_s21 = smov [#allocation7]   ;;  %s42_s17 = int_to_ptr.vmem [resolvable:$true] %s41_s17 }
   0x5   :  { %44 = dma.hbm_to_vmem [thread:$0]  %s40_s15, 64, %s42_s17, [#allocation5]  }
   0x6   :  { %s62_s22 = sshll.u32 %s1941_s21, 4  ;;  %s1942_s23 = smov 256   ;;  %s63_s22 = int_to_ptr.vmem [resolvable:$true] %s62_s22 }
   0x7   :  { %s1943_s24 = smov 16   ;;  %s85_s2 = sshll.u32 %s2164_s6, 4  ;;  %s86_s2 = int_to_ptr.hbm [resolvable:$true] %s85_s2 }
   0x8   :  { %68 = dma.hbm_to_vmem [thread:$0]  %s61_s20, 16384, %s63_s22, [#allocation8], %s1942_s23, %s1942_s23, %s1943_s24  }
   0x9   :  { %s1944_s27 = smov [#allocation10]   ;;  %s25_s4 = sshll.u32 %s2159_s1, 4  ;;  %s26_s4 = int_to_ptr.hbm [resolvable:$true] %s25_s4 }
   0xa   :  { %s87_s28 = sshll.u32 %s1944_s27, 4  ;;  %s1945_s11 = smov [#allocation2]   ;;  %s88_s28 = int_to_ptr.vmem [resolvable:$true] %s87_s28 }
   0xb   :  { %90 = dma.hbm_to_vmem [thread:$0]  %s86_s2, 32, %s88_s28, [#allocation11]  }
   0xc   :  { %s27_s12 = sshll.u32 %s1945_s11, 4  ;;  %s1946_s13 = smov 512   ;;  %s28_s12 = int_to_ptr.vmem [resolvable:$true] %s27_s12 }
   0xd   :  { %s1947_s14 = smov 32   ;;  %s50_s6 = sshll.u32 %s2161_s3, 4  ;;  %s51_s6 = int_to_ptr.hbm [resolvable:$true] %s50_s6 }
   0xe   :  { %33 = dma.hbm_to_vmem [thread:$0]  %s26_s4, 65536, %s28_s12, [#allocation3], %s1946_s13, %s1946_s13, %s1947_s14  }
   0xf   :  { %s1948_s17 = smov [#allocation6]   ;;  %s74_s1 = sshll.u32 %s2163_s5, 4  ;;  %s75_s1 = int_to_ptr.hbm [resolvable:$true] %s74_s1 }
  0x10   :  { %s52_s18 = sshll.u32 %s1948_s17, 4  ;;  %s1949_s21 = smov [#allocation9]   ;;  %s53_s18 = int_to_ptr.vmem [resolvable:$true] %s52_s18 }
  0x11   :  { %55 = dma.hbm_to_vmem [thread:$0]  %s51_s6, 64, %s53_s18, [#allocation5]  }
  0x12   :  { %s76_s22 = sshll.u32 %s1949_s21, 4  ;;  %s95_s25 = sshll.u32 %s2165_s7, 4  ;;  %s77_s22 = int_to_ptr.vmem [resolvable:$true] %s76_s22  ;;  %s96_s25 = int_to_ptr.hbm [resolvable:$true] %s95_s25 }
  0x13   :  { %79 = dma.hbm_to_vmem [thread:$0]  %s75_s1, 32, %s77_s22, [#allocation8]  }
  0x14   :  { %s1950_s3 = smov [#allocation12]   ;;  %s1951_s2 = smov 128  }
  0x15   :  { %s97_s26 = sshll.u32 %s1950_s3, 4  ;;  %s1952_s27 = smov 8   ;;  %s98_s26 = int_to_ptr.vmem [resolvable:$true] %s97_s26 }
  0x16   :  { %103 = dma.hbm_to_vmem [thread:$0]  %s96_s25, 4096, %s98_s26, [#allocation11], %s1951_s2, %s1951_s2, %s1952_s27  }
  0x17   :  { %1932 = dma.done.wait [#allocation3], 65536  }
  0x18   :  { %1933 = vsyncadd [#allocation3], 4294901760 }
  0x19   :  { %1934 = dma.done.wait [#allocation5], 128  }
  0x1a   :  { %1935 = vsyncadd [#allocation5], 4294967168 }
  0x1b   :  { %1936 = dma.done.wait [#allocation8], 16416  }
  0x1c   :  { %1937 = vsyncadd [#allocation8], 4294950880 }
  0x1d   :  { %1938 = dma.done.wait [#allocation11], 4128  }
  0x1e   :  { %1939 = vsyncadd [#allocation11], 4294963168  ;;  %v198_v0 = vld [vmem:[#allocation2 + $0x1e0] sm:$0xff]  ;;  %vm1731_vm0 = vcmask 66560  }
  0x1f   :  { %v262_v1 = vld [vmem:[#allocation2 + $0x3e0] sm:$0xff]  ;;  %671 = vmatpush.msra.mxu0 %v198_v0 }
  0x20   :  { %v326_v2 = vld [vmem:[#allocation2 + $0x5e0] sm:$0xff]  ;;  %691 = vmatpush.msra.mxu1 %v262_v1 }
  0x21   :  { %v194_v3 = vld [vmem:[#allocation2 + $0x1c0] sm:$0xff]  ;;  %711 = vmatpush.msra.mxu2 %v326_v2 }
  0x22   :  { %v258_v4 = vld [vmem:[#allocation2 + $0x3c0] sm:$0xff]  ;;  %672 = vmatpush.msra.mxu0 %v194_v3 }
  0x23   :  { %v322_v5 = vld [vmem:[#allocation2 + $0x5c0] sm:$0xff]  ;;  %692 = vmatpush.msra.mxu1 %v258_v4 }
  0x24   :  { %v390_v6 = vld [vmem:[#allocation2 + $0x7e0] sm:$0xff]  ;;  %712 = vmatpush.msra.mxu2 %v322_v5 }
  0x25   :  { %v190_v7 = vld [vmem:[#allocation2 + $0x1a0] sm:$0xff]  ;;  %731 = vmatpush.msra.mxu3 %v390_v6 }
  0x26   :  { %v254_v8 = vld [vmem:[#allocation2 + $0x3a0] sm:$0xff]  ;;  %673 = vmatpush.msra.mxu0 %v190_v7 }
  0x27   :  { %v318_v9 = vld [vmem:[#allocation2 + $0x5a0] sm:$0xff]  ;;  %693 = vmatpush.msra.mxu1 %v254_v8 }
  0x28   :  { %v386_v10 = vld [vmem:[#allocation2 + $0x7c0] sm:$0xff]  ;;  %713 = vmatpush.msra.mxu2 %v318_v9 }
  0x29   :  { %v186_v11 = vld [vmem:[#allocation2 + $0x180] sm:$0xff]  ;;  %732 = vmatpush.msra.mxu3 %v386_v10 }
  0x2a   :  { %v250_v12 = vld [vmem:[#allocation2 + $0x380] sm:$0xff]  ;;  %674 = vmatpush.msra.mxu0 %v186_v11 }
  0x2b   :  { %v314_v13 = vld [vmem:[#allocation2 + $0x580] sm:$0xff]  ;;  %694 = vmatpush.msra.mxu1 %v250_v12 }
  0x2c   :  { %v382_v14 = vld [vmem:[#allocation2 + $0x7a0] sm:$0xff]  ;;  %714 = vmatpush.msra.mxu2 %v314_v13 }
  0x2d   :  { %v182_v15 = vld [vmem:[#allocation2 + $0x160] sm:$0xff]  ;;  %733 = vmatpush.msra.mxu3 %v382_v14 }
  0x2e   :  { %v246_v16 = vld [vmem:[#allocation2 + $0x360] sm:$0xff]  ;;  %675 = vmatpush.msra.mxu0 %v182_v15 }
  0x2f   :  { %v310_v17 = vld [vmem:[#allocation2 + $0x560] sm:$0xff]  ;;  %695 = vmatpush.msra.mxu1 %v246_v16 }
  0x30   :  { %v378_v18 = vld [vmem:[#allocation2 + $0x780] sm:$0xff]  ;;  %715 = vmatpush.msra.mxu2 %v310_v17 }
  0x31   :  { %v178_v19 = vld [vmem:[#allocation2 + $0x140] sm:$0xff]  ;;  %734 = vmatpush.msra.mxu3 %v378_v18 }
  0x32   :  { %v242_v20 = vld [vmem:[#allocation2 + $0x340] sm:$0xff]  ;;  %676 = vmatpush.msra.mxu0 %v178_v19 }
  0x33   :  { %v306_v21 = vld [vmem:[#allocation2 + $0x540] sm:$0xff]  ;;  %696 = vmatpush.msra.mxu1 %v242_v20 }
  0x34   :  { %v374_v22 = vld [vmem:[#allocation2 + $0x760] sm:$0xff]  ;;  %716 = vmatpush.msra.mxu2 %v306_v21 }
  0x35   :  { %v174_v23 = vld [vmem:[#allocation2 + $0x120] sm:$0xff]  ;;  %735 = vmatpush.msra.mxu3 %v374_v22 }
  0x36   :  { %v238_v24 = vld [vmem:[#allocation2 + $0x320] sm:$0xff]  ;;  %677 = vmatpush.msra.mxu0 %v174_v23  ;;  %v136_v23 = vld [vmem:[%s2158_s0] sm:$0xff] }
  0x37   :  { %v302_v25 = vld [vmem:[#allocation2 + $0x520] sm:$0xff]  ;;  %697 = vmatpush.msra.mxu1 %v238_v24  ;;  %652 = vst [vmem:[#allocation1] ss:$4 sm:$0xff] %v136_v23 }
  0x38   :  { %v370_v26 = vld [vmem:[#allocation2 + $0x740] sm:$0xff]  ;;  %717 = vmatpush.msra.mxu2 %v302_v25 }
  0x39   :  { %v170_v27 = vld [vmem:[#allocation2 + $0x100] sm:$0xff]  ;;  %736 = vmatpush.msra.mxu3 %v370_v26 }
  0x3a   :  { %v234_v28 = vld [vmem:[#allocation2 + $0x300] sm:$0xff]  ;;  %678 = vmatpush.msra.mxu0 %v170_v27 }
  0x3b   :  { %v298_v29 = vld [vmem:[#allocation2 + $0x500] sm:$0xff]  ;;  %698 = vmatpush.msra.mxu1 %v234_v28 }
  0x3c   :  { %v366_v30 = vld [vmem:[#allocation2 + $0x720] sm:$0xff]  ;;  %718 = vmatpush.msra.mxu2 %v298_v29 }
  0x3d   :  { %v166_v31 = vld [vmem:[#allocation2 + $0xe0] sm:$0xff]  ;;  %737 = vmatpush.msra.mxu3 %v366_v30 }
  0x3e   :  { %v230_v32 = vld [vmem:[#allocation2 + $0x2e0] sm:$0xff]  ;;  %679 = vmatpush.msra.mxu0 %v166_v31 }
  0x3f   :  { %v294_v33 = vld [vmem:[#allocation2 + $0x4e0] sm:$0xff]  ;;  %699 = vmatpush.msra.mxu1 %v230_v32 }
  0x40   :  { %v362_v34 = vld [vmem:[#allocation2 + $0x700] sm:$0xff]  ;;  %719 = vmatpush.msra.mxu2 %v294_v33 }
  0x41   :  { %v162_v35 = vld [vmem:[#allocation2 + $0xc0] sm:$0xff]  ;;  %738 = vmatpush.msra.mxu3 %v362_v34 }
  0x42   :  { %v226_v36 = vld [vmem:[#allocation2 + $0x2c0] sm:$0xff]  ;;  %680 = vmatpush.msra.mxu0 %v162_v35 }
  0x43   :  { %v290_v37 = vld [vmem:[#allocation2 + $0x4c0] sm:$0xff]  ;;  %700 = vmatpush.msra.mxu1 %v226_v36 }
  0x44   :  { %v358_v38 = vld [vmem:[#allocation2 + $0x6e0] sm:$0xff]  ;;  %720 = vmatpush.msra.mxu2 %v290_v37 }
  0x45   :  { %v158_v39 = vld [vmem:[#allocation2 + $0xa0] sm:$0xff]  ;;  %739 = vmatpush.msra.mxu3 %v358_v38 }
  0x46   :  { %v222_v40 = vld [vmem:[#allocation2 + $0x2a0] sm:$0xff]  ;;  %681 = vmatpush.msra.mxu0 %v158_v39 }
  0x47   :  { %v286_v41 = vld [vmem:[#allocation2 + $0x4a0] sm:$0xff]  ;;  %701 = vmatpush.msra.mxu1 %v222_v40 }
  0x48   :  { %v354_v42 = vld [vmem:[#allocation2 + $0x6c0] sm:$0xff]  ;;  %721 = vmatpush.msra.mxu2 %v286_v41 }
  0x49   :  { %v154_v43 = vld [vmem:[#allocation2 + $0x80] sm:$0xff]  ;;  %740 = vmatpush.msra.mxu3 %v354_v42 }
  0x4a   :  { %v218_v44 = vld [vmem:[#allocation2 + $0x280] sm:$0xff]  ;;  %682 = vmatpush.msra.mxu0 %v154_v43 }
  0x4b   :  { %v282_v45 = vld [vmem:[#allocation2 + $0x480] sm:$0xff]  ;;  %702 = vmatpush.msra.mxu1 %v218_v44 }
  0x4c   :  { %v350_v46 = vld [vmem:[#allocation2 + $0x6a0] sm:$0xff]  ;;  %722 = vmatpush.msra.mxu2 %v282_v45 }
  0x4d   :  { %v150_v47 = vld [vmem:[#allocation2 + $0x60] sm:$0xff]  ;;  %741 = vmatpush.msra.mxu3 %v350_v46 }
  0x4e   :  { %v214_v48 = vld [vmem:[#allocation2 + $0x260] sm:$0xff]  ;;  %683 = vmatpush.msra.mxu0 %v150_v47 }
  0x4f   :  { %v278_v49 = vld [vmem:[#allocation2 + $0x460] sm:$0xff]  ;;  %703 = vmatpush.msra.mxu1 %v214_v48 }
  0x50   :  { %v346_v50 = vld [vmem:[#allocation2 + $0x680] sm:$0xff]  ;;  %723 = vmatpush.msra.mxu2 %v278_v49 }
  0x51   :  { %v146_v51 = vld [vmem:[#allocation2 + $0x40] sm:$0xff]  ;;  %742 = vmatpush.msra.mxu3 %v346_v50 }
  0x52   :  { %v210_v52 = vld [vmem:[#allocation2 + $0x240] sm:$0xff]  ;;  %684 = vmatpush.msra.mxu0 %v146_v51 }
  0x53   :  { %v274_v53 = vld [vmem:[#allocation2 + $0x440] sm:$0xff]  ;;  %704 = vmatpush.msra.mxu1 %v210_v52 }
  0x54   :  { %v342_v54 = vld [vmem:[#allocation2 + $0x660] sm:$0xff]  ;;  %724 = vmatpush.msra.mxu2 %v274_v53 }
  0x55   :  { %v142_v55 = vld [vmem:[#allocation2 + $0x20] sm:$0xff]  ;;  %743 = vmatpush.msra.mxu3 %v342_v54 }
  0x56   :  { %v206_v56 = vld [vmem:[#allocation2 + $0x220] sm:$0xff]  ;;  %685 = vmatpush.msra.mxu0 %v142_v55 }
  0x57   :  { %v270_v57 = vld [vmem:[#allocation2 + $0x420] sm:$0xff]  ;;  %705 = vmatpush.msra.mxu1 %v206_v56 }
  0x58   :  { %v338_v58 = vld [vmem:[#allocation2 + $0x640] sm:$0xff]  ;;  %725 = vmatpush.msra.mxu2 %v270_v57 }
  0x59   :  { %v138_v59 = vld [vmem:[#allocation2] sm:$0xff]  ;;  %744 = vmatpush.msra.mxu3 %v338_v58 }
  0x5a   :  { %v202_v60 = vld [vmem:[#allocation2 + $0x200] sm:$0xff]  ;;  %686 = vmatpush.msra.mxu0 %v138_v59 }
  0x5b   :  { %v266_v61 = vld [vmem:[#allocation2 + $0x400] sm:$0xff]  ;;  %706 = vmatpush.msra.mxu1 %v202_v60 }
  0x5c   :  { %v334_v62 = vld [vmem:[#allocation2 + $0x620] sm:$0xff]  ;;  %726 = vmatpush.msra.mxu2 %v266_v61  ;;  %v2035_v61 = vld.sshfl [vmem:[#allocation1 + $0x10] sm:$0xff pattern:$0x73625140] }
  0x5d   :  { %v454_v63 = vld [vmem:[#allocation2 + $0x9e0] sm:$0xff]  ;;  %745 = vmatpush.msra.mxu3 %v334_v62  ;;  %727 = vmatmul.f32.vlgmr.msra.gmra.mxu2 %v2035_v61 }
  0x5e   :  { %v518_v0 = vld [vmem:[#allocation2 + $0xbe0] sm:$0xff]  ;;  %751 = vmatpush.msrb.mxu0 %v454_v63 }
  0x5f   :  { %v582_v1 = vld [vmem:[#allocation2 + $0xde0] sm:$0xff]  ;;  %771 = vmatpush.msrb.mxu1 %v518_v0 }
  0x60   :  { %v330_v2 = vld [vmem:[#allocation2 + $0x600] sm:$0xff]  ;;  %791 = vmatpush.msrb.mxu2 %v582_v1 }
  0x61   :  { %v450_v3 = vld [vmem:[#allocation2 + $0x9c0] sm:$0xff]  ;;  %746 = vmatpush.msra.mxu3 %v330_v2  ;;  %v2037_v2 = vld.sshfl [vmem:[#allocation1] sm:$0xff pattern:$0x73625140] }
  0x62   :  { %v514_v4 = vld [vmem:[#allocation2 + $0xbc0] sm:$0xff]  ;;  %752 = vmatpush.msrb.mxu0 %v450_v3 }
  0x63   :  { %v578_v5 = vld [vmem:[#allocation2 + $0xdc0] sm:$0xff]  ;;  %772 = vmatpush.msrb.mxu1 %v514_v4  ;;  %v2042_v4 = vld.sshfl [vmem:[#allocation1 + $0x18] sm:$0xff pattern:$0x73625140]  ;;  %687 = vmatmul.f32.vlgmr.msra.gmra.mxu0 %v2037_v2 }
  0x64   :  { %v646_v6 = vld [vmem:[#allocation2 + $0xfe0] sm:$0xff]  ;;  %792 = vmatpush.msrb.mxu2 %v578_v5  ;;  %v199_v5 = vld [vmem:[#allocation2 + $0x1e8] sm:$0xff]  ;;  %747 = vmatmul.f32.vlgmr.msra.gmra.mxu3 %v2042_v4 }
  0x65   :  { %v446_v7 = vld [vmem:[#allocation2 + $0x9a0] sm:$0xff]  ;;  %811 = vmatpush.msrb.mxu3 %v646_v6  ;;  %v263_v6 = vld [vmem:[#allocation2 + $0x3e8] sm:$0xff] }
  0x66   :  { %v510_v8 = vld [vmem:[#allocation2 + $0xba0] sm:$0xff]  ;;  %753 = vmatpush.msrb.mxu0 %v446_v7  ;;  %v327_v7 = vld [vmem:[#allocation2 + $0x5e8] sm:$0xff] }
  0x67   :  { %v574_v9 = vld [vmem:[#allocation2 + $0xda0] sm:$0xff]  ;;  %773 = vmatpush.msrb.mxu1 %v510_v8 }
  0x68   :  { %v642_v10 = vld [vmem:[#allocation2 + $0xfc0] sm:$0xff]  ;;  %793 = vmatpush.msrb.mxu2 %v574_v9  ;;  %v195_v9 = vld [vmem:[#allocation2 + $0x1c8] sm:$0xff] }
  0x69   :  { %v442_v11 = vld [vmem:[#allocation2 + $0x980] sm:$0xff]  ;;  %812 = vmatpush.msrb.mxu3 %v642_v10  ;;  %v259_v10 = vld [vmem:[#allocation2 + $0x3c8] sm:$0xff] }
  0x6a   :  { %v506_v12 = vld [vmem:[#allocation2 + $0xb80] sm:$0xff]  ;;  %754 = vmatpush.msrb.mxu0 %v442_v11  ;;  %v323_v11 = vld [vmem:[#allocation2 + $0x5c8] sm:$0xff] }
  0x6b   :  { %v570_v13 = vld [vmem:[#allocation2 + $0xd80] sm:$0xff]  ;;  %774 = vmatpush.msrb.mxu1 %v506_v12  ;;  %v391_v12 = vld [vmem:[#allocation2 + $0x7e8] sm:$0xff] }
  0x6c   :  { %v638_v14 = vld [vmem:[#allocation2 + $0xfa0] sm:$0xff]  ;;  %794 = vmatpush.msrb.mxu2 %v570_v13  ;;  %v191_v13 = vld [vmem:[#allocation2 + $0x1a8] sm:$0xff] }
  0x6d   :  { %v438_v15 = vld [vmem:[#allocation2 + $0x960] sm:$0xff]  ;;  %813 = vmatpush.msrb.mxu3 %v638_v14  ;;  %v255_v14 = vld [vmem:[#allocation2 + $0x3a8] sm:$0xff] }
  0x6e   :  { %v502_v16 = vld [vmem:[#allocation2 + $0xb60] sm:$0xff]  ;;  %755 = vmatpush.msrb.mxu0 %v438_v15  ;;  %v319_v15 = vld [vmem:[#allocation2 + $0x5a8] sm:$0xff] }
  0x6f   :  { %v566_v17 = vld [vmem:[#allocation2 + $0xd60] sm:$0xff]  ;;  %775 = vmatpush.msrb.mxu1 %v502_v16  ;;  %v387_v16 = vld [vmem:[#allocation2 + $0x7c8] sm:$0xff] }
  0x70   :  { %v634_v18 = vld [vmem:[#allocation2 + $0xf80] sm:$0xff]  ;;  %795 = vmatpush.msrb.mxu2 %v566_v17 }
  0x71   :  { %v434_v19 = vld [vmem:[#allocation2 + $0x940] sm:$0xff]  ;;  %814 = vmatpush.msrb.mxu3 %v634_v18  ;;  %v187_v18 = vld [vmem:[#allocation2 + $0x188] sm:$0xff] }
  0x72   :  { %v498_v20 = vld [vmem:[#allocation2 + $0xb40] sm:$0xff]  ;;  %756 = vmatpush.msrb.mxu0 %v434_v19  ;;  %v251_v19 = vld [vmem:[#allocation2 + $0x388] sm:$0xff] }
  0x73   :  { %v562_v21 = vld [vmem:[#allocation2 + $0xd40] sm:$0xff]  ;;  %776 = vmatpush.msrb.mxu1 %v498_v20  ;;  %v315_v20 = vld [vmem:[#allocation2 + $0x588] sm:$0xff] }
  0x74   :  { %v630_v22 = vld [vmem:[#allocation2 + $0xf60] sm:$0xff]  ;;  %796 = vmatpush.msrb.mxu2 %v562_v21  ;;  %v383_v21 = vld [vmem:[#allocation2 + $0x7a8] sm:$0xff] }
  0x75   :  { %v430_v24 = vld [vmem:[#allocation2 + $0x920] sm:$0xff]  ;;  %815 = vmatpush.msrb.mxu3 %v630_v22 }
  0x76   :  { %v494_v25 = vld [vmem:[#allocation2 + $0xb20] sm:$0xff]  ;;  %757 = vmatpush.msrb.mxu0 %v430_v24  ;;  %v183_v24 = vld [vmem:[#allocation2 + $0x168] sm:$0xff] }
  0x77   :  { %v558_v26 = vld [vmem:[#allocation2 + $0xd20] sm:$0xff]  ;;  %777 = vmatpush.msrb.mxu1 %v494_v25  ;;  %v247_v25 = vld [vmem:[#allocation2 + $0x368] sm:$0xff] }
  0x78   :  { %v626_v27 = vld [vmem:[#allocation2 + $0xf40] sm:$0xff]  ;;  %797 = vmatpush.msrb.mxu2 %v558_v26  ;;  %v311_v26 = vld [vmem:[#allocation2 + $0x568] sm:$0xff] }
  0x79   :  { %v426_v28 = vld [vmem:[#allocation2 + $0x900] sm:$0xff]  ;;  %816 = vmatpush.msrb.mxu3 %v626_v27  ;;  %v379_v27 = vld [vmem:[#allocation2 + $0x788] sm:$0xff] }
  0x7a   :  { %v490_v29 = vld [vmem:[#allocation2 + $0xb00] sm:$0xff]  ;;  %758 = vmatpush.msrb.mxu0 %v426_v28 }
  0x7b   :  { %v554_v30 = vld [vmem:[#allocation2 + $0xd00] sm:$0xff]  ;;  %778 = vmatpush.msrb.mxu1 %v490_v29  ;;  %v179_v29 = vld [vmem:[#allocation2 + $0x148] sm:$0xff] }
  0x7c   :  { %v622_v31 = vld [vmem:[#allocation2 + $0xf20] sm:$0xff]  ;;  %798 = vmatpush.msrb.mxu2 %v554_v30  ;;  %v243_v30 = vld [vmem:[#allocation2 + $0x348] sm:$0xff] }
  0x7d   :  { %v422_v32 = vld [vmem:[#allocation2 + $0x8e0] sm:$0xff]  ;;  %817 = vmatpush.msrb.mxu3 %v622_v31  ;;  %v307_v31 = vld [vmem:[#allocation2 + $0x548] sm:$0xff] }
  0x7e   :  { %v486_v33 = vld [vmem:[#allocation2 + $0xae0] sm:$0xff]  ;;  %759 = vmatpush.msrb.mxu0 %v422_v32  ;;  %v375_v32 = vld [vmem:[#allocation2 + $0x768] sm:$0xff] }
  0x7f   :  { %v137_v34 = vld [vmem:[%s2158_s0 + $0x8] sm:$0xff]  ;;  %779 = vmatpush.msrb.mxu1 %v486_v33  ;;  %v175_v33 = vld [vmem:[#allocation2 + $0x128] sm:$0xff] }
  0x80   :  { %v550_v35 = vld [vmem:[#allocation2 + $0xce0] sm:$0xff]  ;;  %654 = vst [vmem:[#allocation1 + $0x20] ss:$4 sm:$0xff] %v137_v34  ;;  %v239_v34 = vld [vmem:[#allocation2 + $0x328] sm:$0xff] }
  0x81   :  { %v618_v36 = vld [vmem:[#allocation2 + $0xf00] sm:$0xff]  ;;  %799 = vmatpush.msrb.mxu2 %v550_v35  ;;  %v303_v35 = vld [vmem:[#allocation2 + $0x528] sm:$0xff] }
  0x82   :  { %v418_v37 = vld [vmem:[#allocation2 + $0x8c0] sm:$0xff]  ;;  %818 = vmatpush.msrb.mxu3 %v618_v36  ;;  %v371_v36 = vld [vmem:[#allocation2 + $0x748] sm:$0xff] }
  0x83   :  { %v482_v38 = vld [vmem:[#allocation2 + $0xac0] sm:$0xff]  ;;  %760 = vmatpush.msrb.mxu0 %v418_v37  ;;  %v171_v37 = vld [vmem:[#allocation2 + $0x108] sm:$0xff] }
  0x84   :  { %v546_v39 = vld [vmem:[#allocation2 + $0xcc0] sm:$0xff]  ;;  %780 = vmatpush.msrb.mxu1 %v482_v38  ;;  %v235_v38 = vld [vmem:[#allocation2 + $0x308] sm:$0xff] }
  0x85   :  { %v614_v40 = vld [vmem:[#allocation2 + $0xee0] sm:$0xff]  ;;  %800 = vmatpush.msrb.mxu2 %v546_v39  ;;  %v299_v39 = vld [vmem:[#allocation2 + $0x508] sm:$0xff] }
  0x86   :  { %v414_v41 = vld [vmem:[#allocation2 + $0x8a0] sm:$0xff]  ;;  %819 = vmatpush.msrb.mxu3 %v614_v40  ;;  %v367_v40 = vld [vmem:[#allocation2 + $0x728] sm:$0xff] }
  0x87   :  { %v478_v42 = vld [vmem:[#allocation2 + $0xaa0] sm:$0xff]  ;;  %761 = vmatpush.msrb.mxu0 %v414_v41  ;;  %v2047_v17 = vld.sshfl [vmem:[#allocation1 + $0x30] sm:$0xff pattern:$0x73625140] }
  0x88   :  { %v542_v43 = vld [vmem:[#allocation2 + $0xca0] sm:$0xff]  ;;  %781 = vmatpush.msrb.mxu1 %v478_v42  ;;  %v2049_v22 = vld.sshfl [vmem:[#allocation1 + $0x20] sm:$0xff pattern:$0x73625140]  ;;  %v167_v41 = vld [vmem:[#allocation2 + $0xe8] sm:$0xff] }
  0x89   :  { %v610_v44 = vld [vmem:[#allocation2 + $0xec0] sm:$0xff]  ;;  %801 = vmatpush.msrb.mxu2 %v542_v43  ;;  %v2052_v23 = vld.sshfl [vmem:[#allocation1 + $0x38] sm:$0xff pattern:$0x73625140]  ;;  %v231_v42 = vld [vmem:[#allocation2 + $0x2e8] sm:$0xff] }
  0x8a   :  { %v410_v45 = vld [vmem:[#allocation2 + $0x880] sm:$0xff]  ;;  %820 = vmatpush.msrb.mxu3 %v610_v44  ;;  %v295_v43 = vld [vmem:[#allocation2 + $0x4e8] sm:$0xff] }
  0x8b   :  { %v474_v46 = vld [vmem:[#allocation2 + $0xa80] sm:$0xff]  ;;  %762 = vmatpush.msrb.mxu0 %v410_v45  ;;  %v363_v44 = vld [vmem:[#allocation2 + $0x708] sm:$0xff] }
  0x8c   :  { %v538_v47 = vld [vmem:[#allocation2 + $0xc80] sm:$0xff]  ;;  %782 = vmatpush.msrb.mxu1 %v474_v46  ;;  %v163_v45 = vld [vmem:[#allocation2 + $0xc8] sm:$0xff] }
  0x8d   :  { %v606_v48 = vld [vmem:[#allocation2 + $0xea0] sm:$0xff]  ;;  %802 = vmatpush.msrb.mxu2 %v538_v47  ;;  %v227_v46 = vld [vmem:[#allocation2 + $0x2c8] sm:$0xff] }
  0x8e   :  { %v406_v49 = vld [vmem:[#allocation2 + $0x860] sm:$0xff]  ;;  %821 = vmatpush.msrb.mxu3 %v606_v48  ;;  %v291_v47 = vld [vmem:[#allocation2 + $0x4c8] sm:$0xff] }
  0x8f   :  { %v470_v50 = vld [vmem:[#allocation2 + $0xa60] sm:$0xff]  ;;  %763 = vmatpush.msrb.mxu0 %v406_v49  ;;  %v359_v48 = vld [vmem:[#allocation2 + $0x6e8] sm:$0xff] }
  0x90   :  { %v534_v51 = vld [vmem:[#allocation2 + $0xc60] sm:$0xff]  ;;  %783 = vmatpush.msrb.mxu1 %v470_v50  ;;  %v159_v49 = vld [vmem:[#allocation2 + $0xa8] sm:$0xff] }
  0x91   :  { %v602_v52 = vld [vmem:[#allocation2 + $0xe80] sm:$0xff]  ;;  %803 = vmatpush.msrb.mxu2 %v534_v51  ;;  %v223_v50 = vld [vmem:[#allocation2 + $0x2a8] sm:$0xff] }
  0x92   :  { %v402_v53 = vld [vmem:[#allocation2 + $0x840] sm:$0xff]  ;;  %822 = vmatpush.msrb.mxu3 %v602_v52  ;;  %v287_v51 = vld [vmem:[#allocation2 + $0x4a8] sm:$0xff] }
  0x93   :  { %v466_v54 = vld [vmem:[#allocation2 + $0xa40] sm:$0xff]  ;;  %764 = vmatpush.msrb.mxu0 %v402_v53  ;;  %v355_v52 = vld [vmem:[#allocation2 + $0x6c8] sm:$0xff] }
  0x94   :  { %v530_v55 = vld [vmem:[#allocation2 + $0xc40] sm:$0xff]  ;;  %784 = vmatpush.msrb.mxu1 %v466_v54  ;;  %v155_v53 = vld [vmem:[#allocation2 + $0x88] sm:$0xff] }
  0x95   :  { %v598_v56 = vld [vmem:[#allocation2 + $0xe60] sm:$0xff]  ;;  %804 = vmatpush.msrb.mxu2 %v530_v55  ;;  %v219_v54 = vld [vmem:[#allocation2 + $0x288] sm:$0xff] }
  0x96   :  { %v398_v57 = vld [vmem:[#allocation2 + $0x820] sm:$0xff]  ;;  %823 = vmatpush.msrb.mxu3 %v598_v56  ;;  %v283_v55 = vld [vmem:[#allocation2 + $0x488] sm:$0xff] }
  0x97   :  { %v462_v58 = vld [vmem:[#allocation2 + $0xa20] sm:$0xff]  ;;  %765 = vmatpush.msrb.mxu0 %v398_v57  ;;  %v351_v56 = vld [vmem:[#allocation2 + $0x6a8] sm:$0xff] }
  0x98   :  { %v526_v59 = vld [vmem:[#allocation2 + $0xc20] sm:$0xff]  ;;  %785 = vmatpush.msrb.mxu1 %v462_v58  ;;  %v151_v57 = vld [vmem:[#allocation2 + $0x68] sm:$0xff] }
  0x99   :  { %v594_v60 = vld [vmem:[#allocation2 + $0xe40] sm:$0xff]  ;;  %805 = vmatpush.msrb.mxu2 %v526_v59  ;;  %v215_v58 = vld [vmem:[#allocation2 + $0x268] sm:$0xff] }
  0x9a   :  { %v394_v62 = vld [vmem:[#allocation2 + $0x800] sm:$0xff]  ;;  %824 = vmatpush.msrb.mxu3 %v594_v60  ;;  %v279_v59 = vld [vmem:[#allocation2 + $0x468] sm:$0xff] }
  0x9b   :  { %v458_v63 = vld [vmem:[#allocation2 + $0xa00] sm:$0xff]  ;;  %766 = vmatpush.msrb.mxu0 %v394_v62  ;;  %v347_v60 = vld [vmem:[#allocation2 + $0x688] sm:$0xff] }
  0x9c   :  { %v522_v0 = vld [vmem:[#allocation2 + $0xc00] sm:$0xff]  ;;  %786 = vmatpush.msrb.mxu1 %v458_v63  ;;  %767 = vmatmul.f32.vlgmr.msrb.gmra.mxu0 %v2049_v22  ;;  %v147_v62 = vld [vmem:[#allocation2 + $0x48] sm:$0xff] }
  0x9d   :  { %v590_v1 = vld [vmem:[#allocation2 + $0xe20] sm:$0xff]  ;;  %806 = vmatpush.msrb.mxu2 %v522_v0  ;;  %831 = vmatpush.msra.mxu0 %v199_v5  ;;  %v211_v63 = vld [vmem:[#allocation2 + $0x248] sm:$0xff] }
  0x9e   :  { %v2040_v3 = vld.sshfl [vmem:[#allocation1 + $0x8] sm:$0xff pattern:$0x73625140]  ;;  %825 = vmatpush.msrb.mxu3 %v590_v1  ;;  %807 = vmatmul.f32.vlgmr.msrb.gmra.mxu2 %v2047_v17  ;;  %v275_v0 = vld [vmem:[#allocation2 + $0x448] sm:$0xff] }
  0x9f   :  { %v586_v8 = vld [vmem:[#allocation2 + $0xe00] sm:$0xff]  ;;  %707 = vmatmul.f32.vlgmr.msra.gmra.mxu1 %v2040_v3  ;;  %871 = vmatpush.msra.mxu2 %v327_v7  ;;  %v343_v1 = vld [vmem:[#allocation2 + $0x668] sm:$0xff] }
  0xa0   :  { %851 = vmatpush.msra.mxu1 %v263_v6  ;;  %826 = vmatpush.msrb.mxu3 %v586_v8  ;;  %v2055_v28 = vld.sshfl [vmem:[#allocation1 + $0x28] sm:$0xff pattern:$0x73625140]  ;;  %v143_v5 = vld [vmem:[#allocation2 + $0x28] sm:$0xff] }
  0xa1   :  { %832 = vmatpush.msra.mxu0 %v195_v9  ;;  %872 = vmatpush.msra.mxu2 %v323_v11  ;;  %v207_v6 = vld [vmem:[#allocation2 + $0x228] sm:$0xff] }
  0xa2   :  { %852 = vmatpush.msra.mxu1 %v259_v10  ;;  %891 = vmatpush.msra.mxu3 %v391_v12  ;;  %v271_v7 = vld [vmem:[#allocation2 + $0x428] sm:$0xff] }
  0xa3   :  { %833 = vmatpush.msra.mxu0 %v191_v13  ;;  %873 = vmatpush.msra.mxu2 %v319_v15  ;;  %v339_v8 = vld [vmem:[#allocation2 + $0x648] sm:$0xff] }
  0xa4   :  { %853 = vmatpush.msra.mxu1 %v255_v14  ;;  %892 = vmatpush.msra.mxu3 %v387_v16  ;;  %v139_v9 = vld [vmem:[#allocation2 + $0x8] sm:$0xff] }
  0xa5   :  { %834 = vmatpush.msra.mxu0 %v187_v18  ;;  %874 = vmatpush.msra.mxu2 %v315_v20  ;;  %v203_v10 = vld [vmem:[#allocation2 + $0x208] sm:$0xff] }
  0xa6   :  { %854 = vmatpush.msra.mxu1 %v251_v19  ;;  %893 = vmatpush.msra.mxu3 %v383_v21  ;;  %v267_v11 = vld [vmem:[#allocation2 + $0x408] sm:$0xff] }
  0xa7   :  { %827 = vmatmul.f32.vlgmr.msrb.gmra.mxu3 %v2052_v23  ;;  %835 = vmatpush.msra.mxu0 %v183_v24  ;;  %v335_v12 = vld [vmem:[#allocation2 + $0x628] sm:$0xff] }
  0xa8   :  { %855 = vmatpush.msra.mxu1 %v247_v25  ;;  %875 = vmatpush.msra.mxu2 %v311_v26  ;;  %v455_v13 = vld [vmem:[#allocation2 + $0x9e8] sm:$0xff] }
  0xa9   :  { %894 = vmatpush.msra.mxu3 %v379_v27  ;;  %787 = vmatmul.f32.vlgmr.msrb.gmra.mxu1 %v2055_v28  ;;  %v519_v14 = vld [vmem:[#allocation2 + $0xbe8] sm:$0xff] }
  0xaa   :  { %836 = vmatpush.msra.mxu0 %v179_v29  ;;  %856 = vmatpush.msra.mxu1 %v243_v30  ;;  %v583_v15 = vld [vmem:[#allocation2 + $0xde8] sm:$0xff] }
  0xab   :  { %876 = vmatpush.msra.mxu2 %v307_v31  ;;  %895 = vmatpush.msra.mxu3 %v375_v32  ;;  %v331_v16 = vld [vmem:[#allocation2 + $0x608] sm:$0xff] }
  0xac   :  { %837 = vmatpush.msra.mxu0 %v175_v33  ;;  %857 = vmatpush.msra.mxu1 %v239_v34  ;;  %v451_v18 = vld [vmem:[#allocation2 + $0x9c8] sm:$0xff] }
  0xad   :  { %877 = vmatpush.msra.mxu2 %v303_v35  ;;  %896 = vmatpush.msra.mxu3 %v371_v36  ;;  %v515_v19 = vld [vmem:[#allocation2 + $0xbc8] sm:$0xff] }
  0xae   :  { %838 = vmatpush.msra.mxu0 %v171_v37  ;;  %858 = vmatpush.msra.mxu1 %v235_v38  ;;  %v579_v20 = vld [vmem:[#allocation2 + $0xdc8] sm:$0xff] }
  0xaf   :  { %878 = vmatpush.msra.mxu2 %v299_v39  ;;  %897 = vmatpush.msra.mxu3 %v367_v40  ;;  %v647_v21 = vld [vmem:[#allocation2 + $0xfe8] sm:$0xff] }
  0xb0   :  { %839 = vmatpush.msra.mxu0 %v167_v41  ;;  %859 = vmatpush.msra.mxu1 %v231_v42  ;;  %v447_v24 = vld [vmem:[#allocation2 + $0x9a8] sm:$0xff] }
  0xb1   :  { %879 = vmatpush.msra.mxu2 %v295_v43  ;;  %898 = vmatpush.msra.mxu3 %v363_v44  ;;  %v511_v25 = vld [vmem:[#allocation2 + $0xba8] sm:$0xff] }
  0xb2   :  { %840 = vmatpush.msra.mxu0 %v163_v45  ;;  %860 = vmatpush.msra.mxu1 %v227_v46  ;;  %v575_v26 = vld [vmem:[#allocation2 + $0xda8] sm:$0xff] }
  0xb3   :  { %880 = vmatpush.msra.mxu2 %v291_v47  ;;  %899 = vmatpush.msra.mxu3 %v359_v48  ;;  %v643_v27 = vld [vmem:[#allocation2 + $0xfc8] sm:$0xff] }
  0xb4   :  { %841 = vmatpush.msra.mxu0 %v159_v49  ;;  %861 = vmatpush.msra.mxu1 %v223_v50  ;;  %v443_v29 = vld [vmem:[#allocation2 + $0x988] sm:$0xff] }
  0xb5   :  { %881 = vmatpush.msra.mxu2 %v287_v51  ;;  %900 = vmatpush.msra.mxu3 %v355_v52  ;;  %v507_v30 = vld [vmem:[#allocation2 + $0xb88] sm:$0xff] }
  0xb6   :  { %842 = vmatpush.msra.mxu0 %v155_v53  ;;  %862 = vmatpush.msra.mxu1 %v219_v54  ;;  %v571_v31 = vld [vmem:[#allocation2 + $0xd88] sm:$0xff] }
  0xb7   :  { %882 = vmatpush.msra.mxu2 %v283_v55  ;;  %901 = vmatpush.msra.mxu3 %v351_v56  ;;  %v639_v32 = vld [vmem:[#allocation2 + $0xfa8] sm:$0xff] }
  0xb8   :  { %843 = vmatpush.msra.mxu0 %v151_v57  ;;  %863 = vmatpush.msra.mxu1 %v215_v58  ;;  %v439_v33 = vld [vmem:[#allocation2 + $0x968] sm:$0xff] }
  0xb9   :  { %883 = vmatpush.msra.mxu2 %v279_v59  ;;  %902 = vmatpush.msra.mxu3 %v347_v60  ;;  %v503_v34 = vld [vmem:[#allocation2 + $0xb68] sm:$0xff] }
  0xba   :  { %844 = vmatpush.msra.mxu0 %v147_v62  ;;  %864 = vmatpush.msra.mxu1 %v211_v63  ;;  %v567_v35 = vld [vmem:[#allocation2 + $0xd68] sm:$0xff] }
  0xbb   :  { %884 = vmatpush.msra.mxu2 %v275_v0  ;;  %903 = vmatpush.msra.mxu3 %v343_v1  ;;  %v635_v36 = vld [vmem:[#allocation2 + $0xf88] sm:$0xff] }
  0xbc   :  { %845 = vmatpush.msra.mxu0 %v143_v5  ;;  %865 = vmatpush.msra.mxu1 %v207_v6  ;;  %v435_v37 = vld [vmem:[#allocation2 + $0x948] sm:$0xff] }
  0xbd   :  { %885 = vmatpush.msra.mxu2 %v271_v7  ;;  %904 = vmatpush.msra.mxu3 %v339_v8  ;;  %v499_v38 = vld [vmem:[#allocation2 + $0xb48] sm:$0xff] }
  0xbe   :  { %846 = vmatpush.msra.mxu0 %v139_v9  ;;  %866 = vmatpush.msra.mxu1 %v203_v10  ;;  %v563_v39 = vld [vmem:[#allocation2 + $0xd48] sm:$0xff] }
  0xbf   :  { %886 = vmatpush.msra.mxu2 %v267_v11  ;;  %905 = vmatpush.msra.mxu3 %v335_v12  ;;  %v631_v40 = vld [vmem:[#allocation2 + $0xf68] sm:$0xff] }
  0xc0   :  { %911 = vmatpush.msrb.mxu0 %v455_v13  ;;  %931 = vmatpush.msrb.mxu1 %v519_v14  ;;  %v431_v41 = vld [vmem:[#allocation2 + $0x928] sm:$0xff] }
  0xc1   :  { %951 = vmatpush.msrb.mxu2 %v583_v15  ;;  %906 = vmatpush.msra.mxu3 %v331_v16  ;;  %v495_v42 = vld [vmem:[#allocation2 + $0xb28] sm:$0xff] }
  0xc2   :  { %912 = vmatpush.msrb.mxu0 %v451_v18  ;;  %932 = vmatpush.msrb.mxu1 %v515_v19  ;;  %v559_v43 = vld [vmem:[#allocation2 + $0xd28] sm:$0xff] }
  0xc3   :  { %952 = vmatpush.msrb.mxu2 %v579_v20  ;;  %971 = vmatpush.msrb.mxu3 %v647_v21  ;;  %v627_v44 = vld [vmem:[#allocation2 + $0xf48] sm:$0xff] }
  0xc4   :  { %913 = vmatpush.msrb.mxu0 %v447_v24  ;;  %933 = vmatpush.msrb.mxu1 %v511_v25  ;;  %v427_v45 = vld [vmem:[#allocation2 + $0x908] sm:$0xff]  ;;  %v200_v24 = vld [vmem:[#allocation2 + $0x1f0] sm:$0xff] }
  0xc5   :  { %953 = vmatpush.msrb.mxu2 %v575_v26  ;;  %972 = vmatpush.msrb.mxu3 %v643_v27  ;;  %v491_v46 = vld [vmem:[#allocation2 + $0xb08] sm:$0xff]  ;;  %v264_v25 = vld [vmem:[#allocation2 + $0x3f0] sm:$0xff] }
  0xc6   :  { %914 = vmatpush.msrb.mxu0 %v443_v29  ;;  %934 = vmatpush.msrb.mxu1 %v507_v30  ;;  %v555_v47 = vld [vmem:[#allocation2 + $0xd08] sm:$0xff]  ;;  %v328_v26 = vld [vmem:[#allocation2 + $0x5f0] sm:$0xff] }
  0xc7   :  { %954 = vmatpush.msrb.mxu2 %v571_v31  ;;  %973 = vmatpush.msrb.mxu3 %v639_v32  ;;  %v623_v48 = vld [vmem:[#allocation2 + $0xf28] sm:$0xff]  ;;  %v196_v29 = vld [vmem:[#allocation2 + $0x1d0] sm:$0xff] }
  0xc8   :  { %915 = vmatpush.msrb.mxu0 %v439_v33  ;;  %935 = vmatpush.msrb.mxu1 %v503_v34  ;;  %v423_v49 = vld [vmem:[#allocation2 + $0x8e8] sm:$0xff]  ;;  %v260_v30 = vld [vmem:[#allocation2 + $0x3d0] sm:$0xff] }
  0xc9   :  { %955 = vmatpush.msrb.mxu2 %v567_v35  ;;  %974 = vmatpush.msrb.mxu3 %v635_v36  ;;  %v487_v50 = vld [vmem:[#allocation2 + $0xae8] sm:$0xff]  ;;  %v324_v31 = vld [vmem:[#allocation2 + $0x5d0] sm:$0xff] }
  0xca   :  { %916 = vmatpush.msrb.mxu0 %v435_v37  ;;  %936 = vmatpush.msrb.mxu1 %v499_v38  ;;  %v551_v51 = vld [vmem:[#allocation2 + $0xce8] sm:$0xff]  ;;  %v192_v32 = vld [vmem:[#allocation2 + $0x1b0] sm:$0xff] }
  0xcb   :  { %956 = vmatpush.msrb.mxu2 %v563_v39  ;;  %975 = vmatpush.msrb.mxu3 %v631_v40  ;;  %v619_v52 = vld [vmem:[#allocation2 + $0xf08] sm:$0xff]  ;;  %v256_v33 = vld [vmem:[#allocation2 + $0x3b0] sm:$0xff] }
  0xcc   :  { %917 = vmatpush.msrb.mxu0 %v431_v41  ;;  %937 = vmatpush.msrb.mxu1 %v495_v42  ;;  %v419_v53 = vld [vmem:[#allocation2 + $0x8c8] sm:$0xff]  ;;  %v320_v34 = vld [vmem:[#allocation2 + $0x5b0] sm:$0xff] }
  0xcd   :  { %957 = vmatpush.msrb.mxu2 %v559_v43  ;;  %976 = vmatpush.msrb.mxu3 %v627_v44  ;;  %v483_v54 = vld [vmem:[#allocation2 + $0xac8] sm:$0xff]  ;;  %v188_v35 = vld [vmem:[#allocation2 + $0x190] sm:$0xff] }
  0xce   :  { %918 = vmatpush.msrb.mxu0 %v427_v45  ;;  %938 = vmatpush.msrb.mxu1 %v491_v46  ;;  %v547_v55 = vld [vmem:[#allocation2 + $0xcc8] sm:$0xff]  ;;  %v384_v36 = vld [vmem:[#allocation2 + $0x7b0] sm:$0xff] }
  0xcf   :  { %958 = vmatpush.msrb.mxu2 %v555_v47  ;;  %977 = vmatpush.msrb.mxu3 %v623_v48  ;;  %v615_v56 = vld [vmem:[#allocation2 + $0xee8] sm:$0xff]  ;;  %v184_v37 = vld [vmem:[#allocation2 + $0x170] sm:$0xff] }
  0xd0   :  { %919 = vmatpush.msrb.mxu0 %v423_v49  ;;  %939 = vmatpush.msrb.mxu1 %v487_v50  ;;  %v415_v57 = vld [vmem:[#allocation2 + $0x8a8] sm:$0xff]  ;;  %v248_v38 = vld [vmem:[#allocation2 + $0x370] sm:$0xff] }
  0xd1   :  { %959 = vmatpush.msrb.mxu2 %v551_v51  ;;  %978 = vmatpush.msrb.mxu3 %v619_v52  ;;  %v479_v58 = vld [vmem:[#allocation2 + $0xaa8] sm:$0xff]  ;;  %v312_v39 = vld [vmem:[#allocation2 + $0x570] sm:$0xff] }
  0xd2   :  { %920 = vmatpush.msrb.mxu0 %v419_v53  ;;  %940 = vmatpush.msrb.mxu1 %v483_v54  ;;  %v543_v59 = vld [vmem:[#allocation2 + $0xca8] sm:$0xff]  ;;  %v380_v40 = vld [vmem:[#allocation2 + $0x790] sm:$0xff] }
  0xd3   :  { %v611_v60 = vld [vmem:[#allocation2 + $0xec8] sm:$0xff]  ;;  %960 = vmatpush.msrb.mxu2 %v547_v55  ;;  %979 = vmatpush.msrb.mxu3 %v615_v56  ;;  %v180_v41 = vld [vmem:[#allocation2 + $0x150] sm:$0xff] }
  0xd4   :  { %v411_v62 = vld [vmem:[#allocation2 + $0x888] sm:$0xff]  ;;  %921 = vmatpush.msrb.mxu0 %v415_v57  ;;  %941 = vmatpush.msrb.mxu1 %v479_v58  ;;  %v244_v42 = vld [vmem:[#allocation2 + $0x350] sm:$0xff] }
  0xd5   :  { %v475_v63 = vld [vmem:[#allocation2 + $0xa88] sm:$0xff]  ;;  %961 = vmatpush.msrb.mxu2 %v543_v59  ;;  %980 = vmatpush.msrb.mxu3 %v611_v60  ;;  %v308_v43 = vld [vmem:[#allocation2 + $0x550] sm:$0xff] }
  0xd6   :  { %v539_v0 = vld [vmem:[#allocation2 + $0xc88] sm:$0xff]  ;;  %922 = vmatpush.msrb.mxu0 %v411_v62  ;;  %942 = vmatpush.msrb.mxu1 %v475_v63  ;;  %v376_v44 = vld [vmem:[#allocation2 + $0x770] sm:$0xff] }
  0xd7   :  { %v607_v1 = vld [vmem:[#allocation2 + $0xea8] sm:$0xff]  ;;  %962 = vmatpush.msrb.mxu2 %v539_v0  ;;  %847 = vmatmul.f32.vlgmr.msra.gmra.mxu0 %v2037_v2  ;;  %v388_v2 = vld [vmem:[#allocation2 + $0x7d0] sm:$0xff] }
  0xd8   :  { %v407_v5 = vld [vmem:[#allocation2 + $0x868] sm:$0xff]  ;;  %981 = vmatpush.msrb.mxu3 %v607_v1  ;;  %887 = vmatmul.f32.vlgmr.msra.gmra.mxu2 %v2035_v61  ;;  %v392_v61 = vld [vmem:[#allocation2 + $0x7f0] sm:$0xff] }
  0xd9   :  { %v471_v6 = vld [vmem:[#allocation2 + $0xa68] sm:$0xff]  ;;  %923 = vmatpush.msrb.mxu0 %v407_v5  ;;  %867 = vmatmul.f32.vlgmr.msra.gmra.mxu1 %v2040_v3  ;;  %v252_v3 = vld [vmem:[#allocation2 + $0x390] sm:$0xff] }
  0xda   :  { %v535_v7 = vld [vmem:[#allocation2 + $0xc68] sm:$0xff]  ;;  %943 = vmatpush.msrb.mxu1 %v471_v6  ;;  %907 = vmatmul.f32.vlgmr.msra.gmra.mxu3 %v2042_v4  ;;  %v316_v4 = vld [vmem:[#allocation2 + $0x590] sm:$0xff] }
  0xdb   :  { %v603_v8 = vld [vmem:[#allocation2 + $0xe88] sm:$0xff]  ;;  %963 = vmatpush.msrb.mxu2 %v535_v7  ;;  %v240_v45 = vld [vmem:[#allocation2 + $0x330] sm:$0xff] }
  0xdc   :  { %v403_v9 = vld [vmem:[#allocation2 + $0x848] sm:$0xff]  ;;  %982 = vmatpush.msrb.mxu3 %v603_v8  ;;  %v304_v46 = vld [vmem:[#allocation2 + $0x530] sm:$0xff] }
  0xdd   :  { %v467_v10 = vld [vmem:[#allocation2 + $0xa48] sm:$0xff]  ;;  %924 = vmatpush.msrb.mxu0 %v403_v9  ;;  %v372_v47 = vld [vmem:[#allocation2 + $0x750] sm:$0xff] }
  0xde   :  { %v531_v11 = vld [vmem:[#allocation2 + $0xc48] sm:$0xff]  ;;  %944 = vmatpush.msrb.mxu1 %v467_v10  ;;  %v300_v48 = vld [vmem:[#allocation2 + $0x510] sm:$0xff] }
  0xdf   :  { %v599_v12 = vld [vmem:[#allocation2 + $0xe68] sm:$0xff]  ;;  %964 = vmatpush.msrb.mxu2 %v531_v11  ;;  %v368_v49 = vld [vmem:[#allocation2 + $0x730] sm:$0xff] }
  0xe0   :  { %v399_v13 = vld [vmem:[#allocation2 + $0x828] sm:$0xff]  ;;  %983 = vmatpush.msrb.mxu3 %v599_v12  ;;  %v168_v50 = vld [vmem:[#allocation2 + $0xf0] sm:$0xff] }
  0xe1   :  { %v463_v14 = vld [vmem:[#allocation2 + $0xa28] sm:$0xff]  ;;  %925 = vmatpush.msrb.mxu0 %v399_v13  ;;  %v232_v51 = vld [vmem:[#allocation2 + $0x2f0] sm:$0xff] }
  0xe2   :  { %v527_v15 = vld [vmem:[#allocation2 + $0xc28] sm:$0xff]  ;;  %945 = vmatpush.msrb.mxu1 %v463_v14  ;;  %v364_v52 = vld [vmem:[#allocation2 + $0x710] sm:$0xff] }
  0xe3   :  { %v595_v16 = vld [vmem:[#allocation2 + $0xe48] sm:$0xff]  ;;  %965 = vmatpush.msrb.mxu2 %v527_v15  ;;  %v164_v53 = vld [vmem:[#allocation2 + $0xd0] sm:$0xff] }
  0xe4   :  { %v395_v18 = vld [vmem:[#allocation2 + $0x808] sm:$0xff]  ;;  %984 = vmatpush.msrb.mxu3 %v595_v16  ;;  %v228_v54 = vld [vmem:[#allocation2 + $0x2d0] sm:$0xff] }
  0xe5   :  { %v459_v19 = vld [vmem:[#allocation2 + $0xa08] sm:$0xff]  ;;  %926 = vmatpush.msrb.mxu0 %v395_v18  ;;  %v292_v55 = vld [vmem:[#allocation2 + $0x4d0] sm:$0xff] }
  0xe6   :  { %v523_v20 = vld [vmem:[#allocation2 + $0xc08] sm:$0xff]  ;;  %946 = vmatpush.msrb.mxu1 %v459_v19  ;;  %927 = vmatmul.f32.vlgmr.msrb.gmra.mxu0 %v2049_v22  ;;  %v172_v22 = vld [vmem:[#allocation2 + $0x110] sm:$0xff] }
  0xe7   :  { %v591_v21 = vld [vmem:[#allocation2 + $0xe28] sm:$0xff]  ;;  %966 = vmatpush.msrb.mxu2 %v523_v20  ;;  %991 = vmatpush.msra.mxu0 %v200_v24  ;;  %v360_v56 = vld [vmem:[#allocation2 + $0x6f0] sm:$0xff] }
  0xe8   :  { %985 = vmatpush.msrb.mxu3 %v591_v21  ;;  %v587_v27 = vld [vmem:[#allocation2 + $0xe08] sm:$0xff]  ;;  %1011 = vmatpush.msra.mxu1 %v264_v25  ;;  %v160_v57 = vld [vmem:[#allocation2 + $0xb0] sm:$0xff] }
  0xe9   :  { %1031 = vmatpush.msra.mxu2 %v328_v26  ;;  %992 = vmatpush.msra.mxu0 %v196_v29  ;;  %v224_v58 = vld [vmem:[#allocation2 + $0x2b0] sm:$0xff] }
  0xea   :  { %986 = vmatpush.msrb.mxu3 %v587_v27  ;;  %1012 = vmatpush.msra.mxu1 %v260_v30  ;;  %v288_v59 = vld [vmem:[#allocation2 + $0x4b0] sm:$0xff] }
  0xeb   :  { %1032 = vmatpush.msra.mxu2 %v324_v31  ;;  %993 = vmatpush.msra.mxu0 %v192_v32  ;;  %v356_v60 = vld [vmem:[#allocation2 + $0x6d0] sm:$0xff] }
  0xec   :  { %1051 = vmatpush.msra.mxu3 %v392_v61  ;;  %1013 = vmatpush.msra.mxu1 %v256_v33  ;;  %v156_v62 = vld [vmem:[#allocation2 + $0x90] sm:$0xff] }
  0xed   :  { %1033 = vmatpush.msra.mxu2 %v320_v34  ;;  %994 = vmatpush.msra.mxu0 %v188_v35  ;;  %v220_v63 = vld [vmem:[#allocation2 + $0x290] sm:$0xff] }
  0xee   :  { %1052 = vmatpush.msra.mxu3 %v388_v2  ;;  %967 = vmatmul.f32.vlgmr.msrb.gmra.mxu2 %v2047_v17  ;;  %v176_v17 = vld [vmem:[#allocation2 + $0x130] sm:$0xff] }
  0xef   :  { %1014 = vmatpush.msra.mxu1 %v252_v3  ;;  %1034 = vmatpush.msra.mxu2 %v316_v4  ;;  %v284_v0 = vld [vmem:[#allocation2 + $0x490] sm:$0xff] }
  0xf0   :  { %1053 = vmatpush.msra.mxu3 %v384_v36  ;;  %995 = vmatpush.msra.mxu0 %v184_v37  ;;  %v352_v1 = vld [vmem:[#allocation2 + $0x6b0] sm:$0xff] }
  0xf1   :  { %987 = vmatmul.f32.vlgmr.msrb.gmra.mxu3 %v2052_v23  ;;  %1015 = vmatpush.msra.mxu1 %v248_v38  ;;  %v236_v23 = vld [vmem:[#allocation2 + $0x310] sm:$0xff] }
  0xf2   :  { %1035 = vmatpush.msra.mxu2 %v312_v39  ;;  %1054 = vmatpush.msra.mxu3 %v380_v40  ;;  %v152_v5 = vld [vmem:[#allocation2 + $0x70] sm:$0xff] }
  0xf3   :  { %947 = vmatmul.f32.vlgmr.msrb.gmra.mxu1 %v2055_v28  ;;  %996 = vmatpush.msra.mxu0 %v180_v41  ;;  %v296_v28 = vld [vmem:[#allocation2 + $0x4f0] sm:$0xff] }
  0xf4   :  { %1016 = vmatpush.msra.mxu1 %v244_v42  ;;  %1036 = vmatpush.msra.mxu2 %v308_v43  ;;  %v216_v6 = vld [vmem:[#allocation2 + $0x270] sm:$0xff] }
  0xf5   :  { %1055 = vmatpush.msra.mxu3 %v376_v44  ;;  %997 = vmatpush.msra.mxu0 %v176_v17  ;;  %v280_v7 = vld [vmem:[#allocation2 + $0x470] sm:$0xff] }
  0xf6   :  { %1017 = vmatpush.msra.mxu1 %v240_v45  ;;  %1037 = vmatpush.msra.mxu2 %v304_v46  ;;  %v348_v8 = vld [vmem:[#allocation2 + $0x690] sm:$0xff] }
  0xf7   :  { %1056 = vmatpush.msra.mxu3 %v372_v47  ;;  %998 = vmatpush.msra.mxu0 %v172_v22  ;;  %v148_v9 = vld [vmem:[#allocation2 + $0x50] sm:$0xff] }
  0xf8   :  { %1018 = vmatpush.msra.mxu1 %v236_v23  ;;  %1038 = vmatpush.msra.mxu2 %v300_v48  ;;  %v212_v10 = vld [vmem:[#allocation2 + $0x250] sm:$0xff] }
  0xf9   :  { %1057 = vmatpush.msra.mxu3 %v368_v49  ;;  %999 = vmatpush.msra.mxu0 %v168_v50  ;;  %v276_v11 = vld [vmem:[#allocation2 + $0x450] sm:$0xff] }
  0xfa   :  { %1019 = vmatpush.msra.mxu1 %v232_v51  ;;  %1039 = vmatpush.msra.mxu2 %v296_v28  ;;  %v344_v12 = vld [vmem:[#allocation2 + $0x670] sm:$0xff] }
  0xfb   :  { %1058 = vmatpush.msra.mxu3 %v364_v52  ;;  %1000 = vmatpush.msra.mxu0 %v164_v53  ;;  %v144_v13 = vld [vmem:[#allocation2 + $0x30] sm:$0xff] }
  0xfc   :  { %1020 = vmatpush.msra.mxu1 %v228_v54  ;;  %1040 = vmatpush.msra.mxu2 %v292_v55  ;;  %v208_v14 = vld [vmem:[#allocation2 + $0x230] sm:$0xff] }
  0xfd   :  { %1059 = vmatpush.msra.mxu3 %v360_v56  ;;  %1001 = vmatpush.msra.mxu0 %v160_v57  ;;  %v272_v15 = vld [vmem:[#allocation2 + $0x430] sm:$0xff] }
  0xfe   :  { %1021 = vmatpush.msra.mxu1 %v224_v58  ;;  %1041 = vmatpush.msra.mxu2 %v288_v59  ;;  %v340_v16 = vld [vmem:[#allocation2 + $0x650] sm:$0xff] }
  0xff   :  { %1060 = vmatpush.msra.mxu3 %v356_v60  ;;  %1002 = vmatpush.msra.mxu0 %v156_v62  ;;  %v140_v18 = vld [vmem:[#allocation2 + $0x10] sm:$0xff] }
 0x100   :  { %1022 = vmatpush.msra.mxu1 %v220_v63  ;;  %1042 = vmatpush.msra.mxu2 %v284_v0  ;;  %v204_v19 = vld [vmem:[#allocation2 + $0x210] sm:$0xff] }
 0x101   :  { %1061 = vmatpush.msra.mxu3 %v352_v1  ;;  %1003 = vmatpush.msra.mxu0 %v152_v5  ;;  %v268_v20 = vld [vmem:[#allocation2 + $0x410] sm:$0xff] }
 0x102   :  { %1023 = vmatpush.msra.mxu1 %v216_v6  ;;  %1043 = vmatpush.msra.mxu2 %v280_v7  ;;  %v336_v21 = vld [vmem:[#allocation2 + $0x630] sm:$0xff] }
 0x103   :  { %1062 = vmatpush.msra.mxu3 %v348_v8  ;;  %1004 = vmatpush.msra.mxu0 %v148_v9  ;;  %v456_v24 = vld [vmem:[#allocation2 + $0x9f0] sm:$0xff]  ;;  %v2067_v9 = vld.sshfl [vmem:[#allocation1 + $0x10] sm:$0xff pattern:$0x73625140] }
 0x104   :  { %1024 = vmatpush.msra.mxu1 %v212_v10  ;;  %1044 = vmatpush.msra.mxu2 %v276_v11  ;;  %v520_v25 = vld [vmem:[#allocation2 + $0xbf0] sm:$0xff] }
 0x105   :  { %1063 = vmatpush.msra.mxu3 %v344_v12  ;;  %1005 = vmatpush.msra.mxu0 %v144_v13  ;;  %v584_v26 = vld [vmem:[#allocation2 + $0xdf0] sm:$0xff]  ;;  %v2070_v13 = vld.sshfl [vmem:[#allocation1] sm:$0xff pattern:$0x73625140] }
 0x106   :  { %1025 = vmatpush.msra.mxu1 %v208_v14  ;;  %1045 = vmatpush.msra.mxu2 %v272_v15  ;;  %v332_v27 = vld [vmem:[#allocation2 + $0x610] sm:$0xff] }
 0x107   :  { %1064 = vmatpush.msra.mxu3 %v340_v16  ;;  %1006 = vmatpush.msra.mxu0 %v140_v18  ;;  %v452_v29 = vld [vmem:[#allocation2 + $0x9d0] sm:$0xff] }
 0x108   :  { %1026 = vmatpush.msra.mxu1 %v204_v19  ;;  %1046 = vmatpush.msra.mxu2 %v268_v20  ;;  %v516_v30 = vld [vmem:[#allocation2 + $0xbd0] sm:$0xff] }
 0x109   :  { %1065 = vmatpush.msra.mxu3 %v336_v21  ;;  %1071 = vmatpush.msrb.mxu0 %v456_v24  ;;  %v580_v31 = vld [vmem:[#allocation2 + $0xdd0] sm:$0xff]  ;;  %v2076_v21 = vld.sshfl [vmem:[#allocation1 + $0x8] sm:$0xff pattern:$0x73625140] }
 0x10a   :  { %1091 = vmatpush.msrb.mxu1 %v520_v25  ;;  %v648_v61 = vld [vmem:[#allocation2 + $0xff0] sm:$0xff]  ;;  %1111 = vmatpush.msrb.mxu2 %v584_v26 }
 0x10b   :  { %1066 = vmatpush.msra.mxu3 %v332_v27  ;;  %v448_v32 = vld [vmem:[#allocation2 + $0x9b0] sm:$0xff]  ;;  %1072 = vmatpush.msrb.mxu0 %v452_v29  ;;  %v201_v29 = vld [vmem:[#allocation2 + $0x1f8] sm:$0xff] }
 0x10c   :  { %v512_v33 = vld [vmem:[#allocation2 + $0xbb0] sm:$0xff]  ;;  %1092 = vmatpush.msrb.mxu1 %v516_v30  ;;  %1112 = vmatpush.msrb.mxu2 %v580_v31  ;;  %v265_v30 = vld [vmem:[#allocation2 + $0x3f8] sm:$0xff] }
 0x10d   :  { %v576_v34 = vld [vmem:[#allocation2 + $0xdb0] sm:$0xff]  ;;  %1131 = vmatpush.msrb.mxu3 %v648_v61  ;;  %1073 = vmatpush.msrb.mxu0 %v448_v32  ;;  %v329_v31 = vld [vmem:[#allocation2 + $0x5f8] sm:$0xff]  ;;  %v2079_v32 = vld.sshfl [vmem:[#allocation1 + $0x30] sm:$0xff pattern:$0x73625140] }
 0x10e   :  { %v644_v2 = vld [vmem:[#allocation2 + $0xfd0] sm:$0xff]  ;;  %1093 = vmatpush.msrb.mxu1 %v512_v33  ;;  %1113 = vmatpush.msrb.mxu2 %v576_v34  ;;  %v197_v33 = vld [vmem:[#allocation2 + $0x1d8] sm:$0xff] }
 0x10f   :  { %v444_v35 = vld [vmem:[#allocation2 + $0x990] sm:$0xff]  ;;  %1132 = vmatpush.msrb.mxu3 %v644_v2  ;;  %1047 = vmatmul.f32.vlgmr.msra.gmra.mxu2 %v2067_v9  ;;  %v261_v34 = vld [vmem:[#allocation2 + $0x3d8] sm:$0xff] }
 0x110   :  { %v508_v3 = vld [vmem:[#allocation2 + $0xb90] sm:$0xff]  ;;  %1074 = vmatpush.msrb.mxu0 %v444_v35  ;;  %1027 = vmatmul.f32.vlgmr.msra.gmra.mxu1 %v2076_v21  ;;  %v325_v2 = vld [vmem:[#allocation2 + $0x5d8] sm:$0xff] }
 0x111   :  { %v572_v4 = vld [vmem:[#allocation2 + $0xd90] sm:$0xff]  ;;  %1094 = vmatpush.msrb.mxu1 %v508_v3  ;;  %1007 = vmatmul.f32.vlgmr.msra.gmra.mxu0 %v2070_v13  ;;  %v2082_v35 = vld.sshfl [vmem:[#allocation1 + $0x20] sm:$0xff pattern:$0x73625140] }
 0x112   :  { %v640_v36 = vld [vmem:[#allocation2 + $0xfb0] sm:$0xff]  ;;  %1114 = vmatpush.msrb.mxu2 %v572_v4  ;;  %v393_v3 = vld [vmem:[#allocation2 + $0x7f8] sm:$0xff] }
 0x113   :  { %v440_v37 = vld [vmem:[#allocation2 + $0x970] sm:$0xff]  ;;  %1133 = vmatpush.msrb.mxu3 %v640_v36  ;;  %v193_v36 = vld [vmem:[#allocation2 + $0x1b8] sm:$0xff] }
 0x114   :  { %v504_v38 = vld [vmem:[#allocation2 + $0xb70] sm:$0xff]  ;;  %1075 = vmatpush.msrb.mxu0 %v440_v37  ;;  %v257_v37 = vld [vmem:[#allocation2 + $0x3b8] sm:$0xff] }
 0x115   :  { %v568_v39 = vld [vmem:[#allocation2 + $0xd70] sm:$0xff]  ;;  %1095 = vmatpush.msrb.mxu1 %v504_v38  ;;  %v321_v38 = vld [vmem:[#allocation2 + $0x5b8] sm:$0xff] }
 0x116   :  { %v636_v40 = vld [vmem:[#allocation2 + $0xf90] sm:$0xff]  ;;  %1115 = vmatpush.msrb.mxu2 %v568_v39  ;;  %v389_v39 = vld [vmem:[#allocation2 + $0x7d8] sm:$0xff] }
 0x117   :  { %v436_v41 = vld [vmem:[#allocation2 + $0x950] sm:$0xff]  ;;  %1134 = vmatpush.msrb.mxu3 %v636_v40  ;;  %v2088_v40 = vld.sshfl [vmem:[#allocation1 + $0x28] sm:$0xff pattern:$0x73625140] }
 0x118   :  { %v500_v42 = vld [vmem:[#allocation2 + $0xb50] sm:$0xff]  ;;  %1076 = vmatpush.msrb.mxu0 %v436_v41  ;;  %v189_v41 = vld [vmem:[#allocation2 + $0x198] sm:$0xff] }
 0x119   :  { %v564_v43 = vld [vmem:[#allocation2 + $0xd50] sm:$0xff]  ;;  %1096 = vmatpush.msrb.mxu1 %v500_v42  ;;  %v253_v42 = vld [vmem:[#allocation2 + $0x398] sm:$0xff] }
 0x11a   :  { %v632_v44 = vld [vmem:[#allocation2 + $0xf70] sm:$0xff]  ;;  %1116 = vmatpush.msrb.mxu2 %v564_v43  ;;  %v317_v43 = vld [vmem:[#allocation2 + $0x598] sm:$0xff] }
 0x11b   :  { %v432_v17 = vld [vmem:[#allocation2 + $0x930] sm:$0xff]  ;;  %1135 = vmatpush.msrb.mxu3 %v632_v44  ;;  %v385_v44 = vld [vmem:[#allocation2 + $0x7b8] sm:$0xff] }
 0x11c   :  { %v496_v45 = vld [vmem:[#allocation2 + $0xb30] sm:$0xff]  ;;  %1077 = vmatpush.msrb.mxu0 %v432_v17  ;;  %v185_v17 = vld [vmem:[#allocation2 + $0x178] sm:$0xff] }
 0x11d   :  { %v560_v46 = vld [vmem:[#allocation2 + $0xd30] sm:$0xff]  ;;  %1097 = vmatpush.msrb.mxu1 %v496_v45  ;;  %v249_v45 = vld [vmem:[#allocation2 + $0x378] sm:$0xff] }
 0x11e   :  { %v628_v47 = vld [vmem:[#allocation2 + $0xf50] sm:$0xff]  ;;  %1117 = vmatpush.msrb.mxu2 %v560_v46  ;;  %v313_v46 = vld [vmem:[#allocation2 + $0x578] sm:$0xff] }
 0x11f   :  { %v428_v22 = vld [vmem:[#allocation2 + $0x910] sm:$0xff]  ;;  %1136 = vmatpush.msrb.mxu3 %v628_v47  ;;  %v381_v47 = vld [vmem:[#allocation2 + $0x798] sm:$0xff] }
 0x120   :  { %v492_v23 = vld [vmem:[#allocation2 + $0xb10] sm:$0xff]  ;;  %1078 = vmatpush.msrb.mxu0 %v428_v22  ;;  %v181_v22 = vld [vmem:[#allocation2 + $0x158] sm:$0xff] }
 0x121   :  { %v556_v48 = vld [vmem:[#allocation2 + $0xd10] sm:$0xff]  ;;  %1098 = vmatpush.msrb.mxu1 %v492_v23  ;;  %v245_v23 = vld [vmem:[#allocation2 + $0x358] sm:$0xff] }
 0x122   :  { %v624_v49 = vld [vmem:[#allocation2 + $0xf30] sm:$0xff]  ;;  %1118 = vmatpush.msrb.mxu2 %v556_v48  ;;  %v309_v48 = vld [vmem:[#allocation2 + $0x558] sm:$0xff] }
 0x123   :  { %v424_v50 = vld [vmem:[#allocation2 + $0x8f0] sm:$0xff]  ;;  %1137 = vmatpush.msrb.mxu3 %v624_v49  ;;  %v377_v49 = vld [vmem:[#allocation2 + $0x778] sm:$0xff] }
 0x124   :  { %v488_v51 = vld [vmem:[#allocation2 + $0xaf0] sm:$0xff]  ;;  %1079 = vmatpush.msrb.mxu0 %v424_v50  ;;  %v177_v50 = vld [vmem:[#allocation2 + $0x138] sm:$0xff] }
 0x125   :  { %v552_v28 = vld [vmem:[#allocation2 + $0xcf0] sm:$0xff]  ;;  %1099 = vmatpush.msrb.mxu1 %v488_v51  ;;  %v241_v51 = vld [vmem:[#allocation2 + $0x338] sm:$0xff] }
 0x126   :  { %v620_v52 = vld [vmem:[#allocation2 + $0xf10] sm:$0xff]  ;;  %1119 = vmatpush.msrb.mxu2 %v552_v28  ;;  %v305_v28 = vld [vmem:[#allocation2 + $0x538] sm:$0xff] }
 0x127   :  { %v420_v53 = vld [vmem:[#allocation2 + $0x8d0] sm:$0xff]  ;;  %1138 = vmatpush.msrb.mxu3 %v620_v52  ;;  %v373_v52 = vld [vmem:[#allocation2 + $0x758] sm:$0xff] }
 0x128   :  { %v484_v54 = vld [vmem:[#allocation2 + $0xad0] sm:$0xff]  ;;  %1080 = vmatpush.msrb.mxu0 %v420_v53  ;;  %v173_v53 = vld [vmem:[#allocation2 + $0x118] sm:$0xff] }
 0x129   :  { %v548_v55 = vld [vmem:[#allocation2 + $0xcd0] sm:$0xff]  ;;  %1100 = vmatpush.msrb.mxu1 %v484_v54  ;;  %v237_v54 = vld [vmem:[#allocation2 + $0x318] sm:$0xff] }
 0x12a   :  { %v616_v56 = vld [vmem:[#allocation2 + $0xef0] sm:$0xff]  ;;  %1120 = vmatpush.msrb.mxu2 %v548_v55  ;;  %v301_v55 = vld [vmem:[#allocation2 + $0x518] sm:$0xff] }
 0x12b   :  { %v416_v57 = vld [vmem:[#allocation2 + $0x8b0] sm:$0xff]  ;;  %1139 = vmatpush.msrb.mxu3 %v616_v56  ;;  %v369_v56 = vld [vmem:[#allocation2 + $0x738] sm:$0xff] }
 0x12c   :  { %v480_v58 = vld [vmem:[#allocation2 + $0xab0] sm:$0xff]  ;;  %1081 = vmatpush.msrb.mxu0 %v416_v57  ;;  %v169_v57 = vld [vmem:[#allocation2 + $0xf8] sm:$0xff] }
 0x12d   :  { %v544_v59 = vld [vmem:[#allocation2 + $0xcb0] sm:$0xff]  ;;  %1101 = vmatpush.msrb.mxu1 %v480_v58  ;;  %v233_v58 = vld [vmem:[#allocation2 + $0x2f8] sm:$0xff] }
 0x12e   :  { %v612_v60 = vld [vmem:[#allocation2 + $0xed0] sm:$0xff]  ;;  %1121 = vmatpush.msrb.mxu2 %v544_v59  ;;  %v297_v59 = vld [vmem:[#allocation2 + $0x4f8] sm:$0xff] }
 0x12f   :  { %v412_v62 = vld [vmem:[#allocation2 + $0x890] sm:$0xff]  ;;  %1140 = vmatpush.msrb.mxu3 %v612_v60  ;;  %v365_v60 = vld [vmem:[#allocation2 + $0x718] sm:$0xff] }
 0x130   :  { %v476_v63 = vld [vmem:[#allocation2 + $0xa90] sm:$0xff]  ;;  %1082 = vmatpush.msrb.mxu0 %v412_v62  ;;  %v165_v62 = vld [vmem:[#allocation2 + $0xd8] sm:$0xff] }
 0x131   :  { %v540_v0 = vld [vmem:[#allocation2 + $0xc90] sm:$0xff]  ;;  %1102 = vmatpush.msrb.mxu1 %v476_v63  ;;  %v229_v63 = vld [vmem:[#allocation2 + $0x2d8] sm:$0xff] }
 0x132   :  { %v608_v1 = vld [vmem:[#allocation2 + $0xeb0] sm:$0xff]  ;;  %1122 = vmatpush.msrb.mxu2 %v540_v0  ;;  %v293_v0 = vld [vmem:[#allocation2 + $0x4d8] sm:$0xff] }
 0x133   :  { %v408_v5 = vld [vmem:[#allocation2 + $0x870] sm:$0xff]  ;;  %1141 = vmatpush.msrb.mxu3 %v608_v1  ;;  %v361_v1 = vld [vmem:[#allocation2 + $0x6f8] sm:$0xff] }
 0x134   :  { %v472_v6 = vld [vmem:[#allocation2 + $0xa70] sm:$0xff]  ;;  %1083 = vmatpush.msrb.mxu0 %v408_v5  ;;  %v161_v5 = vld [vmem:[#allocation2 + $0xb8] sm:$0xff] }
 0x135   :  { %v536_v7 = vld [vmem:[#allocation2 + $0xc70] sm:$0xff]  ;;  %1103 = vmatpush.msrb.mxu1 %v472_v6  ;;  %v225_v6 = vld [vmem:[#allocation2 + $0x2b8] sm:$0xff] }
 0x136   :  { %v604_v8 = vld [vmem:[#allocation2 + $0xe90] sm:$0xff]  ;;  %1123 = vmatpush.msrb.mxu2 %v536_v7  ;;  %v289_v7 = vld [vmem:[#allocation2 + $0x4b8] sm:$0xff] }
 0x137   :  { %v404_v10 = vld [vmem:[#allocation2 + $0x850] sm:$0xff]  ;;  %1142 = vmatpush.msrb.mxu3 %v604_v8  ;;  %v357_v8 = vld [vmem:[#allocation2 + $0x6d8] sm:$0xff] }
 0x138   :  { %v468_v11 = vld [vmem:[#allocation2 + $0xa50] sm:$0xff]  ;;  %1084 = vmatpush.msrb.mxu0 %v404_v10  ;;  %v157_v10 = vld [vmem:[#allocation2 + $0x98] sm:$0xff] }
 0x139   :  { %v532_v12 = vld [vmem:[#allocation2 + $0xc50] sm:$0xff]  ;;  %1104 = vmatpush.msrb.mxu1 %v468_v11  ;;  %v221_v11 = vld [vmem:[#allocation2 + $0x298] sm:$0xff] }
 0x13a   :  { %v600_v14 = vld [vmem:[#allocation2 + $0xe70] sm:$0xff]  ;;  %1124 = vmatpush.msrb.mxu2 %v532_v12  ;;  %v285_v12 = vld [vmem:[#allocation2 + $0x498] sm:$0xff] }
 0x13b   :  { %v2073_v15 = vld.sshfl [vmem:[#allocation1 + $0x18] sm:$0xff pattern:$0x73625140]  ;;  %1143 = vmatpush.msrb.mxu3 %v600_v14  ;;  %v353_v14 = vld [vmem:[#allocation2 + $0x6b8] sm:$0xff] }
 0x13c   :  { %1067 = vmatmul.f32.vlgmr.msra.gmra.mxu3 %v2073_v15  ;;  %v400_v16 = vld [vmem:[#allocation2 + $0x830] sm:$0xff] }
 0x13d   :  { %v464_v18 = vld [vmem:[#allocation2 + $0xa30] sm:$0xff]  ;;  %1085 = vmatpush.msrb.mxu0 %v400_v16  ;;  %v153_v16 = vld [vmem:[#allocation2 + $0x78] sm:$0xff] }
 0x13e   :  { %v528_v19 = vld [vmem:[#allocation2 + $0xc30] sm:$0xff]  ;;  %1105 = vmatpush.msrb.mxu1 %v464_v18  ;;  %v217_v18 = vld [vmem:[#allocation2 + $0x278] sm:$0xff] }
 0x13f   :  { %v596_v20 = vld [vmem:[#allocation2 + $0xe50] sm:$0xff]  ;;  %1125 = vmatpush.msrb.mxu2 %v528_v19  ;;  %v281_v19 = vld [vmem:[#allocation2 + $0x478] sm:$0xff] }
 0x140   :  { %v396_v24 = vld [vmem:[#allocation2 + $0x810] sm:$0xff]  ;;  %1144 = vmatpush.msrb.mxu3 %v596_v20  ;;  %v349_v20 = vld [vmem:[#allocation2 + $0x698] sm:$0xff] }
 0x141   :  { %v460_v25 = vld [vmem:[#allocation2 + $0xa10] sm:$0xff]  ;;  %1086 = vmatpush.msrb.mxu0 %v396_v24  ;;  %v149_v24 = vld [vmem:[#allocation2 + $0x58] sm:$0xff] }
 0x142   :  { %v524_v26 = vld [vmem:[#allocation2 + $0xc10] sm:$0xff]  ;;  %1106 = vmatpush.msrb.mxu1 %v460_v25  ;;  %1087 = vmatmul.f32.vlgmr.msrb.gmra.mxu0 %v2082_v35  ;;  %v213_v25 = vld [vmem:[#allocation2 + $0x258] sm:$0xff] }
 0x143   :  { %v592_v27 = vld [vmem:[#allocation2 + $0xe30] sm:$0xff]  ;;  %1126 = vmatpush.msrb.mxu2 %v524_v26  ;;  %1151 = vmatpush.msra.mxu0 %v201_v29  ;;  %v277_v26 = vld [vmem:[#allocation2 + $0x458] sm:$0xff] }
 0x144   :  { %1145 = vmatpush.msrb.mxu3 %v592_v27  ;;  %v588_v61 = vld [vmem:[#allocation2 + $0xe10] sm:$0xff]  ;;  %1127 = vmatmul.f32.vlgmr.msrb.gmra.mxu2 %v2079_v32  ;;  %v345_v27 = vld [vmem:[#allocation2 + $0x678] sm:$0xff] }
 0x145   :  { %1171 = vmatpush.msra.mxu1 %v265_v30  ;;  %1191 = vmatpush.msra.mxu2 %v329_v31  ;;  %v2085_v4 = vld.sshfl [vmem:[#allocation1 + $0x38] sm:$0xff pattern:$0x73625140]  ;;  %v145_v29 = vld [vmem:[#allocation2 + $0x38] sm:$0xff] }
 0x146   :  { %1146 = vmatpush.msrb.mxu3 %v588_v61  ;;  %1152 = vmatpush.msra.mxu0 %v197_v33  ;;  %v209_v30 = vld [vmem:[#allocation2 + $0x238] sm:$0xff] }
 0x147   :  { %1147 = vmatmul.f32.vlgmr.msrb.gmra.mxu3 %v2085_v4  ;;  %1172 = vmatpush.msra.mxu1 %v261_v34  ;;  %v273_v31 = vld [vmem:[#allocation2 + $0x438] sm:$0xff] }
 0x148   :  { %1192 = vmatpush.msra.mxu2 %v325_v2  ;;  %1211 = vmatpush.msra.mxu3 %v393_v3  ;;  %v341_v61 = vld [vmem:[#allocation2 + $0x658] sm:$0xff] }
 0x149   :  { %1107 = vmatmul.f32.vlgmr.msrb.gmra.mxu1 %v2088_v40  ;;  %1153 = vmatpush.msra.mxu0 %v193_v36  ;;  %v141_v33 = vld [vmem:[#allocation2 + $0x18] sm:$0xff] }
 0x14a   :  { %1173 = vmatpush.msra.mxu1 %v257_v37  ;;  %1193 = vmatpush.msra.mxu2 %v321_v38  ;;  %v205_v34 = vld [vmem:[#allocation2 + $0x218] sm:$0xff] }
 0x14b   :  { %1212 = vmatpush.msra.mxu3 %v389_v39  ;;  %1154 = vmatpush.msra.mxu0 %v189_v41  ;;  %v269_v2 = vld [vmem:[#allocation2 + $0x418] sm:$0xff] }
 0x14c   :  { %1174 = vmatpush.msra.mxu1 %v253_v42  ;;  %1194 = vmatpush.msra.mxu2 %v317_v43  ;;  %v337_v3 = vld [vmem:[#allocation2 + $0x638] sm:$0xff] }
 0x14d   :  { %1213 = vmatpush.msra.mxu3 %v385_v44  ;;  %1155 = vmatpush.msra.mxu0 %v185_v17  ;;  %v457_v36 = vld [vmem:[#allocation2 + $0x9f8] sm:$0xff] }
 0x14e   :  { %1175 = vmatpush.msra.mxu1 %v249_v45  ;;  %1195 = vmatpush.msra.mxu2 %v313_v46  ;;  %v521_v37 = vld [vmem:[#allocation2 + $0xbf8] sm:$0xff] }
 0x14f   :  { %1214 = vmatpush.msra.mxu3 %v381_v47  ;;  %1156 = vmatpush.msra.mxu0 %v181_v22  ;;  %v585_v38 = vld [vmem:[#allocation2 + $0xdf8] sm:$0xff] }
 0x150   :  { %1176 = vmatpush.msra.mxu1 %v245_v23  ;;  %1196 = vmatpush.msra.mxu2 %v309_v48  ;;  %v333_v39 = vld [vmem:[#allocation2 + $0x618] sm:$0xff] }
 0x151   :  { %1215 = vmatpush.msra.mxu3 %v377_v49  ;;  %1157 = vmatpush.msra.mxu0 %v177_v50  ;;  %v453_v41 = vld [vmem:[#allocation2 + $0x9d8] sm:$0xff] }
 0x152   :  { %1177 = vmatpush.msra.mxu1 %v241_v51  ;;  %1197 = vmatpush.msra.mxu2 %v305_v28  ;;  %v517_v42 = vld [vmem:[#allocation2 + $0xbd8] sm:$0xff] }
 0x153   :  { %1216 = vmatpush.msra.mxu3 %v373_v52  ;;  %1158 = vmatpush.msra.mxu0 %v173_v53  ;;  %v581_v43 = vld [vmem:[#allocation2 + $0xdd8] sm:$0xff] }
 0x154   :  { %1178 = vmatpush.msra.mxu1 %v237_v54  ;;  %1198 = vmatpush.msra.mxu2 %v301_v55  ;;  %v649_v44 = vld [vmem:[#allocation2 + $0xff8] sm:$0xff]  ;;  %v2091_v55 = vpop.f32.mrf.mxu1 }
 0x155   :  { %1217 = vmatpush.msra.mxu3 %v369_v56  ;;  %1159 = vmatpush.msra.mxu0 %v169_v57  ;;  %v449_v17 = vld [vmem:[#allocation2 + $0x9b8] sm:$0xff] }
 0x156   :  { %1179 = vmatpush.msra.mxu1 %v233_v58  ;;  %1199 = vmatpush.msra.mxu2 %v297_v59  ;;  %v513_v45 = vld [vmem:[#allocation2 + $0xbb8] sm:$0xff] }
 0x157   :  { %1218 = vmatpush.msra.mxu3 %v365_v60  ;;  %1160 = vmatpush.msra.mxu0 %v165_v62  ;;  %v577_v46 = vld [vmem:[#allocation2 + $0xdb8] sm:$0xff]  ;;  %v2093_v60 = vpop.f32.mrf.mxu0 }
 0x158   :  { %1180 = vmatpush.msra.mxu1 %v229_v63  ;;  %1200 = vmatpush.msra.mxu2 %v293_v0  ;;  %v645_v47 = vld [vmem:[#allocation2 + $0xfd8] sm:$0xff] }
 0x159   :  { %1219 = vmatpush.msra.mxu3 %v361_v1  ;;  %1161 = vmatpush.msra.mxu0 %v161_v5  ;;  %v445_v22 = vld [vmem:[#allocation2 + $0x998] sm:$0xff]  ;;  %v2095_v5 = vpop.f32.mrf.mxu2 }
 0x15a   :  { %1181 = vmatpush.msra.mxu1 %v225_v6  ;;  %1201 = vmatpush.msra.mxu2 %v289_v7  ;;  %v509_v23 = vld [vmem:[#allocation2 + $0xb98] sm:$0xff] }
 0x15b   :  { %1220 = vmatpush.msra.mxu3 %v357_v8  ;;  %1162 = vmatpush.msra.mxu0 %v157_v10  ;;  %v573_v48 = vld [vmem:[#allocation2 + $0xd98] sm:$0xff] }
 0x15c   :  { %1182 = vmatpush.msra.mxu1 %v221_v11  ;;  %1202 = vmatpush.msra.mxu2 %v285_v12  ;;  %v641_v49 = vld [vmem:[#allocation2 + $0xfb8] sm:$0xff] }
 0x15d   :  { %1221 = vmatpush.msra.mxu3 %v353_v14  ;;  %1163 = vmatpush.msra.mxu0 %v153_v16  ;;  %v441_v50 = vld [vmem:[#allocation2 + $0x978] sm:$0xff] }
 0x15e   :  { %1183 = vmatpush.msra.mxu1 %v217_v18  ;;  %1203 = vmatpush.msra.mxu2 %v281_v19  ;;  %v505_v51 = vld [vmem:[#allocation2 + $0xb78] sm:$0xff]  ;;  %v2097_v18 = vpop.f32.mrf.mxu3 }
 0x15f   :  { %1222 = vmatpush.msra.mxu3 %v349_v20  ;;  %1164 = vmatpush.msra.mxu0 %v149_v24  ;;  %v569_v28 = vld [vmem:[#allocation2 + $0xd78] sm:$0xff] }
 0x160   :  { %1184 = vmatpush.msra.mxu1 %v213_v25  ;;  %1204 = vmatpush.msra.mxu2 %v277_v26  ;;  %v637_v52 = vld [vmem:[#allocation2 + $0xf98] sm:$0xff]  ;;  %v2099_v26 = vpop.f32.mrf.mxu1 }
 0x161   :  { %1223 = vmatpush.msra.mxu3 %v345_v27  ;;  %1165 = vmatpush.msra.mxu0 %v145_v29  ;;  %v437_v53 = vld [vmem:[#allocation2 + $0x958] sm:$0xff] }
 0x162   :  { %1185 = vmatpush.msra.mxu1 %v209_v30  ;;  %1205 = vmatpush.msra.mxu2 %v273_v31  ;;  %v501_v54 = vld [vmem:[#allocation2 + $0xb58] sm:$0xff]  ;;  %v2101_v31 = vpop.f32.mrf.mxu0 }
 0x163   :  { %1224 = vmatpush.msra.mxu3 %v341_v61  ;;  %1166 = vmatpush.msra.mxu0 %v141_v33  ;;  %v565_v56 = vld [vmem:[#allocation2 + $0xd58] sm:$0xff] }
 0x164   :  { %1186 = vmatpush.msra.mxu1 %v205_v34  ;;  %1206 = vmatpush.msra.mxu2 %v269_v2  ;;  %v633_v57 = vld [vmem:[#allocation2 + $0xf78] sm:$0xff]  ;;  %v2103_v2 = vpop.f32.mrf.mxu2 }
 0x165   :  { %1225 = vmatpush.msra.mxu3 %v337_v3  ;;  %1231 = vmatpush.msrb.mxu0 %v457_v36  ;;  %v433_v58 = vld [vmem:[#allocation2 + $0x938] sm:$0xff] }
 0x166   :  { %1251 = vmatpush.msrb.mxu1 %v521_v37  ;;  %1271 = vmatpush.msrb.mxu2 %v585_v38  ;;  %v497_v59 = vld [vmem:[#allocation2 + $0xb38] sm:$0xff] }
 0x167   :  { %1226 = vmatpush.msra.mxu3 %v333_v39  ;;  %1232 = vmatpush.msrb.mxu0 %v453_v41  ;;  %v561_v62 = vld [vmem:[#allocation2 + $0xd38] sm:$0xff] }
 0x168   :  { %1252 = vmatpush.msrb.mxu1 %v517_v42  ;;  %1272 = vmatpush.msrb.mxu2 %v581_v43  ;;  %v629_v63 = vld [vmem:[#allocation2 + $0xf58] sm:$0xff]  ;;  %v2108_v42 = vpop.f32.mrf.mxu3 }
 0x169   :  { %1291 = vmatpush.msrb.mxu3 %v649_v44  ;;  %1233 = vmatpush.msrb.mxu0 %v449_v17  ;;  %v429_v0 = vld [vmem:[#allocation2 + $0x918] sm:$0xff]  ;;  %v868_v44 = vpop.f32.mrf.mxu1 }
 0x16a   :  { %1253 = vmatpush.msrb.mxu1 %v513_v45  ;;  %1273 = vmatpush.msrb.mxu2 %v577_v46  ;;  %v493_v1 = vld [vmem:[#allocation2 + $0xb18] sm:$0xff] }
 0x16b   :  { %1292 = vmatpush.msrb.mxu3 %v645_v47  ;;  %1234 = vmatpush.msrb.mxu0 %v445_v22  ;;  %v557_v6 = vld [vmem:[#allocation2 + $0xd18] sm:$0xff]  ;;  %v848_v47 = vpop.f32.mrf.mxu0 }
 0x16c   :  { %1254 = vmatpush.msrb.mxu1 %v509_v23  ;;  %1274 = vmatpush.msrb.mxu2 %v573_v48  ;;  %v625_v7 = vld [vmem:[#allocation2 + $0xf38] sm:$0xff]  ;;  %v869_v48 = vadd.f32 %v868_v44, %v848_v47 }
 0x16d   :  { %1293 = vmatpush.msrb.mxu3 %v641_v49  ;;  %1235 = vmatpush.msrb.mxu0 %v441_v50  ;;  %v425_v8 = vld [vmem:[#allocation2 + $0x8f8] sm:$0xff] }
 0x16e   :  { %1255 = vmatpush.msrb.mxu1 %v505_v51  ;;  %1275 = vmatpush.msrb.mxu2 %v569_v28  ;;  %v489_v10 = vld [vmem:[#allocation2 + $0xaf8] sm:$0xff] }
 0x16f   :  { %1294 = vmatpush.msrb.mxu3 %v637_v52  ;;  %1236 = vmatpush.msrb.mxu0 %v437_v53  ;;  %v553_v11 = vld [vmem:[#allocation2 + $0xcf8] sm:$0xff] }
 0x170   :  { %1256 = vmatpush.msrb.mxu1 %v501_v54  ;;  %1276 = vmatpush.msrb.mxu2 %v565_v56  ;;  %v621_v12 = vld [vmem:[#allocation2 + $0xf18] sm:$0xff]  ;;  %v908_v56 = vpop.f32.mrf.mxu3 }
 0x171   :  { %1295 = vmatpush.msrb.mxu3 %v633_v57  ;;  %1237 = vmatpush.msrb.mxu0 %v433_v58  ;;  %v421_v14 = vld [vmem:[#allocation2 + $0x8d8] sm:$0xff]  ;;  %v1403_v57 = vld [vmem:[#allocation7 + $0x1e0] sm:$0xff] }
 0x172   :  { %1257 = vmatpush.msrb.mxu1 %v497_v59  ;;  %1277 = vmatpush.msrb.mxu2 %v561_v62  ;;  %v485_v16 = vld [vmem:[#allocation2 + $0xad8] sm:$0xff] }
 0x173   :  { %1296 = vmatpush.msrb.mxu3 %v629_v63  ;;  %1238 = vmatpush.msrb.mxu0 %v429_v0  ;;  %v549_v19 = vld [vmem:[#allocation2 + $0xcd8] sm:$0xff]  ;;  %v928_v0 = vpop.f32.mrf.mxu0 }
 0x174   :  { %1258 = vmatpush.msrb.mxu1 %v493_v1  ;;  %1278 = vmatpush.msrb.mxu2 %v557_v6  ;;  %v617_v20 = vld [vmem:[#allocation2 + $0xef8] sm:$0xff]  ;;  %v1399_v1 = vld [vmem:[#allocation7 + $0x1c0] sm:$0xff] }
 0x175   :  { %1297 = vmatpush.msrb.mxu3 %v625_v7  ;;  %1239 = vmatpush.msrb.mxu0 %v425_v8  ;;  %v417_v24 = vld [vmem:[#allocation2 + $0x8b8] sm:$0xff] }
 0x176   :  { %1259 = vmatpush.msrb.mxu1 %v489_v10  ;;  %1279 = vmatpush.msrb.mxu2 %v553_v11  ;;  %v481_v25 = vld [vmem:[#allocation2 + $0xab8] sm:$0xff]  ;;  %v1363_v10 = vld [vmem:[#allocation7 + $0xa0] sm:$0xff]  ;;  %v948_v11 = vpop.f32.mrf.mxu1 }
 0x177   :  { %1298 = vmatpush.msrb.mxu3 %v621_v12  ;;  %1240 = vmatpush.msrb.mxu0 %v421_v14  ;;  %v545_v27 = vld [vmem:[#allocation2 + $0xcb8] sm:$0xff]  ;;  %v1395_v12 = vld [vmem:[#allocation7 + $0x1a0] sm:$0xff] }
 0x178   :  { %1260 = vmatpush.msrb.mxu1 %v485_v16  ;;  %v613_v29 = vld [vmem:[#allocation2 + $0xed8] sm:$0xff]  ;;  %1280 = vmatpush.msrb.mxu2 %v549_v19 }
 0x179   :  { %1299 = vmatpush.msrb.mxu3 %v617_v20  ;;  %v413_v30 = vld [vmem:[#allocation2 + $0x898] sm:$0xff]  ;;  %1241 = vmatpush.msrb.mxu0 %v417_v24  ;;  %v1427_v24 = vld [vmem:[#allocation7 + $0x2a0] sm:$0xff] }
 0x17a   :  { %1261 = vmatpush.msrb.mxu1 %v481_v25  ;;  %v477_v61 = vld [vmem:[#allocation2 + $0xa98] sm:$0xff]  ;;  %1281 = vmatpush.msrb.mxu2 %v545_v27  ;;  %v1359_v27 = vld [vmem:[#allocation7 + $0x80] sm:$0xff] }
 0x17b   :  { %v541_v33 = vld [vmem:[#allocation2 + $0xc98] sm:$0xff]  ;;  %1300 = vmatpush.msrb.mxu3 %v613_v29  ;;  %1207 = vmatmul.f32.vlgmr.msra.gmra.mxu2 %v2067_v9  ;;  %v1391_v29 = vld [vmem:[#allocation7 + $0x180] sm:$0xff] }
 0x17c   :  { %v609_v34 = vld [vmem:[#allocation2 + $0xeb8] sm:$0xff]  ;;  %1242 = vmatpush.msrb.mxu0 %v413_v30  ;;  %1262 = vmatpush.msrb.mxu1 %v477_v61 }
 0x17d   :  { %v409_v3 = vld [vmem:[#allocation2 + $0x878] sm:$0xff]  ;;  %1282 = vmatpush.msrb.mxu2 %v541_v33  ;;  %1301 = vmatpush.msrb.mxu3 %v609_v34 }
 0x17e   :  { %v473_v36 = vld [vmem:[#allocation2 + $0xa78] sm:$0xff]  ;;  %1167 = vmatmul.f32.vlgmr.msra.gmra.mxu0 %v2070_v13  ;;  %1227 = vmatmul.f32.vlgmr.msra.gmra.mxu3 %v2073_v15  ;;  %v709_v13 = vadd.f32 %v2091_v55, %v2093_v60  ;;  %v1371_v55 = vld [vmem:[#allocation7 + $0xe0] sm:$0xff] }
 0x17f   :  { %v537_v37 = vld [vmem:[#allocation2 + $0xc78] sm:$0xff]  ;;  %1243 = vmatpush.msrb.mxu0 %v409_v3  ;;  %1263 = vmatpush.msrb.mxu1 %v473_v36  ;;  %v1423_v3 = vld [vmem:[#allocation7 + $0x280] sm:$0xff]  ;;  %v988_v36 = vpop.f32.mrf.mxu3 }
 0x180   :  { %v605_v38 = vld [vmem:[#allocation2 + $0xe98] sm:$0xff]  ;;  %1283 = vmatpush.msrb.mxu2 %v537_v37  ;;  %1187 = vmatmul.f32.vlgmr.msra.gmra.mxu1 %v2076_v21  ;;  %v888_v21 = vpop.f32.mrf.mxu2  ;;  %v729_v51 = vadd.f32 %v2095_v5, %v709_v13  ;;  %v1355_v37 = vld [vmem:[#allocation7 + $0x60] sm:$0xff] }
 0x181   :  { %v405_v39 = vld [vmem:[#allocation2 + $0x858] sm:$0xff]  ;;  %1302 = vmatpush.msrb.mxu3 %v605_v38  ;;  %v889_v54 = vadd.f32 %v888_v21, %v869_v48  ;;  %v1387_v38 = vld [vmem:[#allocation7 + $0x160] sm:$0xff] }
 0x182   :  { %v469_v41 = vld [vmem:[#allocation2 + $0xa58] sm:$0xff]  ;;  %1244 = vmatpush.msrb.mxu0 %v405_v39  ;;  %v749_v59 = vadd.f32 %v2097_v18, %v729_v51  ;;  %v1419_v13 = vld [vmem:[#allocation7 + $0x260] sm:$0xff] }
 0x183   :  { %v533_v9 = vld [vmem:[#allocation2 + $0xc58] sm:$0xff]  ;;  %1264 = vmatpush.msrb.mxu1 %v469_v41  ;;  %v909_v63 = vadd.f32 %v908_v56, %v889_v54  ;;  %v1415_v21 = vld [vmem:[#allocation7 + $0x240] sm:$0xff] }
 0x184   :  { %v601_v43 = vld [vmem:[#allocation2 + $0xe78] sm:$0xff]  ;;  %1284 = vmatpush.msrb.mxu2 %v533_v9  ;;  %v769_v6 = vadd.f32 %v2101_v31, %v749_v59  ;;  %v1347_v51 = vld [vmem:[#allocation7 + $0x20] sm:$0xff] }
 0x185   :  { %v401_v17 = vld [vmem:[#allocation2 + $0x838] sm:$0xff]  ;;  %1303 = vmatpush.msrb.mxu3 %v601_v43  ;;  %v929_v8 = vadd.f32 %v928_v0, %v909_v63  ;;  %v2126_v43 = vld [vmem:[#allocation6] sm:$0xf]  ;;  %v1375_v59 = vld [vmem:[#allocation7 + $0x100] sm:$0xff] }
 0x186   :  { %v465_v45 = vld [vmem:[#allocation2 + $0xa38] sm:$0xff]  ;;  %1245 = vmatpush.msrb.mxu0 %v401_v17  ;;  %v789_v16 = vadd.f32 %v2099_v26, %v769_v6  ;;  %v2122_v26 = vld [vmem:[#allocation4] sm:$0xf]  ;;  %v1372_v0 = vld [vmem:[#allocation7 + $0xe8] sm:$0xff] }
 0x187   :  { %v529_v15 = vld [vmem:[#allocation2 + $0xc38] sm:$0xff]  ;;  %1265 = vmatpush.msrb.mxu1 %v465_v45  ;;  %v949_v19 = vadd.f32 %v948_v11, %v929_v8  ;;  %v1314_v17 = vperm.slane %v2122_v26, 1  ;;  %v1370_v6 = vld [vmem:[#allocation7 + $0xd8] sm:$0xff]  ;;  %v1368_v8 = vld [vmem:[#allocation7 + $0xc8] sm:$0xff] }
 0x188   :  { %v597_v46 = vld [vmem:[#allocation2 + $0xe58] sm:$0xff]  ;;  %1285 = vmatpush.msrb.mxu2 %v529_v15  ;;  %v968_v25 = vpop.f32.mrf.mxu2  ;;  %v809_v31 = vadd.f32 %v2103_v2, %v789_v16  ;;  %v1313_v2 = vperm.slane %v2122_v26, 0  ;;  %v1351_v15 = vld [vmem:[#allocation7 + $0x40] sm:$0xff]  ;;  %v1366_v11 = vld [vmem:[#allocation7 + $0xb8] sm:$0xff] }
 0x189   :  { %v397_v22 = vld [vmem:[#allocation2 + $0x818] sm:$0xff]  ;;  %1304 = vmatpush.msrb.mxu3 %v597_v46  ;;  %v969_v33 = vadd.f32 %v968_v25, %v949_v19  ;;  %v1383_v46 = vld [vmem:[#allocation7 + $0x140] sm:$0xff]  ;;  %v1364_v16 = vld [vmem:[#allocation7 + $0xa8] sm:$0xff] }
 0x18a   :  { %v461_v23 = vld [vmem:[#allocation2 + $0xa18] sm:$0xff]  ;;  %1246 = vmatpush.msrb.mxu0 %v397_v22  ;;  %v829_v41 = vadd.f32 %v2108_v42, %v809_v31  ;;  %v1327_v22 = vperm.slane %v2126_v43, 0  ;;  %v1396_v19 = vld [vmem:[#allocation7 + $0x1a8] sm:$0xff]  ;;  %v1394_v25 = vld [vmem:[#allocation7 + $0x198] sm:$0xff] }
 0x18b   :  { %v525_v49 = vld [vmem:[#allocation2 + $0xc18] sm:$0xff]  ;;  %1266 = vmatpush.msrb.mxu1 %v461_v23  ;;  %1247 = vmatmul.f32.vlgmr.msrb.gmra.mxu0 %v2082_v35  ;;  %v1435_v35 = vld [vmem:[#allocation7 + $0x2e0] sm:$0xff]  ;;  %v989_v44 = vadd.f32 %v988_v36, %v969_v33  ;;  %v1392_v31 = vld [vmem:[#allocation7 + $0x188] sm:$0xff] }
 0x18c   :  { %v593_v50 = vld [vmem:[#allocation2 + $0xe38] sm:$0xff]  ;;  %1286 = vmatpush.msrb.mxu2 %v525_v49  ;;  %1267 = vmatmul.f32.vlgmr.msrb.gmra.mxu1 %v2088_v40  ;;  %v1321_v42 = vmul.f32 %v1313_v2, %v829_v41  ;;  %v1328_v49 = vperm.slane %v2126_v43, 1  ;;  %v1426_v33 = vld [vmem:[#allocation7 + $0x298] sm:$0xff]  ;;  %v1424_v36 = vld [vmem:[#allocation7 + $0x288] sm:$0xff] }
 0x18d   :  { %v1373_v28 = vld [vmem:[#allocation7 + $0xf0] sm:$0xff]  ;;  %1305 = vmatpush.msrb.mxu3 %v593_v50  ;;  %1287 = vmatmul.f32.vlgmr.msrb.gmra.mxu2 %v2079_v32  ;;  %v1367_v32 = vld [vmem:[#allocation7 + $0xc0] sm:$0xff]  ;;  %v1322_v48 = vmul.f32 %v1314_v17, %v989_v44  ;;  %v1422_v41 = vld [vmem:[#allocation7 + $0x278] sm:$0xff] }
 0x18e   :  { %v1405_v52 = vld [vmem:[#allocation7 + $0x1f0] sm:$0xff]  ;;  %1471 = vmatpush.msra.mxu0 %v1373_v28  ;;  %v1379_v28 = vld [vmem:[#allocation7 + $0x120] sm:$0xff]  ;;  %v1386_v2 = vld [vmem:[#allocation7 + $0x158] sm:$0xff] }
 0x18f   :  { %v589_v53 = vld [vmem:[#allocation2 + $0xe18] sm:$0xff]  ;;  %1491 = vmatpush.msra.mxu1 %v1405_v52  ;;  %v1352_v17 = vld [vmem:[#allocation7 + $0x48] sm:$0xff] }
 0x190   :  { %v1437_v58 = vld [vmem:[#allocation7 + $0x2f0] sm:$0xff]  ;;  %1306 = vmatpush.msrb.mxu3 %v589_v53  ;;  %1472 = vmatpush.msra.mxu0 %v1371_v55  ;;  %v2131_v53 = vadd.f32 %v1327_v22, %v1321_v42  ;;  %v2133_v55 = vadd.f32 %v1328_v49, %v1322_v48  ;;  %v1463_v42 = vld [vmem:[#allocation7 + $0x3c0] sm:$0xff]  ;;  %v1350_v22 = vld [vmem:[#allocation7 + $0x38] sm:$0xff] }
 0x191   :  { %v1369_v60 = vld [vmem:[#allocation7 + $0xd0] sm:$0xff]  ;;  %1307 = vmatmul.f32.vlgmr.msrb.gmra.mxu3 %v2085_v4  ;;  %1492 = vmatpush.msra.mxu1 %v1403_v57  ;;  %v1431_v4 = vld [vmem:[#allocation7 + $0x2c0] sm:$0xff]  ;;  %v1382_v48 = vld [vmem:[#allocation7 + $0x138] sm:$0xff] }
 0x192   :  { %v1401_v62 = vld [vmem:[#allocation7 + $0x1d0] sm:$0xff]  ;;  %1511 = vmatpush.msra.mxu2 %v1437_v58  ;;  %1473 = vmatpush.msra.mxu0 %v1369_v60  ;;  %v1411_v57 = vld [vmem:[#allocation7 + $0x220] sm:$0xff]  ;;  %v1339_v60 = vmax.f32 %v2131_v53, 0.0  ;;  %v1340_v63 = vmax.f32 %v2133_v55, 0.0 }
 0x193   :  { %v1433_v5 = vld [vmem:[#allocation7 + $0x2d0] sm:$0xff]  ;;  %1493 = vmatpush.msra.mxu1 %v1401_v62  ;;  %v1343_v58 = vld [vmem:[#allocation7] sm:$0xff]  ;;  %v1374_v62 = vld [vmem:[#allocation7 + $0xf8] sm:$0xff] }
 0x194   :  { %v1365_v7 = vld [vmem:[#allocation7 + $0xb0] sm:$0xff]  ;;  %1512 = vmatpush.msra.mxu2 %v1435_v35  ;;  %1474 = vmatpush.msra.mxu0 %v1367_v32  ;;  %v1406_v35 = vld [vmem:[#allocation7 + $0x1f8] sm:$0xff] }
 0x195   :  { %v1397_v40 = vld [vmem:[#allocation7 + $0x1b0] sm:$0xff]  ;;  %1494 = vmatpush.msra.mxu1 %v1399_v1  ;;  %v1404_v1 = vld [vmem:[#allocation7 + $0x1e8] sm:$0xff] }
 0x196   :  { %1513 = vmatpush.msra.mxu2 %v1433_v5  ;;  %1475 = vmatpush.msra.mxu0 %v1365_v7  ;;  %v1429_v14 = vld [vmem:[#allocation7 + $0x2b0] sm:$0xff]  ;;  %v1407_v5 = vld [vmem:[#allocation7 + $0x200] sm:$0xff]  ;;  %v1438_v7 = vld [vmem:[#allocation7 + $0x2f8] sm:$0xff] }
 0x197   :  { %1495 = vmatpush.msra.mxu1 %v1397_v40  ;;  %v1361_v18 = vld [vmem:[#allocation7 + $0x90] sm:$0xff]  ;;  %v1402_v40 = vld [vmem:[#allocation7 + $0x1d8] sm:$0xff] }
 0x198   :  { %1514 = vmatpush.msra.mxu2 %v1431_v4  ;;  %1476 = vmatpush.msra.mxu0 %v1363_v10  ;;  %v1393_v20 = vld [vmem:[#allocation7 + $0x190] sm:$0xff]  ;;  %v1436_v4 = vld [vmem:[#allocation7 + $0x2e8] sm:$0xff] }
 0x199   :  { %1496 = vmatpush.msra.mxu1 %v1395_v12  ;;  %v1425_v30 = vld [vmem:[#allocation7 + $0x290] sm:$0xff]  ;;  %v1400_v10 = vld [vmem:[#allocation7 + $0x1c8] sm:$0xff]  ;;  %v1434_v12 = vld [vmem:[#allocation7 + $0x2d8] sm:$0xff] }
 0x19a   :  { %1515 = vmatpush.msra.mxu2 %v1429_v14  ;;  %1477 = vmatpush.msra.mxu0 %v1361_v18  ;;  %v1357_v61 = vld [vmem:[#allocation7 + $0x70] sm:$0xff]  ;;  %v1398_v14 = vld [vmem:[#allocation7 + $0x1b8] sm:$0xff]  ;;  %v1432_v18 = vld [vmem:[#allocation7 + $0x2c8] sm:$0xff] }
 0x19b   :  { %1497 = vmatpush.msra.mxu1 %v1393_v20  ;;  %v1389_v34 = vld [vmem:[#allocation7 + $0x170] sm:$0xff]  ;;  %v1362_v20 = vld [vmem:[#allocation7 + $0x98] sm:$0xff] }
 0x19c   :  { %1516 = vmatpush.msra.mxu2 %v1427_v24  ;;  %1478 = vmatpush.msra.mxu0 %v1359_v27  ;;  %v1421_v39 = vld [vmem:[#allocation7 + $0x270] sm:$0xff]  ;;  %v1430_v24 = vld [vmem:[#allocation7 + $0x2b8] sm:$0xff]  ;;  %v1360_v27 = vld [vmem:[#allocation7 + $0x88] sm:$0xff] }
 0x19d   :  { %1498 = vmatpush.msra.mxu1 %v1391_v29  ;;  %v1353_v9 = vld [vmem:[#allocation7 + $0x50] sm:$0xff]  ;;  %v1428_v29 = vld [vmem:[#allocation7 + $0x2a8] sm:$0xff] }
 0x19e   :  { %1517 = vmatpush.msra.mxu2 %v1425_v30  ;;  %1479 = vmatpush.msra.mxu0 %v1357_v61  ;;  %v1385_v45 = vld [vmem:[#allocation7 + $0x150] sm:$0xff]  ;;  %v1358_v61 = vld [vmem:[#allocation7 + $0x78] sm:$0xff] }
 0x19f   :  { %1499 = vmatpush.msra.mxu1 %v1389_v34  ;;  %v1417_v47 = vld [vmem:[#allocation7 + $0x250] sm:$0xff]  ;;  %v1390_v34 = vld [vmem:[#allocation7 + $0x178] sm:$0xff] }
 0x1a0   :  { %1518 = vmatpush.msra.mxu2 %v1423_v3  ;;  %1480 = vmatpush.msra.mxu0 %v1355_v37  ;;  %v1349_v23 = vld [vmem:[#allocation7 + $0x30] sm:$0xff]  ;;  %v1356_v3 = vld [vmem:[#allocation7 + $0x68] sm:$0xff] }
 0x1a1   :  { %1500 = vmatpush.msra.mxu1 %v1387_v38  ;;  %v1381_v50 = vld [vmem:[#allocation7 + $0x130] sm:$0xff]  ;;  %v1388_v37 = vld [vmem:[#allocation7 + $0x168] sm:$0xff]  ;;  %v1008_v38 = vpop.f32.mrf.mxu0 }
 0x1a2   :  { %1519 = vmatpush.msra.mxu2 %v1421_v39  ;;  %1481 = vmatpush.msra.mxu0 %v1353_v9  ;;  %v1413_v52 = vld [vmem:[#allocation7 + $0x230] sm:$0xff]  ;;  %v1354_v39 = vld [vmem:[#allocation7 + $0x58] sm:$0xff]  ;;  %v1467_v9 = vld [vmem:[#allocation7 + $0x3e0] sm:$0xff] }
 0x1a3   :  { %1501 = vmatpush.msra.mxu1 %v1385_v45  ;;  %v1345_v54 = vld [vmem:[#allocation7 + $0x10] sm:$0xff]  ;;  %v1028_v45 = vpop.f32.mrf.mxu1 }
 0x1a4   :  { %1520 = vmatpush.msra.mxu2 %v1419_v13  ;;  %1482 = vmatpush.msra.mxu0 %v1351_v15  ;;  %v1377_v56 = vld [vmem:[#allocation7 + $0x110] sm:$0xff]  ;;  %v1420_v13 = vld [vmem:[#allocation7 + $0x268] sm:$0xff] }
 0x1a5   :  { %1502 = vmatpush.msra.mxu1 %v1383_v46  ;;  %v1409_v32 = vld [vmem:[#allocation7 + $0x210] sm:$0xff]  ;;  %v1384_v15 = vld [vmem:[#allocation7 + $0x148] sm:$0xff]  ;;  %v1029_v46 = vadd.f32 %v1028_v45, %v1008_v38 }
 0x1a6   :  { %1521 = vmatpush.msra.mxu2 %v1417_v47  ;;  %1483 = vmatpush.msra.mxu0 %v1349_v23  ;;  %v1469_v30 = vld [vmem:[#allocation7 + $0x3f0] sm:$0xff]  ;;  %v1048_v47 = vpop.f32.mrf.mxu2  ;;  %v1418_v23 = vld [vmem:[#allocation7 + $0x258] sm:$0xff]  ;;  %v1456_v38 = vld [vmem:[#allocation7 + $0x388] sm:$0xff] }
 0x1a7   :  { %1503 = vmatpush.msra.mxu1 %v1381_v50  ;;  %1531 = vmatpush.msra.mxu3 %v1469_v30  ;;  %v1465_v44 = vld [vmem:[#allocation7 + $0x3d0] sm:$0xff]  ;;  %v1049_v49 = vadd.f32 %v1048_v47, %v1029_v46  ;;  %v1439_v30 = vld [vmem:[#allocation7 + $0x300] sm:$0xff] }
 0x1a8   :  { %1522 = vmatpush.msra.mxu2 %v1415_v21  ;;  %1484 = vmatpush.msra.mxu0 %v1347_v51  ;;  %v1461_v50 = vld [vmem:[#allocation7 + $0x3b0] sm:$0xff]  ;;  %v1348_v21 = vld [vmem:[#allocation7 + $0x28] sm:$0xff] }
 0x1a9   :  { %1504 = vmatpush.msra.mxu1 %v1379_v28  ;;  %1532 = vmatpush.msra.mxu3 %v1467_v9  ;;  %v1416_v28 = vld [vmem:[#allocation7 + $0x248] sm:$0xff]  ;;  %v1449_v53 = vld [vmem:[#allocation7 + $0x350] sm:$0xff] }
 0x1aa   :  { %1523 = vmatpush.msra.mxu2 %v1413_v52  ;;  %1485 = vmatpush.msra.mxu0 %v1345_v54  ;;  %v1380_v52 = vld [vmem:[#allocation7 + $0x128] sm:$0xff] }
 0x1ab   :  { %1505 = vmatpush.msra.mxu1 %v1377_v56  ;;  %1533 = vmatpush.msra.mxu3 %v1465_v44  ;;  %v1459_v56 = vld [vmem:[#allocation7 + $0x3a0] sm:$0xff]  ;;  %v1448_v9 = vld [vmem:[#allocation7 + $0x348] sm:$0xff]  ;;  %v1446_v44 = vld [vmem:[#allocation7 + $0x338] sm:$0xff] }
 0x1ac   :  { %1524 = vmatpush.msra.mxu2 %v1411_v57  ;;  %1486 = vmatpush.msra.mxu0 %v1343_v58  ;;  %v1346_v57 = vld [vmem:[#allocation7 + $0x18] sm:$0xff] }
 0x1ad   :  { %1506 = vmatpush.msra.mxu1 %v1375_v59  ;;  %1487 = vmatmul.f32.vlgmr.msra.gmra.mxu0 %v1339_v60  ;;  %v1414_v58 = vld [vmem:[#allocation7 + $0x238] sm:$0xff] }
 0x1ae   :  { %1507 = vmatmul.f32.vlgmr.msra.gmra.mxu1 %v1340_v63  ;;  %1551 = vmatpush.msrb.mxu0 %v1374_v62  ;;  %v1378_v59 = vld [vmem:[#allocation7 + $0x118] sm:$0xff] }
 0x1af   :  { %1571 = vmatpush.msrb.mxu1 %v1406_v35  ;;  %1525 = vmatpush.msra.mxu2 %v1409_v32  ;;  %v1457_v35 = vld [vmem:[#allocation7 + $0x390] sm:$0xff]  ;;  %v1344_v32 = vld [vmem:[#allocation7 + $0x8] sm:$0xff] }
 0x1b0   :  { %1552 = vmatpush.msrb.mxu0 %v1372_v0  ;;  %1534 = vmatpush.msra.mxu3 %v1463_v42 }
 0x1b1   :  { %1572 = vmatpush.msrb.mxu1 %v1404_v1  ;;  %1526 = vmatpush.msra.mxu2 %v1407_v5  ;;  %v1412_v1 = vld [vmem:[#allocation7 + $0x228] sm:$0xff] }
 0x1b2   :  { %1553 = vmatpush.msrb.mxu0 %v1370_v6  ;;  %1535 = vmatpush.msra.mxu3 %v1461_v50  ;;  %v1376_v5 = vld [vmem:[#allocation7 + $0x108] sm:$0xff] }
 0x1b3   :  { %1591 = vmatpush.msrb.mxu2 %v1438_v7  ;;  %1573 = vmatpush.msrb.mxu1 %v1402_v40  ;;  %v1410_v7 = vld [vmem:[#allocation7 + $0x218] sm:$0xff] }
 0x1b4   :  { %1554 = vmatpush.msrb.mxu0 %v1368_v8  ;;  %1536 = vmatpush.msra.mxu3 %v1459_v56 }
 0x1b5   :  { %1592 = vmatpush.msrb.mxu2 %v1436_v4  ;;  %1574 = vmatpush.msrb.mxu1 %v1400_v10  ;;  %v1455_v4 = vld [vmem:[#allocation7 + $0x380] sm:$0xff]  ;;  %v1408_v10 = vld [vmem:[#allocation7 + $0x208] sm:$0xff] }
 0x1b6   :  { %1555 = vmatpush.msrb.mxu0 %v1366_v11  ;;  %1537 = vmatpush.msra.mxu3 %v1457_v35 }
 0x1b7   :  { %1593 = vmatpush.msrb.mxu2 %v1434_v12  ;;  %1575 = vmatpush.msrb.mxu1 %v1398_v14  ;;  %v1315_v12 = vperm.slane %v2122_v26, 2  ;;  %v1453_v14 = vld [vmem:[#allocation7 + $0x370] sm:$0xff] }
 0x1b8   :  { %1556 = vmatpush.msrb.mxu0 %v1364_v16  ;;  %1538 = vmatpush.msra.mxu3 %v1455_v4  ;;  %v1659_v4 = vld [vmem:[#allocation12 + $0x50] sm:$0xff] }
 0x1b9   :  { %1594 = vmatpush.msrb.mxu2 %v1432_v18  ;;  %1576 = vmatpush.msrb.mxu1 %v1396_v19  ;;  %v1329_v19 = vperm.slane %v2126_v43, 2 }
 0x1ba   :  { %1557 = vmatpush.msrb.mxu0 %v1362_v20  ;;  %v1451_v20 = vld [vmem:[#allocation7 + $0x360] sm:$0xff]  ;;  %1539 = vmatpush.msra.mxu3 %v1453_v14 }
 0x1bb   :  { %1595 = vmatpush.msrb.mxu2 %v1430_v24  ;;  %1577 = vmatpush.msrb.mxu1 %v1394_v25  ;;  %v1447_v25 = vld [vmem:[#allocation7 + $0x340] sm:$0xff] }
 0x1bc   :  { %1558 = vmatpush.msrb.mxu0 %v1360_v27  ;;  %1540 = vmatpush.msra.mxu3 %v1451_v20  ;;  %v1443_v27 = vld [vmem:[#allocation7 + $0x320] sm:$0xff] }
 0x1bd   :  { %1596 = vmatpush.msrb.mxu2 %v1428_v29  ;;  %1578 = vmatpush.msrb.mxu1 %v1392_v31  ;;  %v1441_v29 = vld [vmem:[#allocation7 + $0x310] sm:$0xff]  ;;  %v1470_v31 = vld [vmem:[#allocation7 + $0x3f8] sm:$0xff]  ;;  %v1657_v14 = vld [vmem:[#allocation12 + $0x40] sm:$0xff] }
 0x1be   :  { %1559 = vmatpush.msrb.mxu0 %v1358_v61  ;;  %1541 = vmatpush.msra.mxu3 %v1449_v53  ;;  %v1468_v61 = vld [vmem:[#allocation7 + $0x3e8] sm:$0xff]  ;;  %v1652_v53 = vld [vmem:[#allocation12 + $0x18] sm:$0xff] }
 0x1bf   :  { %1597 = vmatpush.msrb.mxu2 %v1426_v33  ;;  %1579 = vmatpush.msrb.mxu1 %v1390_v34  ;;  %v1068_v51 = vpop.f32.mrf.mxu3  ;;  %v1088_v62 = vpop.f32.mrf.mxu0  ;;  %v1466_v33 = vld [vmem:[#allocation7 + $0x3d8] sm:$0xff]  ;;  %v1464_v34 = vld [vmem:[#allocation7 + $0x3c8] sm:$0xff] }
 0x1c0   :  { %1560 = vmatpush.msrb.mxu0 %v1356_v3  ;;  %v1069_v54 = vadd.f32 %v1068_v51, %v1049_v49  ;;  %1542 = vmatpush.msra.mxu3 %v1447_v25  ;;  %v1462_v3 = vld [vmem:[#allocation7 + $0x3b8] sm:$0xff]  ;;  %v1653_v20 = vld [vmem:[#allocation12 + $0x20] sm:$0xff] }
 0x1c1   :  { %1598 = vmatpush.msrb.mxu2 %v1424_v36  ;;  %1580 = vmatpush.msrb.mxu1 %v1388_v37  ;;  %v1460_v36 = vld [vmem:[#allocation7 + $0x3a8] sm:$0xff]  ;;  %v1458_v37 = vld [vmem:[#allocation7 + $0x398] sm:$0xff] }
 0x1c2   :  { %1561 = vmatpush.msrb.mxu0 %v1354_v39  ;;  %v1089_v0 = vadd.f32 %v1088_v62, %v1069_v54  ;;  %v1454_v39 = vld [vmem:[#allocation7 + $0x378] sm:$0xff]  ;;  %v1316_v54 = vperm.slane %v2122_v26, 3  ;;  %v1677_v26 = vld [vmem:[#allocation12 + $0xe0] sm:$0xff] }
 0x1c3   :  { %1599 = vmatpush.msrb.mxu2 %v1422_v41  ;;  %1581 = vmatpush.msrb.mxu1 %v1386_v2  ;;  %v1452_v41 = vld [vmem:[#allocation7 + $0x368] sm:$0xff]  ;;  %v1450_v2 = vld [vmem:[#allocation7 + $0x358] sm:$0xff] }
 0x1c4   :  { %1562 = vmatpush.msrb.mxu0 %v1352_v17  ;;  %v1444_v17 = vld [vmem:[#allocation7 + $0x328] sm:$0xff]  ;;  %v1651_v25 = vld [vmem:[#allocation12 + $0x10] sm:$0xff] }
 0x1c5   :  { %1600 = vmatpush.msrb.mxu2 %v1420_v13  ;;  %1582 = vmatpush.msrb.mxu1 %v1384_v15  ;;  %v1442_v13 = vld [vmem:[#allocation7 + $0x318] sm:$0xff]  ;;  %v1440_v15 = vld [vmem:[#allocation7 + $0x308] sm:$0xff] }
 0x1c6   :  { %1563 = vmatpush.msrb.mxu0 %v1350_v22  ;;  %v1108_v6 = vpop.f32.mrf.mxu1 }
 0x1c7   :  { %1601 = vmatpush.msrb.mxu2 %v1418_v23  ;;  %1583 = vmatpush.msrb.mxu1 %v1382_v48  ;;  %v1109_v40 = vadd.f32 %v1108_v6, %v1089_v0  ;;  %v1128_v8 = vpop.f32.mrf.mxu2  ;;  %v1663_v0 = vld [vmem:[#allocation12 + $0x70] sm:$0xff] }
 0x1c8   :  { %1564 = vmatpush.msrb.mxu0 %v1348_v21  ;;  %v1679_v6 = vld [vmem:[#allocation12 + $0xf0] sm:$0xff] }
 0x1c9   :  { %1602 = vmatpush.msrb.mxu2 %v1416_v28  ;;  %1584 = vmatpush.msrb.mxu1 %v1380_v52  ;;  %v1129_v11 = vadd.f32 %v1128_v8, %v1109_v40  ;;  %v1661_v40 = vld [vmem:[#allocation12 + $0x60] sm:$0xff]  ;;  %v1660_v8 = vld [vmem:[#allocation12 + $0x58] sm:$0xff] }
 0x1ca   :  { %1565 = vmatpush.msrb.mxu0 %v1346_v57  ;;  %v1148_v16 = vpop.f32.mrf.mxu3 }
 0x1cb   :  { %1603 = vmatpush.msrb.mxu2 %v1414_v58  ;;  %1585 = vmatpush.msrb.mxu1 %v1378_v59  ;;  %v1149_v18 = vadd.f32 %v1148_v16, %v1129_v11  ;;  %v1330_v58 = vperm.slane %v2126_v43, 3  ;;  %v1676_v43 = vld [vmem:[#allocation12 + $0xd8] sm:$0xff]  ;;  %v1658_v11 = vld [vmem:[#allocation12 + $0x48] sm:$0xff] }
 0x1cc   :  { %1566 = vmatpush.msrb.mxu0 %v1344_v32  ;;  %v1664_v32 = vld [vmem:[#allocation12 + $0x78] sm:$0xff] }
 0x1cd   :  { %1604 = vmatpush.msrb.mxu2 %v1412_v1  ;;  %1586 = vmatpush.msrb.mxu1 %v1376_v5  ;;  %v1323_v24 = vmul.f32 %v1315_v12, %v1149_v18  ;;  %v1680_v1 = vld [vmem:[#allocation12 + $0xf8] sm:$0xff]  ;;  %v1662_v5 = vld [vmem:[#allocation12 + $0x68] sm:$0xff]  ;;  %v1655_v18 = vld [vmem:[#allocation12 + $0x30] sm:$0xff] }
 0x1ce   :  { %1567 = vmatmul.f32.vlgmr.msrb.gmra.mxu0 %v1339_v60  ;;  %1587 = vmatmul.f32.vlgmr.msrb.gmra.mxu1 %v1340_v63  ;;  %v1445_v63 = vld [vmem:[#allocation7 + $0x330] sm:$0xff]  ;;  %v1656_v16 = vld [vmem:[#allocation12 + $0x38] sm:$0xff] }
 0x1cf   :  { %1605 = vmatpush.msrb.mxu2 %v1410_v7  ;;  %v1337_v60 = vadd.f32 %v1329_v19, %v1323_v24  ;;  %1543 = vmatpush.msra.mxu3 %v1445_v63  ;;  %v1678_v7 = vld [vmem:[#allocation12 + $0xe8] sm:$0xff]  ;;  %v1673_v24 = vld [vmem:[#allocation12 + $0xc0] sm:$0xff] }
 0x1d0   :  { %1681 = vmatpush.msra.mxu0 %v1664_v32  ;;  %1701 = vmatpush.msra.mxu1 %v1680_v1  ;;  %v1674_v12 = vld [vmem:[#allocation12 + $0xc8] sm:$0xff] }
 0x1d1   :  { %1606 = vmatpush.msrb.mxu2 %v1408_v10  ;;  %v1341_v55 = vmax.f32 %v1337_v60, 0.0  ;;  %1544 = vmatpush.msra.mxu3 %v1443_v27  ;;  %v1675_v10 = vld [vmem:[#allocation12 + $0xd0] sm:$0xff]  ;;  %v1654_v19 = vld [vmem:[#allocation12 + $0x28] sm:$0xff]  ;;  %v1672_v60 = vld [vmem:[#allocation12 + $0xb8] sm:$0xff] }
 0x1d2   :  { %1682 = vmatpush.msra.mxu0 %v1663_v0  ;;  %1702 = vmatpush.msra.mxu1 %v1679_v6  ;;  %v1650_v63 = vld [vmem:[#allocation12 + $0x8] sm:$0xff] }
 0x1d3   :  { %1527 = vmatmul.f32.vlgmr.msra.gmra.mxu2 %v1341_v55  ;;  %1545 = vmatpush.msra.mxu3 %v1441_v29  ;;  %v1670_v27 = vld [vmem:[#allocation12 + $0xa8] sm:$0xff]  ;;  %v1649_v29 = vld [vmem:[#allocation12] sm:$0xff] }
 0x1d4   :  { %1683 = vmatpush.msra.mxu0 %v1662_v5  ;;  %1703 = vmatpush.msra.mxu1 %v1678_v7 }
 0x1d5   :  { %1546 = vmatpush.msra.mxu3 %v1439_v30  ;;  %v1669_v30 = vld [vmem:[#allocation12 + $0xa0] sm:$0xff] }
 0x1d6   :  { %1684 = vmatpush.msra.mxu0 %v1661_v40  ;;  %1704 = vmatpush.msra.mxu1 %v1677_v26 }
 0x1d7   :  { %1611 = vmatpush.msrb.mxu3 %v1470_v31  ;;  %v1668_v31 = vld [vmem:[#allocation12 + $0x98] sm:$0xff] }
 0x1d8   :  { %1685 = vmatpush.msra.mxu0 %v1660_v8  ;;  %1705 = vmatpush.msra.mxu1 %v1676_v43 }
 0x1d9   :  { %1612 = vmatpush.msrb.mxu3 %v1468_v61  ;;  %v1667_v61 = vld [vmem:[#allocation12 + $0x90] sm:$0xff] }
 0x1da   :  { %1686 = vmatpush.msra.mxu0 %v1659_v4  ;;  %1706 = vmatpush.msra.mxu1 %v1675_v10 }
 0x1db   :  { %1607 = vmatmul.f32.vlgmr.msrb.gmra.mxu2 %v1341_v55  ;;  %1613 = vmatpush.msrb.mxu3 %v1466_v33  ;;  %v1671_v55 = vld [vmem:[#allocation12 + $0xb0] sm:$0xff]  ;;  %v1666_v33 = vld [vmem:[#allocation12 + $0x88] sm:$0xff] }
 0x1dc   :  { %1687 = vmatpush.msra.mxu0 %v1658_v11  ;;  %1707 = vmatpush.msra.mxu1 %v1674_v12 }
 0x1dd   :  { %1614 = vmatpush.msrb.mxu3 %v1464_v34  ;;  %v1665_v34 = vld [vmem:[#allocation12 + $0x80] sm:$0xff] }
 0x1de   :  { %1688 = vmatpush.msra.mxu0 %v1657_v14  ;;  %1708 = vmatpush.msra.mxu1 %v1673_v24 }
 0x1df   :  { %1615 = vmatpush.msrb.mxu3 %v1462_v3 }
 0x1e0   :  { %1689 = vmatpush.msra.mxu0 %v1656_v16  ;;  %1709 = vmatpush.msra.mxu1 %v1672_v60 }
 0x1e1   :  { %1616 = vmatpush.msrb.mxu3 %v1460_v36 }
 0x1e2   :  { %1690 = vmatpush.msra.mxu0 %v1655_v18  ;;  %1710 = vmatpush.msra.mxu1 %v1671_v55 }
 0x1e3   :  { %1617 = vmatpush.msrb.mxu3 %v1458_v37 }
 0x1e4   :  { %1691 = vmatpush.msra.mxu0 %v1654_v19  ;;  %1711 = vmatpush.msra.mxu1 %v1670_v27 }
 0x1e5   :  { %1618 = vmatpush.msrb.mxu3 %v1456_v38  ;;  %v1631_v38 = vld [vmem:[#allocation9] sm:$0x3] }
 0x1e6   :  { %1692 = vmatpush.msra.mxu0 %v1653_v20  ;;  %1712 = vmatpush.msra.mxu1 %v1669_v30 }
 0x1e7   :  { %1619 = vmatpush.msrb.mxu3 %v1454_v39 }
 0x1e8   :  { %1693 = vmatpush.msra.mxu0 %v1652_v53  ;;  %1713 = vmatpush.msra.mxu1 %v1668_v31 }
 0x1e9   :  { %1620 = vmatpush.msrb.mxu3 %v1452_v41  ;;  %v1639_v41 = vld [vmem:[#allocation10] sm:$0x3] }
 0x1ea   :  { %1694 = vmatpush.msra.mxu0 %v1651_v25  ;;  %1714 = vmatpush.msra.mxu1 %v1667_v61 }
 0x1eb   :  { %1621 = vmatpush.msrb.mxu3 %v1450_v2 }
 0x1ec   :  { %1695 = vmatpush.msra.mxu0 %v1650_v63  ;;  %1715 = vmatpush.msra.mxu1 %v1666_v33 }
 0x1ed   :  { %1622 = vmatpush.msrb.mxu3 %v1448_v9  ;;  %v1633_v9 = vperm.slane %v1631_v38, 0 }
 0x1ee   :  { %1696 = vmatpush.msra.mxu0 %v1649_v29  ;;  %1716 = vmatpush.msra.mxu1 %v1665_v34 }
 0x1ef   :  { %1623 = vmatpush.msrb.mxu3 %v1446_v44 }
 0x1f1   :  { %1624 = vmatpush.msrb.mxu3 %v1444_v17 }
 0x1f3   :  { %1625 = vmatpush.msrb.mxu3 %v1442_v13 }
 0x1f5   :  { %1626 = vmatpush.msrb.mxu3 %v1440_v15 }
 0x1fb   :  { %v1168_v45 = vpop.f32.mrf.mxu0 }
 0x1fd   :  { %v1188_v46 = vpop.f32.mrf.mxu1 }
 0x1fe   :  { %v1189_v47 = vadd.f32 %v1188_v46, %v1168_v45  ;;  %v1208_v42 = vpop.f32.mrf.mxu2  ;;  %v1641_v45 = vperm.slane %v1639_v41, 0 }
 0x200   :  { %v1209_v22 = vadd.f32 %v1208_v42, %v1189_v47 }
 0x201   :  { %v1228_v23 = vpop.f32.mrf.mxu3 }
 0x202   :  { %v1229_v48 = vadd.f32 %v1228_v23, %v1209_v22 }
 0x208   :  { %v1248_v49 = vpop.f32.mrf.mxu0 }
 0x209   :  { %v1249_v50 = vadd.f32 %v1248_v49, %v1229_v48  ;;  %v1268_v21 = vpop.f32.mrf.mxu1  ;;  %v1634_v49 = vperm.slane %v1631_v38, 1 }
 0x20b   :  { %v1269_v51 = vadd.f32 %v1268_v21, %v1249_v50 }
 0x210   :  { %v1288_v28 = vpop.f32.mrf.mxu2 }
 0x211   :  { %v1289_v52 = vadd.f32 %v1288_v28, %v1269_v51  ;;  %v1642_v51 = vperm.slane %v1639_v41, 1 }
 0x214   :  { %v1308_v56 = vpop.f32.mrf.mxu3 }
 0x215   :  { %v1309_v57 = vadd.f32 %v1308_v56, %v1289_v52  ;;  %v1754_v56 = vld [vmem:[%s2166_s8] ss:$0 sm:$0xff] }
 0x217   :  { %v1324_v59 = vmul.f32 %v1316_v54, %v1309_v57 }
 0x219   :  { %v1338_v62 = vadd.f32 %v1330_v58, %v1324_v59 }
 0x21b   :  { %v1342_v35 = vmax.f32 %v1338_v62, 0.0  ;;  %v1755_v62 = vld [vmem:[%s2167_s9] ss:$0 sm:$0xff] }
 0x21d   :  { %1547 = vmatmul.f32.vlgmr.msra.gmra.mxu3 %v1342_v35 }
 0x225   :  { %1627 = vmatmul.f32.vlgmr.msrb.gmra.mxu3 %v1342_v35 }
 0x22a   :  { %v1488_v3 = vpop.f32.mrf.mxu0 }
 0x22b   :  { %v1508_v36 = vpop.f32.mrf.mxu1 }
 0x22c   :  { %v1509_v39 = vadd.f32 %v1508_v36, %v1488_v3 }
 0x24b   :  { %v1568_v13 = vpop.f32.mrf.mxu0  ;;  %v1588_v15 = vpop.f32.mrf.mxu1 }
 0x24c   :  { %v1589_v42 = vadd.f32 %v1588_v15, %v1568_v13 }
 0x256   :  { %v1528_v37 = vpop.f32.mrf.mxu2 }
 0x257   :  { %v1529_v2 = vadd.f32 %v1528_v37, %v1509_v39 }
 0x25e   :  { %v1608_v47 = vpop.f32.mrf.mxu2 }
 0x25f   :  { %v1609_v23 = vadd.f32 %v1608_v47, %v1589_v42 }
 0x2a0   :  { %v1548_v44 = vpop.f32.mrf.mxu3 }
 0x2a1   :  { %v1549_v17 = vadd.f32 %v1548_v44, %v1529_v2 }
 0x2a3   :  { %v1637_v46 = vmul.f32 %v1633_v9, %v1549_v17 }
 0x2a5   :  { %v1645_v22 = vadd.f32 %v1641_v45, %v1637_v46 }
 0x2a7   :  { %v1647_v48 = vmax.f32 %v1645_v22, 0.0 }
 0x2a8   :  { %v1628_v50 = vpop.f32.mrf.mxu3 }
 0x2a9   :  { %v1629_v21 = vadd.f32 %v1628_v50, %v1609_v23  ;;  %1697 = vmatmul.f32.vlgmr.msra.gmra.mxu0 %v1647_v48 }
 0x2ab   :  { %v1638_v28 = vmul.f32 %v1634_v49, %v1629_v21 }
 0x2ad   :  { %v1646_v52 = vadd.f32 %v1642_v51, %v1638_v28 }
 0x2af   :  { %v1648_v54 = vmax.f32 %v1646_v52, 0.0 }
 0x2b1   :  { %1717 = vmatmul.f32.vlgmr.msra.gmra.mxu1 %v1648_v54 }
 0x326   :  { %v1698_v57 = vpop.f32.mrf.mxu0 }
 0x32e   :  { %v1718_v58 = vpop.f32.mrf.mxu1 }
 0x32f   :  { %v1719_v59 = vadd.f32 %v1718_v58, %v1698_v57 }
 0x331   :  { %v1725_v35 = vmul.f32 %v1754_v56, %v1719_v59 }
 0x333   :  { %v1730_v32 = vadd.f32 %v1755_v62, %v1725_v35 }
 0x335   :  { %1732 = vst.msk [vmem:[%s2168_s10] sm:$0x3] %vm1731_vm0, %v1730_v32 }
 0x336   :  { %1737 = vsyncpa [#allocation3], 1 }
 0x337   :  { %1738 = vsyncpa [#allocation5], 1 }
 0x338   :  { %1739 = vsyncpa [#allocation8], 1 }
 0x339   :  { %1740 = vsyncpa [#allocation11], 1 }

// kernel: _lambda_.7
= control target key start
LH: loop header
LB: loop body
LE: loop exit
PB: predicated region body
PF: predicated region fallthrough
CT: control target
= control target key end

     0   :  { %15 = vsyncpa [#allocation3], 0  ;;  %s2261_s0 = inlined_call_operand.vmem [shape: f32[2,1024], index: 0, kind: input, shape index: {}]   ;;  %s2262_s1 = inlined_call_operand.hbm [shape: f32[1024,512], index: 1, kind: input, shape index: {}]   ;;  %s2263_s2 = inlined_call_operand.hbm [shape: f32[1,512], index: 2, kind: input, shape index: {}]   ;;  %s2264_s3 = inlined_call_operand.hbm [shape: f32[1,512], index: 3, kind: input, shape index: {}]   ;;  %s2265_s4 = inlined_call_operand.hbm [shape: f32[512,256], index: 4, kind: input, shape index: {}]   ;;  %s2266_s5 = inlined_call_operand.hbm [shape: f32[1,256], index: 5, kind: input, shape index: {}]   ;;  %s2267_s6 = inlined_call_operand.hbm [shape: f32[1,256], index: 6, kind: input, shape index: {}]   ;;  %s2268_s7 = inlined_call_operand.hbm [shape: f32[256,2], index: 7, kind: input, shape index: {}]   ;;  %s2269_s8 = inlined_call_operand.vmem [shape: f32[1,2], index: 8, kind: input, shape index: {}]   ;;  %s2270_s9 = inlined_call_operand.hbm [shape: f32[1,2], index: 9, kind: input, shape index: {}]   ;;  %s2271_s10 = inlined_call_operand.hbm [shape: f32[2,2], index: 10, kind: output, shape index: {}]  }
   0x1   :  { %16 = vsyncpa [#allocation6], 0 }
   0x2   :  { %17 = vsyncpa [#allocation9], 0 }
   0x3   :  { %18 = vsyncpa [#allocation12], 0 }
   0x4   :  { %19 = vsyncpa [#allocation15], 0  ;;  %s41_s15 = sshll.u32 %s2263_s2, 4  ;;  %s42_s15 = int_to_ptr.hbm [resolvable:$true] %s41_s15 }
   0x5   :  { %20 = vsyncpa [#allocation4], 0  ;;  %s2038_s16 = smov [#allocation5]   ;;  %s62_s20 = sshll.u32 %s2265_s4, 4  ;;  %s63_s20 = int_to_ptr.hbm [resolvable:$true] %s62_s20 }
   0x6   :  { %s43_s17 = sshll.u32 %s2038_s16, 4  ;;  %s2039_s21 = smov [#allocation8]   ;;  %s44_s17 = int_to_ptr.vmem [resolvable:$true] %s43_s17 }
   0x7   :  { %46 = dma.hbm_to_vmem [thread:$0]  %s42_s15, 64, %s44_s17, [#allocation6]  }
   0x8   :  { %s64_s22 = sshll.u32 %s2039_s21, 4  ;;  %s2040_s23 = smov 256   ;;  %s65_s22 = int_to_ptr.vmem [resolvable:$true] %s64_s22 }
   0x9   :  { %s2041_s24 = smov 16   ;;  %s87_s2 = sshll.u32 %s2267_s6, 4  ;;  %s88_s2 = int_to_ptr.hbm [resolvable:$true] %s87_s2 }
   0xa   :  { %70 = dma.hbm_to_vmem [thread:$0]  %s63_s20, 16384, %s65_s22, [#allocation9], %s2040_s23, %s2040_s23, %s2041_s24  }
   0xb   :  { %s2042_s27 = smov [#allocation11]   ;;  %s27_s4 = sshll.u32 %s2262_s1, 4  ;;  %s28_s4 = int_to_ptr.hbm [resolvable:$true] %s27_s4 }
   0xc   :  { %s89_s28 = sshll.u32 %s2042_s27, 4  ;;  %s2043_s11 = smov [#allocation2]   ;;  %s90_s28 = int_to_ptr.vmem [resolvable:$true] %s89_s28 }
   0xd   :  { %92 = dma.hbm_to_vmem [thread:$0]  %s88_s2, 32, %s90_s28, [#allocation12]  }
   0xe   :  { %s29_s12 = sshll.u32 %s2043_s11, 4  ;;  %s2044_s13 = smov 512   ;;  %s30_s12 = int_to_ptr.vmem [resolvable:$true] %s29_s12 }
   0xf   :  { %s2045_s14 = smov 32   ;;  %s52_s6 = sshll.u32 %s2264_s3, 4  ;;  %s53_s6 = int_to_ptr.hbm [resolvable:$true] %s52_s6 }
  0x10   :  { %35 = dma.hbm_to_vmem [thread:$0]  %s28_s4, 65536, %s30_s12, [#allocation3], %s2044_s13, %s2044_s13, %s2045_s14  }
  0x11   :  { %s2046_s17 = smov [#allocation7]   ;;  %s76_s1 = sshll.u32 %s2266_s5, 4  ;;  %s77_s1 = int_to_ptr.hbm [resolvable:$true] %s76_s1 }
  0x12   :  { %s54_s18 = sshll.u32 %s2046_s17, 4  ;;  %s2047_s21 = smov [#allocation10]   ;;  %s55_s18 = int_to_ptr.vmem [resolvable:$true] %s54_s18 }
  0x13   :  { %57 = dma.hbm_to_vmem [thread:$0]  %s53_s6, 64, %s55_s18, [#allocation6]  }
  0x14   :  { %s78_s22 = sshll.u32 %s2047_s21, 4  ;;  %s97_s25 = sshll.u32 %s2268_s7, 4  ;;  %s79_s22 = int_to_ptr.vmem [resolvable:$true] %s78_s22  ;;  %s98_s25 = int_to_ptr.hbm [resolvable:$true] %s97_s25 }
  0x15   :  { %81 = dma.hbm_to_vmem [thread:$0]  %s77_s1, 32, %s79_s22, [#allocation9]  }
  0x16   :  { %s2048_s3 = smov [#allocation13]   ;;  %s113_s28 = sshll.u32 %s2270_s9, 4  ;;  %s114_s28 = int_to_ptr.hbm [resolvable:$true] %s113_s28 }
  0x17   :  { %s99_s26 = sshll.u32 %s2048_s3, 4  ;;  %s2049_s29 = smov 128   ;;  %s100_s26 = int_to_ptr.vmem [resolvable:$true] %s99_s26 }
  0x18   :  { %s2050_s5 = smov 8   ;;  %s2051_s30 = smov [#allocation14]  }
  0x19   :  { %105 = dma.hbm_to_vmem [thread:$0]  %s98_s25, 4096, %s100_s26, [#allocation12], %s2049_s29, %s2049_s29, %s2050_s5  }
  0x1a   :  { %s115_s4 = sshll.u32 %s2051_s30, 4  ;;  %s116_s4 = int_to_ptr.vmem [resolvable:$true] %s115_s4 }
  0x1b   :  { %118 = dma.hbm_to_vmem [thread:$0]  %s114_s28, 16, %s116_s4, [#allocation15]  }
  0x1c   :  { %2026 = dma.done.wait [#allocation3], 65536  }
  0x1d   :  { %2027 = vsyncadd [#allocation3], 4294901760 }
  0x1e   :  { %2028 = dma.done.wait [#allocation6], 128  }
  0x1f   :  { %2029 = vsyncadd [#allocation6], 4294967168 }
  0x20   :  { %2030 = dma.done.wait [#allocation9], 16416  }
  0x21   :  { %2031 = vsyncadd [#allocation9], 4294950880 }
  0x22   :  { %2032 = dma.done.wait [#allocation12], 4128  }
  0x23   :  { %2033 = vsyncadd [#allocation12], 4294963168 }
  0x24   :  { %2034 = dma.done.wait [#allocation15], 16  }
  0x25   :  { %2035 = vsyncadd [#allocation15], 4294967280  ;;  %v213_v0 = vld [vmem:[#allocation2 + $0x1e0] sm:$0xff]  ;;  %vm1746_vm0 = vcmask 9216   ;;  %s1767_s6 = sshll.u32 %s2271_s10, 4  ;;  %s1768_s6 = int_to_ptr.hbm [resolvable:$true] %s1767_s6 }
  0x26   :  { %v277_v1 = vld [vmem:[#allocation2 + $0x3e0] sm:$0xff]  ;;  %686 = vmatpush.msra.mxu0 %v213_v0 }
  0x27   :  { %v341_v2 = vld [vmem:[#allocation2 + $0x5e0] sm:$0xff]  ;;  %706 = vmatpush.msra.mxu1 %v277_v1 }
  0x28   :  { %v209_v3 = vld [vmem:[#allocation2 + $0x1c0] sm:$0xff]  ;;  %726 = vmatpush.msra.mxu2 %v341_v2 }
  0x29   :  { %v273_v4 = vld [vmem:[#allocation2 + $0x3c0] sm:$0xff]  ;;  %687 = vmatpush.msra.mxu0 %v209_v3 }
  0x2a   :  { %v337_v5 = vld [vmem:[#allocation2 + $0x5c0] sm:$0xff]  ;;  %707 = vmatpush.msra.mxu1 %v273_v4 }
  0x2b   :  { %v405_v6 = vld [vmem:[#allocation2 + $0x7e0] sm:$0xff]  ;;  %727 = vmatpush.msra.mxu2 %v337_v5 }
  0x2c   :  { %v205_v7 = vld [vmem:[#allocation2 + $0x1a0] sm:$0xff]  ;;  %746 = vmatpush.msra.mxu3 %v405_v6 }
  0x2d   :  { %v269_v8 = vld [vmem:[#allocation2 + $0x3a0] sm:$0xff]  ;;  %688 = vmatpush.msra.mxu0 %v205_v7 }
  0x2e   :  { %v333_v9 = vld [vmem:[#allocation2 + $0x5a0] sm:$0xff]  ;;  %708 = vmatpush.msra.mxu1 %v269_v8 }
  0x2f   :  { %v401_v10 = vld [vmem:[#allocation2 + $0x7c0] sm:$0xff]  ;;  %728 = vmatpush.msra.mxu2 %v333_v9 }
  0x30   :  { %v201_v11 = vld [vmem:[#allocation2 + $0x180] sm:$0xff]  ;;  %747 = vmatpush.msra.mxu3 %v401_v10 }
  0x31   :  { %v265_v12 = vld [vmem:[#allocation2 + $0x380] sm:$0xff]  ;;  %689 = vmatpush.msra.mxu0 %v201_v11 }
  0x32   :  { %v329_v13 = vld [vmem:[#allocation2 + $0x580] sm:$0xff]  ;;  %709 = vmatpush.msra.mxu1 %v265_v12 }
  0x33   :  { %v397_v14 = vld [vmem:[#allocation2 + $0x7a0] sm:$0xff]  ;;  %729 = vmatpush.msra.mxu2 %v329_v13 }
  0x34   :  { %v197_v15 = vld [vmem:[#allocation2 + $0x160] sm:$0xff]  ;;  %748 = vmatpush.msra.mxu3 %v397_v14 }
  0x35   :  { %v261_v16 = vld [vmem:[#allocation2 + $0x360] sm:$0xff]  ;;  %690 = vmatpush.msra.mxu0 %v197_v15 }
  0x36   :  { %v325_v17 = vld [vmem:[#allocation2 + $0x560] sm:$0xff]  ;;  %710 = vmatpush.msra.mxu1 %v261_v16 }
  0x37   :  { %v393_v18 = vld [vmem:[#allocation2 + $0x780] sm:$0xff]  ;;  %730 = vmatpush.msra.mxu2 %v325_v17 }
  0x38   :  { %v193_v19 = vld [vmem:[#allocation2 + $0x140] sm:$0xff]  ;;  %749 = vmatpush.msra.mxu3 %v393_v18 }
  0x39   :  { %v257_v20 = vld [vmem:[#allocation2 + $0x340] sm:$0xff]  ;;  %691 = vmatpush.msra.mxu0 %v193_v19 }
  0x3a   :  { %v321_v21 = vld [vmem:[#allocation2 + $0x540] sm:$0xff]  ;;  %711 = vmatpush.msra.mxu1 %v257_v20 }
  0x3b   :  { %v389_v22 = vld [vmem:[#allocation2 + $0x760] sm:$0xff]  ;;  %731 = vmatpush.msra.mxu2 %v321_v21 }
  0x3c   :  { %v189_v23 = vld [vmem:[#allocation2 + $0x120] sm:$0xff]  ;;  %750 = vmatpush.msra.mxu3 %v389_v22 }
  0x3d   :  { %v253_v24 = vld [vmem:[#allocation2 + $0x320] sm:$0xff]  ;;  %692 = vmatpush.msra.mxu0 %v189_v23  ;;  %v151_v23 = vld [vmem:[%s2261_s0] sm:$0xff] }
  0x3e   :  { %v317_v25 = vld [vmem:[#allocation2 + $0x520] sm:$0xff]  ;;  %712 = vmatpush.msra.mxu1 %v253_v24  ;;  %667 = vst [vmem:[#allocation1] ss:$4 sm:$0xff] %v151_v23 }
  0x3f   :  { %v385_v26 = vld [vmem:[#allocation2 + $0x740] sm:$0xff]  ;;  %732 = vmatpush.msra.mxu2 %v317_v25 }
  0x40   :  { %v185_v27 = vld [vmem:[#allocation2 + $0x100] sm:$0xff]  ;;  %751 = vmatpush.msra.mxu3 %v385_v26 }
  0x41   :  { %v249_v28 = vld [vmem:[#allocation2 + $0x300] sm:$0xff]  ;;  %693 = vmatpush.msra.mxu0 %v185_v27 }
  0x42   :  { %v313_v29 = vld [vmem:[#allocation2 + $0x500] sm:$0xff]  ;;  %713 = vmatpush.msra.mxu1 %v249_v28 }
  0x43   :  { %v381_v30 = vld [vmem:[#allocation2 + $0x720] sm:$0xff]  ;;  %733 = vmatpush.msra.mxu2 %v313_v29 }
  0x44   :  { %v181_v31 = vld [vmem:[#allocation2 + $0xe0] sm:$0xff]  ;;  %752 = vmatpush.msra.mxu3 %v381_v30 }
  0x45   :  { %v245_v32 = vld [vmem:[#allocation2 + $0x2e0] sm:$0xff]  ;;  %694 = vmatpush.msra.mxu0 %v181_v31 }
  0x46   :  { %v309_v33 = vld [vmem:[#allocation2 + $0x4e0] sm:$0xff]  ;;  %714 = vmatpush.msra.mxu1 %v245_v32 }
  0x47   :  { %v377_v34 = vld [vmem:[#allocation2 + $0x700] sm:$0xff]  ;;  %734 = vmatpush.msra.mxu2 %v309_v33 }
  0x48   :  { %v177_v35 = vld [vmem:[#allocation2 + $0xc0] sm:$0xff]  ;;  %753 = vmatpush.msra.mxu3 %v377_v34 }
  0x49   :  { %v241_v36 = vld [vmem:[#allocation2 + $0x2c0] sm:$0xff]  ;;  %695 = vmatpush.msra.mxu0 %v177_v35 }
  0x4a   :  { %v305_v37 = vld [vmem:[#allocation2 + $0x4c0] sm:$0xff]  ;;  %715 = vmatpush.msra.mxu1 %v241_v36 }
  0x4b   :  { %v373_v38 = vld [vmem:[#allocation2 + $0x6e0] sm:$0xff]  ;;  %735 = vmatpush.msra.mxu2 %v305_v37 }
  0x4c   :  { %v173_v39 = vld [vmem:[#allocation2 + $0xa0] sm:$0xff]  ;;  %754 = vmatpush.msra.mxu3 %v373_v38 }
  0x4d   :  { %v237_v40 = vld [vmem:[#allocation2 + $0x2a0] sm:$0xff]  ;;  %696 = vmatpush.msra.mxu0 %v173_v39 }
  0x4e   :  { %v301_v41 = vld [vmem:[#allocation2 + $0x4a0] sm:$0xff]  ;;  %716 = vmatpush.msra.mxu1 %v237_v40 }
  0x4f   :  { %v369_v42 = vld [vmem:[#allocation2 + $0x6c0] sm:$0xff]  ;;  %736 = vmatpush.msra.mxu2 %v301_v41 }
  0x50   :  { %v169_v43 = vld [vmem:[#allocation2 + $0x80] sm:$0xff]  ;;  %755 = vmatpush.msra.mxu3 %v369_v42 }
  0x51   :  { %v233_v44 = vld [vmem:[#allocation2 + $0x280] sm:$0xff]  ;;  %697 = vmatpush.msra.mxu0 %v169_v43 }
  0x52   :  { %v297_v45 = vld [vmem:[#allocation2 + $0x480] sm:$0xff]  ;;  %717 = vmatpush.msra.mxu1 %v233_v44 }
  0x53   :  { %v365_v46 = vld [vmem:[#allocation2 + $0x6a0] sm:$0xff]  ;;  %737 = vmatpush.msra.mxu2 %v297_v45 }
  0x54   :  { %v165_v47 = vld [vmem:[#allocation2 + $0x60] sm:$0xff]  ;;  %756 = vmatpush.msra.mxu3 %v365_v46 }
  0x55   :  { %v229_v48 = vld [vmem:[#allocation2 + $0x260] sm:$0xff]  ;;  %698 = vmatpush.msra.mxu0 %v165_v47 }
  0x56   :  { %v293_v49 = vld [vmem:[#allocation2 + $0x460] sm:$0xff]  ;;  %718 = vmatpush.msra.mxu1 %v229_v48 }
  0x57   :  { %v361_v50 = vld [vmem:[#allocation2 + $0x680] sm:$0xff]  ;;  %738 = vmatpush.msra.mxu2 %v293_v49 }
  0x58   :  { %v161_v51 = vld [vmem:[#allocation2 + $0x40] sm:$0xff]  ;;  %757 = vmatpush.msra.mxu3 %v361_v50 }
  0x59   :  { %v225_v52 = vld [vmem:[#allocation2 + $0x240] sm:$0xff]  ;;  %699 = vmatpush.msra.mxu0 %v161_v51 }
  0x5a   :  { %v289_v53 = vld [vmem:[#allocation2 + $0x440] sm:$0xff]  ;;  %719 = vmatpush.msra.mxu1 %v225_v52 }
  0x5b   :  { %v357_v54 = vld [vmem:[#allocation2 + $0x660] sm:$0xff]  ;;  %739 = vmatpush.msra.mxu2 %v289_v53 }
  0x5c   :  { %v157_v55 = vld [vmem:[#allocation2 + $0x20] sm:$0xff]  ;;  %758 = vmatpush.msra.mxu3 %v357_v54 }
  0x5d   :  { %v221_v56 = vld [vmem:[#allocation2 + $0x220] sm:$0xff]  ;;  %700 = vmatpush.msra.mxu0 %v157_v55 }
  0x5e   :  { %v285_v57 = vld [vmem:[#allocation2 + $0x420] sm:$0xff]  ;;  %720 = vmatpush.msra.mxu1 %v221_v56 }
  0x5f   :  { %v353_v58 = vld [vmem:[#allocation2 + $0x640] sm:$0xff]  ;;  %740 = vmatpush.msra.mxu2 %v285_v57 }
  0x60   :  { %v153_v59 = vld [vmem:[#allocation2] sm:$0xff]  ;;  %759 = vmatpush.msra.mxu3 %v353_v58 }
  0x61   :  { %v217_v60 = vld [vmem:[#allocation2 + $0x200] sm:$0xff]  ;;  %701 = vmatpush.msra.mxu0 %v153_v59 }
  0x62   :  { %v281_v61 = vld [vmem:[#allocation2 + $0x400] sm:$0xff]  ;;  %721 = vmatpush.msra.mxu1 %v217_v60 }
  0x63   :  { %v349_v62 = vld [vmem:[#allocation2 + $0x620] sm:$0xff]  ;;  %741 = vmatpush.msra.mxu2 %v281_v61  ;;  %v2138_v61 = vld.sshfl [vmem:[#allocation1 + $0x10] sm:$0xff pattern:$0x73625140] }
  0x64   :  { %v469_v63 = vld [vmem:[#allocation2 + $0x9e0] sm:$0xff]  ;;  %760 = vmatpush.msra.mxu3 %v349_v62  ;;  %742 = vmatmul.f32.vlgmr.msra.gmra.mxu2 %v2138_v61 }
  0x65   :  { %v533_v0 = vld [vmem:[#allocation2 + $0xbe0] sm:$0xff]  ;;  %766 = vmatpush.msrb.mxu0 %v469_v63 }
  0x66   :  { %v597_v1 = vld [vmem:[#allocation2 + $0xde0] sm:$0xff]  ;;  %786 = vmatpush.msrb.mxu1 %v533_v0 }
  0x67   :  { %v345_v2 = vld [vmem:[#allocation2 + $0x600] sm:$0xff]  ;;  %806 = vmatpush.msrb.mxu2 %v597_v1 }
  0x68   :  { %v465_v3 = vld [vmem:[#allocation2 + $0x9c0] sm:$0xff]  ;;  %761 = vmatpush.msra.mxu3 %v345_v2  ;;  %v2140_v2 = vld.sshfl [vmem:[#allocation1] sm:$0xff pattern:$0x73625140] }
  0x69   :  { %v529_v4 = vld [vmem:[#allocation2 + $0xbc0] sm:$0xff]  ;;  %767 = vmatpush.msrb.mxu0 %v465_v3 }
  0x6a   :  { %v593_v5 = vld [vmem:[#allocation2 + $0xdc0] sm:$0xff]  ;;  %787 = vmatpush.msrb.mxu1 %v529_v4  ;;  %v2145_v4 = vld.sshfl [vmem:[#allocation1 + $0x18] sm:$0xff pattern:$0x73625140]  ;;  %702 = vmatmul.f32.vlgmr.msra.gmra.mxu0 %v2140_v2 }
  0x6b   :  { %v661_v6 = vld [vmem:[#allocation2 + $0xfe0] sm:$0xff]  ;;  %807 = vmatpush.msrb.mxu2 %v593_v5  ;;  %v214_v5 = vld [vmem:[#allocation2 + $0x1e8] sm:$0xff]  ;;  %762 = vmatmul.f32.vlgmr.msra.gmra.mxu3 %v2145_v4 }
  0x6c   :  { %v461_v7 = vld [vmem:[#allocation2 + $0x9a0] sm:$0xff]  ;;  %826 = vmatpush.msrb.mxu3 %v661_v6  ;;  %v278_v6 = vld [vmem:[#allocation2 + $0x3e8] sm:$0xff] }
  0x6d   :  { %v525_v8 = vld [vmem:[#allocation2 + $0xba0] sm:$0xff]  ;;  %768 = vmatpush.msrb.mxu0 %v461_v7  ;;  %v342_v7 = vld [vmem:[#allocation2 + $0x5e8] sm:$0xff] }
  0x6e   :  { %v589_v9 = vld [vmem:[#allocation2 + $0xda0] sm:$0xff]  ;;  %788 = vmatpush.msrb.mxu1 %v525_v8 }
  0x6f   :  { %v657_v10 = vld [vmem:[#allocation2 + $0xfc0] sm:$0xff]  ;;  %808 = vmatpush.msrb.mxu2 %v589_v9  ;;  %v210_v9 = vld [vmem:[#allocation2 + $0x1c8] sm:$0xff] }
  0x70   :  { %v457_v11 = vld [vmem:[#allocation2 + $0x980] sm:$0xff]  ;;  %827 = vmatpush.msrb.mxu3 %v657_v10  ;;  %v274_v10 = vld [vmem:[#allocation2 + $0x3c8] sm:$0xff] }
  0x71   :  { %v521_v12 = vld [vmem:[#allocation2 + $0xb80] sm:$0xff]  ;;  %769 = vmatpush.msrb.mxu0 %v457_v11  ;;  %v338_v11 = vld [vmem:[#allocation2 + $0x5c8] sm:$0xff] }
  0x72   :  { %v585_v13 = vld [vmem:[#allocation2 + $0xd80] sm:$0xff]  ;;  %789 = vmatpush.msrb.mxu1 %v521_v12  ;;  %v406_v12 = vld [vmem:[#allocation2 + $0x7e8] sm:$0xff] }
  0x73   :  { %v653_v14 = vld [vmem:[#allocation2 + $0xfa0] sm:$0xff]  ;;  %809 = vmatpush.msrb.mxu2 %v585_v13  ;;  %v206_v13 = vld [vmem:[#allocation2 + $0x1a8] sm:$0xff] }
  0x74   :  { %v453_v15 = vld [vmem:[#allocation2 + $0x960] sm:$0xff]  ;;  %828 = vmatpush.msrb.mxu3 %v653_v14  ;;  %v270_v14 = vld [vmem:[#allocation2 + $0x3a8] sm:$0xff] }
  0x75   :  { %v517_v16 = vld [vmem:[#allocation2 + $0xb60] sm:$0xff]  ;;  %770 = vmatpush.msrb.mxu0 %v453_v15  ;;  %v334_v15 = vld [vmem:[#allocation2 + $0x5a8] sm:$0xff] }
  0x76   :  { %v581_v17 = vld [vmem:[#allocation2 + $0xd60] sm:$0xff]  ;;  %790 = vmatpush.msrb.mxu1 %v517_v16  ;;  %v402_v16 = vld [vmem:[#allocation2 + $0x7c8] sm:$0xff] }
  0x77   :  { %v649_v18 = vld [vmem:[#allocation2 + $0xf80] sm:$0xff]  ;;  %810 = vmatpush.msrb.mxu2 %v581_v17 }
  0x78   :  { %v449_v19 = vld [vmem:[#allocation2 + $0x940] sm:$0xff]  ;;  %829 = vmatpush.msrb.mxu3 %v649_v18  ;;  %v202_v18 = vld [vmem:[#allocation2 + $0x188] sm:$0xff] }
  0x79   :  { %v513_v20 = vld [vmem:[#allocation2 + $0xb40] sm:$0xff]  ;;  %771 = vmatpush.msrb.mxu0 %v449_v19  ;;  %v266_v19 = vld [vmem:[#allocation2 + $0x388] sm:$0xff] }
  0x7a   :  { %v577_v21 = vld [vmem:[#allocation2 + $0xd40] sm:$0xff]  ;;  %791 = vmatpush.msrb.mxu1 %v513_v20  ;;  %v330_v20 = vld [vmem:[#allocation2 + $0x588] sm:$0xff] }
  0x7b   :  { %v645_v22 = vld [vmem:[#allocation2 + $0xf60] sm:$0xff]  ;;  %811 = vmatpush.msrb.mxu2 %v577_v21  ;;  %v398_v21 = vld [vmem:[#allocation2 + $0x7a8] sm:$0xff] }
  0x7c   :  { %v445_v24 = vld [vmem:[#allocation2 + $0x920] sm:$0xff]  ;;  %830 = vmatpush.msrb.mxu3 %v645_v22 }
  0x7d   :  { %v509_v25 = vld [vmem:[#allocation2 + $0xb20] sm:$0xff]  ;;  %772 = vmatpush.msrb.mxu0 %v445_v24  ;;  %v198_v24 = vld [vmem:[#allocation2 + $0x168] sm:$0xff] }
  0x7e   :  { %v573_v26 = vld [vmem:[#allocation2 + $0xd20] sm:$0xff]  ;;  %792 = vmatpush.msrb.mxu1 %v509_v25  ;;  %v262_v25 = vld [vmem:[#allocation2 + $0x368] sm:$0xff] }
  0x7f   :  { %v641_v27 = vld [vmem:[#allocation2 + $0xf40] sm:$0xff]  ;;  %812 = vmatpush.msrb.mxu2 %v573_v26  ;;  %v326_v26 = vld [vmem:[#allocation2 + $0x568] sm:$0xff] }
  0x80   :  { %v441_v28 = vld [vmem:[#allocation2 + $0x900] sm:$0xff]  ;;  %831 = vmatpush.msrb.mxu3 %v641_v27  ;;  %v394_v27 = vld [vmem:[#allocation2 + $0x788] sm:$0xff] }
  0x81   :  { %v505_v29 = vld [vmem:[#allocation2 + $0xb00] sm:$0xff]  ;;  %773 = vmatpush.msrb.mxu0 %v441_v28 }
  0x82   :  { %v569_v30 = vld [vmem:[#allocation2 + $0xd00] sm:$0xff]  ;;  %793 = vmatpush.msrb.mxu1 %v505_v29  ;;  %v194_v29 = vld [vmem:[#allocation2 + $0x148] sm:$0xff] }
  0x83   :  { %v637_v31 = vld [vmem:[#allocation2 + $0xf20] sm:$0xff]  ;;  %813 = vmatpush.msrb.mxu2 %v569_v30  ;;  %v258_v30 = vld [vmem:[#allocation2 + $0x348] sm:$0xff] }
  0x84   :  { %v437_v32 = vld [vmem:[#allocation2 + $0x8e0] sm:$0xff]  ;;  %832 = vmatpush.msrb.mxu3 %v637_v31  ;;  %v322_v31 = vld [vmem:[#allocation2 + $0x548] sm:$0xff] }
  0x85   :  { %v501_v33 = vld [vmem:[#allocation2 + $0xae0] sm:$0xff]  ;;  %774 = vmatpush.msrb.mxu0 %v437_v32  ;;  %v390_v32 = vld [vmem:[#allocation2 + $0x768] sm:$0xff] }
  0x86   :  { %v152_v34 = vld [vmem:[%s2261_s0 + $0x8] sm:$0xff]  ;;  %794 = vmatpush.msrb.mxu1 %v501_v33  ;;  %v190_v33 = vld [vmem:[#allocation2 + $0x128] sm:$0xff] }
  0x87   :  { %v565_v35 = vld [vmem:[#allocation2 + $0xce0] sm:$0xff]  ;;  %669 = vst [vmem:[#allocation1 + $0x20] ss:$4 sm:$0xff] %v152_v34  ;;  %v254_v34 = vld [vmem:[#allocation2 + $0x328] sm:$0xff] }
  0x88   :  { %v633_v36 = vld [vmem:[#allocation2 + $0xf00] sm:$0xff]  ;;  %814 = vmatpush.msrb.mxu2 %v565_v35  ;;  %v318_v35 = vld [vmem:[#allocation2 + $0x528] sm:$0xff] }
  0x89   :  { %v433_v37 = vld [vmem:[#allocation2 + $0x8c0] sm:$0xff]  ;;  %833 = vmatpush.msrb.mxu3 %v633_v36  ;;  %v386_v36 = vld [vmem:[#allocation2 + $0x748] sm:$0xff] }
  0x8a   :  { %v497_v38 = vld [vmem:[#allocation2 + $0xac0] sm:$0xff]  ;;  %775 = vmatpush.msrb.mxu0 %v433_v37  ;;  %v186_v37 = vld [vmem:[#allocation2 + $0x108] sm:$0xff] }
  0x8b   :  { %v561_v39 = vld [vmem:[#allocation2 + $0xcc0] sm:$0xff]  ;;  %795 = vmatpush.msrb.mxu1 %v497_v38  ;;  %v250_v38 = vld [vmem:[#allocation2 + $0x308] sm:$0xff] }
  0x8c   :  { %v629_v40 = vld [vmem:[#allocation2 + $0xee0] sm:$0xff]  ;;  %815 = vmatpush.msrb.mxu2 %v561_v39  ;;  %v314_v39 = vld [vmem:[#allocation2 + $0x508] sm:$0xff] }
  0x8d   :  { %v429_v41 = vld [vmem:[#allocation2 + $0x8a0] sm:$0xff]  ;;  %834 = vmatpush.msrb.mxu3 %v629_v40  ;;  %v382_v40 = vld [vmem:[#allocation2 + $0x728] sm:$0xff] }
  0x8e   :  { %v493_v42 = vld [vmem:[#allocation2 + $0xaa0] sm:$0xff]  ;;  %776 = vmatpush.msrb.mxu0 %v429_v41  ;;  %v2150_v17 = vld.sshfl [vmem:[#allocation1 + $0x30] sm:$0xff pattern:$0x73625140] }
  0x8f   :  { %v557_v43 = vld [vmem:[#allocation2 + $0xca0] sm:$0xff]  ;;  %796 = vmatpush.msrb.mxu1 %v493_v42  ;;  %v2152_v22 = vld.sshfl [vmem:[#allocation1 + $0x20] sm:$0xff pattern:$0x73625140]  ;;  %v182_v41 = vld [vmem:[#allocation2 + $0xe8] sm:$0xff] }
  0x90   :  { %v625_v44 = vld [vmem:[#allocation2 + $0xec0] sm:$0xff]  ;;  %816 = vmatpush.msrb.mxu2 %v557_v43  ;;  %v2155_v23 = vld.sshfl [vmem:[#allocation1 + $0x38] sm:$0xff pattern:$0x73625140]  ;;  %v246_v42 = vld [vmem:[#allocation2 + $0x2e8] sm:$0xff] }
  0x91   :  { %v425_v45 = vld [vmem:[#allocation2 + $0x880] sm:$0xff]  ;;  %835 = vmatpush.msrb.mxu3 %v625_v44  ;;  %v310_v43 = vld [vmem:[#allocation2 + $0x4e8] sm:$0xff] }
  0x92   :  { %v489_v46 = vld [vmem:[#allocation2 + $0xa80] sm:$0xff]  ;;  %777 = vmatpush.msrb.mxu0 %v425_v45  ;;  %v378_v44 = vld [vmem:[#allocation2 + $0x708] sm:$0xff] }
  0x93   :  { %v553_v47 = vld [vmem:[#allocation2 + $0xc80] sm:$0xff]  ;;  %797 = vmatpush.msrb.mxu1 %v489_v46  ;;  %v178_v45 = vld [vmem:[#allocation2 + $0xc8] sm:$0xff] }
  0x94   :  { %v621_v48 = vld [vmem:[#allocation2 + $0xea0] sm:$0xff]  ;;  %817 = vmatpush.msrb.mxu2 %v553_v47  ;;  %v242_v46 = vld [vmem:[#allocation2 + $0x2c8] sm:$0xff] }
  0x95   :  { %v421_v49 = vld [vmem:[#allocation2 + $0x860] sm:$0xff]  ;;  %836 = vmatpush.msrb.mxu3 %v621_v48  ;;  %v306_v47 = vld [vmem:[#allocation2 + $0x4c8] sm:$0xff] }
  0x96   :  { %v485_v50 = vld [vmem:[#allocation2 + $0xa60] sm:$0xff]  ;;  %778 = vmatpush.msrb.mxu0 %v421_v49  ;;  %v374_v48 = vld [vmem:[#allocation2 + $0x6e8] sm:$0xff] }
  0x97   :  { %v549_v51 = vld [vmem:[#allocation2 + $0xc60] sm:$0xff]  ;;  %798 = vmatpush.msrb.mxu1 %v485_v50  ;;  %v174_v49 = vld [vmem:[#allocation2 + $0xa8] sm:$0xff] }
  0x98   :  { %v617_v52 = vld [vmem:[#allocation2 + $0xe80] sm:$0xff]  ;;  %818 = vmatpush.msrb.mxu2 %v549_v51  ;;  %v238_v50 = vld [vmem:[#allocation2 + $0x2a8] sm:$0xff] }
  0x99   :  { %v417_v53 = vld [vmem:[#allocation2 + $0x840] sm:$0xff]  ;;  %837 = vmatpush.msrb.mxu3 %v617_v52  ;;  %v302_v51 = vld [vmem:[#allocation2 + $0x4a8] sm:$0xff] }
  0x9a   :  { %v481_v54 = vld [vmem:[#allocation2 + $0xa40] sm:$0xff]  ;;  %779 = vmatpush.msrb.mxu0 %v417_v53  ;;  %v370_v52 = vld [vmem:[#allocation2 + $0x6c8] sm:$0xff] }
  0x9b   :  { %v545_v55 = vld [vmem:[#allocation2 + $0xc40] sm:$0xff]  ;;  %799 = vmatpush.msrb.mxu1 %v481_v54  ;;  %v170_v53 = vld [vmem:[#allocation2 + $0x88] sm:$0xff] }
  0x9c   :  { %v613_v56 = vld [vmem:[#allocation2 + $0xe60] sm:$0xff]  ;;  %819 = vmatpush.msrb.mxu2 %v545_v55  ;;  %v234_v54 = vld [vmem:[#allocation2 + $0x288] sm:$0xff] }
  0x9d   :  { %v413_v57 = vld [vmem:[#allocation2 + $0x820] sm:$0xff]  ;;  %838 = vmatpush.msrb.mxu3 %v613_v56  ;;  %v298_v55 = vld [vmem:[#allocation2 + $0x488] sm:$0xff] }
  0x9e   :  { %v477_v58 = vld [vmem:[#allocation2 + $0xa20] sm:$0xff]  ;;  %780 = vmatpush.msrb.mxu0 %v413_v57  ;;  %v366_v56 = vld [vmem:[#allocation2 + $0x6a8] sm:$0xff] }
  0x9f   :  { %v541_v59 = vld [vmem:[#allocation2 + $0xc20] sm:$0xff]  ;;  %800 = vmatpush.msrb.mxu1 %v477_v58  ;;  %v166_v57 = vld [vmem:[#allocation2 + $0x68] sm:$0xff] }
  0xa0   :  { %v609_v60 = vld [vmem:[#allocation2 + $0xe40] sm:$0xff]  ;;  %820 = vmatpush.msrb.mxu2 %v541_v59  ;;  %v230_v58 = vld [vmem:[#allocation2 + $0x268] sm:$0xff] }
  0xa1   :  { %v409_v62 = vld [vmem:[#allocation2 + $0x800] sm:$0xff]  ;;  %839 = vmatpush.msrb.mxu3 %v609_v60  ;;  %v294_v59 = vld [vmem:[#allocation2 + $0x468] sm:$0xff] }
  0xa2   :  { %v473_v63 = vld [vmem:[#allocation2 + $0xa00] sm:$0xff]  ;;  %781 = vmatpush.msrb.mxu0 %v409_v62  ;;  %v362_v60 = vld [vmem:[#allocation2 + $0x688] sm:$0xff] }
  0xa3   :  { %v537_v0 = vld [vmem:[#allocation2 + $0xc00] sm:$0xff]  ;;  %801 = vmatpush.msrb.mxu1 %v473_v63  ;;  %782 = vmatmul.f32.vlgmr.msrb.gmra.mxu0 %v2152_v22  ;;  %v162_v62 = vld [vmem:[#allocation2 + $0x48] sm:$0xff] }
  0xa4   :  { %v605_v1 = vld [vmem:[#allocation2 + $0xe20] sm:$0xff]  ;;  %821 = vmatpush.msrb.mxu2 %v537_v0  ;;  %846 = vmatpush.msra.mxu0 %v214_v5  ;;  %v226_v63 = vld [vmem:[#allocation2 + $0x248] sm:$0xff] }
  0xa5   :  { %v2143_v3 = vld.sshfl [vmem:[#allocation1 + $0x8] sm:$0xff pattern:$0x73625140]  ;;  %840 = vmatpush.msrb.mxu3 %v605_v1  ;;  %822 = vmatmul.f32.vlgmr.msrb.gmra.mxu2 %v2150_v17  ;;  %v290_v0 = vld [vmem:[#allocation2 + $0x448] sm:$0xff] }
  0xa6   :  { %v601_v8 = vld [vmem:[#allocation2 + $0xe00] sm:$0xff]  ;;  %722 = vmatmul.f32.vlgmr.msra.gmra.mxu1 %v2143_v3  ;;  %886 = vmatpush.msra.mxu2 %v342_v7  ;;  %v358_v1 = vld [vmem:[#allocation2 + $0x668] sm:$0xff] }
  0xa7   :  { %866 = vmatpush.msra.mxu1 %v278_v6  ;;  %841 = vmatpush.msrb.mxu3 %v601_v8  ;;  %v2158_v28 = vld.sshfl [vmem:[#allocation1 + $0x28] sm:$0xff pattern:$0x73625140]  ;;  %v158_v5 = vld [vmem:[#allocation2 + $0x28] sm:$0xff] }
  0xa8   :  { %847 = vmatpush.msra.mxu0 %v210_v9  ;;  %887 = vmatpush.msra.mxu2 %v338_v11  ;;  %v222_v6 = vld [vmem:[#allocation2 + $0x228] sm:$0xff] }
  0xa9   :  { %867 = vmatpush.msra.mxu1 %v274_v10  ;;  %906 = vmatpush.msra.mxu3 %v406_v12  ;;  %v286_v7 = vld [vmem:[#allocation2 + $0x428] sm:$0xff] }
  0xaa   :  { %848 = vmatpush.msra.mxu0 %v206_v13  ;;  %888 = vmatpush.msra.mxu2 %v334_v15  ;;  %v354_v8 = vld [vmem:[#allocation2 + $0x648] sm:$0xff] }
  0xab   :  { %868 = vmatpush.msra.mxu1 %v270_v14  ;;  %907 = vmatpush.msra.mxu3 %v402_v16  ;;  %v154_v9 = vld [vmem:[#allocation2 + $0x8] sm:$0xff] }
  0xac   :  { %849 = vmatpush.msra.mxu0 %v202_v18  ;;  %889 = vmatpush.msra.mxu2 %v330_v20  ;;  %v218_v10 = vld [vmem:[#allocation2 + $0x208] sm:$0xff] }
  0xad   :  { %869 = vmatpush.msra.mxu1 %v266_v19  ;;  %908 = vmatpush.msra.mxu3 %v398_v21  ;;  %v282_v11 = vld [vmem:[#allocation2 + $0x408] sm:$0xff] }
  0xae   :  { %842 = vmatmul.f32.vlgmr.msrb.gmra.mxu3 %v2155_v23  ;;  %850 = vmatpush.msra.mxu0 %v198_v24  ;;  %v350_v12 = vld [vmem:[#allocation2 + $0x628] sm:$0xff] }
  0xaf   :  { %870 = vmatpush.msra.mxu1 %v262_v25  ;;  %890 = vmatpush.msra.mxu2 %v326_v26  ;;  %v470_v13 = vld [vmem:[#allocation2 + $0x9e8] sm:$0xff] }
  0xb0   :  { %909 = vmatpush.msra.mxu3 %v394_v27  ;;  %802 = vmatmul.f32.vlgmr.msrb.gmra.mxu1 %v2158_v28  ;;  %v534_v14 = vld [vmem:[#allocation2 + $0xbe8] sm:$0xff] }
  0xb1   :  { %851 = vmatpush.msra.mxu0 %v194_v29  ;;  %871 = vmatpush.msra.mxu1 %v258_v30  ;;  %v598_v15 = vld [vmem:[#allocation2 + $0xde8] sm:$0xff] }
  0xb2   :  { %891 = vmatpush.msra.mxu2 %v322_v31  ;;  %910 = vmatpush.msra.mxu3 %v390_v32  ;;  %v346_v16 = vld [vmem:[#allocation2 + $0x608] sm:$0xff] }
  0xb3   :  { %852 = vmatpush.msra.mxu0 %v190_v33  ;;  %872 = vmatpush.msra.mxu1 %v254_v34  ;;  %v466_v18 = vld [vmem:[#allocation2 + $0x9c8] sm:$0xff] }
  0xb4   :  { %892 = vmatpush.msra.mxu2 %v318_v35  ;;  %911 = vmatpush.msra.mxu3 %v386_v36  ;;  %v530_v19 = vld [vmem:[#allocation2 + $0xbc8] sm:$0xff] }
  0xb5   :  { %853 = vmatpush.msra.mxu0 %v186_v37  ;;  %873 = vmatpush.msra.mxu1 %v250_v38  ;;  %v594_v20 = vld [vmem:[#allocation2 + $0xdc8] sm:$0xff] }
  0xb6   :  { %893 = vmatpush.msra.mxu2 %v314_v39  ;;  %912 = vmatpush.msra.mxu3 %v382_v40  ;;  %v662_v21 = vld [vmem:[#allocation2 + $0xfe8] sm:$0xff] }
  0xb7   :  { %854 = vmatpush.msra.mxu0 %v182_v41  ;;  %874 = vmatpush.msra.mxu1 %v246_v42  ;;  %v462_v24 = vld [vmem:[#allocation2 + $0x9a8] sm:$0xff] }
  0xb8   :  { %894 = vmatpush.msra.mxu2 %v310_v43  ;;  %913 = vmatpush.msra.mxu3 %v378_v44  ;;  %v526_v25 = vld [vmem:[#allocation2 + $0xba8] sm:$0xff] }
  0xb9   :  { %855 = vmatpush.msra.mxu0 %v178_v45  ;;  %875 = vmatpush.msra.mxu1 %v242_v46  ;;  %v590_v26 = vld [vmem:[#allocation2 + $0xda8] sm:$0xff] }
  0xba   :  { %895 = vmatpush.msra.mxu2 %v306_v47  ;;  %914 = vmatpush.msra.mxu3 %v374_v48  ;;  %v658_v27 = vld [vmem:[#allocation2 + $0xfc8] sm:$0xff] }
  0xbb   :  { %856 = vmatpush.msra.mxu0 %v174_v49  ;;  %876 = vmatpush.msra.mxu1 %v238_v50  ;;  %v458_v29 = vld [vmem:[#allocation2 + $0x988] sm:$0xff] }
  0xbc   :  { %896 = vmatpush.msra.mxu2 %v302_v51  ;;  %915 = vmatpush.msra.mxu3 %v370_v52  ;;  %v522_v30 = vld [vmem:[#allocation2 + $0xb88] sm:$0xff] }
  0xbd   :  { %857 = vmatpush.msra.mxu0 %v170_v53  ;;  %877 = vmatpush.msra.mxu1 %v234_v54  ;;  %v586_v31 = vld [vmem:[#allocation2 + $0xd88] sm:$0xff] }
  0xbe   :  { %897 = vmatpush.msra.mxu2 %v298_v55  ;;  %916 = vmatpush.msra.mxu3 %v366_v56  ;;  %v654_v32 = vld [vmem:[#allocation2 + $0xfa8] sm:$0xff] }
  0xbf   :  { %858 = vmatpush.msra.mxu0 %v166_v57  ;;  %878 = vmatpush.msra.mxu1 %v230_v58  ;;  %v454_v33 = vld [vmem:[#allocation2 + $0x968] sm:$0xff] }
  0xc0   :  { %898 = vmatpush.msra.mxu2 %v294_v59  ;;  %917 = vmatpush.msra.mxu3 %v362_v60  ;;  %v518_v34 = vld [vmem:[#allocation2 + $0xb68] sm:$0xff] }
  0xc1   :  { %859 = vmatpush.msra.mxu0 %v162_v62  ;;  %879 = vmatpush.msra.mxu1 %v226_v63  ;;  %v582_v35 = vld [vmem:[#allocation2 + $0xd68] sm:$0xff] }
  0xc2   :  { %899 = vmatpush.msra.mxu2 %v290_v0  ;;  %918 = vmatpush.msra.mxu3 %v358_v1  ;;  %v650_v36 = vld [vmem:[#allocation2 + $0xf88] sm:$0xff] }
  0xc3   :  { %860 = vmatpush.msra.mxu0 %v158_v5  ;;  %880 = vmatpush.msra.mxu1 %v222_v6  ;;  %v450_v37 = vld [vmem:[#allocation2 + $0x948] sm:$0xff] }
  0xc4   :  { %900 = vmatpush.msra.mxu2 %v286_v7  ;;  %919 = vmatpush.msra.mxu3 %v354_v8  ;;  %v514_v38 = vld [vmem:[#allocation2 + $0xb48] sm:$0xff] }
  0xc5   :  { %861 = vmatpush.msra.mxu0 %v154_v9  ;;  %881 = vmatpush.msra.mxu1 %v218_v10  ;;  %v578_v39 = vld [vmem:[#allocation2 + $0xd48] sm:$0xff] }
  0xc6   :  { %901 = vmatpush.msra.mxu2 %v282_v11  ;;  %920 = vmatpush.msra.mxu3 %v350_v12  ;;  %v646_v40 = vld [vmem:[#allocation2 + $0xf68] sm:$0xff] }
  0xc7   :  { %926 = vmatpush.msrb.mxu0 %v470_v13  ;;  %946 = vmatpush.msrb.mxu1 %v534_v14  ;;  %v446_v41 = vld [vmem:[#allocation2 + $0x928] sm:$0xff] }
  0xc8   :  { %966 = vmatpush.msrb.mxu2 %v598_v15  ;;  %921 = vmatpush.msra.mxu3 %v346_v16  ;;  %v510_v42 = vld [vmem:[#allocation2 + $0xb28] sm:$0xff] }
  0xc9   :  { %927 = vmatpush.msrb.mxu0 %v466_v18  ;;  %947 = vmatpush.msrb.mxu1 %v530_v19  ;;  %v574_v43 = vld [vmem:[#allocation2 + $0xd28] sm:$0xff] }
  0xca   :  { %967 = vmatpush.msrb.mxu2 %v594_v20  ;;  %986 = vmatpush.msrb.mxu3 %v662_v21  ;;  %v642_v44 = vld [vmem:[#allocation2 + $0xf48] sm:$0xff] }
  0xcb   :  { %928 = vmatpush.msrb.mxu0 %v462_v24  ;;  %948 = vmatpush.msrb.mxu1 %v526_v25  ;;  %v442_v45 = vld [vmem:[#allocation2 + $0x908] sm:$0xff]  ;;  %v215_v24 = vld [vmem:[#allocation2 + $0x1f0] sm:$0xff] }
  0xcc   :  { %968 = vmatpush.msrb.mxu2 %v590_v26  ;;  %987 = vmatpush.msrb.mxu3 %v658_v27  ;;  %v506_v46 = vld [vmem:[#allocation2 + $0xb08] sm:$0xff]  ;;  %v279_v25 = vld [vmem:[#allocation2 + $0x3f0] sm:$0xff] }
  0xcd   :  { %929 = vmatpush.msrb.mxu0 %v458_v29  ;;  %949 = vmatpush.msrb.mxu1 %v522_v30  ;;  %v570_v47 = vld [vmem:[#allocation2 + $0xd08] sm:$0xff]  ;;  %v343_v26 = vld [vmem:[#allocation2 + $0x5f0] sm:$0xff] }
  0xce   :  { %969 = vmatpush.msrb.mxu2 %v586_v31  ;;  %988 = vmatpush.msrb.mxu3 %v654_v32  ;;  %v638_v48 = vld [vmem:[#allocation2 + $0xf28] sm:$0xff]  ;;  %v211_v29 = vld [vmem:[#allocation2 + $0x1d0] sm:$0xff] }
  0xcf   :  { %930 = vmatpush.msrb.mxu0 %v454_v33  ;;  %950 = vmatpush.msrb.mxu1 %v518_v34  ;;  %v438_v49 = vld [vmem:[#allocation2 + $0x8e8] sm:$0xff]  ;;  %v275_v30 = vld [vmem:[#allocation2 + $0x3d0] sm:$0xff] }
  0xd0   :  { %970 = vmatpush.msrb.mxu2 %v582_v35  ;;  %989 = vmatpush.msrb.mxu3 %v650_v36  ;;  %v502_v50 = vld [vmem:[#allocation2 + $0xae8] sm:$0xff]  ;;  %v339_v31 = vld [vmem:[#allocation2 + $0x5d0] sm:$0xff] }
  0xd1   :  { %931 = vmatpush.msrb.mxu0 %v450_v37  ;;  %951 = vmatpush.msrb.mxu1 %v514_v38  ;;  %v566_v51 = vld [vmem:[#allocation2 + $0xce8] sm:$0xff]  ;;  %v207_v32 = vld [vmem:[#allocation2 + $0x1b0] sm:$0xff] }
  0xd2   :  { %971 = vmatpush.msrb.mxu2 %v578_v39  ;;  %990 = vmatpush.msrb.mxu3 %v646_v40  ;;  %v634_v52 = vld [vmem:[#allocation2 + $0xf08] sm:$0xff]  ;;  %v271_v33 = vld [vmem:[#allocation2 + $0x3b0] sm:$0xff] }
  0xd3   :  { %932 = vmatpush.msrb.mxu0 %v446_v41  ;;  %952 = vmatpush.msrb.mxu1 %v510_v42  ;;  %v434_v53 = vld [vmem:[#allocation2 + $0x8c8] sm:$0xff]  ;;  %v335_v34 = vld [vmem:[#allocation2 + $0x5b0] sm:$0xff] }
  0xd4   :  { %972 = vmatpush.msrb.mxu2 %v574_v43  ;;  %991 = vmatpush.msrb.mxu3 %v642_v44  ;;  %v498_v54 = vld [vmem:[#allocation2 + $0xac8] sm:$0xff]  ;;  %v203_v35 = vld [vmem:[#allocation2 + $0x190] sm:$0xff] }
  0xd5   :  { %933 = vmatpush.msrb.mxu0 %v442_v45  ;;  %953 = vmatpush.msrb.mxu1 %v506_v46  ;;  %v562_v55 = vld [vmem:[#allocation2 + $0xcc8] sm:$0xff]  ;;  %v399_v36 = vld [vmem:[#allocation2 + $0x7b0] sm:$0xff] }
  0xd6   :  { %973 = vmatpush.msrb.mxu2 %v570_v47  ;;  %992 = vmatpush.msrb.mxu3 %v638_v48  ;;  %v630_v56 = vld [vmem:[#allocation2 + $0xee8] sm:$0xff]  ;;  %v199_v37 = vld [vmem:[#allocation2 + $0x170] sm:$0xff] }
  0xd7   :  { %934 = vmatpush.msrb.mxu0 %v438_v49  ;;  %954 = vmatpush.msrb.mxu1 %v502_v50  ;;  %v430_v57 = vld [vmem:[#allocation2 + $0x8a8] sm:$0xff]  ;;  %v263_v38 = vld [vmem:[#allocation2 + $0x370] sm:$0xff] }
  0xd8   :  { %974 = vmatpush.msrb.mxu2 %v566_v51  ;;  %993 = vmatpush.msrb.mxu3 %v634_v52  ;;  %v494_v58 = vld [vmem:[#allocation2 + $0xaa8] sm:$0xff]  ;;  %v327_v39 = vld [vmem:[#allocation2 + $0x570] sm:$0xff] }
  0xd9   :  { %935 = vmatpush.msrb.mxu0 %v434_v53  ;;  %955 = vmatpush.msrb.mxu1 %v498_v54  ;;  %v558_v59 = vld [vmem:[#allocation2 + $0xca8] sm:$0xff]  ;;  %v395_v40 = vld [vmem:[#allocation2 + $0x790] sm:$0xff] }
  0xda   :  { %v626_v60 = vld [vmem:[#allocation2 + $0xec8] sm:$0xff]  ;;  %975 = vmatpush.msrb.mxu2 %v562_v55  ;;  %994 = vmatpush.msrb.mxu3 %v630_v56  ;;  %v195_v41 = vld [vmem:[#allocation2 + $0x150] sm:$0xff] }
  0xdb   :  { %v426_v62 = vld [vmem:[#allocation2 + $0x888] sm:$0xff]  ;;  %936 = vmatpush.msrb.mxu0 %v430_v57  ;;  %956 = vmatpush.msrb.mxu1 %v494_v58  ;;  %v259_v42 = vld [vmem:[#allocation2 + $0x350] sm:$0xff] }
  0xdc   :  { %v490_v63 = vld [vmem:[#allocation2 + $0xa88] sm:$0xff]  ;;  %976 = vmatpush.msrb.mxu2 %v558_v59  ;;  %995 = vmatpush.msrb.mxu3 %v626_v60  ;;  %v323_v43 = vld [vmem:[#allocation2 + $0x550] sm:$0xff] }
  0xdd   :  { %v554_v0 = vld [vmem:[#allocation2 + $0xc88] sm:$0xff]  ;;  %937 = vmatpush.msrb.mxu0 %v426_v62  ;;  %957 = vmatpush.msrb.mxu1 %v490_v63  ;;  %v391_v44 = vld [vmem:[#allocation2 + $0x770] sm:$0xff] }
  0xde   :  { %v622_v1 = vld [vmem:[#allocation2 + $0xea8] sm:$0xff]  ;;  %977 = vmatpush.msrb.mxu2 %v554_v0  ;;  %862 = vmatmul.f32.vlgmr.msra.gmra.mxu0 %v2140_v2  ;;  %v403_v2 = vld [vmem:[#allocation2 + $0x7d0] sm:$0xff] }
  0xdf   :  { %v422_v5 = vld [vmem:[#allocation2 + $0x868] sm:$0xff]  ;;  %996 = vmatpush.msrb.mxu3 %v622_v1  ;;  %902 = vmatmul.f32.vlgmr.msra.gmra.mxu2 %v2138_v61  ;;  %v407_v61 = vld [vmem:[#allocation2 + $0x7f0] sm:$0xff] }
  0xe0   :  { %v486_v6 = vld [vmem:[#allocation2 + $0xa68] sm:$0xff]  ;;  %938 = vmatpush.msrb.mxu0 %v422_v5  ;;  %882 = vmatmul.f32.vlgmr.msra.gmra.mxu1 %v2143_v3  ;;  %v267_v3 = vld [vmem:[#allocation2 + $0x390] sm:$0xff] }
  0xe1   :  { %v550_v7 = vld [vmem:[#allocation2 + $0xc68] sm:$0xff]  ;;  %958 = vmatpush.msrb.mxu1 %v486_v6  ;;  %922 = vmatmul.f32.vlgmr.msra.gmra.mxu3 %v2145_v4  ;;  %v331_v4 = vld [vmem:[#allocation2 + $0x590] sm:$0xff] }
  0xe2   :  { %v618_v8 = vld [vmem:[#allocation2 + $0xe88] sm:$0xff]  ;;  %978 = vmatpush.msrb.mxu2 %v550_v7  ;;  %v255_v45 = vld [vmem:[#allocation2 + $0x330] sm:$0xff] }
  0xe3   :  { %v418_v9 = vld [vmem:[#allocation2 + $0x848] sm:$0xff]  ;;  %997 = vmatpush.msrb.mxu3 %v618_v8  ;;  %v319_v46 = vld [vmem:[#allocation2 + $0x530] sm:$0xff] }
  0xe4   :  { %v482_v10 = vld [vmem:[#allocation2 + $0xa48] sm:$0xff]  ;;  %939 = vmatpush.msrb.mxu0 %v418_v9  ;;  %v387_v47 = vld [vmem:[#allocation2 + $0x750] sm:$0xff] }
  0xe5   :  { %v546_v11 = vld [vmem:[#allocation2 + $0xc48] sm:$0xff]  ;;  %959 = vmatpush.msrb.mxu1 %v482_v10  ;;  %v315_v48 = vld [vmem:[#allocation2 + $0x510] sm:$0xff] }
  0xe6   :  { %v614_v12 = vld [vmem:[#allocation2 + $0xe68] sm:$0xff]  ;;  %979 = vmatpush.msrb.mxu2 %v546_v11  ;;  %v383_v49 = vld [vmem:[#allocation2 + $0x730] sm:$0xff] }
  0xe7   :  { %v414_v13 = vld [vmem:[#allocation2 + $0x828] sm:$0xff]  ;;  %998 = vmatpush.msrb.mxu3 %v614_v12  ;;  %v183_v50 = vld [vmem:[#allocation2 + $0xf0] sm:$0xff] }
  0xe8   :  { %v478_v14 = vld [vmem:[#allocation2 + $0xa28] sm:$0xff]  ;;  %940 = vmatpush.msrb.mxu0 %v414_v13  ;;  %v247_v51 = vld [vmem:[#allocation2 + $0x2f0] sm:$0xff] }
  0xe9   :  { %v542_v15 = vld [vmem:[#allocation2 + $0xc28] sm:$0xff]  ;;  %960 = vmatpush.msrb.mxu1 %v478_v14  ;;  %v379_v52 = vld [vmem:[#allocation2 + $0x710] sm:$0xff] }
  0xea   :  { %v610_v16 = vld [vmem:[#allocation2 + $0xe48] sm:$0xff]  ;;  %980 = vmatpush.msrb.mxu2 %v542_v15  ;;  %v179_v53 = vld [vmem:[#allocation2 + $0xd0] sm:$0xff] }
  0xeb   :  { %v410_v18 = vld [vmem:[#allocation2 + $0x808] sm:$0xff]  ;;  %999 = vmatpush.msrb.mxu3 %v610_v16  ;;  %v243_v54 = vld [vmem:[#allocation2 + $0x2d0] sm:$0xff] }
  0xec   :  { %v474_v19 = vld [vmem:[#allocation2 + $0xa08] sm:$0xff]  ;;  %941 = vmatpush.msrb.mxu0 %v410_v18  ;;  %v307_v55 = vld [vmem:[#allocation2 + $0x4d0] sm:$0xff] }
  0xed   :  { %v538_v20 = vld [vmem:[#allocation2 + $0xc08] sm:$0xff]  ;;  %961 = vmatpush.msrb.mxu1 %v474_v19  ;;  %942 = vmatmul.f32.vlgmr.msrb.gmra.mxu0 %v2152_v22  ;;  %v187_v22 = vld [vmem:[#allocation2 + $0x110] sm:$0xff] }
  0xee   :  { %v606_v21 = vld [vmem:[#allocation2 + $0xe28] sm:$0xff]  ;;  %981 = vmatpush.msrb.mxu2 %v538_v20  ;;  %1006 = vmatpush.msra.mxu0 %v215_v24  ;;  %v375_v56 = vld [vmem:[#allocation2 + $0x6f0] sm:$0xff] }
  0xef   :  { %1000 = vmatpush.msrb.mxu3 %v606_v21  ;;  %v602_v27 = vld [vmem:[#allocation2 + $0xe08] sm:$0xff]  ;;  %1026 = vmatpush.msra.mxu1 %v279_v25  ;;  %v175_v57 = vld [vmem:[#allocation2 + $0xb0] sm:$0xff] }
  0xf0   :  { %1046 = vmatpush.msra.mxu2 %v343_v26  ;;  %1007 = vmatpush.msra.mxu0 %v211_v29  ;;  %v239_v58 = vld [vmem:[#allocation2 + $0x2b0] sm:$0xff] }
  0xf1   :  { %1001 = vmatpush.msrb.mxu3 %v602_v27  ;;  %1027 = vmatpush.msra.mxu1 %v275_v30  ;;  %v303_v59 = vld [vmem:[#allocation2 + $0x4b0] sm:$0xff] }
  0xf2   :  { %1047 = vmatpush.msra.mxu2 %v339_v31  ;;  %1008 = vmatpush.msra.mxu0 %v207_v32  ;;  %v371_v60 = vld [vmem:[#allocation2 + $0x6d0] sm:$0xff] }
  0xf3   :  { %1066 = vmatpush.msra.mxu3 %v407_v61  ;;  %1028 = vmatpush.msra.mxu1 %v271_v33  ;;  %v171_v62 = vld [vmem:[#allocation2 + $0x90] sm:$0xff] }
  0xf4   :  { %1048 = vmatpush.msra.mxu2 %v335_v34  ;;  %1009 = vmatpush.msra.mxu0 %v203_v35  ;;  %v235_v63 = vld [vmem:[#allocation2 + $0x290] sm:$0xff] }
  0xf5   :  { %1067 = vmatpush.msra.mxu3 %v403_v2  ;;  %982 = vmatmul.f32.vlgmr.msrb.gmra.mxu2 %v2150_v17  ;;  %v191_v17 = vld [vmem:[#allocation2 + $0x130] sm:$0xff] }
  0xf6   :  { %1029 = vmatpush.msra.mxu1 %v267_v3  ;;  %1049 = vmatpush.msra.mxu2 %v331_v4  ;;  %v299_v0 = vld [vmem:[#allocation2 + $0x490] sm:$0xff] }
  0xf7   :  { %1068 = vmatpush.msra.mxu3 %v399_v36  ;;  %1010 = vmatpush.msra.mxu0 %v199_v37  ;;  %v367_v1 = vld [vmem:[#allocation2 + $0x6b0] sm:$0xff] }
  0xf8   :  { %1002 = vmatmul.f32.vlgmr.msrb.gmra.mxu3 %v2155_v23  ;;  %1030 = vmatpush.msra.mxu1 %v263_v38  ;;  %v251_v23 = vld [vmem:[#allocation2 + $0x310] sm:$0xff] }
  0xf9   :  { %1050 = vmatpush.msra.mxu2 %v327_v39  ;;  %1069 = vmatpush.msra.mxu3 %v395_v40  ;;  %v167_v5 = vld [vmem:[#allocation2 + $0x70] sm:$0xff] }
  0xfa   :  { %962 = vmatmul.f32.vlgmr.msrb.gmra.mxu1 %v2158_v28  ;;  %1011 = vmatpush.msra.mxu0 %v195_v41  ;;  %v311_v28 = vld [vmem:[#allocation2 + $0x4f0] sm:$0xff] }
  0xfb   :  { %1031 = vmatpush.msra.mxu1 %v259_v42  ;;  %1051 = vmatpush.msra.mxu2 %v323_v43  ;;  %v231_v6 = vld [vmem:[#allocation2 + $0x270] sm:$0xff] }
  0xfc   :  { %1070 = vmatpush.msra.mxu3 %v391_v44  ;;  %1012 = vmatpush.msra.mxu0 %v191_v17  ;;  %v295_v7 = vld [vmem:[#allocation2 + $0x470] sm:$0xff] }
  0xfd   :  { %1032 = vmatpush.msra.mxu1 %v255_v45  ;;  %1052 = vmatpush.msra.mxu2 %v319_v46  ;;  %v363_v8 = vld [vmem:[#allocation2 + $0x690] sm:$0xff] }
  0xfe   :  { %1071 = vmatpush.msra.mxu3 %v387_v47  ;;  %1013 = vmatpush.msra.mxu0 %v187_v22  ;;  %v163_v9 = vld [vmem:[#allocation2 + $0x50] sm:$0xff] }
  0xff   :  { %1033 = vmatpush.msra.mxu1 %v251_v23  ;;  %1053 = vmatpush.msra.mxu2 %v315_v48  ;;  %v227_v10 = vld [vmem:[#allocation2 + $0x250] sm:$0xff] }
 0x100   :  { %1072 = vmatpush.msra.mxu3 %v383_v49  ;;  %1014 = vmatpush.msra.mxu0 %v183_v50  ;;  %v291_v11 = vld [vmem:[#allocation2 + $0x450] sm:$0xff] }
 0x101   :  { %1034 = vmatpush.msra.mxu1 %v247_v51  ;;  %1054 = vmatpush.msra.mxu2 %v311_v28  ;;  %v359_v12 = vld [vmem:[#allocation2 + $0x670] sm:$0xff] }
 0x102   :  { %1073 = vmatpush.msra.mxu3 %v379_v52  ;;  %1015 = vmatpush.msra.mxu0 %v179_v53  ;;  %v159_v13 = vld [vmem:[#allocation2 + $0x30] sm:$0xff] }
 0x103   :  { %1035 = vmatpush.msra.mxu1 %v243_v54  ;;  %1055 = vmatpush.msra.mxu2 %v307_v55  ;;  %v223_v14 = vld [vmem:[#allocation2 + $0x230] sm:$0xff] }
 0x104   :  { %1074 = vmatpush.msra.mxu3 %v375_v56  ;;  %1016 = vmatpush.msra.mxu0 %v175_v57  ;;  %v287_v15 = vld [vmem:[#allocation2 + $0x430] sm:$0xff] }
 0x105   :  { %1036 = vmatpush.msra.mxu1 %v239_v58  ;;  %1056 = vmatpush.msra.mxu2 %v303_v59  ;;  %v355_v16 = vld [vmem:[#allocation2 + $0x650] sm:$0xff] }
 0x106   :  { %1075 = vmatpush.msra.mxu3 %v371_v60  ;;  %1017 = vmatpush.msra.mxu0 %v171_v62  ;;  %v155_v18 = vld [vmem:[#allocation2 + $0x10] sm:$0xff] }
 0x107   :  { %1037 = vmatpush.msra.mxu1 %v235_v63  ;;  %1057 = vmatpush.msra.mxu2 %v299_v0  ;;  %v219_v19 = vld [vmem:[#allocation2 + $0x210] sm:$0xff] }
 0x108   :  { %1076 = vmatpush.msra.mxu3 %v367_v1  ;;  %1018 = vmatpush.msra.mxu0 %v167_v5  ;;  %v283_v20 = vld [vmem:[#allocation2 + $0x410] sm:$0xff] }
 0x109   :  { %1038 = vmatpush.msra.mxu1 %v231_v6  ;;  %1058 = vmatpush.msra.mxu2 %v295_v7  ;;  %v351_v21 = vld [vmem:[#allocation2 + $0x630] sm:$0xff] }
 0x10a   :  { %1077 = vmatpush.msra.mxu3 %v363_v8  ;;  %1019 = vmatpush.msra.mxu0 %v163_v9  ;;  %v471_v24 = vld [vmem:[#allocation2 + $0x9f0] sm:$0xff]  ;;  %v2170_v9 = vld.sshfl [vmem:[#allocation1 + $0x10] sm:$0xff pattern:$0x73625140] }
 0x10b   :  { %1039 = vmatpush.msra.mxu1 %v227_v10  ;;  %1059 = vmatpush.msra.mxu2 %v291_v11  ;;  %v535_v25 = vld [vmem:[#allocation2 + $0xbf0] sm:$0xff] }
 0x10c   :  { %1078 = vmatpush.msra.mxu3 %v359_v12  ;;  %1020 = vmatpush.msra.mxu0 %v159_v13  ;;  %v599_v26 = vld [vmem:[#allocation2 + $0xdf0] sm:$0xff]  ;;  %v2173_v13 = vld.sshfl [vmem:[#allocation1] sm:$0xff pattern:$0x73625140] }
 0x10d   :  { %1040 = vmatpush.msra.mxu1 %v223_v14  ;;  %1060 = vmatpush.msra.mxu2 %v287_v15  ;;  %v347_v27 = vld [vmem:[#allocation2 + $0x610] sm:$0xff] }
 0x10e   :  { %1079 = vmatpush.msra.mxu3 %v355_v16  ;;  %1021 = vmatpush.msra.mxu0 %v155_v18  ;;  %v467_v29 = vld [vmem:[#allocation2 + $0x9d0] sm:$0xff] }
 0x10f   :  { %1041 = vmatpush.msra.mxu1 %v219_v19  ;;  %1061 = vmatpush.msra.mxu2 %v283_v20  ;;  %v531_v30 = vld [vmem:[#allocation2 + $0xbd0] sm:$0xff] }
 0x110   :  { %1080 = vmatpush.msra.mxu3 %v351_v21  ;;  %1086 = vmatpush.msrb.mxu0 %v471_v24  ;;  %v595_v31 = vld [vmem:[#allocation2 + $0xdd0] sm:$0xff]  ;;  %v2179_v21 = vld.sshfl [vmem:[#allocation1 + $0x8] sm:$0xff pattern:$0x73625140] }
 0x111   :  { %1106 = vmatpush.msrb.mxu1 %v535_v25  ;;  %v663_v61 = vld [vmem:[#allocation2 + $0xff0] sm:$0xff]  ;;  %1126 = vmatpush.msrb.mxu2 %v599_v26 }
 0x112   :  { %1081 = vmatpush.msra.mxu3 %v347_v27  ;;  %v463_v32 = vld [vmem:[#allocation2 + $0x9b0] sm:$0xff]  ;;  %1087 = vmatpush.msrb.mxu0 %v467_v29  ;;  %v216_v29 = vld [vmem:[#allocation2 + $0x1f8] sm:$0xff] }
 0x113   :  { %v527_v33 = vld [vmem:[#allocation2 + $0xbb0] sm:$0xff]  ;;  %1107 = vmatpush.msrb.mxu1 %v531_v30  ;;  %1127 = vmatpush.msrb.mxu2 %v595_v31  ;;  %v280_v30 = vld [vmem:[#allocation2 + $0x3f8] sm:$0xff] }
 0x114   :  { %v591_v34 = vld [vmem:[#allocation2 + $0xdb0] sm:$0xff]  ;;  %1146 = vmatpush.msrb.mxu3 %v663_v61  ;;  %1088 = vmatpush.msrb.mxu0 %v463_v32  ;;  %v344_v31 = vld [vmem:[#allocation2 + $0x5f8] sm:$0xff]  ;;  %v2182_v32 = vld.sshfl [vmem:[#allocation1 + $0x30] sm:$0xff pattern:$0x73625140] }
 0x115   :  { %v659_v2 = vld [vmem:[#allocation2 + $0xfd0] sm:$0xff]  ;;  %1108 = vmatpush.msrb.mxu1 %v527_v33  ;;  %1128 = vmatpush.msrb.mxu2 %v591_v34  ;;  %v212_v33 = vld [vmem:[#allocation2 + $0x1d8] sm:$0xff] }
 0x116   :  { %v459_v35 = vld [vmem:[#allocation2 + $0x990] sm:$0xff]  ;;  %1147 = vmatpush.msrb.mxu3 %v659_v2  ;;  %1062 = vmatmul.f32.vlgmr.msra.gmra.mxu2 %v2170_v9  ;;  %v276_v34 = vld [vmem:[#allocation2 + $0x3d8] sm:$0xff] }
 0x117   :  { %v523_v3 = vld [vmem:[#allocation2 + $0xb90] sm:$0xff]  ;;  %1089 = vmatpush.msrb.mxu0 %v459_v35  ;;  %1042 = vmatmul.f32.vlgmr.msra.gmra.mxu1 %v2179_v21  ;;  %v340_v2 = vld [vmem:[#allocation2 + $0x5d8] sm:$0xff] }
 0x118   :  { %v587_v4 = vld [vmem:[#allocation2 + $0xd90] sm:$0xff]  ;;  %1109 = vmatpush.msrb.mxu1 %v523_v3  ;;  %1022 = vmatmul.f32.vlgmr.msra.gmra.mxu0 %v2173_v13  ;;  %v2185_v35 = vld.sshfl [vmem:[#allocation1 + $0x20] sm:$0xff pattern:$0x73625140] }
 0x119   :  { %v655_v36 = vld [vmem:[#allocation2 + $0xfb0] sm:$0xff]  ;;  %1129 = vmatpush.msrb.mxu2 %v587_v4  ;;  %v408_v3 = vld [vmem:[#allocation2 + $0x7f8] sm:$0xff] }
 0x11a   :  { %v455_v37 = vld [vmem:[#allocation2 + $0x970] sm:$0xff]  ;;  %1148 = vmatpush.msrb.mxu3 %v655_v36  ;;  %v208_v36 = vld [vmem:[#allocation2 + $0x1b8] sm:$0xff] }
 0x11b   :  { %v519_v38 = vld [vmem:[#allocation2 + $0xb70] sm:$0xff]  ;;  %1090 = vmatpush.msrb.mxu0 %v455_v37  ;;  %v272_v37 = vld [vmem:[#allocation2 + $0x3b8] sm:$0xff] }
 0x11c   :  { %v583_v39 = vld [vmem:[#allocation2 + $0xd70] sm:$0xff]  ;;  %1110 = vmatpush.msrb.mxu1 %v519_v38  ;;  %v336_v38 = vld [vmem:[#allocation2 + $0x5b8] sm:$0xff] }
 0x11d   :  { %v651_v40 = vld [vmem:[#allocation2 + $0xf90] sm:$0xff]  ;;  %1130 = vmatpush.msrb.mxu2 %v583_v39  ;;  %v404_v39 = vld [vmem:[#allocation2 + $0x7d8] sm:$0xff] }
 0x11e   :  { %v451_v41 = vld [vmem:[#allocation2 + $0x950] sm:$0xff]  ;;  %1149 = vmatpush.msrb.mxu3 %v651_v40  ;;  %v2191_v40 = vld.sshfl [vmem:[#allocation1 + $0x28] sm:$0xff pattern:$0x73625140] }
 0x11f   :  { %v515_v42 = vld [vmem:[#allocation2 + $0xb50] sm:$0xff]  ;;  %1091 = vmatpush.msrb.mxu0 %v451_v41  ;;  %v204_v41 = vld [vmem:[#allocation2 + $0x198] sm:$0xff] }
 0x120   :  { %v579_v43 = vld [vmem:[#allocation2 + $0xd50] sm:$0xff]  ;;  %1111 = vmatpush.msrb.mxu1 %v515_v42  ;;  %v268_v42 = vld [vmem:[#allocation2 + $0x398] sm:$0xff] }
 0x121   :  { %v647_v44 = vld [vmem:[#allocation2 + $0xf70] sm:$0xff]  ;;  %1131 = vmatpush.msrb.mxu2 %v579_v43  ;;  %v332_v43 = vld [vmem:[#allocation2 + $0x598] sm:$0xff] }
 0x122   :  { %v447_v17 = vld [vmem:[#allocation2 + $0x930] sm:$0xff]  ;;  %1150 = vmatpush.msrb.mxu3 %v647_v44  ;;  %v400_v44 = vld [vmem:[#allocation2 + $0x7b8] sm:$0xff] }
 0x123   :  { %v511_v45 = vld [vmem:[#allocation2 + $0xb30] sm:$0xff]  ;;  %1092 = vmatpush.msrb.mxu0 %v447_v17  ;;  %v200_v17 = vld [vmem:[#allocation2 + $0x178] sm:$0xff] }
 0x124   :  { %v575_v46 = vld [vmem:[#allocation2 + $0xd30] sm:$0xff]  ;;  %1112 = vmatpush.msrb.mxu1 %v511_v45  ;;  %v264_v45 = vld [vmem:[#allocation2 + $0x378] sm:$0xff] }
 0x125   :  { %v643_v47 = vld [vmem:[#allocation2 + $0xf50] sm:$0xff]  ;;  %1132 = vmatpush.msrb.mxu2 %v575_v46  ;;  %v328_v46 = vld [vmem:[#allocation2 + $0x578] sm:$0xff] }
 0x126   :  { %v443_v22 = vld [vmem:[#allocation2 + $0x910] sm:$0xff]  ;;  %1151 = vmatpush.msrb.mxu3 %v643_v47  ;;  %v396_v47 = vld [vmem:[#allocation2 + $0x798] sm:$0xff] }
 0x127   :  { %v507_v23 = vld [vmem:[#allocation2 + $0xb10] sm:$0xff]  ;;  %1093 = vmatpush.msrb.mxu0 %v443_v22  ;;  %v196_v22 = vld [vmem:[#allocation2 + $0x158] sm:$0xff] }
 0x128   :  { %v571_v48 = vld [vmem:[#allocation2 + $0xd10] sm:$0xff]  ;;  %1113 = vmatpush.msrb.mxu1 %v507_v23  ;;  %v260_v23 = vld [vmem:[#allocation2 + $0x358] sm:$0xff] }
 0x129   :  { %v639_v49 = vld [vmem:[#allocation2 + $0xf30] sm:$0xff]  ;;  %1133 = vmatpush.msrb.mxu2 %v571_v48  ;;  %v324_v48 = vld [vmem:[#allocation2 + $0x558] sm:$0xff] }
 0x12a   :  { %v439_v50 = vld [vmem:[#allocation2 + $0x8f0] sm:$0xff]  ;;  %1152 = vmatpush.msrb.mxu3 %v639_v49  ;;  %v392_v49 = vld [vmem:[#allocation2 + $0x778] sm:$0xff] }
 0x12b   :  { %v503_v51 = vld [vmem:[#allocation2 + $0xaf0] sm:$0xff]  ;;  %1094 = vmatpush.msrb.mxu0 %v439_v50  ;;  %v192_v50 = vld [vmem:[#allocation2 + $0x138] sm:$0xff] }
 0x12c   :  { %v567_v28 = vld [vmem:[#allocation2 + $0xcf0] sm:$0xff]  ;;  %1114 = vmatpush.msrb.mxu1 %v503_v51  ;;  %v256_v51 = vld [vmem:[#allocation2 + $0x338] sm:$0xff] }
 0x12d   :  { %v635_v52 = vld [vmem:[#allocation2 + $0xf10] sm:$0xff]  ;;  %1134 = vmatpush.msrb.mxu2 %v567_v28  ;;  %v320_v28 = vld [vmem:[#allocation2 + $0x538] sm:$0xff] }
 0x12e   :  { %v435_v53 = vld [vmem:[#allocation2 + $0x8d0] sm:$0xff]  ;;  %1153 = vmatpush.msrb.mxu3 %v635_v52  ;;  %v388_v52 = vld [vmem:[#allocation2 + $0x758] sm:$0xff] }
 0x12f   :  { %v499_v54 = vld [vmem:[#allocation2 + $0xad0] sm:$0xff]  ;;  %1095 = vmatpush.msrb.mxu0 %v435_v53  ;;  %v188_v53 = vld [vmem:[#allocation2 + $0x118] sm:$0xff] }
 0x130   :  { %v563_v55 = vld [vmem:[#allocation2 + $0xcd0] sm:$0xff]  ;;  %1115 = vmatpush.msrb.mxu1 %v499_v54  ;;  %v252_v54 = vld [vmem:[#allocation2 + $0x318] sm:$0xff] }
 0x131   :  { %v631_v56 = vld [vmem:[#allocation2 + $0xef0] sm:$0xff]  ;;  %1135 = vmatpush.msrb.mxu2 %v563_v55  ;;  %v316_v55 = vld [vmem:[#allocation2 + $0x518] sm:$0xff] }
 0x132   :  { %v431_v57 = vld [vmem:[#allocation2 + $0x8b0] sm:$0xff]  ;;  %1154 = vmatpush.msrb.mxu3 %v631_v56  ;;  %v384_v56 = vld [vmem:[#allocation2 + $0x738] sm:$0xff] }
 0x133   :  { %v495_v58 = vld [vmem:[#allocation2 + $0xab0] sm:$0xff]  ;;  %1096 = vmatpush.msrb.mxu0 %v431_v57  ;;  %v184_v57 = vld [vmem:[#allocation2 + $0xf8] sm:$0xff] }
 0x134   :  { %v559_v59 = vld [vmem:[#allocation2 + $0xcb0] sm:$0xff]  ;;  %1116 = vmatpush.msrb.mxu1 %v495_v58  ;;  %v248_v58 = vld [vmem:[#allocation2 + $0x2f8] sm:$0xff] }
 0x135   :  { %v627_v60 = vld [vmem:[#allocation2 + $0xed0] sm:$0xff]  ;;  %1136 = vmatpush.msrb.mxu2 %v559_v59  ;;  %v312_v59 = vld [vmem:[#allocation2 + $0x4f8] sm:$0xff] }
 0x136   :  { %v427_v62 = vld [vmem:[#allocation2 + $0x890] sm:$0xff]  ;;  %1155 = vmatpush.msrb.mxu3 %v627_v60  ;;  %v380_v60 = vld [vmem:[#allocation2 + $0x718] sm:$0xff] }
 0x137   :  { %v491_v63 = vld [vmem:[#allocation2 + $0xa90] sm:$0xff]  ;;  %1097 = vmatpush.msrb.mxu0 %v427_v62  ;;  %v180_v62 = vld [vmem:[#allocation2 + $0xd8] sm:$0xff] }
 0x138   :  { %v555_v0 = vld [vmem:[#allocation2 + $0xc90] sm:$0xff]  ;;  %1117 = vmatpush.msrb.mxu1 %v491_v63  ;;  %v244_v63 = vld [vmem:[#allocation2 + $0x2d8] sm:$0xff] }
 0x139   :  { %v623_v1 = vld [vmem:[#allocation2 + $0xeb0] sm:$0xff]  ;;  %1137 = vmatpush.msrb.mxu2 %v555_v0  ;;  %v308_v0 = vld [vmem:[#allocation2 + $0x4d8] sm:$0xff] }
 0x13a   :  { %v423_v5 = vld [vmem:[#allocation2 + $0x870] sm:$0xff]  ;;  %1156 = vmatpush.msrb.mxu3 %v623_v1  ;;  %v376_v1 = vld [vmem:[#allocation2 + $0x6f8] sm:$0xff] }
 0x13b   :  { %v487_v6 = vld [vmem:[#allocation2 + $0xa70] sm:$0xff]  ;;  %1098 = vmatpush.msrb.mxu0 %v423_v5  ;;  %v176_v5 = vld [vmem:[#allocation2 + $0xb8] sm:$0xff] }
 0x13c   :  { %v551_v7 = vld [vmem:[#allocation2 + $0xc70] sm:$0xff]  ;;  %1118 = vmatpush.msrb.mxu1 %v487_v6  ;;  %v240_v6 = vld [vmem:[#allocation2 + $0x2b8] sm:$0xff] }
 0x13d   :  { %v619_v8 = vld [vmem:[#allocation2 + $0xe90] sm:$0xff]  ;;  %1138 = vmatpush.msrb.mxu2 %v551_v7  ;;  %v304_v7 = vld [vmem:[#allocation2 + $0x4b8] sm:$0xff] }
 0x13e   :  { %v419_v10 = vld [vmem:[#allocation2 + $0x850] sm:$0xff]  ;;  %1157 = vmatpush.msrb.mxu3 %v619_v8  ;;  %v372_v8 = vld [vmem:[#allocation2 + $0x6d8] sm:$0xff] }
 0x13f   :  { %v483_v11 = vld [vmem:[#allocation2 + $0xa50] sm:$0xff]  ;;  %1099 = vmatpush.msrb.mxu0 %v419_v10  ;;  %v172_v10 = vld [vmem:[#allocation2 + $0x98] sm:$0xff] }
 0x140   :  { %v547_v12 = vld [vmem:[#allocation2 + $0xc50] sm:$0xff]  ;;  %1119 = vmatpush.msrb.mxu1 %v483_v11  ;;  %v236_v11 = vld [vmem:[#allocation2 + $0x298] sm:$0xff] }
 0x141   :  { %v615_v14 = vld [vmem:[#allocation2 + $0xe70] sm:$0xff]  ;;  %1139 = vmatpush.msrb.mxu2 %v547_v12  ;;  %v300_v12 = vld [vmem:[#allocation2 + $0x498] sm:$0xff] }
 0x142   :  { %v2176_v15 = vld.sshfl [vmem:[#allocation1 + $0x18] sm:$0xff pattern:$0x73625140]  ;;  %1158 = vmatpush.msrb.mxu3 %v615_v14  ;;  %v368_v14 = vld [vmem:[#allocation2 + $0x6b8] sm:$0xff] }
 0x143   :  { %1082 = vmatmul.f32.vlgmr.msra.gmra.mxu3 %v2176_v15  ;;  %v415_v16 = vld [vmem:[#allocation2 + $0x830] sm:$0xff] }
 0x144   :  { %v479_v18 = vld [vmem:[#allocation2 + $0xa30] sm:$0xff]  ;;  %1100 = vmatpush.msrb.mxu0 %v415_v16  ;;  %v168_v16 = vld [vmem:[#allocation2 + $0x78] sm:$0xff] }
 0x145   :  { %v543_v19 = vld [vmem:[#allocation2 + $0xc30] sm:$0xff]  ;;  %1120 = vmatpush.msrb.mxu1 %v479_v18  ;;  %v232_v18 = vld [vmem:[#allocation2 + $0x278] sm:$0xff] }
 0x146   :  { %v611_v20 = vld [vmem:[#allocation2 + $0xe50] sm:$0xff]  ;;  %1140 = vmatpush.msrb.mxu2 %v543_v19  ;;  %v296_v19 = vld [vmem:[#allocation2 + $0x478] sm:$0xff] }
 0x147   :  { %v411_v24 = vld [vmem:[#allocation2 + $0x810] sm:$0xff]  ;;  %1159 = vmatpush.msrb.mxu3 %v611_v20  ;;  %v364_v20 = vld [vmem:[#allocation2 + $0x698] sm:$0xff] }
 0x148   :  { %v475_v25 = vld [vmem:[#allocation2 + $0xa10] sm:$0xff]  ;;  %1101 = vmatpush.msrb.mxu0 %v411_v24  ;;  %v164_v24 = vld [vmem:[#allocation2 + $0x58] sm:$0xff] }
 0x149   :  { %v539_v26 = vld [vmem:[#allocation2 + $0xc10] sm:$0xff]  ;;  %1121 = vmatpush.msrb.mxu1 %v475_v25  ;;  %1102 = vmatmul.f32.vlgmr.msrb.gmra.mxu0 %v2185_v35  ;;  %v228_v25 = vld [vmem:[#allocation2 + $0x258] sm:$0xff] }
 0x14a   :  { %v607_v27 = vld [vmem:[#allocation2 + $0xe30] sm:$0xff]  ;;  %1141 = vmatpush.msrb.mxu2 %v539_v26  ;;  %1166 = vmatpush.msra.mxu0 %v216_v29  ;;  %v292_v26 = vld [vmem:[#allocation2 + $0x458] sm:$0xff] }
 0x14b   :  { %1160 = vmatpush.msrb.mxu3 %v607_v27  ;;  %v603_v61 = vld [vmem:[#allocation2 + $0xe10] sm:$0xff]  ;;  %1142 = vmatmul.f32.vlgmr.msrb.gmra.mxu2 %v2182_v32  ;;  %v360_v27 = vld [vmem:[#allocation2 + $0x678] sm:$0xff] }
 0x14c   :  { %1186 = vmatpush.msra.mxu1 %v280_v30  ;;  %1206 = vmatpush.msra.mxu2 %v344_v31  ;;  %v2188_v4 = vld.sshfl [vmem:[#allocation1 + $0x38] sm:$0xff pattern:$0x73625140]  ;;  %v160_v29 = vld [vmem:[#allocation2 + $0x38] sm:$0xff] }
 0x14d   :  { %1161 = vmatpush.msrb.mxu3 %v603_v61  ;;  %1167 = vmatpush.msra.mxu0 %v212_v33  ;;  %v224_v30 = vld [vmem:[#allocation2 + $0x238] sm:$0xff] }
 0x14e   :  { %1162 = vmatmul.f32.vlgmr.msrb.gmra.mxu3 %v2188_v4  ;;  %1187 = vmatpush.msra.mxu1 %v276_v34  ;;  %v288_v31 = vld [vmem:[#allocation2 + $0x438] sm:$0xff] }
 0x14f   :  { %1207 = vmatpush.msra.mxu2 %v340_v2  ;;  %1226 = vmatpush.msra.mxu3 %v408_v3  ;;  %v356_v61 = vld [vmem:[#allocation2 + $0x658] sm:$0xff] }
 0x150   :  { %1122 = vmatmul.f32.vlgmr.msrb.gmra.mxu1 %v2191_v40  ;;  %1168 = vmatpush.msra.mxu0 %v208_v36  ;;  %v156_v33 = vld [vmem:[#allocation2 + $0x18] sm:$0xff] }
 0x151   :  { %1188 = vmatpush.msra.mxu1 %v272_v37  ;;  %1208 = vmatpush.msra.mxu2 %v336_v38  ;;  %v220_v34 = vld [vmem:[#allocation2 + $0x218] sm:$0xff] }
 0x152   :  { %1227 = vmatpush.msra.mxu3 %v404_v39  ;;  %1169 = vmatpush.msra.mxu0 %v204_v41  ;;  %v284_v2 = vld [vmem:[#allocation2 + $0x418] sm:$0xff] }
 0x153   :  { %1189 = vmatpush.msra.mxu1 %v268_v42  ;;  %1209 = vmatpush.msra.mxu2 %v332_v43  ;;  %v352_v3 = vld [vmem:[#allocation2 + $0x638] sm:$0xff] }
 0x154   :  { %1228 = vmatpush.msra.mxu3 %v400_v44  ;;  %1170 = vmatpush.msra.mxu0 %v200_v17  ;;  %v472_v36 = vld [vmem:[#allocation2 + $0x9f8] sm:$0xff] }
 0x155   :  { %1190 = vmatpush.msra.mxu1 %v264_v45  ;;  %1210 = vmatpush.msra.mxu2 %v328_v46  ;;  %v536_v37 = vld [vmem:[#allocation2 + $0xbf8] sm:$0xff] }
 0x156   :  { %1229 = vmatpush.msra.mxu3 %v396_v47  ;;  %1171 = vmatpush.msra.mxu0 %v196_v22  ;;  %v600_v38 = vld [vmem:[#allocation2 + $0xdf8] sm:$0xff] }
 0x157   :  { %1191 = vmatpush.msra.mxu1 %v260_v23  ;;  %1211 = vmatpush.msra.mxu2 %v324_v48  ;;  %v348_v39 = vld [vmem:[#allocation2 + $0x618] sm:$0xff] }
 0x158   :  { %1230 = vmatpush.msra.mxu3 %v392_v49  ;;  %1172 = vmatpush.msra.mxu0 %v192_v50  ;;  %v468_v41 = vld [vmem:[#allocation2 + $0x9d8] sm:$0xff] }
 0x159   :  { %1192 = vmatpush.msra.mxu1 %v256_v51  ;;  %1212 = vmatpush.msra.mxu2 %v320_v28  ;;  %v532_v42 = vld [vmem:[#allocation2 + $0xbd8] sm:$0xff] }
 0x15a   :  { %1231 = vmatpush.msra.mxu3 %v388_v52  ;;  %1173 = vmatpush.msra.mxu0 %v188_v53  ;;  %v596_v43 = vld [vmem:[#allocation2 + $0xdd8] sm:$0xff] }
 0x15b   :  { %1193 = vmatpush.msra.mxu1 %v252_v54  ;;  %1213 = vmatpush.msra.mxu2 %v316_v55  ;;  %v664_v44 = vld [vmem:[#allocation2 + $0xff8] sm:$0xff]  ;;  %v2194_v55 = vpop.f32.mrf.mxu1 }
 0x15c   :  { %1232 = vmatpush.msra.mxu3 %v384_v56  ;;  %1174 = vmatpush.msra.mxu0 %v184_v57  ;;  %v464_v17 = vld [vmem:[#allocation2 + $0x9b8] sm:$0xff] }
 0x15d   :  { %1194 = vmatpush.msra.mxu1 %v248_v58  ;;  %1214 = vmatpush.msra.mxu2 %v312_v59  ;;  %v528_v45 = vld [vmem:[#allocation2 + $0xbb8] sm:$0xff] }
 0x15e   :  { %1233 = vmatpush.msra.mxu3 %v380_v60  ;;  %1175 = vmatpush.msra.mxu0 %v180_v62  ;;  %v592_v46 = vld [vmem:[#allocation2 + $0xdb8] sm:$0xff]  ;;  %v2196_v60 = vpop.f32.mrf.mxu0 }
 0x15f   :  { %1195 = vmatpush.msra.mxu1 %v244_v63  ;;  %1215 = vmatpush.msra.mxu2 %v308_v0  ;;  %v660_v47 = vld [vmem:[#allocation2 + $0xfd8] sm:$0xff] }
 0x160   :  { %1234 = vmatpush.msra.mxu3 %v376_v1  ;;  %1176 = vmatpush.msra.mxu0 %v176_v5  ;;  %v460_v22 = vld [vmem:[#allocation2 + $0x998] sm:$0xff]  ;;  %v2198_v5 = vpop.f32.mrf.mxu2 }
 0x161   :  { %1196 = vmatpush.msra.mxu1 %v240_v6  ;;  %1216 = vmatpush.msra.mxu2 %v304_v7  ;;  %v524_v23 = vld [vmem:[#allocation2 + $0xb98] sm:$0xff] }
 0x162   :  { %1235 = vmatpush.msra.mxu3 %v372_v8  ;;  %1177 = vmatpush.msra.mxu0 %v172_v10  ;;  %v588_v48 = vld [vmem:[#allocation2 + $0xd98] sm:$0xff] }
 0x163   :  { %1197 = vmatpush.msra.mxu1 %v236_v11  ;;  %1217 = vmatpush.msra.mxu2 %v300_v12  ;;  %v656_v49 = vld [vmem:[#allocation2 + $0xfb8] sm:$0xff] }
 0x164   :  { %1236 = vmatpush.msra.mxu3 %v368_v14  ;;  %1178 = vmatpush.msra.mxu0 %v168_v16  ;;  %v456_v50 = vld [vmem:[#allocation2 + $0x978] sm:$0xff] }
 0x165   :  { %1198 = vmatpush.msra.mxu1 %v232_v18  ;;  %1218 = vmatpush.msra.mxu2 %v296_v19  ;;  %v520_v51 = vld [vmem:[#allocation2 + $0xb78] sm:$0xff]  ;;  %v2200_v18 = vpop.f32.mrf.mxu3 }
 0x166   :  { %1237 = vmatpush.msra.mxu3 %v364_v20  ;;  %1179 = vmatpush.msra.mxu0 %v164_v24  ;;  %v584_v28 = vld [vmem:[#allocation2 + $0xd78] sm:$0xff] }
 0x167   :  { %1199 = vmatpush.msra.mxu1 %v228_v25  ;;  %1219 = vmatpush.msra.mxu2 %v292_v26  ;;  %v652_v52 = vld [vmem:[#allocation2 + $0xf98] sm:$0xff]  ;;  %v2202_v26 = vpop.f32.mrf.mxu1 }
 0x168   :  { %1238 = vmatpush.msra.mxu3 %v360_v27  ;;  %1180 = vmatpush.msra.mxu0 %v160_v29  ;;  %v452_v53 = vld [vmem:[#allocation2 + $0x958] sm:$0xff] }
 0x169   :  { %1200 = vmatpush.msra.mxu1 %v224_v30  ;;  %1220 = vmatpush.msra.mxu2 %v288_v31  ;;  %v516_v54 = vld [vmem:[#allocation2 + $0xb58] sm:$0xff]  ;;  %v2204_v31 = vpop.f32.mrf.mxu0 }
 0x16a   :  { %1239 = vmatpush.msra.mxu3 %v356_v61  ;;  %1181 = vmatpush.msra.mxu0 %v156_v33  ;;  %v580_v56 = vld [vmem:[#allocation2 + $0xd58] sm:$0xff] }
 0x16b   :  { %1201 = vmatpush.msra.mxu1 %v220_v34  ;;  %1221 = vmatpush.msra.mxu2 %v284_v2  ;;  %v648_v57 = vld [vmem:[#allocation2 + $0xf78] sm:$0xff]  ;;  %v2206_v2 = vpop.f32.mrf.mxu2 }
 0x16c   :  { %1240 = vmatpush.msra.mxu3 %v352_v3  ;;  %1246 = vmatpush.msrb.mxu0 %v472_v36  ;;  %v448_v58 = vld [vmem:[#allocation2 + $0x938] sm:$0xff] }
 0x16d   :  { %1266 = vmatpush.msrb.mxu1 %v536_v37  ;;  %1286 = vmatpush.msrb.mxu2 %v600_v38  ;;  %v512_v59 = vld [vmem:[#allocation2 + $0xb38] sm:$0xff] }
 0x16e   :  { %1241 = vmatpush.msra.mxu3 %v348_v39  ;;  %1247 = vmatpush.msrb.mxu0 %v468_v41  ;;  %v576_v62 = vld [vmem:[#allocation2 + $0xd38] sm:$0xff] }
 0x16f   :  { %1267 = vmatpush.msrb.mxu1 %v532_v42  ;;  %1287 = vmatpush.msrb.mxu2 %v596_v43  ;;  %v644_v63 = vld [vmem:[#allocation2 + $0xf58] sm:$0xff]  ;;  %v2211_v42 = vpop.f32.mrf.mxu3 }
 0x170   :  { %1306 = vmatpush.msrb.mxu3 %v664_v44  ;;  %1248 = vmatpush.msrb.mxu0 %v464_v17  ;;  %v444_v0 = vld [vmem:[#allocation2 + $0x918] sm:$0xff]  ;;  %v883_v44 = vpop.f32.mrf.mxu1 }
 0x171   :  { %1268 = vmatpush.msrb.mxu1 %v528_v45  ;;  %1288 = vmatpush.msrb.mxu2 %v592_v46  ;;  %v508_v1 = vld [vmem:[#allocation2 + $0xb18] sm:$0xff] }
 0x172   :  { %1307 = vmatpush.msrb.mxu3 %v660_v47  ;;  %1249 = vmatpush.msrb.mxu0 %v460_v22  ;;  %v572_v6 = vld [vmem:[#allocation2 + $0xd18] sm:$0xff]  ;;  %v863_v47 = vpop.f32.mrf.mxu0 }
 0x173   :  { %1269 = vmatpush.msrb.mxu1 %v524_v23  ;;  %1289 = vmatpush.msrb.mxu2 %v588_v48  ;;  %v640_v7 = vld [vmem:[#allocation2 + $0xf38] sm:$0xff]  ;;  %v884_v48 = vadd.f32 %v883_v44, %v863_v47 }
 0x174   :  { %1308 = vmatpush.msrb.mxu3 %v656_v49  ;;  %1250 = vmatpush.msrb.mxu0 %v456_v50  ;;  %v440_v8 = vld [vmem:[#allocation2 + $0x8f8] sm:$0xff] }
 0x175   :  { %1270 = vmatpush.msrb.mxu1 %v520_v51  ;;  %1290 = vmatpush.msrb.mxu2 %v584_v28  ;;  %v504_v10 = vld [vmem:[#allocation2 + $0xaf8] sm:$0xff] }
 0x176   :  { %1309 = vmatpush.msrb.mxu3 %v652_v52  ;;  %1251 = vmatpush.msrb.mxu0 %v452_v53  ;;  %v568_v11 = vld [vmem:[#allocation2 + $0xcf8] sm:$0xff] }
 0x177   :  { %1271 = vmatpush.msrb.mxu1 %v516_v54  ;;  %1291 = vmatpush.msrb.mxu2 %v580_v56  ;;  %v636_v12 = vld [vmem:[#allocation2 + $0xf18] sm:$0xff]  ;;  %v923_v56 = vpop.f32.mrf.mxu3 }
 0x178   :  { %1310 = vmatpush.msrb.mxu3 %v648_v57  ;;  %1252 = vmatpush.msrb.mxu0 %v448_v58  ;;  %v436_v14 = vld [vmem:[#allocation2 + $0x8d8] sm:$0xff]  ;;  %v1418_v57 = vld [vmem:[#allocation8 + $0x1e0] sm:$0xff] }
 0x179   :  { %1272 = vmatpush.msrb.mxu1 %v512_v59  ;;  %1292 = vmatpush.msrb.mxu2 %v576_v62  ;;  %v500_v16 = vld [vmem:[#allocation2 + $0xad8] sm:$0xff] }
 0x17a   :  { %1311 = vmatpush.msrb.mxu3 %v644_v63  ;;  %1253 = vmatpush.msrb.mxu0 %v444_v0  ;;  %v564_v19 = vld [vmem:[#allocation2 + $0xcd8] sm:$0xff]  ;;  %v943_v0 = vpop.f32.mrf.mxu0 }
 0x17b   :  { %1273 = vmatpush.msrb.mxu1 %v508_v1  ;;  %1293 = vmatpush.msrb.mxu2 %v572_v6  ;;  %v632_v20 = vld [vmem:[#allocation2 + $0xef8] sm:$0xff]  ;;  %v1414_v1 = vld [vmem:[#allocation8 + $0x1c0] sm:$0xff] }
 0x17c   :  { %1312 = vmatpush.msrb.mxu3 %v640_v7  ;;  %1254 = vmatpush.msrb.mxu0 %v440_v8  ;;  %v432_v24 = vld [vmem:[#allocation2 + $0x8b8] sm:$0xff] }
 0x17d   :  { %1274 = vmatpush.msrb.mxu1 %v504_v10  ;;  %1294 = vmatpush.msrb.mxu2 %v568_v11  ;;  %v496_v25 = vld [vmem:[#allocation2 + $0xab8] sm:$0xff]  ;;  %v1378_v10 = vld [vmem:[#allocation8 + $0xa0] sm:$0xff]  ;;  %v963_v11 = vpop.f32.mrf.mxu1 }
 0x17e   :  { %1313 = vmatpush.msrb.mxu3 %v636_v12  ;;  %1255 = vmatpush.msrb.mxu0 %v436_v14  ;;  %v560_v27 = vld [vmem:[#allocation2 + $0xcb8] sm:$0xff]  ;;  %v1410_v12 = vld [vmem:[#allocation8 + $0x1a0] sm:$0xff] }
 0x17f   :  { %1275 = vmatpush.msrb.mxu1 %v500_v16  ;;  %v628_v29 = vld [vmem:[#allocation2 + $0xed8] sm:$0xff]  ;;  %1295 = vmatpush.msrb.mxu2 %v564_v19 }
 0x180   :  { %1314 = vmatpush.msrb.mxu3 %v632_v20  ;;  %v428_v30 = vld [vmem:[#allocation2 + $0x898] sm:$0xff]  ;;  %1256 = vmatpush.msrb.mxu0 %v432_v24  ;;  %v1442_v24 = vld [vmem:[#allocation8 + $0x2a0] sm:$0xff] }
 0x181   :  { %1276 = vmatpush.msrb.mxu1 %v496_v25  ;;  %v492_v61 = vld [vmem:[#allocation2 + $0xa98] sm:$0xff]  ;;  %1296 = vmatpush.msrb.mxu2 %v560_v27  ;;  %v1374_v27 = vld [vmem:[#allocation8 + $0x80] sm:$0xff] }
 0x182   :  { %v556_v33 = vld [vmem:[#allocation2 + $0xc98] sm:$0xff]  ;;  %1315 = vmatpush.msrb.mxu3 %v628_v29  ;;  %1222 = vmatmul.f32.vlgmr.msra.gmra.mxu2 %v2170_v9  ;;  %v1406_v29 = vld [vmem:[#allocation8 + $0x180] sm:$0xff] }
 0x183   :  { %v624_v34 = vld [vmem:[#allocation2 + $0xeb8] sm:$0xff]  ;;  %1257 = vmatpush.msrb.mxu0 %v428_v30  ;;  %1277 = vmatpush.msrb.mxu1 %v492_v61 }
 0x184   :  { %v424_v3 = vld [vmem:[#allocation2 + $0x878] sm:$0xff]  ;;  %1297 = vmatpush.msrb.mxu2 %v556_v33  ;;  %1316 = vmatpush.msrb.mxu3 %v624_v34 }
 0x185   :  { %v488_v36 = vld [vmem:[#allocation2 + $0xa78] sm:$0xff]  ;;  %1182 = vmatmul.f32.vlgmr.msra.gmra.mxu0 %v2173_v13  ;;  %1242 = vmatmul.f32.vlgmr.msra.gmra.mxu3 %v2176_v15  ;;  %v724_v13 = vadd.f32 %v2194_v55, %v2196_v60  ;;  %v1386_v55 = vld [vmem:[#allocation8 + $0xe0] sm:$0xff] }
 0x186   :  { %v552_v37 = vld [vmem:[#allocation2 + $0xc78] sm:$0xff]  ;;  %1258 = vmatpush.msrb.mxu0 %v424_v3  ;;  %1278 = vmatpush.msrb.mxu1 %v488_v36  ;;  %v1438_v3 = vld [vmem:[#allocation8 + $0x280] sm:$0xff]  ;;  %v1003_v36 = vpop.f32.mrf.mxu3 }
 0x187   :  { %v620_v38 = vld [vmem:[#allocation2 + $0xe98] sm:$0xff]  ;;  %1298 = vmatpush.msrb.mxu2 %v552_v37  ;;  %1202 = vmatmul.f32.vlgmr.msra.gmra.mxu1 %v2179_v21  ;;  %v903_v21 = vpop.f32.mrf.mxu2  ;;  %v744_v51 = vadd.f32 %v2198_v5, %v724_v13  ;;  %v1370_v37 = vld [vmem:[#allocation8 + $0x60] sm:$0xff] }
 0x188   :  { %v420_v39 = vld [vmem:[#allocation2 + $0x858] sm:$0xff]  ;;  %1317 = vmatpush.msrb.mxu3 %v620_v38  ;;  %v904_v54 = vadd.f32 %v903_v21, %v884_v48  ;;  %v1402_v38 = vld [vmem:[#allocation8 + $0x160] sm:$0xff] }
 0x189   :  { %v484_v41 = vld [vmem:[#allocation2 + $0xa58] sm:$0xff]  ;;  %1259 = vmatpush.msrb.mxu0 %v420_v39  ;;  %v764_v59 = vadd.f32 %v2200_v18, %v744_v51  ;;  %v1434_v13 = vld [vmem:[#allocation8 + $0x260] sm:$0xff] }
 0x18a   :  { %v548_v9 = vld [vmem:[#allocation2 + $0xc58] sm:$0xff]  ;;  %1279 = vmatpush.msrb.mxu1 %v484_v41  ;;  %v924_v63 = vadd.f32 %v923_v56, %v904_v54  ;;  %v1430_v21 = vld [vmem:[#allocation8 + $0x240] sm:$0xff] }
 0x18b   :  { %v616_v43 = vld [vmem:[#allocation2 + $0xe78] sm:$0xff]  ;;  %1299 = vmatpush.msrb.mxu2 %v548_v9  ;;  %v784_v6 = vadd.f32 %v2204_v31, %v764_v59  ;;  %v1362_v51 = vld [vmem:[#allocation8 + $0x20] sm:$0xff] }
 0x18c   :  { %v416_v17 = vld [vmem:[#allocation2 + $0x838] sm:$0xff]  ;;  %1318 = vmatpush.msrb.mxu3 %v616_v43  ;;  %v944_v8 = vadd.f32 %v943_v0, %v924_v63  ;;  %v2229_v43 = vld [vmem:[#allocation7] sm:$0xf]  ;;  %v1390_v59 = vld [vmem:[#allocation8 + $0x100] sm:$0xff] }
 0x18d   :  { %v480_v45 = vld [vmem:[#allocation2 + $0xa38] sm:$0xff]  ;;  %1260 = vmatpush.msrb.mxu0 %v416_v17  ;;  %v804_v16 = vadd.f32 %v2202_v26, %v784_v6  ;;  %v2225_v26 = vld [vmem:[#allocation5] sm:$0xf]  ;;  %v1387_v0 = vld [vmem:[#allocation8 + $0xe8] sm:$0xff] }
 0x18e   :  { %v544_v15 = vld [vmem:[#allocation2 + $0xc38] sm:$0xff]  ;;  %1280 = vmatpush.msrb.mxu1 %v480_v45  ;;  %v964_v19 = vadd.f32 %v963_v11, %v944_v8  ;;  %v1329_v17 = vperm.slane %v2225_v26, 1  ;;  %v1385_v6 = vld [vmem:[#allocation8 + $0xd8] sm:$0xff]  ;;  %v1383_v8 = vld [vmem:[#allocation8 + $0xc8] sm:$0xff] }
 0x18f   :  { %v612_v46 = vld [vmem:[#allocation2 + $0xe58] sm:$0xff]  ;;  %1300 = vmatpush.msrb.mxu2 %v544_v15  ;;  %v983_v25 = vpop.f32.mrf.mxu2  ;;  %v824_v31 = vadd.f32 %v2206_v2, %v804_v16  ;;  %v1328_v2 = vperm.slane %v2225_v26, 0  ;;  %v1366_v15 = vld [vmem:[#allocation8 + $0x40] sm:$0xff]  ;;  %v1381_v11 = vld [vmem:[#allocation8 + $0xb8] sm:$0xff] }
 0x190   :  { %v412_v22 = vld [vmem:[#allocation2 + $0x818] sm:$0xff]  ;;  %1319 = vmatpush.msrb.mxu3 %v612_v46  ;;  %v984_v33 = vadd.f32 %v983_v25, %v964_v19  ;;  %v1398_v46 = vld [vmem:[#allocation8 + $0x140] sm:$0xff]  ;;  %v1379_v16 = vld [vmem:[#allocation8 + $0xa8] sm:$0xff] }
 0x191   :  { %v476_v23 = vld [vmem:[#allocation2 + $0xa18] sm:$0xff]  ;;  %1261 = vmatpush.msrb.mxu0 %v412_v22  ;;  %v844_v41 = vadd.f32 %v2211_v42, %v824_v31  ;;  %v1342_v22 = vperm.slane %v2229_v43, 0  ;;  %v1411_v19 = vld [vmem:[#allocation8 + $0x1a8] sm:$0xff]  ;;  %v1409_v25 = vld [vmem:[#allocation8 + $0x198] sm:$0xff] }
 0x192   :  { %v540_v49 = vld [vmem:[#allocation2 + $0xc18] sm:$0xff]  ;;  %1281 = vmatpush.msrb.mxu1 %v476_v23  ;;  %1262 = vmatmul.f32.vlgmr.msrb.gmra.mxu0 %v2185_v35  ;;  %v1450_v35 = vld [vmem:[#allocation8 + $0x2e0] sm:$0xff]  ;;  %v1004_v44 = vadd.f32 %v1003_v36, %v984_v33  ;;  %v1407_v31 = vld [vmem:[#allocation8 + $0x188] sm:$0xff] }
 0x193   :  { %v608_v50 = vld [vmem:[#allocation2 + $0xe38] sm:$0xff]  ;;  %1301 = vmatpush.msrb.mxu2 %v540_v49  ;;  %1282 = vmatmul.f32.vlgmr.msrb.gmra.mxu1 %v2191_v40  ;;  %v1336_v42 = vmul.f32 %v1328_v2, %v844_v41  ;;  %v1343_v49 = vperm.slane %v2229_v43, 1  ;;  %v1441_v33 = vld [vmem:[#allocation8 + $0x298] sm:$0xff]  ;;  %v1439_v36 = vld [vmem:[#allocation8 + $0x288] sm:$0xff] }
 0x194   :  { %v1388_v28 = vld [vmem:[#allocation8 + $0xf0] sm:$0xff]  ;;  %1320 = vmatpush.msrb.mxu3 %v608_v50  ;;  %1302 = vmatmul.f32.vlgmr.msrb.gmra.mxu2 %v2182_v32  ;;  %v1382_v32 = vld [vmem:[#allocation8 + $0xc0] sm:$0xff]  ;;  %v1337_v48 = vmul.f32 %v1329_v17, %v1004_v44  ;;  %v1437_v41 = vld [vmem:[#allocation8 + $0x278] sm:$0xff] }
 0x195   :  { %v1420_v52 = vld [vmem:[#allocation8 + $0x1f0] sm:$0xff]  ;;  %1486 = vmatpush.msra.mxu0 %v1388_v28  ;;  %v1394_v28 = vld [vmem:[#allocation8 + $0x120] sm:$0xff]  ;;  %v1401_v2 = vld [vmem:[#allocation8 + $0x158] sm:$0xff] }
 0x196   :  { %v604_v53 = vld [vmem:[#allocation2 + $0xe18] sm:$0xff]  ;;  %1506 = vmatpush.msra.mxu1 %v1420_v52  ;;  %v1367_v17 = vld [vmem:[#allocation8 + $0x48] sm:$0xff] }
 0x197   :  { %v1452_v58 = vld [vmem:[#allocation8 + $0x2f0] sm:$0xff]  ;;  %1321 = vmatpush.msrb.mxu3 %v604_v53  ;;  %1487 = vmatpush.msra.mxu0 %v1386_v55  ;;  %v2234_v53 = vadd.f32 %v1342_v22, %v1336_v42  ;;  %v2236_v55 = vadd.f32 %v1343_v49, %v1337_v48  ;;  %v1478_v42 = vld [vmem:[#allocation8 + $0x3c0] sm:$0xff]  ;;  %v1365_v22 = vld [vmem:[#allocation8 + $0x38] sm:$0xff] }
 0x198   :  { %v1384_v60 = vld [vmem:[#allocation8 + $0xd0] sm:$0xff]  ;;  %1322 = vmatmul.f32.vlgmr.msrb.gmra.mxu3 %v2188_v4  ;;  %1507 = vmatpush.msra.mxu1 %v1418_v57  ;;  %v1446_v4 = vld [vmem:[#allocation8 + $0x2c0] sm:$0xff]  ;;  %v1397_v48 = vld [vmem:[#allocation8 + $0x138] sm:$0xff] }
 0x199   :  { %v1416_v62 = vld [vmem:[#allocation8 + $0x1d0] sm:$0xff]  ;;  %1526 = vmatpush.msra.mxu2 %v1452_v58  ;;  %1488 = vmatpush.msra.mxu0 %v1384_v60  ;;  %v1426_v57 = vld [vmem:[#allocation8 + $0x220] sm:$0xff]  ;;  %v1354_v60 = vmax.f32 %v2234_v53, 0.0  ;;  %v1355_v63 = vmax.f32 %v2236_v55, 0.0 }
 0x19a   :  { %v1448_v5 = vld [vmem:[#allocation8 + $0x2d0] sm:$0xff]  ;;  %1508 = vmatpush.msra.mxu1 %v1416_v62  ;;  %v1358_v58 = vld [vmem:[#allocation8] sm:$0xff]  ;;  %v1389_v62 = vld [vmem:[#allocation8 + $0xf8] sm:$0xff] }
 0x19b   :  { %v1380_v7 = vld [vmem:[#allocation8 + $0xb0] sm:$0xff]  ;;  %1527 = vmatpush.msra.mxu2 %v1450_v35  ;;  %1489 = vmatpush.msra.mxu0 %v1382_v32  ;;  %v1421_v35 = vld [vmem:[#allocation8 + $0x1f8] sm:$0xff] }
 0x19c   :  { %v1412_v40 = vld [vmem:[#allocation8 + $0x1b0] sm:$0xff]  ;;  %1509 = vmatpush.msra.mxu1 %v1414_v1  ;;  %v1419_v1 = vld [vmem:[#allocation8 + $0x1e8] sm:$0xff] }
 0x19d   :  { %1528 = vmatpush.msra.mxu2 %v1448_v5  ;;  %1490 = vmatpush.msra.mxu0 %v1380_v7  ;;  %v1444_v14 = vld [vmem:[#allocation8 + $0x2b0] sm:$0xff]  ;;  %v1422_v5 = vld [vmem:[#allocation8 + $0x200] sm:$0xff]  ;;  %v1453_v7 = vld [vmem:[#allocation8 + $0x2f8] sm:$0xff] }
 0x19e   :  { %1510 = vmatpush.msra.mxu1 %v1412_v40  ;;  %v1376_v18 = vld [vmem:[#allocation8 + $0x90] sm:$0xff]  ;;  %v1417_v40 = vld [vmem:[#allocation8 + $0x1d8] sm:$0xff] }
 0x19f   :  { %1529 = vmatpush.msra.mxu2 %v1446_v4  ;;  %1491 = vmatpush.msra.mxu0 %v1378_v10  ;;  %v1408_v20 = vld [vmem:[#allocation8 + $0x190] sm:$0xff]  ;;  %v1451_v4 = vld [vmem:[#allocation8 + $0x2e8] sm:$0xff] }
 0x1a0   :  { %1511 = vmatpush.msra.mxu1 %v1410_v12  ;;  %v1440_v30 = vld [vmem:[#allocation8 + $0x290] sm:$0xff]  ;;  %v1415_v10 = vld [vmem:[#allocation8 + $0x1c8] sm:$0xff]  ;;  %v1449_v12 = vld [vmem:[#allocation8 + $0x2d8] sm:$0xff] }
 0x1a1   :  { %1530 = vmatpush.msra.mxu2 %v1444_v14  ;;  %1492 = vmatpush.msra.mxu0 %v1376_v18  ;;  %v1372_v61 = vld [vmem:[#allocation8 + $0x70] sm:$0xff]  ;;  %v1413_v14 = vld [vmem:[#allocation8 + $0x1b8] sm:$0xff]  ;;  %v1447_v18 = vld [vmem:[#allocation8 + $0x2c8] sm:$0xff] }
 0x1a2   :  { %1512 = vmatpush.msra.mxu1 %v1408_v20  ;;  %v1404_v34 = vld [vmem:[#allocation8 + $0x170] sm:$0xff]  ;;  %v1377_v20 = vld [vmem:[#allocation8 + $0x98] sm:$0xff] }
 0x1a3   :  { %1531 = vmatpush.msra.mxu2 %v1442_v24  ;;  %1493 = vmatpush.msra.mxu0 %v1374_v27  ;;  %v1436_v39 = vld [vmem:[#allocation8 + $0x270] sm:$0xff]  ;;  %v1445_v24 = vld [vmem:[#allocation8 + $0x2b8] sm:$0xff]  ;;  %v1375_v27 = vld [vmem:[#allocation8 + $0x88] sm:$0xff] }
 0x1a4   :  { %1513 = vmatpush.msra.mxu1 %v1406_v29  ;;  %v1368_v9 = vld [vmem:[#allocation8 + $0x50] sm:$0xff]  ;;  %v1443_v29 = vld [vmem:[#allocation8 + $0x2a8] sm:$0xff] }
 0x1a5   :  { %1532 = vmatpush.msra.mxu2 %v1440_v30  ;;  %1494 = vmatpush.msra.mxu0 %v1372_v61  ;;  %v1400_v45 = vld [vmem:[#allocation8 + $0x150] sm:$0xff]  ;;  %v1373_v61 = vld [vmem:[#allocation8 + $0x78] sm:$0xff] }
 0x1a6   :  { %1514 = vmatpush.msra.mxu1 %v1404_v34  ;;  %v1432_v47 = vld [vmem:[#allocation8 + $0x250] sm:$0xff]  ;;  %v1405_v34 = vld [vmem:[#allocation8 + $0x178] sm:$0xff] }
 0x1a7   :  { %1533 = vmatpush.msra.mxu2 %v1438_v3  ;;  %1495 = vmatpush.msra.mxu0 %v1370_v37  ;;  %v1364_v23 = vld [vmem:[#allocation8 + $0x30] sm:$0xff]  ;;  %v1371_v3 = vld [vmem:[#allocation8 + $0x68] sm:$0xff] }
 0x1a8   :  { %1515 = vmatpush.msra.mxu1 %v1402_v38  ;;  %v1396_v50 = vld [vmem:[#allocation8 + $0x130] sm:$0xff]  ;;  %v1403_v37 = vld [vmem:[#allocation8 + $0x168] sm:$0xff]  ;;  %v1023_v38 = vpop.f32.mrf.mxu0 }
 0x1a9   :  { %1534 = vmatpush.msra.mxu2 %v1436_v39  ;;  %1496 = vmatpush.msra.mxu0 %v1368_v9  ;;  %v1428_v52 = vld [vmem:[#allocation8 + $0x230] sm:$0xff]  ;;  %v1369_v39 = vld [vmem:[#allocation8 + $0x58] sm:$0xff]  ;;  %v1482_v9 = vld [vmem:[#allocation8 + $0x3e0] sm:$0xff] }
 0x1aa   :  { %1516 = vmatpush.msra.mxu1 %v1400_v45  ;;  %v1360_v54 = vld [vmem:[#allocation8 + $0x10] sm:$0xff]  ;;  %v1043_v45 = vpop.f32.mrf.mxu1 }
 0x1ab   :  { %1535 = vmatpush.msra.mxu2 %v1434_v13  ;;  %1497 = vmatpush.msra.mxu0 %v1366_v15  ;;  %v1392_v56 = vld [vmem:[#allocation8 + $0x110] sm:$0xff]  ;;  %v1435_v13 = vld [vmem:[#allocation8 + $0x268] sm:$0xff] }
 0x1ac   :  { %1517 = vmatpush.msra.mxu1 %v1398_v46  ;;  %v1424_v32 = vld [vmem:[#allocation8 + $0x210] sm:$0xff]  ;;  %v1399_v15 = vld [vmem:[#allocation8 + $0x148] sm:$0xff]  ;;  %v1044_v46 = vadd.f32 %v1043_v45, %v1023_v38 }
 0x1ad   :  { %1536 = vmatpush.msra.mxu2 %v1432_v47  ;;  %1498 = vmatpush.msra.mxu0 %v1364_v23  ;;  %v1484_v30 = vld [vmem:[#allocation8 + $0x3f0] sm:$0xff]  ;;  %v1063_v47 = vpop.f32.mrf.mxu2  ;;  %v1433_v23 = vld [vmem:[#allocation8 + $0x258] sm:$0xff]  ;;  %v1471_v38 = vld [vmem:[#allocation8 + $0x388] sm:$0xff] }
 0x1ae   :  { %1518 = vmatpush.msra.mxu1 %v1396_v50  ;;  %1546 = vmatpush.msra.mxu3 %v1484_v30  ;;  %v1480_v44 = vld [vmem:[#allocation8 + $0x3d0] sm:$0xff]  ;;  %v1064_v49 = vadd.f32 %v1063_v47, %v1044_v46  ;;  %v1454_v30 = vld [vmem:[#allocation8 + $0x300] sm:$0xff] }
 0x1af   :  { %1537 = vmatpush.msra.mxu2 %v1430_v21  ;;  %1499 = vmatpush.msra.mxu0 %v1362_v51  ;;  %v1476_v50 = vld [vmem:[#allocation8 + $0x3b0] sm:$0xff]  ;;  %v1363_v21 = vld [vmem:[#allocation8 + $0x28] sm:$0xff] }
 0x1b0   :  { %1519 = vmatpush.msra.mxu1 %v1394_v28  ;;  %1547 = vmatpush.msra.mxu3 %v1482_v9  ;;  %v1431_v28 = vld [vmem:[#allocation8 + $0x248] sm:$0xff]  ;;  %v1464_v53 = vld [vmem:[#allocation8 + $0x350] sm:$0xff] }
 0x1b1   :  { %1538 = vmatpush.msra.mxu2 %v1428_v52  ;;  %1500 = vmatpush.msra.mxu0 %v1360_v54  ;;  %v1395_v52 = vld [vmem:[#allocation8 + $0x128] sm:$0xff] }
 0x1b2   :  { %1520 = vmatpush.msra.mxu1 %v1392_v56  ;;  %1548 = vmatpush.msra.mxu3 %v1480_v44  ;;  %v1474_v56 = vld [vmem:[#allocation8 + $0x3a0] sm:$0xff]  ;;  %v1463_v9 = vld [vmem:[#allocation8 + $0x348] sm:$0xff]  ;;  %v1461_v44 = vld [vmem:[#allocation8 + $0x338] sm:$0xff] }
 0x1b3   :  { %1539 = vmatpush.msra.mxu2 %v1426_v57  ;;  %1501 = vmatpush.msra.mxu0 %v1358_v58  ;;  %v1361_v57 = vld [vmem:[#allocation8 + $0x18] sm:$0xff] }
 0x1b4   :  { %1521 = vmatpush.msra.mxu1 %v1390_v59  ;;  %1502 = vmatmul.f32.vlgmr.msra.gmra.mxu0 %v1354_v60  ;;  %v1429_v58 = vld [vmem:[#allocation8 + $0x238] sm:$0xff] }
 0x1b5   :  { %1522 = vmatmul.f32.vlgmr.msra.gmra.mxu1 %v1355_v63  ;;  %1566 = vmatpush.msrb.mxu0 %v1389_v62  ;;  %v1393_v59 = vld [vmem:[#allocation8 + $0x118] sm:$0xff] }
 0x1b6   :  { %1586 = vmatpush.msrb.mxu1 %v1421_v35  ;;  %1540 = vmatpush.msra.mxu2 %v1424_v32  ;;  %v1472_v35 = vld [vmem:[#allocation8 + $0x390] sm:$0xff]  ;;  %v1359_v32 = vld [vmem:[#allocation8 + $0x8] sm:$0xff] }
 0x1b7   :  { %1567 = vmatpush.msrb.mxu0 %v1387_v0  ;;  %1549 = vmatpush.msra.mxu3 %v1478_v42 }
 0x1b8   :  { %1587 = vmatpush.msrb.mxu1 %v1419_v1  ;;  %1541 = vmatpush.msra.mxu2 %v1422_v5  ;;  %v1427_v1 = vld [vmem:[#allocation8 + $0x228] sm:$0xff] }
 0x1b9   :  { %1568 = vmatpush.msrb.mxu0 %v1385_v6  ;;  %1550 = vmatpush.msra.mxu3 %v1476_v50  ;;  %v1391_v5 = vld [vmem:[#allocation8 + $0x108] sm:$0xff] }
 0x1ba   :  { %1606 = vmatpush.msrb.mxu2 %v1453_v7  ;;  %1588 = vmatpush.msrb.mxu1 %v1417_v40  ;;  %v1425_v7 = vld [vmem:[#allocation8 + $0x218] sm:$0xff] }
 0x1bb   :  { %1569 = vmatpush.msrb.mxu0 %v1383_v8  ;;  %1551 = vmatpush.msra.mxu3 %v1474_v56 }
 0x1bc   :  { %1607 = vmatpush.msrb.mxu2 %v1451_v4  ;;  %1589 = vmatpush.msrb.mxu1 %v1415_v10  ;;  %v1470_v4 = vld [vmem:[#allocation8 + $0x380] sm:$0xff]  ;;  %v1423_v10 = vld [vmem:[#allocation8 + $0x208] sm:$0xff] }
 0x1bd   :  { %1570 = vmatpush.msrb.mxu0 %v1381_v11  ;;  %1552 = vmatpush.msra.mxu3 %v1472_v35 }
 0x1be   :  { %1608 = vmatpush.msrb.mxu2 %v1449_v12  ;;  %1590 = vmatpush.msrb.mxu1 %v1413_v14  ;;  %v1330_v12 = vperm.slane %v2225_v26, 2  ;;  %v1468_v14 = vld [vmem:[#allocation8 + $0x370] sm:$0xff] }
 0x1bf   :  { %1571 = vmatpush.msrb.mxu0 %v1379_v16  ;;  %1553 = vmatpush.msra.mxu3 %v1470_v4  ;;  %v1674_v4 = vld [vmem:[#allocation13 + $0x50] sm:$0xff] }
 0x1c0   :  { %1609 = vmatpush.msrb.mxu2 %v1447_v18  ;;  %1591 = vmatpush.msrb.mxu1 %v1411_v19  ;;  %v1344_v19 = vperm.slane %v2229_v43, 2 }
 0x1c1   :  { %1572 = vmatpush.msrb.mxu0 %v1377_v20  ;;  %v1466_v20 = vld [vmem:[#allocation8 + $0x360] sm:$0xff]  ;;  %1554 = vmatpush.msra.mxu3 %v1468_v14 }
 0x1c2   :  { %1610 = vmatpush.msrb.mxu2 %v1445_v24  ;;  %1592 = vmatpush.msrb.mxu1 %v1409_v25  ;;  %v1462_v25 = vld [vmem:[#allocation8 + $0x340] sm:$0xff] }
 0x1c3   :  { %1573 = vmatpush.msrb.mxu0 %v1375_v27  ;;  %1555 = vmatpush.msra.mxu3 %v1466_v20  ;;  %v1458_v27 = vld [vmem:[#allocation8 + $0x320] sm:$0xff] }
 0x1c4   :  { %1611 = vmatpush.msrb.mxu2 %v1443_v29  ;;  %1593 = vmatpush.msrb.mxu1 %v1407_v31  ;;  %v1456_v29 = vld [vmem:[#allocation8 + $0x310] sm:$0xff]  ;;  %v1485_v31 = vld [vmem:[#allocation8 + $0x3f8] sm:$0xff]  ;;  %v1672_v14 = vld [vmem:[#allocation13 + $0x40] sm:$0xff] }
 0x1c5   :  { %1574 = vmatpush.msrb.mxu0 %v1373_v61  ;;  %1556 = vmatpush.msra.mxu3 %v1464_v53  ;;  %v1483_v61 = vld [vmem:[#allocation8 + $0x3e8] sm:$0xff]  ;;  %v1667_v53 = vld [vmem:[#allocation13 + $0x18] sm:$0xff] }
 0x1c6   :  { %1612 = vmatpush.msrb.mxu2 %v1441_v33  ;;  %1594 = vmatpush.msrb.mxu1 %v1405_v34  ;;  %v1083_v51 = vpop.f32.mrf.mxu3  ;;  %v1103_v62 = vpop.f32.mrf.mxu0  ;;  %v1481_v33 = vld [vmem:[#allocation8 + $0x3d8] sm:$0xff]  ;;  %v1479_v34 = vld [vmem:[#allocation8 + $0x3c8] sm:$0xff] }
 0x1c7   :  { %1575 = vmatpush.msrb.mxu0 %v1371_v3  ;;  %v1084_v54 = vadd.f32 %v1083_v51, %v1064_v49  ;;  %1557 = vmatpush.msra.mxu3 %v1462_v25  ;;  %v1477_v3 = vld [vmem:[#allocation8 + $0x3b8] sm:$0xff]  ;;  %v1668_v20 = vld [vmem:[#allocation13 + $0x20] sm:$0xff] }
 0x1c8   :  { %1613 = vmatpush.msrb.mxu2 %v1439_v36  ;;  %1595 = vmatpush.msrb.mxu1 %v1403_v37  ;;  %v1475_v36 = vld [vmem:[#allocation8 + $0x3a8] sm:$0xff]  ;;  %v1473_v37 = vld [vmem:[#allocation8 + $0x398] sm:$0xff] }
 0x1c9   :  { %1576 = vmatpush.msrb.mxu0 %v1369_v39  ;;  %v1104_v0 = vadd.f32 %v1103_v62, %v1084_v54  ;;  %v1469_v39 = vld [vmem:[#allocation8 + $0x378] sm:$0xff]  ;;  %v1331_v54 = vperm.slane %v2225_v26, 3  ;;  %v1692_v26 = vld [vmem:[#allocation13 + $0xe0] sm:$0xff] }
 0x1ca   :  { %1614 = vmatpush.msrb.mxu2 %v1437_v41  ;;  %1596 = vmatpush.msrb.mxu1 %v1401_v2  ;;  %v1467_v41 = vld [vmem:[#allocation8 + $0x368] sm:$0xff]  ;;  %v1465_v2 = vld [vmem:[#allocation8 + $0x358] sm:$0xff] }
 0x1cb   :  { %1577 = vmatpush.msrb.mxu0 %v1367_v17  ;;  %v1459_v17 = vld [vmem:[#allocation8 + $0x328] sm:$0xff]  ;;  %v1666_v25 = vld [vmem:[#allocation13 + $0x10] sm:$0xff] }
 0x1cc   :  { %1615 = vmatpush.msrb.mxu2 %v1435_v13  ;;  %1597 = vmatpush.msrb.mxu1 %v1399_v15  ;;  %v1457_v13 = vld [vmem:[#allocation8 + $0x318] sm:$0xff]  ;;  %v1455_v15 = vld [vmem:[#allocation8 + $0x308] sm:$0xff] }
 0x1cd   :  { %1578 = vmatpush.msrb.mxu0 %v1365_v22  ;;  %v1123_v6 = vpop.f32.mrf.mxu1 }
 0x1ce   :  { %1616 = vmatpush.msrb.mxu2 %v1433_v23  ;;  %1598 = vmatpush.msrb.mxu1 %v1397_v48  ;;  %v1124_v40 = vadd.f32 %v1123_v6, %v1104_v0  ;;  %v1143_v8 = vpop.f32.mrf.mxu2  ;;  %v1678_v0 = vld [vmem:[#allocation13 + $0x70] sm:$0xff] }
 0x1cf   :  { %1579 = vmatpush.msrb.mxu0 %v1363_v21  ;;  %v1694_v6 = vld [vmem:[#allocation13 + $0xf0] sm:$0xff] }
 0x1d0   :  { %1617 = vmatpush.msrb.mxu2 %v1431_v28  ;;  %1599 = vmatpush.msrb.mxu1 %v1395_v52  ;;  %v1144_v11 = vadd.f32 %v1143_v8, %v1124_v40  ;;  %v1676_v40 = vld [vmem:[#allocation13 + $0x60] sm:$0xff]  ;;  %v1675_v8 = vld [vmem:[#allocation13 + $0x58] sm:$0xff] }
 0x1d1   :  { %1580 = vmatpush.msrb.mxu0 %v1361_v57  ;;  %v1163_v16 = vpop.f32.mrf.mxu3 }
 0x1d2   :  { %1618 = vmatpush.msrb.mxu2 %v1429_v58  ;;  %1600 = vmatpush.msrb.mxu1 %v1393_v59  ;;  %v1164_v18 = vadd.f32 %v1163_v16, %v1144_v11  ;;  %v1345_v58 = vperm.slane %v2229_v43, 3  ;;  %v1691_v43 = vld [vmem:[#allocation13 + $0xd8] sm:$0xff]  ;;  %v1673_v11 = vld [vmem:[#allocation13 + $0x48] sm:$0xff] }
 0x1d3   :  { %1581 = vmatpush.msrb.mxu0 %v1359_v32  ;;  %v1679_v32 = vld [vmem:[#allocation13 + $0x78] sm:$0xff] }
 0x1d4   :  { %1619 = vmatpush.msrb.mxu2 %v1427_v1  ;;  %1601 = vmatpush.msrb.mxu1 %v1391_v5  ;;  %v1338_v24 = vmul.f32 %v1330_v12, %v1164_v18  ;;  %v1695_v1 = vld [vmem:[#allocation13 + $0xf8] sm:$0xff]  ;;  %v1677_v5 = vld [vmem:[#allocation13 + $0x68] sm:$0xff]  ;;  %v1670_v18 = vld [vmem:[#allocation13 + $0x30] sm:$0xff] }
 0x1d5   :  { %1582 = vmatmul.f32.vlgmr.msrb.gmra.mxu0 %v1354_v60  ;;  %1602 = vmatmul.f32.vlgmr.msrb.gmra.mxu1 %v1355_v63  ;;  %v1460_v63 = vld [vmem:[#allocation8 + $0x330] sm:$0xff]  ;;  %v1671_v16 = vld [vmem:[#allocation13 + $0x38] sm:$0xff] }
 0x1d6   :  { %1620 = vmatpush.msrb.mxu2 %v1425_v7  ;;  %v1352_v60 = vadd.f32 %v1344_v19, %v1338_v24  ;;  %1558 = vmatpush.msra.mxu3 %v1460_v63  ;;  %v1693_v7 = vld [vmem:[#allocation13 + $0xe8] sm:$0xff]  ;;  %v1688_v24 = vld [vmem:[#allocation13 + $0xc0] sm:$0xff] }
 0x1d7   :  { %1696 = vmatpush.msra.mxu0 %v1679_v32  ;;  %1716 = vmatpush.msra.mxu1 %v1695_v1  ;;  %v1689_v12 = vld [vmem:[#allocation13 + $0xc8] sm:$0xff] }
 0x1d8   :  { %1621 = vmatpush.msrb.mxu2 %v1423_v10  ;;  %v1356_v55 = vmax.f32 %v1352_v60, 0.0  ;;  %1559 = vmatpush.msra.mxu3 %v1458_v27  ;;  %v1690_v10 = vld [vmem:[#allocation13 + $0xd0] sm:$0xff]  ;;  %v1669_v19 = vld [vmem:[#allocation13 + $0x28] sm:$0xff]  ;;  %v1687_v60 = vld [vmem:[#allocation13 + $0xb8] sm:$0xff] }
 0x1d9   :  { %1697 = vmatpush.msra.mxu0 %v1678_v0  ;;  %1717 = vmatpush.msra.mxu1 %v1694_v6  ;;  %v1665_v63 = vld [vmem:[#allocation13 + $0x8] sm:$0xff] }
 0x1da   :  { %1542 = vmatmul.f32.vlgmr.msra.gmra.mxu2 %v1356_v55  ;;  %1560 = vmatpush.msra.mxu3 %v1456_v29  ;;  %v1685_v27 = vld [vmem:[#allocation13 + $0xa8] sm:$0xff]  ;;  %v1664_v29 = vld [vmem:[#allocation13] sm:$0xff] }
 0x1db   :  { %1698 = vmatpush.msra.mxu0 %v1677_v5  ;;  %1718 = vmatpush.msra.mxu1 %v1693_v7 }
 0x1dc   :  { %1561 = vmatpush.msra.mxu3 %v1454_v30  ;;  %v1684_v30 = vld [vmem:[#allocation13 + $0xa0] sm:$0xff] }
 0x1dd   :  { %1699 = vmatpush.msra.mxu0 %v1676_v40  ;;  %1719 = vmatpush.msra.mxu1 %v1692_v26 }
 0x1de   :  { %1626 = vmatpush.msrb.mxu3 %v1485_v31  ;;  %v1683_v31 = vld [vmem:[#allocation13 + $0x98] sm:$0xff] }
 0x1df   :  { %1700 = vmatpush.msra.mxu0 %v1675_v8  ;;  %1720 = vmatpush.msra.mxu1 %v1691_v43 }
 0x1e0   :  { %1627 = vmatpush.msrb.mxu3 %v1483_v61  ;;  %v1682_v61 = vld [vmem:[#allocation13 + $0x90] sm:$0xff] }
 0x1e1   :  { %1701 = vmatpush.msra.mxu0 %v1674_v4  ;;  %1721 = vmatpush.msra.mxu1 %v1690_v10 }
 0x1e2   :  { %1622 = vmatmul.f32.vlgmr.msrb.gmra.mxu2 %v1356_v55  ;;  %1628 = vmatpush.msrb.mxu3 %v1481_v33  ;;  %v1686_v55 = vld [vmem:[#allocation13 + $0xb0] sm:$0xff]  ;;  %v1681_v33 = vld [vmem:[#allocation13 + $0x88] sm:$0xff] }
 0x1e3   :  { %1702 = vmatpush.msra.mxu0 %v1673_v11  ;;  %1722 = vmatpush.msra.mxu1 %v1689_v12 }
 0x1e4   :  { %1629 = vmatpush.msrb.mxu3 %v1479_v34  ;;  %v1680_v34 = vld [vmem:[#allocation13 + $0x80] sm:$0xff] }
 0x1e5   :  { %1703 = vmatpush.msra.mxu0 %v1672_v14  ;;  %1723 = vmatpush.msra.mxu1 %v1688_v24 }
 0x1e6   :  { %1630 = vmatpush.msrb.mxu3 %v1477_v3 }
 0x1e7   :  { %1704 = vmatpush.msra.mxu0 %v1671_v16  ;;  %1724 = vmatpush.msra.mxu1 %v1687_v60 }
 0x1e8   :  { %1631 = vmatpush.msrb.mxu3 %v1475_v36 }
 0x1e9   :  { %1705 = vmatpush.msra.mxu0 %v1670_v18  ;;  %1725 = vmatpush.msra.mxu1 %v1686_v55 }
 0x1ea   :  { %1632 = vmatpush.msrb.mxu3 %v1473_v37 }
 0x1eb   :  { %1706 = vmatpush.msra.mxu0 %v1669_v19  ;;  %1726 = vmatpush.msra.mxu1 %v1685_v27 }
 0x1ec   :  { %1633 = vmatpush.msrb.mxu3 %v1471_v38  ;;  %v1646_v38 = vld [vmem:[#allocation10] sm:$0x3] }
 0x1ed   :  { %1707 = vmatpush.msra.mxu0 %v1668_v20  ;;  %1727 = vmatpush.msra.mxu1 %v1684_v30 }
 0x1ee   :  { %1634 = vmatpush.msrb.mxu3 %v1469_v39 }
 0x1ef   :  { %1708 = vmatpush.msra.mxu0 %v1667_v53  ;;  %1728 = vmatpush.msra.mxu1 %v1683_v31 }
 0x1f0   :  { %1635 = vmatpush.msrb.mxu3 %v1467_v41  ;;  %v1654_v41 = vld [vmem:[#allocation11] sm:$0x3] }
 0x1f1   :  { %1709 = vmatpush.msra.mxu0 %v1666_v25  ;;  %1729 = vmatpush.msra.mxu1 %v1682_v61 }
 0x1f2   :  { %1636 = vmatpush.msrb.mxu3 %v1465_v2 }
 0x1f3   :  { %1710 = vmatpush.msra.mxu0 %v1665_v63  ;;  %1730 = vmatpush.msra.mxu1 %v1681_v33 }
 0x1f4   :  { %1637 = vmatpush.msrb.mxu3 %v1463_v9  ;;  %v1648_v9 = vperm.slane %v1646_v38, 0 }
 0x1f5   :  { %1711 = vmatpush.msra.mxu0 %v1664_v29  ;;  %1731 = vmatpush.msra.mxu1 %v1680_v34 }
 0x1f6   :  { %1638 = vmatpush.msrb.mxu3 %v1461_v44 }
 0x1f8   :  { %1639 = vmatpush.msrb.mxu3 %v1459_v17 }
 0x1fa   :  { %1640 = vmatpush.msrb.mxu3 %v1457_v13 }
 0x1fc   :  { %1641 = vmatpush.msrb.mxu3 %v1455_v15 }
 0x202   :  { %v1183_v45 = vpop.f32.mrf.mxu0 }
 0x204   :  { %v1203_v46 = vpop.f32.mrf.mxu1 }
 0x205   :  { %v1204_v47 = vadd.f32 %v1203_v46, %v1183_v45  ;;  %v1223_v42 = vpop.f32.mrf.mxu2  ;;  %v1656_v45 = vperm.slane %v1654_v41, 0 }
 0x207   :  { %v1224_v22 = vadd.f32 %v1223_v42, %v1204_v47 }
 0x208   :  { %v1243_v23 = vpop.f32.mrf.mxu3 }
 0x209   :  { %v1244_v48 = vadd.f32 %v1243_v23, %v1224_v22 }
 0x20f   :  { %v1263_v49 = vpop.f32.mrf.mxu0 }
 0x210   :  { %v1264_v50 = vadd.f32 %v1263_v49, %v1244_v48  ;;  %v1283_v21 = vpop.f32.mrf.mxu1  ;;  %v1649_v49 = vperm.slane %v1646_v38, 1 }
 0x212   :  { %v1284_v51 = vadd.f32 %v1283_v21, %v1264_v50 }
 0x217   :  { %v1303_v28 = vpop.f32.mrf.mxu2 }
 0x218   :  { %v1304_v52 = vadd.f32 %v1303_v28, %v1284_v51  ;;  %v1657_v51 = vperm.slane %v1654_v41, 1 }
 0x21b   :  { %v1323_v56 = vpop.f32.mrf.mxu3 }
 0x21c   :  { %v1324_v57 = vadd.f32 %v1323_v56, %v1304_v52  ;;  %v1796_v56 = vld [vmem:[%s2269_s8] ss:$0 sm:$0xff]  ;;  %s2052_s8 = smov [#allocation16]  }
 0x21d   :  { %s1765_s14 = sshll.u32 %s2052_s8, 4  ;;  %s1766_s14 = int_to_ptr.vmem [resolvable:$true] %s1765_s14 }
 0x21e   :  { %v1339_v59 = vmul.f32 %v1331_v54, %v1324_v57 }
 0x220   :  { %v1353_v62 = vadd.f32 %v1345_v58, %v1339_v59 }
 0x222   :  { %v1357_v35 = vmax.f32 %v1353_v62, 0.0  ;;  %v1797_v62 = vld [vmem:[#allocation14] ss:$0 sm:$0xff] }
 0x224   :  { %1562 = vmatmul.f32.vlgmr.msra.gmra.mxu3 %v1357_v35 }
 0x22c   :  { %1642 = vmatmul.f32.vlgmr.msrb.gmra.mxu3 %v1357_v35 }
 0x231   :  { %v1503_v3 = vpop.f32.mrf.mxu0 }
 0x232   :  { %v1523_v36 = vpop.f32.mrf.mxu1 }
 0x233   :  { %v1524_v39 = vadd.f32 %v1523_v36, %v1503_v3 }
 0x252   :  { %v1583_v13 = vpop.f32.mrf.mxu0  ;;  %v1603_v15 = vpop.f32.mrf.mxu1 }
 0x253   :  { %v1604_v42 = vadd.f32 %v1603_v15, %v1583_v13 }
 0x25d   :  { %v1543_v37 = vpop.f32.mrf.mxu2 }
 0x25e   :  { %v1544_v2 = vadd.f32 %v1543_v37, %v1524_v39 }
 0x265   :  { %v1623_v47 = vpop.f32.mrf.mxu2 }
 0x266   :  { %v1624_v23 = vadd.f32 %v1623_v47, %v1604_v42 }
 0x2a7   :  { %v1563_v44 = vpop.f32.mrf.mxu3 }
 0x2a8   :  { %v1564_v17 = vadd.f32 %v1563_v44, %v1544_v2 }
 0x2aa   :  { %v1652_v46 = vmul.f32 %v1648_v9, %v1564_v17 }
 0x2ac   :  { %v1660_v22 = vadd.f32 %v1656_v45, %v1652_v46 }
 0x2ae   :  { %v1662_v48 = vmax.f32 %v1660_v22, 0.0 }
 0x2af   :  { %v1643_v50 = vpop.f32.mrf.mxu3 }
 0x2b0   :  { %v1644_v21 = vadd.f32 %v1643_v50, %v1624_v23  ;;  %1712 = vmatmul.f32.vlgmr.msra.gmra.mxu0 %v1662_v48 }
 0x2b2   :  { %v1653_v28 = vmul.f32 %v1649_v49, %v1644_v21 }
 0x2b4   :  { %v1661_v52 = vadd.f32 %v1657_v51, %v1653_v28 }
 0x2b6   :  { %v1663_v54 = vmax.f32 %v1661_v52, 0.0 }
 0x2b8   :  { %1732 = vmatmul.f32.vlgmr.msra.gmra.mxu1 %v1663_v54 }
 0x32d   :  { %v1713_v57 = vpop.f32.mrf.mxu0 }
 0x335   :  { %v1733_v58 = vpop.f32.mrf.mxu1 }
 0x336   :  { %v1734_v59 = vadd.f32 %v1733_v58, %v1713_v57 }
 0x338   :  { %v1740_v35 = vmul.f32 %v1796_v56, %v1734_v59 }
 0x33a   :  { %v1745_v32 = vadd.f32 %v1797_v62, %v1740_v35 }
 0x33c   :  { %v1747_v0 = vsel %vm1746_vm0, %v1745_v32, -inf }
 0x33d   :  { %1748 = vmax.xlane.f32.xlu0 %v1747_v0 }
 0x3b0   :  { %v1749_v1 = vpop.xlane.xlu0 %1748 }
 0x3b1   :  { %v1750_v5 = vsub.f32 %v1745_v32, %v1749_v1 }
 0x3b3   :  { %v1751_v6 = vmul.f32 1.442695, %v1750_v5 }
 0x3b5   :  { %1798 = vpow2.f32 %v1751_v6 }
 0x3bb   :  { %v1799_v7 = vpop.eup %1798 }
 0x3bc   :  { %v1753_v40 = vsel %vm1746_vm0, %v1799_v7, 0.0 }
 0x3bd   :  { %1754 = vadd.xlane.f32.xlu0 %v1753_v40 }
 0x430   :  { %v1755_v26 = vpop.xlane.xlu0 %1754 }
 0x431   :  { %1800 = vlog2.f32 %v1755_v26 }
 0x437   :  { %v1801_v8 = vpop.eup %1800 }
 0x438   :  { %v1757_v43 = vmul.f32 0.6931472, %v1801_v8 }
 0x43a   :  { %v1758_v4 = vsub.f32 %v1750_v5, %v1757_v43 }
 0x43c   :  { %1759 = vst.msk [vmem:[#allocation16] sm:$0x3] %vm1746_vm0, %v1758_v4 }
 0x43d   :  { %1770 = dma.vmem_to_hbm [thread:$0]  %s1766_s14, 32, %s1768_s6, [#allocation4]  }
 0x43e   :  { %2036 = dma.done.wait [#allocation4], 32  }
 0x43f   :  { %2037 = vsyncadd [#allocation4], 4294967264 }
 0x440   :  { %1775 = vsyncpa [#allocation3], 1 }
 0x441   :  { %1776 = vsyncpa [#allocation6], 1 }
 0x442   :  { %1777 = vsyncpa [#allocation9], 1 }
 0x443   :  { %1778 = vsyncpa [#allocation12], 1 }
 0x444   :  { %1779 = vsyncpa [#allocation15], 1 }
 0x445   :  { %1780 = vsyncpa [#allocation4], 1 }

</bundles_post_ra>
